<compile_context>
chip_gen: v7x
topology: tpu7x:2x2x1
jax: 0.10.0
libtpu: 0.0.40
codegen_flags: <defaults>
</compile_context>

<pallas_src>
import math
from functools import partial

import jax
import jax.numpy as jnp
from jax import lax
from jax.experimental import pallas as pl
from jax.experimental.pallas import tpu as pltpu


# ----------------------------------------------------------------------------
# Pallas kernels
# ----------------------------------------------------------------------------

def _qkv_proj_kernel(x_ref, w_ref, b_ref, qkv_ref):
    """Fused 1x1-conv projections: one (tile, C) @ (C, 3C) matmul + bias."""
    qkv_ref[...] = (
        jnp.dot(x_ref[...], w_ref[...], preferred_element_type=jnp.float32)
        + b_ref[...]
    )


def _attention_kernel(q_ref, k_ref, v_ref, o_ref):
    """Scaled dot-product attention for one batch element (block (1, L, D))."""
    q = q_ref[0]                                              # (L, D)
    k = k_ref[0]
    v = v_ref[0]
    scale = 1.0 / math.sqrt(q.shape[-1])
    # Contract the last dims of both operands -> no k.T relayout via the XLU.
    s = lax.dot_general(q, k, (((1,), (1,)), ((), ())),
                        preferred_element_type=jnp.float32) * scale
    s = s - jnp.max(s, axis=-1, keepdims=True)
    p = jnp.exp(s)
    denom = jnp.sum(p, axis=-1, keepdims=True)
    p = p * pl.reciprocal(denom, approx=True)                 # EUP, ~free
    o_ref[0] = jnp.dot(p, v, preferred_element_type=jnp.float32)


def _conv3x3_lrelu_kernel(xpad_ref, w_ref, b_ref, o_ref):
    """3x3 conv (pad=1) + bias + LeakyReLU(0.2), im2col done in-kernel.

    xpad_ref: (blk, h+2, w+2, c_in) padded NHWC image block.
    w_ref:    (9, c_in, c_out) per-tap weight matrices.
    b_ref:    (1, c_out).
    o_ref:    (blk, h*w, c_out).
    """
    blk = xpad_ref.shape[0]
    hp2 = xpad_ref.shape[1]
    wp2 = xpad_ref.shape[2]
    c_in = xpad_ref.shape[3]
    h = hp2 - 2
    w = wp2 - 2
    c_out = o_ref.shape[-1]
    m = blk * h * w

    acc = jnp.zeros((m, c_out), jnp.float32)
    for ki in range(3):
        for kj in range(3):
            patch = xpad_ref[:, ki:ki + h, kj:kj + w, :]       # (blk, h, w, c_in)
            acc = acc + jnp.dot(patch.reshape(m, c_in),
                                w_ref[ki * 3 + kj],
                                preferred_element_type=jnp.float32)
    acc = acc + b_ref[...]
    acc = jnp.where(acc >= 0, acc, 0.2 * acc)
    o_ref[...] = acc.reshape(blk, h * w, c_out)


# ----------------------------------------------------------------------------
# Pallas wrappers
# ----------------------------------------------------------------------------

_VMEM_LIMIT = 48 * 1024 * 1024  # safe on v5e/v6e (128 MiB) and v7x (64 MiB)


def _pick_row_tile(n, target=512):
    """Largest divisor of n that is <= target and a multiple of 8 (else n)."""
    if n <= target:
        return n
    for d in range(target, 7, -1):
        if n % d == 0 and d % 8 == 0:
            return d
    return n


def _pick_batch_block(bt, hw, max_rows=2048):
    """Largest divisor `blk` of bt with blk*hw <= max_rows (>= 1)."""
    best = 1
    for blk in range(1, bt + 1):
        if bt % blk == 0 and blk * hw <= max_rows:
            best = blk
    return best


def qkv_projection(x_flat, w_qkv, b_qkv):
    """x_flat: (N, C).  w_qkv: (C, 3C).  b_qkv: (1, 3C).  Returns (N, 3C)."""
    n, c = x_flat.shape
    c3 = w_qkv.shape[1]
    tile = _pick_row_tile(n)
    grid = (n // tile,)
    return pl.pallas_call(
        _qkv_proj_kernel,
        out_shape=jax.ShapeDtypeStruct((n, c3), jnp.float32),
        grid=grid,
        in_specs=[
            pl.BlockSpec((tile, c), lambda i: (i, 0)),
            pl.BlockSpec((c, c3), lambda i: (0, 0)),
            pl.BlockSpec((1, c3), lambda i: (0, 0)),
        ],
        out_specs=pl.BlockSpec((tile, c3), lambda i: (i, 0)),
        compiler_params=pltpu.CompilerParams(
            dimension_semantics=("parallel",),
            vmem_limit_bytes=_VMEM_LIMIT),
    )(x_flat, w_qkv, b_qkv)


def attention_pallas(q, k, v):
    """q, k, v: (b, L, D).  Per-batch grid ("parallel"), pipelined."""
    b, L, D = q.shape
    spec = pl.BlockSpec((1, L, D), lambda i: (i, 0, 0))
    return pl.pallas_call(
        _attention_kernel,
        out_shape=jax.ShapeDtypeStruct((b, L, D), jnp.float32),
        grid=(b,),
        in_specs=[spec, spec, spec],
        out_specs=spec,
        compiler_params=pltpu.CompilerParams(
            dimension_semantics=("parallel",),
            vmem_limit_bytes=_VMEM_LIMIT),
    )(q, k, v)


def conv3x3_lrelu(x_nhwc, w9, bias_row):
    """3x3 conv (stride 1, pad 1) + LeakyReLU(0.2).

    x_nhwc: (bt, h, w, c).  w9: (9, c, c) with tap order (ki*3+kj, c_in, c_out).
    Returns (bt, h, w, c) NHWC.
    """
    bt, h, w, c = x_nhwc.shape
    x_pad = jnp.pad(x_nhwc, ((0, 0), (1, 1), (1, 1), (0, 0)))
    blk = _pick_batch_block(bt, h * w)
    out = pl.pallas_call(
        _conv3x3_lrelu_kernel,
        out_shape=jax.ShapeDtypeStruct((bt, h * w, c), jnp.float32),
        grid=(bt // blk,),
        in_specs=[
            pl.BlockSpec((blk, h + 2, w + 2, c), lambda i: (i, 0, 0, 0)),
            pl.BlockSpec((9, c, c), lambda i: (0, 0, 0)),
            pl.BlockSpec((1, c), lambda i: (0, 0)),
        ],
        out_specs=pl.BlockSpec((blk, h * w, c), lambda i: (i, 0, 0)),
        compiler_params=pltpu.CompilerParams(
            dimension_semantics=("parallel",),
            vmem_limit_bytes=_VMEM_LIMIT),
    )(x_pad, w9, bias_row)
    return out.reshape(bt, h, w, c)


# ----------------------------------------------------------------------------
# MultiHeadedAttention forward (whole thing jitted; hot paths in Pallas)
# ----------------------------------------------------------------------------

@partial(jax.jit, static_argnames=("b", "c", "patchsize"))
def multi_headed_attention(x, m, b, c, params, patchsize):
    """x: (bt, c, h, w) NCHW float32.  Mirrors MultiHeadedAttention.forward."""
    del m  # masked_fill result not assigned back in the reference => no-op.
    bt, _, h, w = x.shape
    t = bt // b
    d_k = c // len(patchsize)

    # ---- fused Q/K/V 1x1-conv projection --------------------------------
    x_nhwc = jnp.transpose(x, (0, 2, 3, 1))                    # (bt, h, w, c)
    x_flat = x_nhwc.reshape(bt * h * w, c)
    w_qkv = jnp.concatenate([params["wq"], params["wk"], params["wv"]], axis=1)
    b_qkv = jnp.concatenate([params["bq"], params["bk"], params["bv"]], axis=1)
    qkv = qkv_projection(x_flat, w_qkv, b_qkv)                 # (N, 3c)
    qkv = qkv.reshape(bt, h, w, 3 * c)
    q_nhwc = qkv[..., 0 * c:1 * c]
    k_nhwc = qkv[..., 1 * c:2 * c]
    v_nhwc = qkv[..., 2 * c:3 * c]

    # ---- per-head patch attention ---------------------------------------
    head_outs = []
    for idx, (p_w, p_h) in enumerate(patchsize):
        out_w, out_h = w // p_w, h // p_h
        L = t * out_h * out_w
        D = d_k * p_h * p_w
        sl = slice(idx * d_k, (idx + 1) * d_k)

        def to_tokens(z, p_h=p_h, p_w=p_w, out_h=out_h, out_w=out_w, L=L, D=D):
            # (bt, h, w, d_k) -> (b, L, D) with feature order (p_h, p_w, d_k)
            z = z.reshape(b, t, out_h, p_h, out_w, p_w, d_k)
            z = jnp.transpose(z, (0, 1, 2, 4, 3, 5, 6))
            return z.reshape(b, L, D)

        q_p = to_tokens(q_nhwc[..., sl])
        k_p = to_tokens(k_nhwc[..., sl])
        v_p = to_tokens(v_nhwc[..., sl])

        y = attention_pallas(q_p, k_p, v_p)                    # (b, L, D)

        y = y.reshape(b, t, out_h, out_w, p_h, p_w, d_k)
        y = jnp.transpose(y, (0, 1, 2, 4, 3, 5, 6))            # (b,t,oh,ph,ow,pw,dk)
        head_outs.append(y.reshape(bt, h, w, d_k))

    output_nhwc = jnp.concatenate(head_outs, axis=-1)          # (bt, h, w, c)

    # ---- 3x3 output conv + LeakyReLU(0.2) --------------------------------
    w9 = params["w_out"].reshape(9, c, c)
    out_nhwc = conv3x3_lrelu(output_nhwc, w9, params["b_out"])
    return jnp.transpose(out_nhwc, (0, 3, 1, 2))               # (bt, c, h, w)


# ----------------------------------------------------------------------------
# Pure-JAX reference (PyTorch feature ordering) for correctness check
# ----------------------------------------------------------------------------

def multi_headed_attention_ref(x, b, c, params, patchsize):
    bt, _, h, w = x.shape
    t = bt // b
    d_k = c // len(patchsize)
    x_flat = jnp.transpose(x, (0, 2, 3, 1)).reshape(bt * h * w, c)
    q_flat = x_flat @ params["wq"] + params["bq"]
    k_flat = x_flat @ params["wk"] + params["bk"]
    v_flat = x_flat @ params["wv"] + params["bv"]

    def to_nchw(f):
        return jnp.transpose(f.reshape(bt, h, w, c), (0, 3, 1, 2))

    _q, _k, _v = to_nchw(q_flat), to_nchw(k_flat), to_nchw(v_flat)
    outputs = []
    for idx, (width, height) in enumerate(patchsize):
        out_w, out_h = w // width, h // height
        sl = slice(idx * d_k, (idx + 1) * d_k)

        def to_patches(z):
            z = z.reshape(b, t, d_k, out_h, height, out_w, width)
            z = jnp.transpose(z, (0, 1, 3, 5, 2, 4, 6))
            return z.reshape(b, t * out_h * out_w, d_k * height * width)

        qp, kp, vp = to_patches(_q[:, sl]), to_patches(_k[:, sl]), to_patches(_v[:, sl])
        scores = jnp.einsum("bld,bmd->blm", qp, kp) / math.sqrt(qp.shape[-1])
        p = jax.nn.softmax(scores, axis=-1)
        y = jnp.einsum("blm,bmd->bld", p, vp)
        y = y.reshape(b, t, out_h, out_w, d_k, height, width)
        y = jnp.transpose(y, (0, 1, 4, 2, 5, 3, 6)).reshape(bt, d_k, h, w)
        outputs.append(y)
    output = jnp.concatenate(outputs, axis=1)
    x_nhwc = jnp.transpose(output, (0, 2, 3, 1))
    x_pad = jnp.pad(x_nhwc, ((0, 0), (1, 1), (1, 1), (0, 0)))
    patches = jnp.stack(
        [x_pad[:, ki:ki + h, kj:kj + w, :] for ki in range(3) for kj in range(3)],
        axis=3,
    ).reshape(bt * h * w, 9 * c)
    out = patches @ params["w_out"] + params["b_out"]
    out = jnp.where(out >= 0, out, 0.2 * out)
    return jnp.transpose(out.reshape(bt, h, w, c), (0, 3, 1, 2))


# ----------------------------------------------------------------------------
# Main
# ----------------------------------------------------------------------------

if __name__ == "__main__":
    # d_model = c = 16, b = 2, t = 2, h = w = 16, patchsize -> d_k = 8.
    b, t, c, h, w = 2, 2, 16, 16, 16
    bt = b * t
    patchsize = ((8, 8), (4, 4))   # static (hashable) for jit

    key = jax.random.PRNGKey(0)
    ks = jax.random.split(key, 10)
    params = {
        # 1x1 conv weights stored directly as (c_in, c_out) matmul matrices.
        "wq": jax.random.normal(ks[0], (c, c), jnp.float32) * 0.1,
        "wk": jax.random.normal(ks[1], (c, c), jnp.float32) * 0.1,
        "wv": jax.random.normal(ks[2], (c, c), jnp.float32) * 0.1,
        "bq": jax.random.normal(ks[3], (1, c), jnp.float32) * 0.01,
        "bk": jax.random.normal(ks[4], (1, c), jnp.float32) * 0.01,
        "bv": jax.random.normal(ks[5], (1, c), jnp.float32) * 0.01,
        # 3x3 output conv: row index = (ki*3+kj)*c + c_in, col = c_out.
        "w_out": jax.random.normal(ks[6], (9 * c, c), jnp.float32) * 0.05,
        "b_out": jax.random.normal(ks[7], (1, c), jnp.float32) * 0.01,
    }

    x = jax.random.normal(ks[8], (bt, c, h, w), jnp.float32)
    m = None  # mask; reference semantics make it a no-op anyway

    out = multi_headed_attention(x, m, b, c, params, patchsize)
    out = jax.block_until_ready(out)

    ref = multi_headed_attention_ref(x, b, c, params, patchsize)
    assert out.shape == (bt, c, h, w), out.shape
    # Tolerance loosened from 1e-4 because the softmax denominator uses the
    # EUP approx reciprocal (pl.reciprocal(approx=True)).
    assert jnp.allclose(out, ref, rtol=2e-3, atol=2e-3), (
        float(jnp.max(jnp.abs(out - ref))))

    print("KERNEL_OK")
</pallas_src>

<mosaic_0001>
module attributes {stable_mosaic.version = 11 : i64} {
  func.func @_qkv_proj_kernel(%arg0: i32, %arg1: memref<512x16xf32, #tpu.memory_space<vmem>>, %arg2: memref<16x48xf32, #tpu.memory_space<vmem>>, %arg3: memref<1x48xf32, #tpu.memory_space<vmem>>, %arg4: memref<512x48xf32, #tpu.memory_space<vmem>>) attributes {dimension_semantics = [#tpu.dimension_semantics<parallel>], iteration_bounds = array<i64: 2>, scalar_prefetch = 0 : i64, scratch_operands = 0 : i64, tpu.core_type = #tpu.core_type<tc>, window_params = [{transform_indices = @transform_0, window_bounds = array<i64: 512, 16>}, {pipeline_mode = #tpu.pipeline_mode<synchronous>, transform_indices = @transform_1, window_bounds = array<i64: 16, 48>}, {pipeline_mode = #tpu.pipeline_mode<synchronous>, transform_indices = @transform_2, window_bounds = array<i64: 1, 48>}, {transform_indices = @transform_3, window_bounds = array<i64: 512, 48>}]} {
    %c0 = arith.constant 0 : index
    %c0_0 = arith.constant 0 : index
    %0 = vector.load %arg1[%c0, %c0_0] : memref<512x16xf32, #tpu.memory_space<vmem>>, vector<512x16xf32>
    %c0_1 = arith.constant 0 : index
    %c0_2 = arith.constant 0 : index
    %1 = vector.load %arg2[%c0_1, %c0_2] : memref<16x48xf32, #tpu.memory_space<vmem>>, vector<16x48xf32>
    %cst = arith.constant dense<0.000000e+00> : vector<512x48xf32>
    %2 = tpu.matmul %0, %1, %cst {dimension_numbers = #tpu.dot_dimension_numbers<[1], [0], [0], [1], [0, 0, 1, 1], [], []>} : vector<512x16xf32>, vector<16x48xf32>, vector<512x48xf32> -> vector<512x48xf32>
    %c0_3 = arith.constant 0 : index
    %c0_4 = arith.constant 0 : index
    %3 = vector.load %arg3[%c0_3, %c0_4] : memref<1x48xf32, #tpu.memory_space<vmem>>, vector<1x48xf32>
    %4 = vector.broadcast %3 : vector<1x48xf32> to vector<512x48xf32>
    %5 = arith.addf %2, %4 : vector<512x48xf32>
    %c0_5 = arith.constant 0 : index
    %c0_6 = arith.constant 0 : index
    %6 = vector.load %arg4[%c0_5, %c0_6] : memref<512x48xf32, #tpu.memory_space<vmem>>, vector<512x48xf32>
    tpu.vector_store %arg4[%c0_5, %c0_6], %5 {strides = array<i32>} : memref<512x48xf32, #tpu.memory_space<vmem>>, vector<512x48xf32>,
    return
  }
  func.func @transform_0(%arg0: i32) -> (i32, i32) {
    %c0_i32 = arith.constant 0 : i32
    %c0_i32_0 = arith.constant 0 : i32
    return %arg0, %c0_i32 : i32, i32
  }
  func.func @transform_1(%arg0: i32) -> (i32, i32) {
    %c0_i32 = arith.constant 0 : i32
    %c0_i32_0 = arith.constant 0 : i32
    %c0_i32_1 = arith.constant 0 : i32
    return %c0_i32, %c0_i32_0 : i32, i32
  }
  func.func @transform_2(%arg0: i32) -> (i32, i32) {
    %c0_i32 = arith.constant 0 : i32
    %c0_i32_0 = arith.constant 0 : i32
    %c0_i32_1 = arith.constant 0 : i32
    return %c0_i32, %c0_i32_0 : i32, i32
  }
  func.func @transform_3(%arg0: i32) -> (i32, i32) {
    %c0_i32 = arith.constant 0 : i32
    %c0_i32_0 = arith.constant 0 : i32
    return %arg0, %c0_i32 : i32, i32
  }
}

module attributes {stable_mosaic.version = 11 : i64} {
  func.func @_attention_kernel(%arg0: i32, %arg1: memref<1x8x512xf32, #tpu.memory_space<vmem>>, %arg2: memref<1x8x512xf32, #tpu.memory_space<vmem>>, %arg3: memref<1x8x512xf32, #tpu.memory_space<vmem>>, %arg4: memref<1x8x512xf32, #tpu.memory_space<vmem>>) attributes {dimension_semantics = [#tpu.dimension_semantics<parallel>], iteration_bounds = array<i64: 2>, scalar_prefetch = 0 : i64, scratch_operands = 0 : i64, tpu.core_type = #tpu.core_type<tc>, window_params = [{transform_indices = @transform_0, window_bounds = array<i64: 1, 8, 512>}, {transform_indices = @transform_1, window_bounds = array<i64: 1, 8, 512>}, {transform_indices = @transform_2, window_bounds = array<i64: 1, 8, 512>}, {transform_indices = @transform_3, window_bounds = array<i64: 1, 8, 512>}]} {
    %c0 = arith.constant 0 : index
    %c0_0 = arith.constant 0 : index
    %c0_1 = arith.constant 0 : index
    %0 = vector.load %arg1[%c0, %c0_0, %c0_1] : memref<1x8x512xf32, #tpu.memory_space<vmem>>, vector<1x8x512xf32>
    %1 = vector.shape_cast %0 : vector<1x8x512xf32> to vector<8x512xf32>
    %c0_2 = arith.constant 0 : index
    %c0_3 = arith.constant 0 : index
    %c0_4 = arith.constant 0 : index
    %2 = vector.load %arg2[%c0_2, %c0_3, %c0_4] : memref<1x8x512xf32, #tpu.memory_space<vmem>>, vector<1x8x512xf32>
    %3 = vector.shape_cast %2 : vector<1x8x512xf32> to vector<8x512xf32>
    %c0_5 = arith.constant 0 : index
    %c0_6 = arith.constant 0 : index
    %c0_7 = arith.constant 0 : index
    %4 = vector.load %arg3[%c0_5, %c0_6, %c0_7] : memref<1x8x512xf32, #tpu.memory_space<vmem>>, vector<1x8x512xf32>
    %5 = vector.shape_cast %4 : vector<1x8x512xf32> to vector<8x512xf32>
    %cst = arith.constant dense<0.000000e+00> : vector<8x8xf32>
    %6 = tpu.matmul %1, %3, %cst {dimension_numbers = #tpu.dot_dimension_numbers<[1], [1], [0], [0], [0, 0, 1, 0], [], []>} : vector<8x512xf32>, vector<8x512xf32>, vector<8x8xf32> -> vector<8x8xf32>
    %cst_8 = arith.constant 0.0441941731 : f32
    %7 = vector.broadcast %cst_8 : f32 to vector<8x8xf32>
    %8 = arith.mulf %6, %7 : vector<8x8xf32>
    %cst_9 = arith.constant dense<0xFF800000> : vector<8xf32>
    %9 = vector.multi_reduction <maximumf>, %8, %cst_9 [1] : vector<8x8xf32> to vector<8xf32>
    %10 = vector.shape_cast %9 : vector<8xf32> to vector<8x1xf32>
    %11 = vector.broadcast %10 : vector<8x1xf32> to vector<8x8xf32>
    %12 = arith.subf %8, %11 : vector<8x8xf32>
    %13 = math.exp %12 : vector<8x8xf32>
    %cst_10 = arith.constant dense<0.000000e+00> : vector<8xf32>
    %14 = vector.multi_reduction <add>, %13, %cst_10 [1] : vector<8x8xf32> to vector<8xf32>
    %15 = vector.shape_cast %14 : vector<8xf32> to vector<8x1xf32>
    %16 = tpu.reciprocal %15 {approx = true} : vector<8x1xf32> -> vector<8x1xf32>
    %17 = vector.broadcast %16 : vector<8x1xf32> to vector<8x8xf32>
    %18 = arith.mulf %13, %17 : vector<8x8xf32>
    %cst_11 = arith.constant dense<0.000000e+00> : vector<8x512xf32>
    %19 = tpu.matmul %18, %5, %cst_11 {dimension_numbers = #tpu.dot_dimension_numbers<[1], [0], [0], [1], [0, 0, 1, 1], [], []>} : vector<8x8xf32>, vector<8x512xf32>, vector<8x512xf32> -> vector<8x512xf32>
    %c0_12 = arith.constant 0 : index
    %c0_13 = arith.constant 0 : index
    %c0_14 = arith.constant 0 : index
    %20 = vector.load %arg4[%c0_12, %c0_13, %c0_14] : memref<1x8x512xf32, #tpu.memory_space<vmem>>, vector<1x8x512xf32>
    %21 = vector.shape_cast %20 : vector<1x8x512xf32> to vector<8x512xf32>
    %22 = vector.shape_cast %19 : vector<8x512xf32> to vector<1x8x512xf32>
    tpu.vector_store %arg4[%c0_12, %c0_13, %c0_14], %22 {strides = array<i32>} : memref<1x8x512xf32, #tpu.memory_space<vmem>>, vector<1x8x512xf32>,
    return
  }
  func.func @transform_0(%arg0: i32) -> (i32, i32, i32) {
    %c0_i32 = arith.constant 0 : i32
    %c0_i32_0 = arith.constant 0 : i32
    %c0_i32_1 = arith.constant 0 : i32
    return %arg0, %c0_i32, %c0_i32_0 : i32, i32, i32
  }
  func.func @transform_1(%arg0: i32) -> (i32, i32, i32) {
    %c0_i32 = arith.constant 0 : i32
    %c0_i32_0 = arith.constant 0 : i32
    %c0_i32_1 = arith.constant 0 : i32
    return %arg0, %c0_i32, %c0_i32_0 : i32, i32, i32
  }
  func.func @transform_2(%arg0: i32) -> (i32, i32, i32) {
    %c0_i32 = arith.constant 0 : i32
    %c0_i32_0 = arith.constant 0 : i32
    %c0_i32_1 = arith.constant 0 : i32
    return %arg0, %c0_i32, %c0_i32_0 : i32, i32, i32
  }
  func.func @transform_3(%arg0: i32) -> (i32, i32, i32) {
    %c0_i32 = arith.constant 0 : i32
    %c0_i32_0 = arith.constant 0 : i32
    %c0_i32_1 = arith.constant 0 : i32
    return %arg0, %c0_i32, %c0_i32_0 : i32, i32, i32
  }
}

module attributes {stable_mosaic.version = 11 : i64} {
  func.func @_attention_kernel(%arg0: i32, %arg1: memref<1x32x128xf32, #tpu.memory_space<vmem>>, %arg2: memref<1x32x128xf32, #tpu.memory_space<vmem>>, %arg3: memref<1x32x128xf32, #tpu.memory_space<vmem>>, %arg4: memref<1x32x128xf32, #tpu.memory_space<vmem>>) attributes {dimension_semantics = [#tpu.dimension_semantics<parallel>], iteration_bounds = array<i64: 2>, scalar_prefetch = 0 : i64, scratch_operands = 0 : i64, tpu.core_type = #tpu.core_type<tc>, window_params = [{transform_indices = @transform_0, window_bounds = array<i64: 1, 32, 128>}, {transform_indices = @transform_1, window_bounds = array<i64: 1, 32, 128>}, {transform_indices = @transform_2, window_bounds = array<i64: 1, 32, 128>}, {transform_indices = @transform_3, window_bounds = array<i64: 1, 32, 128>}]} {
    %c0 = arith.constant 0 : index
    %c0_0 = arith.constant 0 : index
    %c0_1 = arith.constant 0 : index
    %0 = vector.load %arg1[%c0, %c0_0, %c0_1] : memref<1x32x128xf32, #tpu.memory_space<vmem>>, vector<1x32x128xf32>
    %1 = vector.shape_cast %0 : vector<1x32x128xf32> to vector<32x128xf32>
    %c0_2 = arith.constant 0 : index
    %c0_3 = arith.constant 0 : index
    %c0_4 = arith.constant 0 : index
    %2 = vector.load %arg2[%c0_2, %c0_3, %c0_4] : memref<1x32x128xf32, #tpu.memory_space<vmem>>, vector<1x32x128xf32>
    %3 = vector.shape_cast %2 : vector<1x32x128xf32> to vector<32x128xf32>
    %c0_5 = arith.constant 0 : index
    %c0_6 = arith.constant 0 : index
    %c0_7 = arith.constant 0 : index
    %4 = vector.load %arg3[%c0_5, %c0_6, %c0_7] : memref<1x32x128xf32, #tpu.memory_space<vmem>>, vector<1x32x128xf32>
    %5 = vector.shape_cast %4 : vector<1x32x128xf32> to vector<32x128xf32>
    %cst = arith.constant dense<0.000000e+00> : vector<32x32xf32>
    %6 = tpu.matmul %1, %3, %cst {dimension_numbers = #tpu.dot_dimension_numbers<[1], [1], [0], [0], [0, 0, 1, 0], [], []>} : vector<32x128xf32>, vector<32x128xf32>, vector<32x32xf32> -> vector<32x32xf32>
    %cst_8 = arith.constant 0.0883883461 : f32
    %7 = vector.broadcast %cst_8 : f32 to vector<32x32xf32>
    %8 = arith.mulf %6, %7 : vector<32x32xf32>
    %cst_9 = arith.constant dense<0xFF800000> : vector<32xf32>
    %9 = vector.multi_reduction <maximumf>, %8, %cst_9 [1] : vector<32x32xf32> to vector<32xf32>
    %10 = vector.shape_cast %9 : vector<32xf32> to vector<32x1xf32>
    %11 = vector.broadcast %10 : vector<32x1xf32> to vector<32x32xf32>
    %12 = arith.subf %8, %11 : vector<32x32xf32>
    %13 = math.exp %12 : vector<32x32xf32>
    %cst_10 = arith.constant dense<0.000000e+00> : vector<32xf32>
    %14 = vector.multi_reduction <add>, %13, %cst_10 [1] : vector<32x32xf32> to vector<32xf32>
    %15 = vector.shape_cast %14 : vector<32xf32> to vector<32x1xf32>
    %16 = tpu.reciprocal %15 {approx = true} : vector<32x1xf32> -> vector<32x1xf32>
    %17 = vector.broadcast %16 : vector<32x1xf32> to vector<32x32xf32>
    %18 = arith.mulf %13, %17 : vector<32x32xf32>
    %cst_11 = arith.constant dense<0.000000e+00> : vector<32x128xf32>
    %19 = tpu.matmul %18, %5, %cst_11 {dimension_numbers = #tpu.dot_dimension_numbers<[1], [0], [0], [1], [0, 0, 1, 1], [], []>} : vector<32x32xf32>, vector<32x128xf32>, vector<32x128xf32> -> vector<32x128xf32>
    %c0_12 = arith.constant 0 : index
    %c0_13 = arith.constant 0 : index
    %c0_14 = arith.constant 0 : index
    %20 = vector.load %arg4[%c0_12, %c0_13, %c0_14] : memref<1x32x128xf32, #tpu.memory_space<vmem>>, vector<1x32x128xf32>
    %21 = vector.shape_cast %20 : vector<1x32x128xf32> to vector<32x128xf32>
    %22 = vector.shape_cast %19 : vector<32x128xf32> to vector<1x32x128xf32>
    tpu.vector_store %arg4[%c0_12, %c0_13, %c0_14], %22 {strides = array<i32>} : memref<1x32x128xf32, #tpu.memory_space<vmem>>, vector<1x32x128xf32>,
    return
  }
  func.func @transform_0(%arg0: i32) -> (i32, i32, i32) {
    %c0_i32 = arith.constant 0 : i32
    %c0_i32_0 = arith.constant 0 : i32
    %c0_i32_1 = arith.constant 0 : i32
    return %arg0, %c0_i32, %c0_i32_0 : i32, i32, i32
  }
  func.func @transform_1(%arg0: i32) -> (i32, i32, i32) {
    %c0_i32 = arith.constant 0 : i32
    %c0_i32_0 = arith.constant 0 : i32
    %c0_i32_1 = arith.constant 0 : i32
    return %arg0, %c0_i32, %c0_i32_0 : i32, i32, i32
  }
  func.func @transform_2(%arg0: i32) -> (i32, i32, i32) {
    %c0_i32 = arith.constant 0 : i32
    %c0_i32_0 = arith.constant 0 : i32
    %c0_i32_1 = arith.constant 0 : i32
    return %arg0, %c0_i32, %c0_i32_0 : i32, i32, i32
  }
  func.func @transform_3(%arg0: i32) -> (i32, i32, i32) {
    %c0_i32 = arith.constant 0 : i32
    %c0_i32_0 = arith.constant 0 : i32
    %c0_i32_1 = arith.constant 0 : i32
    return %arg0, %c0_i32, %c0_i32_0 : i32, i32, i32
  }
}

module attributes {stable_mosaic.version = 11 : i64} {
  func.func @_conv3x3_lrelu_kernel(%arg0: i32, %arg1: memref<4x18x18x16xf32, #tpu.memory_space<vmem>>, %arg2: memref<9x16x16xf32, #tpu.memory_space<vmem>>, %arg3: memref<1x16xf32, #tpu.memory_space<vmem>>, %arg4: memref<4x256x16xf32, #tpu.memory_space<vmem>>) attributes {dimension_semantics = [#tpu.dimension_semantics<parallel>], iteration_bounds = array<i64: 1>, scalar_prefetch = 0 : i64, scratch_operands = 0 : i64, tpu.core_type = #tpu.core_type<tc>, window_params = [{transform_indices = @transform_0, window_bounds = array<i64: 4, 18, 18, 16>}, {pipeline_mode = #tpu.pipeline_mode<synchronous>, transform_indices = @transform_1, window_bounds = array<i64: 9, 16, 16>}, {pipeline_mode = #tpu.pipeline_mode<synchronous>, transform_indices = @transform_2, window_bounds = array<i64: 1, 16>}, {transform_indices = @transform_3, window_bounds = array<i64: 4, 256, 16>}]} {
    %cst = arith.constant 0.000000e+00 : f32
    %0 = vector.broadcast %cst : f32 to vector<1024x16xf32>
    %c0 = arith.constant 0 : index
    %c0_0 = arith.constant 0 : index
    %c0_1 = arith.constant 0 : index
    %c0_2 = arith.constant 0 : index
    %1 = vector.load %arg1[%c0, %c0_0, %c0_1, %c0_2] : memref<4x18x18x16xf32, #tpu.memory_space<vmem>>, vector<4x16x16x16xf32>
    %2 = vector.shape_cast %1 : vector<4x16x16x16xf32> to vector<1024x16xf32>
    %c0_3 = arith.constant 0 : index
    %c0_4 = arith.constant 0 : index
    %c0_5 = arith.constant 0 : index
    %3 = vector.load %arg2[%c0_3, %c0_4, %c0_5] : memref<9x16x16xf32, #tpu.memory_space<vmem>>, vector<1x16x16xf32>
    %4 = vector.shape_cast %3 : vector<1x16x16xf32> to vector<16x16xf32>
    %cst_6 = arith.constant dense<0.000000e+00> : vector<1024x16xf32>
    %5 = tpu.matmul %2, %4, %cst_6 {dimension_numbers = #tpu.dot_dimension_numbers<[1], [0], [0], [1], [0, 0, 1, 1], [], []>} : vector<1024x16xf32>, vector<16x16xf32>, vector<1024x16xf32> -> vector<1024x16xf32>
    %6 = arith.addf %0, %5 : vector<1024x16xf32>
    %c0_7 = arith.constant 0 : index
    %c0_8 = arith.constant 0 : index
    %c1 = arith.constant 1 : index
    %c0_9 = arith.constant 0 : index
    %7 = vector.load %arg1[%c0_7, %c0_8, %c1, %c0_9] : memref<4x18x18x16xf32, #tpu.memory_space<vmem>>, vector<4x16x16x16xf32>
    %8 = vector.shape_cast %7 : vector<4x16x16x16xf32> to vector<1024x16xf32>
    %c1_10 = arith.constant 1 : index
    %c0_11 = arith.constant 0 : index
    %c0_12 = arith.constant 0 : index
    %9 = vector.load %arg2[%c1_10, %c0_11, %c0_12] : memref<9x16x16xf32, #tpu.memory_space<vmem>>, vector<1x16x16xf32>
    %10 = vector.shape_cast %9 : vector<1x16x16xf32> to vector<16x16xf32>
    %cst_13 = arith.constant dense<0.000000e+00> : vector<1024x16xf32>
    %11 = tpu.matmul %8, %10, %cst_13 {dimension_numbers = #tpu.dot_dimension_numbers<[1], [0], [0], [1], [0, 0, 1, 1], [], []>} : vector<1024x16xf32>, vector<16x16xf32>, vector<1024x16xf32> -> vector<1024x16xf32>
    %12 = arith.addf %6, %11 : vector<1024x16xf32>
    %c0_14 = arith.constant 0 : index
    %c0_15 = arith.constant 0 : index
    %c2 = arith.constant 2 : index
    %c0_16 = arith.constant 0 : index
    %13 = vector.load %arg1[%c0_14, %c0_15, %c2, %c0_16] : memref<4x18x18x16xf32, #tpu.memory_space<vmem>>, vector<4x16x16x16xf32>
    %14 = vector.shape_cast %13 : vector<4x16x16x16xf32> to vector<1024x16xf32>
    %c2_17 = arith.constant 2 : index
    %c0_18 = arith.constant 0 : index
    %c0_19 = arith.constant 0 : index
    %15 = vector.load %arg2[%c2_17, %c0_18, %c0_19] : memref<9x16x16xf32, #tpu.memory_space<vmem>>, vector<1x16x16xf32>
    %16 = vector.shape_cast %15 : vector<1x16x16xf32> to vector<16x16xf32>
    %cst_20 = arith.constant dense<0.000000e+00> : vector<1024x16xf32>
    %17 = tpu.matmul %14, %16, %cst_20 {dimension_numbers = #tpu.dot_dimension_numbers<[1], [0], [0], [1], [0, 0, 1, 1], [], []>} : vector<1024x16xf32>, vector<16x16xf32>, vector<1024x16xf32> -> vector<1024x16xf32>
    %18 = arith.addf %12, %17 : vector<1024x16xf32>
    %c0_21 = arith.constant 0 : index
    %c1_22 = arith.constant 1 : index
    %c0_23 = arith.constant 0 : index
    %c0_24 = arith.constant 0 : index
    %19 = vector.load %arg1[%c0_21, %c1_22, %c0_23, %c0_24] : memref<4x18x18x16xf32, #tpu.memory_space<vmem>>, vector<4x16x16x16xf32>
    %20 = vector.shape_cast %19 : vector<4x16x16x16xf32> to vector<1024x16xf32>
    %c3 = arith.constant 3 : index
    %c0_25 = arith.constant 0 : index
    %c0_26 = arith.constant 0 : index
    %21 = vector.load %arg2[%c3, %c0_25, %c0_26] : memref<9x16x16xf32, #tpu.memory_space<vmem>>, vector<1x16x16xf32>
    %22 = vector.shape_cast %21 : vector<1x16x16xf32> to vector<16x16xf32>
    %cst_27 = arith.constant dense<0.000000e+00> : vector<1024x16xf32>
    %23 = tpu.matmul %20, %22, %cst_27 {dimension_numbers = #tpu.dot_dimension_numbers<[1], [0], [0], [1], [0, 0, 1, 1], [], []>} : vector<1024x16xf32>, vector<16x16xf32>, vector<1024x16xf32> -> vector<1024x16xf32>
    %24 = arith.addf %18, %23 : vector<1024x16xf32>
    %c0_28 = arith.constant 0 : index
    %c1_29 = arith.constant 1 : index
    %c1_30 = arith.constant 1 : index
    %c0_31 = arith.constant 0 : index
    %25 = vector.load %arg1[%c0_28, %c1_29, %c1_30, %c0_31] : memref<4x18x18x16xf32, #tpu.memory_space<vmem>>, vector<4x16x16x16xf32>
    %26 = vector.shape_cast %25 : vector<4x16x16x16xf32> to vector<1024x16xf32>
    %c4 = arith.constant 4 : index
    %c0_32 = arith.constant 0 : index
    %c0_33 = arith.constant 0 : index
    %27 = vector.load %arg2[%c4, %c0_32, %c0_33] : memref<9x16x16xf32, #tpu.memory_space<vmem>>, vector<1x16x16xf32>
    %28 = vector.shape_cast %27 : vector<1x16x16xf32> to vector<16x16xf32>
    %cst_34 = arith.constant dense<0.000000e+00> : vector<1024x16xf32>
    %29 = tpu.matmul %26, %28, %cst_34 {dimension_numbers = #tpu.dot_dimension_numbers<[1], [0], [0], [1], [0, 0, 1, 1], [], []>} : vector<1024x16xf32>, vector<16x16xf32>, vector<1024x16xf32> -> vector<1024x16xf32>
    %30 = arith.addf %24, %29 : vector<1024x16xf32>
    %c0_35 = arith.constant 0 : index
    %c1_36 = arith.constant 1 : index
    %c2_37 = arith.constant 2 : index
    %c0_38 = arith.constant 0 : index
    %31 = vector.load %arg1[%c0_35, %c1_36, %c2_37, %c0_38] : memref<4x18x18x16xf32, #tpu.memory_space<vmem>>, vector<4x16x16x16xf32>
    %32 = vector.shape_cast %31 : vector<4x16x16x16xf32> to vector<1024x16xf32>
    %c5 = arith.constant 5 : index
    %c0_39 = arith.constant 0 : index
    %c0_40 = arith.constant 0 : index
    %33 = vector.load %arg2[%c5, %c0_39, %c0_40] : memref<9x16x16xf32, #tpu.memory_space<vmem>>, vector<1x16x16xf32>
    %34 = vector.shape_cast %33 : vector<1x16x16xf32> to vector<16x16xf32>
    %cst_41 = arith.constant dense<0.000000e+00> : vector<1024x16xf32>
    %35 = tpu.matmul %32, %34, %cst_41 {dimension_numbers = #tpu.dot_dimension_numbers<[1], [0], [0], [1], [0, 0, 1, 1], [], []>} : vector<1024x16xf32>, vector<16x16xf32>, vector<1024x16xf32> -> vector<1024x16xf32>
    %36 = arith.addf %30, %35 : vector<1024x16xf32>
    %c0_42 = arith.constant 0 : index
    %c2_43 = arith.constant 2 : index
    %c0_44 = arith.constant 0 : index
    %c0_45 = arith.constant 0 : index
    %37 = vector.load %arg1[%c0_42, %c2_43, %c0_44, %c0_45] : memref<4x18x18x16xf32, #tpu.memory_space<vmem>>, vector<4x16x16x16xf32>
    %38 = vector.shape_cast %37 : vector<4x16x16x16xf32> to vector<1024x16xf32>
    %c6 = arith.constant 6 : index
    %c0_46 = arith.constant 0 : index
    %c0_47 = arith.constant 0 : index
    %39 = vector.load %arg2[%c6, %c0_46, %c0_47] : memref<9x16x16xf32, #tpu.memory_space<vmem>>, vector<1x16x16xf32>
    %40 = vector.shape_cast %39 : vector<1x16x16xf32> to vector<16x16xf32>
    %cst_48 = arith.constant dense<0.000000e+00> : vector<1024x16xf32>
    %41 = tpu.matmul %38, %40, %cst_48 {dimension_numbers = #tpu.dot_dimension_numbers<[1], [0], [0], [1], [0, 0, 1, 1], [], []>} : vector<1024x16xf32>, vector<16x16xf32>, vector<1024x16xf32> -> vector<1024x16xf32>
    %42 = arith.addf %36, %41 : vector<1024x16xf32>
    %c0_49 = arith.constant 0 : index
    %c2_50 = arith.constant 2 : index
    %c1_51 = arith.constant 1 : index
    %c0_52 = arith.constant 0 : index
    %43 = vector.load %arg1[%c0_49, %c2_50, %c1_51, %c0_52] : memref<4x18x18x16xf32, #tpu.memory_space<vmem>>, vector<4x16x16x16xf32>
    %44 = vector.shape_cast %43 : vector<4x16x16x16xf32> to vector<1024x16xf32>
    %c7 = arith.constant 7 : index
    %c0_53 = arith.constant 0 : index
    %c0_54 = arith.constant 0 : index
    %45 = vector.load %arg2[%c7, %c0_53, %c0_54] : memref<9x16x16xf32, #tpu.memory_space<vmem>>, vector<1x16x16xf32>
    %46 = vector.shape_cast %45 : vector<1x16x16xf32> to vector<16x16xf32>
    %cst_55 = arith.constant dense<0.000000e+00> : vector<1024x16xf32>
    %47 = tpu.matmul %44, %46, %cst_55 {dimension_numbers = #tpu.dot_dimension_numbers<[1], [0], [0], [1], [0, 0, 1, 1], [], []>} : vector<1024x16xf32>, vector<16x16xf32>, vector<1024x16xf32> -> vector<1024x16xf32>
    %48 = arith.addf %42, %47 : vector<1024x16xf32>
    %c0_56 = arith.constant 0 : index
    %c2_57 = arith.constant 2 : index
    %c2_58 = arith.constant 2 : index
    %c0_59 = arith.constant 0 : index
    %49 = vector.load %arg1[%c0_56, %c2_57, %c2_58, %c0_59] : memref<4x18x18x16xf32, #tpu.memory_space<vmem>>, vector<4x16x16x16xf32>
    %50 = vector.shape_cast %49 : vector<4x16x16x16xf32> to vector<1024x16xf32>
    %c8 = arith.constant 8 : index
    %c0_60 = arith.constant 0 : index
    %c0_61 = arith.constant 0 : index
    %51 = vector.load %arg2[%c8, %c0_60, %c0_61] : memref<9x16x16xf32, #tpu.memory_space<vmem>>, vector<1x16x16xf32>
    %52 = vector.shape_cast %51 : vector<1x16x16xf32> to vector<16x16xf32>
    %cst_62 = arith.constant dense<0.000000e+00> : vector<1024x16xf32>
    %53 = tpu.matmul %50, %52, %cst_62 {dimension_numbers = #tpu.dot_dimension_numbers<[1], [0], [0], [1], [0, 0, 1, 1], [], []>} : vector<1024x16xf32>, vector<16x16xf32>, vector<1024x16xf32> -> vector<1024x16xf32>
    %54 = arith.addf %48, %53 : vector<1024x16xf32>
    %c0_63 = arith.constant 0 : index
    %c0_64 = arith.constant 0 : index
    %55 = vector.load %arg3[%c0_63, %c0_64] : memref<1x16xf32, #tpu.memory_space<vmem>>, vector<1x16xf32>
    %56 = vector.broadcast %55 : vector<1x16xf32> to vector<1024x16xf32>
    %57 = arith.addf %54, %56 : vector<1024x16xf32>
    %cst_65 = arith.constant 0.000000e+00 : f32
    %58 = vector.broadcast %cst_65 : f32 to vector<1024x16xf32>
    %59 = arith.cmpf oge, %57, %58 : vector<1024x16xf32>
    %cst_66 = arith.constant 2.000000e-01 : f32
    %60 = vector.broadcast %cst_66 : f32 to vector<1024x16xf32>
    %61 = arith.mulf %60, %57 : vector<1024x16xf32>
    %62 = arith.select %59, %57, %61 : vector<1024x16xi1>, vector<1024x16xf32>
    %63 = vector.shape_cast %62 : vector<1024x16xf32> to vector<4x256x16xf32>
    %c0_67 = arith.constant 0 : index
    %c0_68 = arith.constant 0 : index
    %c0_69 = arith.constant 0 : index
    %64 = vector.load %arg4[%c0_67, %c0_68, %c0_69] : memref<4x256x16xf32, #tpu.memory_space<vmem>>, vector<4x256x16xf32>
    tpu.vector_store %arg4[%c0_67, %c0_68, %c0_69], %63 {strides = array<i32>} : memref<4x256x16xf32, #tpu.memory_space<vmem>>, vector<4x256x16xf32>,
    return
  }
  func.func @transform_0(%arg0: i32) -> (i32, i32, i32, i32) {
    %c0_i32 = arith.constant 0 : i32
    %c0_i32_0 = arith.constant 0 : i32
    %c0_i32_1 = arith.constant 0 : i32
    %c0_i32_2 = arith.constant 0 : i32
    return %arg0, %c0_i32, %c0_i32_0, %c0_i32_1 : i32, i32, i32, i32
  }
  func.func @transform_1(%arg0: i32) -> (i32, i32, i32) {
    %c0_i32 = arith.constant 0 : i32
    %c0_i32_0 = arith.constant 0 : i32
    %c0_i32_1 = arith.constant 0 : i32
    %c0_i32_2 = arith.constant 0 : i32
    return %c0_i32, %c0_i32_0, %c0_i32_1 : i32, i32, i32
  }
  func.func @transform_2(%arg0: i32) -> (i32, i32) {
    %c0_i32 = arith.constant 0 : i32
    %c0_i32_0 = arith.constant 0 : i32
    %c0_i32_1 = arith.constant 0 : i32
    return %c0_i32, %c0_i32_0 : i32, i32
  }
  func.func @transform_3(%arg0: i32) -> (i32, i32, i32) {
    %c0_i32 = arith.constant 0 : i32
    %c0_i32_0 = arith.constant 0 : i32
    %c0_i32_1 = arith.constant 0 : i32
    return %arg0, %c0_i32, %c0_i32_0 : i32, i32, i32
  }
}

</mosaic_0001>

<bundles_post_ra>
// kernel: multi_headed_attention.4
= control target key start
LH: loop header
LB: loop body
LE: loop exit
PB: predicated region body
PF: predicated region fallthrough
CT: control target
= control target key end

     0   :  { %s1230_s12 = smov 0   ;;  %s1589_s0 = inlined_call_operand.vmem [shape: f32[1024,16], index: 0, kind: input, shape index: {}]   ;;  %s1590_s1 = inlined_call_operand.vmem [shape: f32[16,48], index: 1, kind: input, shape index: {}]   ;;  %s1591_s2 = inlined_call_operand.vmem [shape: f32[1,48], index: 2, kind: input, shape index: {}]   ;;  %s1592_s3 = inlined_call_operand.vmem [shape: f32[1024,48], index: 3, kind: output, shape index: {}]  }
   0x1 LB: > { %s946_s13 = sadd.s32 4294967295, %s1208_s12   ;;  %p950_p0 = scmp.ge.s32.totalorder %s1208_s12, 1  ;;  %s1208_s12 = sphi %s1230_s12, %s13_s12  }
   0x2   : > { %p138_p1 = scmp.lt.s32.totalorder %s1208_s12, 3 }
   0x4   : > { %p139_p2 = pnand %p950_p0, %p138_p1 }
   0x5   : > { %v238_v0 = vld [vmem:[%s1590_s1] sm:$0xff] (!%p139_p2)  ;;  %v239_v1 = vld [vmem:[%s1590_s1 + $0x8] sm:$0xff] (!%p139_p2)  ;;  %s951_s18 = sshll.u32 (!%p139_p2), %s946_s13, 6  ;;  %vm247_vm0 = vcmask (!%p139_p2), 130048   ;;  %vm825_vm1 = vcmask (!%p139_p2), 392192  }
   0x6   : > { %142 = sbr.rel (%p139_p2) target bundleno = 295 (0x127), region = 32  ;;  %v1188_v2 = vpack.c.bf16 (!%p139_p2), %v239_v1, %v238_v0  ;;  %p163_p3 = scmp.lt.s32.totalorder (!%p139_p2), %s951_s18, 127 }
   0x8   : > { %1189 = vmatprep.subr.bf16.mxu0 (!%p139_p2), %v1188_v2  ;;  %1192 = vmatprep.subr.bf16.mxu1 (!%p139_p2), %v1188_v2 }
   0x9   : > { %1191 = vmatpush3.bf16.msra.mxu0 (!%p139_p2), %v1188_v2  ;;  %1193 = vmatpush3.bf16.msra.mxu1 (!%p139_p2), %v1188_v2 }
   0xd   : > { %s1594_s18 = smov (!%p163_p3, %s951_s18), 127 }
   0xe   : > { %s952_s19 = sshll.u32 %s1594_s18, 3 }
   0xf   : > { %s1252_s22 = scalar_lea.vmem %s1589_s0, %s952_s19  ;;  %s1392_s27 = scalar_lea.vmem %s1592_s3, %s952_s19 }
  0x10   : > { %v174_v3 = vld [vmem:[%s1252_s22] sm:$0xff]  ;;  %v175_v5 = vld [vmem:[%s1252_s22 + $0x8] sm:$0xff]  ;;  %v176_v7 = vld [vmem:[%s1252_s22 + $0x10] sm:$0xff] }
  0x11   : > { %v206_v4 = vld [vmem:[%s1252_s22 + $0x100] sm:$0xff]  ;;  %1092 = vmatprep.mubr.msk.f32.mxu0 %vm247_vm0, %v174_v3  ;;  %v207_v6 = vld [vmem:[%s1252_s22 + $0x108] sm:$0xff]  ;;  %v208_v8 = vld [vmem:[%s1252_s22 + $0x110] sm:$0xff] }
  0x12   : > { %1140 = vmatprep.mubr.msk.f32.mxu1 %vm247_vm0, %v206_v4  ;;  %1093 = vmatmul.mubr.msk.f32.vlgmr.msra.gmra.mrb[0].mxu0 %vm247_vm0, %v175_v5  ;;  %v177_v9 = vld [vmem:[%s1252_s22 + $0x18] sm:$0xff]  ;;  %v178_v11 = vld [vmem:[%s1252_s22 + $0x20] sm:$0xff]  ;;  %v179_v13 = vld [vmem:[%s1252_s22 + $0x28] sm:$0xff] }
  0x13   : > { %1141 = vmatmul.mubr.msk.f32.vlgmr.msra.gmra.mrb[0].mxu1 %vm247_vm0, %v207_v6  ;;  %1095 = vmatprep.mubr.msk.f32.mxu0 %vm247_vm0, %v176_v7  ;;  %v209_v10 = vld [vmem:[%s1252_s22 + $0x118] sm:$0xff]  ;;  %v210_v12 = vld [vmem:[%s1252_s22 + $0x120] sm:$0xff]  ;;  %v211_v14 = vld [vmem:[%s1252_s22 + $0x128] sm:$0xff] }
  0x14   : > { %1143 = vmatprep.mubr.msk.f32.mxu1 %vm247_vm0, %v208_v8  ;;  %v180_v15 = vld [vmem:[%s1252_s22 + $0x30] sm:$0xff]  ;;  %v181_v17 = vld [vmem:[%s1252_s22 + $0x38] sm:$0xff]  ;;  %v182_v19 = vld [vmem:[%s1252_s22 + $0x40] sm:$0xff] }
  0x15   : > { %v212_v16 = vld [vmem:[%s1252_s22 + $0x130] sm:$0xff]  ;;  %v213_v18 = vld [vmem:[%s1252_s22 + $0x138] sm:$0xff]  ;;  %v214_v20 = vld [vmem:[%s1252_s22 + $0x140] sm:$0xff] }
  0x16   : > { %1096 = vmatmul.mubr.msk.f32.gmra.mrb[2].mxu0 %vm247_vm0, %v177_v9  ;;  %v183_v21 = vld [vmem:[%s1252_s22 + $0x48] sm:$0xff]  ;;  %v184_v23 = vld [vmem:[%s1252_s22 + $0x50] sm:$0xff]  ;;  %v185_v25 = vld [vmem:[%s1252_s22 + $0x58] sm:$0xff] }
  0x17   : > { %1144 = vmatmul.mubr.msk.f32.gmra.mrb[2].mxu1 %vm247_vm0, %v209_v10  ;;  %1098 = vmatprep.mubr.msk.f32.mxu0 %vm247_vm0, %v178_v11  ;;  %v215_v22 = vld [vmem:[%s1252_s22 + $0x148] sm:$0xff]  ;;  %v216_v24 = vld [vmem:[%s1252_s22 + $0x150] sm:$0xff]  ;;  %v217_v26 = vld [vmem:[%s1252_s22 + $0x158] sm:$0xff] }
  0x18   : > { %1146 = vmatprep.mubr.msk.f32.mxu1 %vm247_vm0, %v210_v12  ;;  %v186_v27 = vld [vmem:[%s1252_s22 + $0x60] sm:$0xff]  ;;  %v187_v29 = vld [vmem:[%s1252_s22 + $0x68] sm:$0xff]  ;;  %v188_v31 = vld [vmem:[%s1252_s22 + $0x70] sm:$0xff] }
  0x19   : > { %v218_v28 = vld [vmem:[%s1252_s22 + $0x160] sm:$0xff]  ;;  %v219_v30 = vld [vmem:[%s1252_s22 + $0x168] sm:$0xff]  ;;  %v220_v32 = vld [vmem:[%s1252_s22 + $0x170] sm:$0xff] }
  0x1a   : > { %1099 = vmatmul.mubr.msk.f32.gmra.mrb[4].mxu0 %vm247_vm0, %v179_v13  ;;  %v189_v33 = vld [vmem:[%s1252_s22 + $0x78] sm:$0xff]  ;;  %v190_v35 = vld [vmem:[%s1252_s22 + $0x80] sm:$0xff]  ;;  %v191_v37 = vld [vmem:[%s1252_s22 + $0x88] sm:$0xff] }
  0x1b   : > { %1147 = vmatmul.mubr.msk.f32.gmra.mrb[4].mxu1 %vm247_vm0, %v211_v14  ;;  %1101 = vmatprep.mubr.msk.f32.mxu0 %vm247_vm0, %v180_v15  ;;  %v221_v34 = vld [vmem:[%s1252_s22 + $0x178] sm:$0xff]  ;;  %v222_v36 = vld [vmem:[%s1252_s22 + $0x180] sm:$0xff]  ;;  %v223_v38 = vld [vmem:[%s1252_s22 + $0x188] sm:$0xff] }
  0x1c   : > { %1149 = vmatprep.mubr.msk.f32.mxu1 %vm247_vm0, %v212_v16  ;;  %v192_v39 = vld [vmem:[%s1252_s22 + $0x90] sm:$0xff]  ;;  %v193_v41 = vld [vmem:[%s1252_s22 + $0x98] sm:$0xff]  ;;  %v194_v43 = vld [vmem:[%s1252_s22 + $0xa0] sm:$0xff] }
  0x1d   : > { %v224_v40 = vld [vmem:[%s1252_s22 + $0x190] sm:$0xff]  ;;  %v225_v42 = vld [vmem:[%s1252_s22 + $0x198] sm:$0xff]  ;;  %v226_v44 = vld [vmem:[%s1252_s22 + $0x1a0] sm:$0xff] }
  0x1e   : > { %1102 = vmatmul.mubr.msk.f32.gmra.mrb[6].mxu0 %vm247_vm0, %v181_v17  ;;  %v195_v45 = vld [vmem:[%s1252_s22 + $0xa8] sm:$0xff]  ;;  %v196_v47 = vld [vmem:[%s1252_s22 + $0xb0] sm:$0xff]  ;;  %v197_v49 = vld [vmem:[%s1252_s22 + $0xb8] sm:$0xff] }
  0x1f   : > { %1150 = vmatmul.mubr.msk.f32.gmra.mrb[6].mxu1 %vm247_vm0, %v213_v18  ;;  %1104 = vmatprep.mubr.msk.f32.mxu0 %vm247_vm0, %v182_v19  ;;  %v227_v46 = vld [vmem:[%s1252_s22 + $0x1a8] sm:$0xff]  ;;  %v228_v48 = vld [vmem:[%s1252_s22 + $0x1b0] sm:$0xff]  ;;  %v229_v50 = vld [vmem:[%s1252_s22 + $0x1b8] sm:$0xff] }
  0x20   : > { %1152 = vmatprep.mubr.msk.f32.mxu1 %vm247_vm0, %v214_v20  ;;  %v198_v51 = vld [vmem:[%s1252_s22 + $0xc0] sm:$0xff]  ;;  %v199_v53 = vld [vmem:[%s1252_s22 + $0xc8] sm:$0xff]  ;;  %v200_v55 = vld [vmem:[%s1252_s22 + $0xd0] sm:$0xff] }
  0x21   : > { %v230_v52 = vld [vmem:[%s1252_s22 + $0x1c0] sm:$0xff]  ;;  %v231_v54 = vld [vmem:[%s1252_s22 + $0x1c8] sm:$0xff]  ;;  %v232_v56 = vld [vmem:[%s1252_s22 + $0x1d0] sm:$0xff] }
  0x22   : > { %1105 = vmatmul.mubr.msk.f32.gmra.mrb[8].mxu0 %vm247_vm0, %v183_v21  ;;  %v201_v57 = vld [vmem:[%s1252_s22 + $0xd8] sm:$0xff]  ;;  %v202_v59 = vld [vmem:[%s1252_s22 + $0xe0] sm:$0xff]  ;;  %v203_v61 = vld [vmem:[%s1252_s22 + $0xe8] sm:$0xff] }
  0x23   : > { %1153 = vmatmul.mubr.msk.f32.gmra.mrb[8].mxu1 %vm247_vm0, %v215_v22  ;;  %1107 = vmatprep.mubr.msk.f32.mxu0 %vm247_vm0, %v184_v23  ;;  %v233_v58 = vld [vmem:[%s1252_s22 + $0x1d8] sm:$0xff]  ;;  %v234_v60 = vld [vmem:[%s1252_s22 + $0x1e0] sm:$0xff]  ;;  %v235_v62 = vld [vmem:[%s1252_s22 + $0x1e8] sm:$0xff] }
  0x24   : > { %1155 = vmatprep.mubr.msk.f32.mxu1 %vm247_vm0, %v216_v24  ;;  %v204_v63 = vld [vmem:[%s1252_s22 + $0xf0] sm:$0xff]  ;;  %v205_v1 = vld [vmem:[%s1252_s22 + $0xf8] sm:$0xff]  ;;  %v1385_v3 = vld [vmem:[%s1591_s2] ss:$0 sm:$0xff] }
  0x25   : > { %v236_v0 = vld [vmem:[%s1252_s22 + $0x1f0] sm:$0xff]  ;;  %v237_v2 = vld [vmem:[%s1252_s22 + $0x1f8] sm:$0xff] }
  0x26   : > { %1108 = vmatmul.mubr.msk.f32.gmra.mrb[10].mxu0 %vm247_vm0, %v185_v25 }
  0x27   : > { %1156 = vmatmul.mubr.msk.f32.gmra.mrb[10].mxu1 %vm247_vm0, %v217_v26  ;;  %1110 = vmatprep.mubr.msk.f32.mxu0 %vm247_vm0, %v186_v27 }
  0x28   : > { %1158 = vmatprep.mubr.msk.f32.mxu1 %vm247_vm0, %v218_v28 }
  0x2a   : > { %1111 = vmatmul.mubr.msk.f32.gmra.mrb[12].mxu0 %vm247_vm0, %v187_v29 }
  0x2b   : > { %1159 = vmatmul.mubr.msk.f32.gmra.mrb[12].mxu1 %vm247_vm0, %v219_v30  ;;  %1113 = vmatprep.mubr.msk.f32.mxu0 %vm247_vm0, %v188_v31 }
  0x2c   : > { %1161 = vmatprep.mubr.msk.f32.mxu1 %vm247_vm0, %v220_v32 }
  0x2e   : > { %1114 = vmatmul.mubr.msk.f32.gmra.mrb[14].mxu0 %vm247_vm0, %v189_v33 }
  0x2f   : > { %1162 = vmatmul.mubr.msk.f32.gmra.mrb[14].mxu1 %vm247_vm0, %v221_v34  ;;  %1116 = vmatprep.mubr.msk.f32.mxu0 %vm247_vm0, %v190_v35 }
  0x30   : > { %1164 = vmatprep.mubr.msk.f32.mxu1 %vm247_vm0, %v222_v36 }
  0x32   : > { %1117 = vmatmul.mubr.msk.f32.gmra.mrb[16].mxu0 %vm247_vm0, %v191_v37 }
  0x33   : > { %1165 = vmatmul.mubr.msk.f32.gmra.mrb[16].mxu1 %vm247_vm0, %v223_v38  ;;  %1119 = vmatprep.mubr.msk.f32.mxu0 %vm247_vm0, %v192_v39 }
  0x34   : > { %1167 = vmatprep.mubr.msk.f32.mxu1 %vm247_vm0, %v224_v40 }
  0x36   : > { %1120 = vmatmul.mubr.msk.f32.gmra.mrb[18].mxu0 %vm247_vm0, %v193_v41 }
  0x37   : > { %1168 = vmatmul.mubr.msk.f32.gmra.mrb[18].mxu1 %vm247_vm0, %v225_v42  ;;  %1122 = vmatprep.mubr.msk.f32.mxu0 %vm247_vm0, %v194_v43 }
  0x38   : > { %1170 = vmatprep.mubr.msk.f32.mxu1 %vm247_vm0, %v226_v44 }
  0x3a   : > { %1123 = vmatmul.mubr.msk.f32.gmra.mrb[20].mxu0 %vm247_vm0, %v195_v45 }
  0x3b   : > { %1171 = vmatmul.mubr.msk.f32.gmra.mrb[20].mxu1 %vm247_vm0, %v227_v46  ;;  %1125 = vmatprep.mubr.msk.f32.mxu0 %vm247_vm0, %v196_v47 }
  0x3c   : > { %1173 = vmatprep.mubr.msk.f32.mxu1 %vm247_vm0, %v228_v48 }
  0x3e   : > { %1126 = vmatmul.mubr.msk.f32.gmra.mrb[22].mxu0 %vm247_vm0, %v197_v49 }
  0x3f   : > { %1174 = vmatmul.mubr.msk.f32.gmra.mrb[22].mxu1 %vm247_vm0, %v229_v50  ;;  %1128 = vmatprep.mubr.msk.f32.mxu0 %vm247_vm0, %v198_v51 }
  0x40   : > { %1176 = vmatprep.mubr.msk.f32.mxu1 %vm247_vm0, %v230_v52 }
  0x42   : > { %1129 = vmatmul.mubr.msk.f32.gmra.mrb[24].mxu0 %vm247_vm0, %v199_v53 }
  0x43   : > { %1177 = vmatmul.mubr.msk.f32.gmra.mrb[24].mxu1 %vm247_vm0, %v231_v54  ;;  %1131 = vmatprep.mubr.msk.f32.mxu0 %vm247_vm0, %v200_v55 }
  0x44   : > { %1179 = vmatprep.mubr.msk.f32.mxu1 %vm247_vm0, %v232_v56 }
  0x46   : > { %1132 = vmatmul.mubr.msk.f32.gmra.mrb[26].mxu0 %vm247_vm0, %v201_v57 }
  0x47   : > { %1180 = vmatmul.mubr.msk.f32.gmra.mrb[26].mxu1 %vm247_vm0, %v233_v58  ;;  %1134 = vmatprep.mubr.msk.f32.mxu0 %vm247_vm0, %v202_v59 }
  0x48   : > { %1182 = vmatprep.mubr.msk.f32.mxu1 %vm247_vm0, %v234_v60 }
  0x4a   : > { %1135 = vmatmul.mubr.msk.f32.gmra.mrb[28].mxu0 %vm247_vm0, %v203_v61 }
  0x4b   : > { %1183 = vmatmul.mubr.msk.f32.gmra.mrb[28].mxu1 %vm247_vm0, %v235_v62  ;;  %1137 = vmatprep.mubr.msk.f32.mxu0 %vm247_vm0, %v204_v63 }
  0x4c   : > { %1185 = vmatprep.mubr.msk.f32.mxu1 %vm247_vm0, %v236_v0 }
  0x4e   : > { %1138 = vmatmul.mubr.msk.f32.gmra.mrb[30].mxu0 %vm247_vm0, %v205_v1 }
  0x4f   : > { %1186 = vmatmul.mubr.msk.f32.gmra.mrb[30].mxu1 %vm247_vm0, %v237_v2 }
  0xe5   : > { %v1094_v4 = vpop.f32.mrb[0].mxu0 }
  0xe6   : > { %v1142_v5 = vpop.f32.mrb[0].mxu1  ;;  %v512_v6 = vadd.f32 %v1094_v4, %v1385_v3  ;;  %v506_v8 = vpop.f32.mrb[1].mxu0 }
  0xe7   : > { %v672_v7 = vadd.f32 %v1142_v5, %v1385_v3  ;;  %v666_v9 = vpop.f32.mrb[1].mxu1  ;;  %v507_v10 = vadd.f32 %v1385_v3, %v506_v8 }
  0xe8   : > { %v667_v11 = vadd.f32 %v1385_v3, %v666_v9  ;;  %827 = vst.msk [vmem:[%s1392_s27 + $0x8] sm:$0xff] %vm825_vm1, %v512_v6 }
  0xe9   : > { %859 = vst.msk [vmem:[%s1392_s27 + $0x108] sm:$0xff] %vm825_vm1, %v672_v7  ;;  %826 = vst.msk [vmem:[%s1392_s27] sm:$0xff] %vm825_vm1, %v507_v10  ;;  %v1097_v12 = vpop.f32.mrb[2].mxu0 }
  0xea   : > { %858 = vst.msk [vmem:[%s1392_s27 + $0x100] sm:$0xff] %vm825_vm1, %v667_v11  ;;  %v1145_v13 = vpop.f32.mrb[2].mxu1  ;;  %v522_v14 = vadd.f32 %v1097_v12, %v1385_v3  ;;  %v516_v16 = vpop.f32.mrb[3].mxu0 }
  0xeb   : > { %v682_v15 = vadd.f32 %v1145_v13, %v1385_v3  ;;  %v676_v17 = vpop.f32.mrb[3].mxu1  ;;  %v517_v18 = vadd.f32 %v1385_v3, %v516_v16 }
  0xec   : > { %v677_v19 = vadd.f32 %v1385_v3, %v676_v17  ;;  %829 = vst.msk [vmem:[%s1392_s27 + $0x18] sm:$0xff] %vm825_vm1, %v522_v14 }
  0xed   : > { %861 = vst.msk [vmem:[%s1392_s27 + $0x118] sm:$0xff] %vm825_vm1, %v682_v15  ;;  %828 = vst.msk [vmem:[%s1392_s27 + $0x10] sm:$0xff] %vm825_vm1, %v517_v18  ;;  %v1100_v20 = vpop.f32.mrb[4].mxu0 }
  0xee   : > { %860 = vst.msk [vmem:[%s1392_s27 + $0x110] sm:$0xff] %vm825_vm1, %v677_v19  ;;  %v1148_v21 = vpop.f32.mrb[4].mxu1  ;;  %v532_v22 = vadd.f32 %v1100_v20, %v1385_v3  ;;  %v526_v24 = vpop.f32.mrb[5].mxu0 }
  0xef   : > { %v692_v23 = vadd.f32 %v1148_v21, %v1385_v3  ;;  %v686_v25 = vpop.f32.mrb[5].mxu1  ;;  %v527_v26 = vadd.f32 %v1385_v3, %v526_v24 }
  0xf0   : > { %v687_v27 = vadd.f32 %v1385_v3, %v686_v25  ;;  %831 = vst.msk [vmem:[%s1392_s27 + $0x28] sm:$0xff] %vm825_vm1, %v532_v22 }
  0xf1   : > { %863 = vst.msk [vmem:[%s1392_s27 + $0x128] sm:$0xff] %vm825_vm1, %v692_v23  ;;  %830 = vst.msk [vmem:[%s1392_s27 + $0x20] sm:$0xff] %vm825_vm1, %v527_v26  ;;  %v1103_v28 = vpop.f32.mrb[6].mxu0 }
  0xf2   : > { %862 = vst.msk [vmem:[%s1392_s27 + $0x120] sm:$0xff] %vm825_vm1, %v687_v27  ;;  %v1151_v29 = vpop.f32.mrb[6].mxu1  ;;  %v542_v30 = vadd.f32 %v1103_v28, %v1385_v3  ;;  %v536_v32 = vpop.f32.mrb[7].mxu0 }
  0xf3   : > { %v702_v31 = vadd.f32 %v1151_v29, %v1385_v3  ;;  %v696_v33 = vpop.f32.mrb[7].mxu1  ;;  %v537_v34 = vadd.f32 %v1385_v3, %v536_v32 }
  0xf4   : > { %v697_v35 = vadd.f32 %v1385_v3, %v696_v33  ;;  %833 = vst.msk [vmem:[%s1392_s27 + $0x38] sm:$0xff] %vm825_vm1, %v542_v30 }
  0xf5   : > { %865 = vst.msk [vmem:[%s1392_s27 + $0x138] sm:$0xff] %vm825_vm1, %v702_v31  ;;  %832 = vst.msk [vmem:[%s1392_s27 + $0x30] sm:$0xff] %vm825_vm1, %v537_v34  ;;  %v1106_v36 = vpop.f32.mrb[8].mxu0 }
  0xf6   : > { %864 = vst.msk [vmem:[%s1392_s27 + $0x130] sm:$0xff] %vm825_vm1, %v697_v35  ;;  %v1154_v37 = vpop.f32.mrb[8].mxu1  ;;  %v552_v38 = vadd.f32 %v1106_v36, %v1385_v3  ;;  %v546_v40 = vpop.f32.mrb[9].mxu0 }
  0xf7   : > { %v712_v39 = vadd.f32 %v1154_v37, %v1385_v3  ;;  %v706_v41 = vpop.f32.mrb[9].mxu1  ;;  %v547_v42 = vadd.f32 %v1385_v3, %v546_v40 }
  0xf8   : > { %v707_v43 = vadd.f32 %v1385_v3, %v706_v41  ;;  %835 = vst.msk [vmem:[%s1392_s27 + $0x48] sm:$0xff] %vm825_vm1, %v552_v38 }
  0xf9   : > { %867 = vst.msk [vmem:[%s1392_s27 + $0x148] sm:$0xff] %vm825_vm1, %v712_v39  ;;  %834 = vst.msk [vmem:[%s1392_s27 + $0x40] sm:$0xff] %vm825_vm1, %v547_v42  ;;  %v1109_v44 = vpop.f32.mrb[10].mxu0 }
  0xfa   : > { %866 = vst.msk [vmem:[%s1392_s27 + $0x140] sm:$0xff] %vm825_vm1, %v707_v43  ;;  %v1157_v45 = vpop.f32.mrb[10].mxu1  ;;  %v562_v46 = vadd.f32 %v1109_v44, %v1385_v3  ;;  %v556_v48 = vpop.f32.mrb[11].mxu0 }
  0xfb   : > { %v722_v47 = vadd.f32 %v1157_v45, %v1385_v3  ;;  %v716_v49 = vpop.f32.mrb[11].mxu1  ;;  %v557_v50 = vadd.f32 %v1385_v3, %v556_v48 }
  0xfc   : > { %v717_v51 = vadd.f32 %v1385_v3, %v716_v49  ;;  %837 = vst.msk [vmem:[%s1392_s27 + $0x58] sm:$0xff] %vm825_vm1, %v562_v46 }
  0xfd   : > { %869 = vst.msk [vmem:[%s1392_s27 + $0x158] sm:$0xff] %vm825_vm1, %v722_v47  ;;  %836 = vst.msk [vmem:[%s1392_s27 + $0x50] sm:$0xff] %vm825_vm1, %v557_v50  ;;  %v1112_v52 = vpop.f32.mrb[12].mxu0 }
  0xfe   : > { %868 = vst.msk [vmem:[%s1392_s27 + $0x150] sm:$0xff] %vm825_vm1, %v717_v51  ;;  %v1160_v53 = vpop.f32.mrb[12].mxu1  ;;  %v572_v54 = vadd.f32 %v1112_v52, %v1385_v3  ;;  %v566_v56 = vpop.f32.mrb[13].mxu0 }
  0xff   : > { %v732_v55 = vadd.f32 %v1160_v53, %v1385_v3  ;;  %v726_v57 = vpop.f32.mrb[13].mxu1  ;;  %v567_v58 = vadd.f32 %v1385_v3, %v566_v56 }
 0x100   : > { %v727_v59 = vadd.f32 %v1385_v3, %v726_v57  ;;  %839 = vst.msk [vmem:[%s1392_s27 + $0x68] sm:$0xff] %vm825_vm1, %v572_v54 }
 0x101   : > { %871 = vst.msk [vmem:[%s1392_s27 + $0x168] sm:$0xff] %vm825_vm1, %v732_v55  ;;  %838 = vst.msk [vmem:[%s1392_s27 + $0x60] sm:$0xff] %vm825_vm1, %v567_v58  ;;  %v1115_v60 = vpop.f32.mrb[14].mxu0 }
 0x102   : > { %870 = vst.msk [vmem:[%s1392_s27 + $0x160] sm:$0xff] %vm825_vm1, %v727_v59  ;;  %v1163_v61 = vpop.f32.mrb[14].mxu1  ;;  %v582_v62 = vadd.f32 %v1115_v60, %v1385_v3  ;;  %v576_v0 = vpop.f32.mrb[15].mxu0 }
 0x103   : > { %v742_v63 = vadd.f32 %v1163_v61, %v1385_v3  ;;  %v736_v1 = vpop.f32.mrb[15].mxu1  ;;  %v577_v2 = vadd.f32 %v1385_v3, %v576_v0 }
 0x104   : > { %v737_v4 = vadd.f32 %v1385_v3, %v736_v1  ;;  %841 = vst.msk [vmem:[%s1392_s27 + $0x78] sm:$0xff] %vm825_vm1, %v582_v62 }
 0x105   : > { %873 = vst.msk [vmem:[%s1392_s27 + $0x178] sm:$0xff] %vm825_vm1, %v742_v63  ;;  %840 = vst.msk [vmem:[%s1392_s27 + $0x70] sm:$0xff] %vm825_vm1, %v577_v2  ;;  %v1118_v5 = vpop.f32.mrb[16].mxu0 }
 0x106   : > { %872 = vst.msk [vmem:[%s1392_s27 + $0x170] sm:$0xff] %vm825_vm1, %v737_v4  ;;  %v1166_v6 = vpop.f32.mrb[16].mxu1  ;;  %v592_v7 = vadd.f32 %v1118_v5, %v1385_v3  ;;  %v586_v9 = vpop.f32.mrb[17].mxu0 }
 0x107   : > { %v752_v8 = vadd.f32 %v1166_v6, %v1385_v3  ;;  %v746_v10 = vpop.f32.mrb[17].mxu1  ;;  %v587_v11 = vadd.f32 %v1385_v3, %v586_v9 }
 0x108   : > { %v747_v12 = vadd.f32 %v1385_v3, %v746_v10  ;;  %843 = vst.msk [vmem:[%s1392_s27 + $0x88] sm:$0xff] %vm825_vm1, %v592_v7 }
 0x109   : > { %875 = vst.msk [vmem:[%s1392_s27 + $0x188] sm:$0xff] %vm825_vm1, %v752_v8  ;;  %842 = vst.msk [vmem:[%s1392_s27 + $0x80] sm:$0xff] %vm825_vm1, %v587_v11  ;;  %v1121_v13 = vpop.f32.mrb[18].mxu0 }
 0x10a   : > { %874 = vst.msk [vmem:[%s1392_s27 + $0x180] sm:$0xff] %vm825_vm1, %v747_v12  ;;  %v1169_v14 = vpop.f32.mrb[18].mxu1  ;;  %v602_v15 = vadd.f32 %v1121_v13, %v1385_v3  ;;  %v596_v17 = vpop.f32.mrb[19].mxu0 }
 0x10b   : > { %v762_v16 = vadd.f32 %v1169_v14, %v1385_v3  ;;  %v756_v18 = vpop.f32.mrb[19].mxu1  ;;  %v597_v19 = vadd.f32 %v1385_v3, %v596_v17 }
 0x10c   : > { %v757_v20 = vadd.f32 %v1385_v3, %v756_v18  ;;  %845 = vst.msk [vmem:[%s1392_s27 + $0x98] sm:$0xff] %vm825_vm1, %v602_v15 }
 0x10d   : > { %877 = vst.msk [vmem:[%s1392_s27 + $0x198] sm:$0xff] %vm825_vm1, %v762_v16  ;;  %844 = vst.msk [vmem:[%s1392_s27 + $0x90] sm:$0xff] %vm825_vm1, %v597_v19  ;;  %v1124_v21 = vpop.f32.mrb[20].mxu0 }
 0x10e   : > { %876 = vst.msk [vmem:[%s1392_s27 + $0x190] sm:$0xff] %vm825_vm1, %v757_v20  ;;  %v1172_v22 = vpop.f32.mrb[20].mxu1  ;;  %v612_v23 = vadd.f32 %v1124_v21, %v1385_v3  ;;  %v606_v25 = vpop.f32.mrb[21].mxu0 }
 0x10f   : > { %v772_v24 = vadd.f32 %v1172_v22, %v1385_v3  ;;  %v766_v26 = vpop.f32.mrb[21].mxu1  ;;  %v607_v27 = vadd.f32 %v1385_v3, %v606_v25 }
 0x110   : > { %v767_v28 = vadd.f32 %v1385_v3, %v766_v26  ;;  %847 = vst.msk [vmem:[%s1392_s27 + $0xa8] sm:$0xff] %vm825_vm1, %v612_v23 }
 0x111   : > { %879 = vst.msk [vmem:[%s1392_s27 + $0x1a8] sm:$0xff] %vm825_vm1, %v772_v24  ;;  %846 = vst.msk [vmem:[%s1392_s27 + $0xa0] sm:$0xff] %vm825_vm1, %v607_v27  ;;  %v1127_v29 = vpop.f32.mrb[22].mxu0 }
 0x112   : > { %878 = vst.msk [vmem:[%s1392_s27 + $0x1a0] sm:$0xff] %vm825_vm1, %v767_v28  ;;  %v1175_v30 = vpop.f32.mrb[22].mxu1  ;;  %v622_v31 = vadd.f32 %v1127_v29, %v1385_v3  ;;  %v616_v33 = vpop.f32.mrb[23].mxu0 }
 0x113   : > { %v782_v32 = vadd.f32 %v1175_v30, %v1385_v3  ;;  %v776_v34 = vpop.f32.mrb[23].mxu1  ;;  %v617_v35 = vadd.f32 %v1385_v3, %v616_v33 }
 0x114   : > { %v777_v36 = vadd.f32 %v1385_v3, %v776_v34  ;;  %849 = vst.msk [vmem:[%s1392_s27 + $0xb8] sm:$0xff] %vm825_vm1, %v622_v31 }
 0x115   : > { %881 = vst.msk [vmem:[%s1392_s27 + $0x1b8] sm:$0xff] %vm825_vm1, %v782_v32  ;;  %848 = vst.msk [vmem:[%s1392_s27 + $0xb0] sm:$0xff] %vm825_vm1, %v617_v35  ;;  %v1130_v37 = vpop.f32.mrb[24].mxu0 }
 0x116   : > { %880 = vst.msk [vmem:[%s1392_s27 + $0x1b0] sm:$0xff] %vm825_vm1, %v777_v36  ;;  %v1178_v38 = vpop.f32.mrb[24].mxu1  ;;  %v632_v39 = vadd.f32 %v1130_v37, %v1385_v3  ;;  %v626_v41 = vpop.f32.mrb[25].mxu0 }
 0x117   : > { %v792_v40 = vadd.f32 %v1178_v38, %v1385_v3  ;;  %v786_v42 = vpop.f32.mrb[25].mxu1  ;;  %v627_v43 = vadd.f32 %v1385_v3, %v626_v41 }
 0x118   : > { %v787_v44 = vadd.f32 %v1385_v3, %v786_v42  ;;  %851 = vst.msk [vmem:[%s1392_s27 + $0xc8] sm:$0xff] %vm825_vm1, %v632_v39 }
 0x119   : > { %883 = vst.msk [vmem:[%s1392_s27 + $0x1c8] sm:$0xff] %vm825_vm1, %v792_v40  ;;  %850 = vst.msk [vmem:[%s1392_s27 + $0xc0] sm:$0xff] %vm825_vm1, %v627_v43  ;;  %v1133_v45 = vpop.f32.mrb[26].mxu0 }
 0x11a   : > { %882 = vst.msk [vmem:[%s1392_s27 + $0x1c0] sm:$0xff] %vm825_vm1, %v787_v44  ;;  %v1181_v46 = vpop.f32.mrb[26].mxu1  ;;  %v642_v47 = vadd.f32 %v1133_v45, %v1385_v3  ;;  %v636_v49 = vpop.f32.mrb[27].mxu0 }
 0x11b   : > { %v802_v48 = vadd.f32 %v1181_v46, %v1385_v3  ;;  %v796_v50 = vpop.f32.mrb[27].mxu1  ;;  %v637_v51 = vadd.f32 %v1385_v3, %v636_v49 }
 0x11c   : > { %v797_v52 = vadd.f32 %v1385_v3, %v796_v50  ;;  %853 = vst.msk [vmem:[%s1392_s27 + $0xd8] sm:$0xff] %vm825_vm1, %v642_v47 }
 0x11d   : > { %885 = vst.msk [vmem:[%s1392_s27 + $0x1d8] sm:$0xff] %vm825_vm1, %v802_v48  ;;  %852 = vst.msk [vmem:[%s1392_s27 + $0xd0] sm:$0xff] %vm825_vm1, %v637_v51  ;;  %v1136_v53 = vpop.f32.mrb[28].mxu0 }
 0x11e   : > { %884 = vst.msk [vmem:[%s1392_s27 + $0x1d0] sm:$0xff] %vm825_vm1, %v797_v52  ;;  %v1184_v54 = vpop.f32.mrb[28].mxu1  ;;  %v652_v55 = vadd.f32 %v1136_v53, %v1385_v3  ;;  %v646_v57 = vpop.f32.mrb[29].mxu0 }
 0x11f   : > { %v812_v56 = vadd.f32 %v1184_v54, %v1385_v3  ;;  %v806_v58 = vpop.f32.mrb[29].mxu1  ;;  %v647_v59 = vadd.f32 %v1385_v3, %v646_v57 }
 0x120   : > { %v807_v60 = vadd.f32 %v1385_v3, %v806_v58  ;;  %855 = vst.msk [vmem:[%s1392_s27 + $0xe8] sm:$0xff] %vm825_vm1, %v652_v55 }
 0x121   : > { %887 = vst.msk [vmem:[%s1392_s27 + $0x1e8] sm:$0xff] %vm825_vm1, %v812_v56  ;;  %854 = vst.msk [vmem:[%s1392_s27 + $0xe0] sm:$0xff] %vm825_vm1, %v647_v59  ;;  %v1139_v61 = vpop.f32.mrb[30].mxu0 }
 0x122   : > { %886 = vst.msk [vmem:[%s1392_s27 + $0x1e0] sm:$0xff] %vm825_vm1, %v807_v60  ;;  %v1187_v62 = vpop.f32.mrb[30].mxu1  ;;  %v662_v63 = vadd.f32 %v1139_v61, %v1385_v3  ;;  %v656_v1 = vpop.f32.mrb[31].mxu0 }
 0x123   : > { %v822_v0 = vadd.f32 %v1187_v62, %v1385_v3  ;;  %v816_v2 = vpop.f32.mrb[31].mxu1  ;;  %v657_v4 = vadd.f32 %v1385_v3, %v656_v1 }
 0x124   : > { %v817_v5 = vadd.f32 %v1385_v3, %v816_v2  ;;  %857 = vst.msk [vmem:[%s1392_s27 + $0xf8] sm:$0xff] %vm825_vm1, %v662_v63 }
 0x125   : > { %889 = vst.msk [vmem:[%s1392_s27 + $0x1f8] sm:$0xff] %vm825_vm1, %v822_v0  ;;  %856 = vst.msk [vmem:[%s1392_s27 + $0xf0] sm:$0xff] %vm825_vm1, %v657_v4 }
 0x126   : > { %888 = vst.msk [vmem:[%s1392_s27 + $0x1f0] sm:$0xff] %vm825_vm1, %v817_v5 }
 0x127 PF: > { %s13_s12 = sadd.s32 1, %s1208_s12  }
 0x128   : > { %p10_p4 = scmp.ge.s32.totalorder %s13_s12, 4  }
 0x12a   :  { %12 = sbr.rel (!%p10_p4) target bundleno = 1 (0x1), region = 62 }

// kernel: multi_headed_attention.5
= control target key start
LH: loop header
LB: loop body
LE: loop exit
PB: predicated region body
PF: predicated region fallthrough
CT: control target
= control target key end

     0   :  { %s669_s12 = smov 0   ;;  %s702_s0 = inlined_call_operand.vmem [shape: f32[2,8,512], index: 0, kind: input, shape index: {}]   ;;  %s703_s1 = inlined_call_operand.vmem [shape: f32[2,8,512], index: 1, kind: input, shape index: {}]   ;;  %s704_s2 = inlined_call_operand.vmem [shape: f32[2,8,512], index: 2, kind: input, shape index: {}]   ;;  %s705_s3 = inlined_call_operand.vmem [shape: f32[2,8,512], index: 3, kind: output, shape index: {}]  }
   0x1 LB: > { %s604_s13 = sadd.s32 4294967295, %s646_s12   ;;  %p608_p0 = scmp.ge.s32.totalorder %s646_s12, 1  ;;  %s646_s12 = sphi %s669_s12, %s13_s12  }
   0x2   : > { %p157_p1 = scmp.lt.s32.totalorder %s646_s12, 3 }
   0x4   : > { %p158_p2 = pnand %p608_p0, %p157_p1 }
   0x5   : > { %p191_p3 = scmp.lt.s32.totalorder (!%p158_p2), %s604_s13, 1  ;;  %vm364_vm0 = vcmask (!%p158_p2), 64512   ;;  %v648_v19 = vmov (!%p158_p2), 0.0  }
   0x6   : > { %161 = sbr.rel (%p158_p2) target bundleno = 775 (0x307), region = 32  ;;  %443 = vmatprep.mubr.f32.mxu1 (!%p158_p2), %v648_v19 }
   0xd   : > { %s707_s13 = smov (!%p191_p3, %s604_s13), 1 }
   0xe   : > { %s677_s14 = sshll.u32 %s707_s13, 5 }
   0xf   : > { %s200_s17 = scalar_lea.vmem %s703_s1, %s677_s14  ;;  %s195_s20 = scalar_lea.vmem %s702_s0, %s677_s14 }
  0x10   : > { %v216_v0 = vld [vmem:[%s200_s17 + $0x8] sm:$0xff]  ;;  %v215_v1 = vld [vmem:[%s200_s17] sm:$0xff]  ;;  %v218_v3 = vld [vmem:[%s200_s17 + $0x18] sm:$0xff]  ;;  %s205_s23 = scalar_lea.vmem %s704_s2, %s677_s14  ;;  %s210_s26 = scalar_lea.vmem %s705_s3, %s677_s14 }
  0x11   : > { %v212_v2 = vld [vmem:[%s195_s20 + $0x8] sm:$0xff]  ;;  %223 = vmatprep.subr.mxu0 %v216_v0  ;;  %v211_v4 = vld [vmem:[%s195_s20] sm:$0xff]  ;;  %v217_v5 = vld [vmem:[%s200_s17 + $0x10] sm:$0xff] }
  0x12   : > { %287 = vmatprep.mubr.f32.mxu0 %v212_v2  ;;  %224 = vmatpush1.xpose.msra.mxu0 %v215_v1  ;;  %v214_v6 = vld [vmem:[%s195_s20 + $0x18] sm:$0xff]  ;;  %v213_v7 = vld [vmem:[%s195_s20 + $0x10] sm:$0xff]  ;;  %v220_v17 = vld [vmem:[%s205_s23 + $0x8] sm:$0xff] }
  0x13   : > { %293 = vmatprep.subr.mxu0 %v218_v3  ;;  %v219_v18 = vld [vmem:[%s205_s23] sm:$0xff]  ;;  %379 = vmatprep.subr.mxu1 %v220_v17  ;;  %v222_v20 = vld [vmem:[%s205_s23 + $0x18] sm:$0xff]  ;;  %v221_v24 = vld [vmem:[%s205_s23 + $0x10] sm:$0xff] }
  0x14   : > { %380 = vmatpush1.msra.mxu1 %v219_v18 }
  0x15   : > { %288 = vmatmul.mubr.f32.vlgmr.msra.gmra.mrb[0].mxu0 %v211_v4  ;;  %450 = vmatprep.subr.mxu1 %v222_v20 }
  0x16   : > { %294 = vmatpush1.xpose.msra.mxu0 %v217_v5  ;;  %357 = vmatprep.mubr.f32.mxu0 %v214_v6 }
  0x1d   : > { %358 = vmatmul.mubr.f32.vlgmr.msra.gmra.mrb[0].mxu0 %v213_v7 }
  0xf0   : > { %v359_v8 = vpop.f32.mrb[0].mxu0 }
  0xf1   : > { %v363_v9 = vmul.f32 0.044194173, %v359_v8  ;;  %v361_v10 = vpop.f32.mrb[1].mxu0 }
  0xf3   : > { %v365_v11 = vsel %vm364_vm0, %v363_v9, -inf }
  0xf4   : > { %366 = vmax.xlane.f32.xlu0 %v365_v11 }
 0x181   : > { %v367_v12 = vpop.xlane.xlu0 %366 }
 0x182   : > { %v368_v13 = vsub.f32 %v363_v9, %v367_v12 }
 0x184   : > { %v369_v14 = vmul.f32 1.442695, %v368_v13 }
 0x186   : > { %636 = vpow2.f32 %v369_v14 }
 0x190   : > { %v637_v15 = vpop.eup %636 }
 0x191   : > { %v371_v16 = vsel %vm364_vm0, %v637_v15, 0.0 }
 0x192   : > { %372 = vadd.xlane.f32.xlu0 %v371_v16 }
 0x21f   : > { %v373_v21 = vpop.xlane.xlu0 %372 }
 0x220   : > { %638 = vrcp.f32 %v373_v21 }
 0x22a   : > { %v639_v22 = vpop.eup %638 }
 0x22b   : > { %v375_v23 = vmul.f32 %v639_v22, %v637_v15 }
 0x22d   : > { %617 = vmatmul.mubr.msk.f32.vlgmr.msra.gmra.mrb[0].mxu1 %vm364_vm0, %v375_v23 }
 0x22e   : > { %451 = vmatpush1.msra.mxu1 %v221_v24  ;;  %514 = vmatprep.mubr.f32.mxu1 %v648_v19 }
 0x231   : > { %618 = vmatmul.mubr.msk.f32.vlgmr.msra.gmra.mrb[2].mxu1 %vm364_vm0, %v375_v23 }
 0x300   : > { %v445_v25 = vpop.f32.mrb[0].mxu1 }
 0x301   : > { %521 = vst [vmem:[%s210_s26] sm:$0xff] %v445_v25  ;;  %v447_v26 = vpop.f32.mrb[1].mxu1 }
 0x302   : > { %522 = vst [vmem:[%s210_s26 + $0x8] sm:$0xff] %v447_v26 }
 0x304   : > { %v516_v27 = vpop.f32.mrb[2].mxu1 }
 0x305   : > { %523 = vst [vmem:[%s210_s26 + $0x10] sm:$0xff] %v516_v27  ;;  %v518_v28 = vpop.f32.mrb[3].mxu1 }
 0x306   : > { %524 = vst [vmem:[%s210_s26 + $0x18] sm:$0xff] %v518_v28 }
 0x307 PF: > { %s13_s12 = sadd.s32 1, %s646_s12  }
 0x308   : > { %p10_p4 = scmp.ge.s32.totalorder %s13_s12, 4  }
 0x30a   :  { %12 = sbr.rel (!%p10_p4) target bundleno = 1 (0x1), region = 68 }

// kernel: multi_headed_attention.6
= control target key start
LH: loop header
LB: loop body
LE: loop exit
PB: predicated region body
PF: predicated region fallthrough
CT: control target
= control target key end

     0   :  { %s672_s12 = smov 0   ;;  %s713_s0 = inlined_call_operand.vmem [shape: f32[2,32,128], index: 0, kind: input, shape index: {}]   ;;  %s714_s1 = inlined_call_operand.vmem [shape: f32[2,32,128], index: 1, kind: input, shape index: {}]   ;;  %s715_s2 = inlined_call_operand.vmem [shape: f32[2,32,128], index: 2, kind: input, shape index: {}]   ;;  %s716_s3 = inlined_call_operand.vmem [shape: f32[2,32,128], index: 3, kind: output, shape index: {}]  }
   0x1 LB: > { %s537_s13 = sadd.s32 4294967295, %s650_s12   ;;  %p541_p0 = scmp.ge.s32.totalorder %s650_s12, 1  ;;  %s650_s12 = sphi %s672_s12, %s13_s12  }
   0x2   : > { %p157_p1 = scmp.lt.s32.totalorder %s650_s12, 3 }
   0x4   : > { %p158_p2 = pnand %p541_p0, %p157_p1 }
   0x5   : > { %p191_p3 = scmp.lt.s32.totalorder (!%p158_p2), %s537_s13, 1  ;;  %vm312_vm0 = vcmask (!%p158_p2), 261120  }
   0x6   : > { %161 = sbr.rel (%p158_p2) target bundleno = 786 (0x312), region = 32 }
   0xd   : > { %s718_s13 = smov (!%p191_p3, %s537_s13), 1 }
   0xe   : > { %s680_s14 = sshll.u32 %s718_s13, 5 }
   0xf   : > { %s200_s17 = scalar_lea.vmem %s714_s1, %s680_s14  ;;  %s195_s20 = scalar_lea.vmem %s713_s0, %s680_s14 }
  0x10   : > { %v215_v0 = vld [vmem:[%s200_s17] sm:$0xff]  ;;  %v216_v1 = vld [vmem:[%s200_s17 + $0x8] sm:$0xff]  ;;  %v217_v2 = vld [vmem:[%s200_s17 + $0x10] sm:$0xff]  ;;  %s205_s23 = scalar_lea.vmem %s715_s2, %s680_s14  ;;  %s210_s26 = scalar_lea.vmem %s716_s3, %s680_s14 }
  0x11   : > { %v604_v3 = vpack.c.bf16 %v216_v1, %v215_v0  ;;  %v218_v4 = vld [vmem:[%s200_s17 + $0x18] sm:$0xff]  ;;  %v211_v5 = vld [vmem:[%s195_s20] sm:$0xff]  ;;  %v212_v7 = vld [vmem:[%s195_s20 + $0x8] sm:$0xff] }
  0x12   : > { %v608_v6 = vpack.c.bf16 %v218_v4, %v217_v2  ;;  %584 = vmatprep.mubr.f32.mxu0 %v211_v5  ;;  %v213_v8 = vld [vmem:[%s195_s20 + $0x10] sm:$0xff]  ;;  %v214_v9 = vld [vmem:[%s195_s20 + $0x18] sm:$0xff]  ;;  %v219_v42 = vld [vmem:[%s205_s23] sm:$0xff] }
  0x13   : > { %605 = vmatprep.subr.bf16.mxu0 %v604_v3  ;;  %v220_v43 = vld [vmem:[%s205_s23 + $0x8] sm:$0xff]  ;;  %v221_v45 = vld [vmem:[%s205_s23 + $0x10] sm:$0xff]  ;;  %v222_v46 = vld [vmem:[%s205_s23 + $0x18] sm:$0xff] }
  0x14   : > { %607 = vmatpush3.bf16.xpose.msra.mxu0 %v604_v3  ;;  %v612_v44 = vpack.c.bf16 %v220_v43, %v219_v42  ;;  %v616_v47 = vpack.c.bf16 %v222_v46, %v221_v45 }
  0x15   : > { %609 = vmatprep.subr.bf16.mxu0 %v608_v6 }
  0x16   : > { %613 = vmatprep.subr.bf16.mxu1 %v612_v44 }
  0x17   : > { %615 = vmatpush3.bf16.msra.mxu1 %v612_v44 }
  0x18   : > { %617 = vmatprep.subr.bf16.mxu1 %v616_v47 }
  0x1b   : > { %619 = vmatpush3.bf16.msra.mxu1 %v616_v47 }
  0x1c   : > { %611 = vmatpush3.bf16.xpose.msra.mxu0 %v608_v6 }
  0x23   : > { %585 = vmatmul.mubr.f32.vlgmr.msra.gmra.mrb[0].mxu0 %v212_v7 }
  0x24   : > { %587 = vmatprep.mubr.f32.mxu0 %v213_v8 }
  0x27   : > { %588 = vmatmul.mubr.f32.gmra.mrb[2].mxu0 %v214_v9 }
  0xf6   : > { %v586_v10 = vpop.f32.mrb[0].mxu0 }
  0xf7   : > { %v289_v11 = vpop.f32.mrb[1].mxu0  ;;  %v309_v13 = vmul.f32 0.088388346, %v586_v10 }
  0xf8   : > { %v308_v12 = vmul.f32 0.088388346, %v289_v11 }
  0xf9   : > { %v316_v19 = vsel %vm312_vm0, %v309_v13, -inf }
  0xfa   : > { %v589_v14 = vpop.f32.mrb[2].mxu0  ;;  %v313_v15 = vsel %vm312_vm0, %v308_v12, -inf }
  0xfb   : > { %314 = vmax.xlane.f32.xlu0 %v313_v15  ;;  %v299_v16 = vpop.f32.mrb[3].mxu0  ;;  %v311_v18 = vmul.f32 0.088388346, %v589_v14 }
  0xfc   : > { %v310_v17 = vmul.f32 0.088388346, %v299_v16 }
  0xfd   : > { %v322_v21 = vsel %vm312_vm0, %v311_v18, -inf }
  0xfe   : > { %v319_v20 = vsel %vm312_vm0, %v310_v17, -inf }
  0xff   : > { %317 = vmax.xlane.f32.xlu0 %v316_v19  ;;  %320 = vmax.xlane.f32.xlu1 %v319_v20 }
 0x103   : > { %323 = vmax.xlane.f32.xlu1 %v322_v21 }
 0x188   : > { %v315_v22 = vpop.xlane.xlu0 %314 }
 0x189   : > { %v325_v23 = vsub.f32 %v308_v12, %v315_v22 }
 0x18b   : > { %v329_v24 = vmul.f32 1.442695, %v325_v23 }
 0x18c   : > { %v318_v25 = vpop.xlane.xlu0 %317  ;;  %v321_v26 = vpop.xlane.xlu1 %320 }
 0x18d   : > { %628 = vpow2.f32 %v329_v24  ;;  %v326_v27 = vsub.f32 %v309_v13, %v318_v25  ;;  %v327_v28 = vsub.f32 %v310_v17, %v321_v26 }
 0x18f   : > { %v331_v29 = vmul.f32 1.442695, %v326_v27  ;;  %v333_v30 = vmul.f32 1.442695, %v327_v28 }
 0x190   : > { %v324_v31 = vpop.xlane.xlu1 %323 }
 0x191   : > { %630 = vpow2.f32 %v331_v29  ;;  %v328_v32 = vsub.f32 %v311_v18, %v324_v31 }
 0x192   : > { %632 = vpow2.f32 %v333_v30 }
 0x193   : > { %v335_v33 = vmul.f32 1.442695, %v328_v32 }
 0x195   : > { %634 = vpow2.f32 %v335_v33 }
 0x197   : > { %v629_v34 = vpop.eup %628 }
 0x198   : > { %v337_v35 = vsel %vm312_vm0, %v629_v34, 0.0 }
 0x199   : > { %338 = vadd.xlane.f32.xlu0 %v337_v35 }
 0x19b   : > { %v631_v36 = vpop.eup %630 }
 0x19c   : > { %v633_v37 = vpop.eup %632  ;;  %v340_v38 = vsel %vm312_vm0, %v631_v36, 0.0 }
 0x19d   : > { %341 = vadd.xlane.f32.xlu1 %v340_v38  ;;  %v343_v39 = vsel %vm312_vm0, %v633_v37, 0.0 }
 0x19e   : > { %344 = vadd.xlane.f32.xlu0 %v343_v39 }
 0x19f   : > { %v635_v40 = vpop.eup %634 }
 0x1a0   : > { %v346_v41 = vsel %vm312_vm0, %v635_v40, 0.0 }
 0x1a1   : > { %347 = vadd.xlane.f32.xlu1 %v346_v41 }
 0x226   : > { %v339_v48 = vpop.xlane.xlu0 %338 }
 0x227   : > { %636 = vrcp.f32 %v339_v48 }
 0x22a   : > { %v342_v49 = vpop.xlane.xlu1 %341 }
 0x22b   : > { %v345_v50 = vpop.xlane.xlu0 %344  ;;  %638 = vrcp.f32 %v342_v49 }
 0x22c   : > { %640 = vrcp.f32 %v345_v50 }
 0x22e   : > { %v348_v51 = vpop.xlane.xlu1 %347 }
 0x22f   : > { %642 = vrcp.f32 %v348_v51 }
 0x231   : > { %v637_v52 = vpop.eup %636 }
 0x232   : > { %v353_v53 = vmul.f32 %v637_v52, %v629_v34 }
 0x234   : > { %598 = vmatprep.mubr.msk.f32.mxu1 %vm312_vm0, %v353_v53 }
 0x235   : > { %v639_v54 = vpop.eup %638 }
 0x236   : > { %v641_v55 = vpop.eup %640  ;;  %v354_v56 = vmul.f32 %v639_v54, %v631_v36 }
 0x237   : > { %v355_v57 = vmul.f32 %v641_v55, %v633_v37 }
 0x238   : > { %599 = vmatmul.mubr.msk.f32.vlgmr.msra.gmra.mrb[0].mxu1 %vm312_vm0, %v354_v56 }
 0x239   : > { %v643_v58 = vpop.eup %642  ;;  %601 = vmatprep.mubr.msk.f32.mxu1 %vm312_vm0, %v355_v57 }
 0x23a   : > { %v356_v59 = vmul.f32 %v643_v58, %v635_v40 }
 0x23c   : > { %602 = vmatmul.mubr.msk.f32.gmra.mrb[2].mxu1 %vm312_vm0, %v356_v59 }
 0x30b   : > { %v600_v60 = vpop.f32.mrb[0].mxu1 }
 0x30c   : > { %455 = vst [vmem:[%s210_s26 + $0x8] sm:$0xff] %v600_v60  ;;  %v435_v61 = vpop.f32.mrb[1].mxu1 }
 0x30d   : > { %454 = vst [vmem:[%s210_s26] sm:$0xff] %v435_v61 }
 0x30f   : > { %v603_v62 = vpop.f32.mrb[2].mxu1 }
 0x310   : > { %457 = vst [vmem:[%s210_s26 + $0x18] sm:$0xff] %v603_v62  ;;  %v445_v63 = vpop.f32.mrb[3].mxu1 }
 0x311   : > { %456 = vst [vmem:[%s210_s26 + $0x10] sm:$0xff] %v445_v63 }
 0x312 PF: > { %s13_s12 = sadd.s32 1, %s650_s12  }
 0x313   : > { %p10_p4 = scmp.ge.s32.totalorder %s13_s12, 4  }
 0x315   :  { %12 = sbr.rel (!%p10_p4) target bundleno = 1 (0x1), region = 68 }

// kernel: multi_headed_attention.7
= control target key start
LH: loop header
LB: loop body
LE: loop exit
PB: predicated region body
PF: predicated region fallthrough
CT: control target
= control target key end

     0   :  { %vm275_vm0 = vcmask 130048   ;;  %s23961_s1 = inlined_call_operand.vmem [shape: f32[9,16,16], index: 1, kind: input, shape index: {}]   ;;  %s23962_s0 = inlined_call_operand.vmem [shape: f32[4,18,18,16], index: 0, kind: input, shape index: {}]   ;;  %s23963_s2 = inlined_call_operand.vmem [shape: f32[1,16], index: 2, kind: input, shape index: {}]   ;;  %s23964_s3 = inlined_call_operand.vmem [shape: f32[4,256,16], index: 3, kind: output, shape index: {}]  }
   0x1   :  { %v12543_v0 = vld [vmem:[%s23961_s1 + $0x10] sm:$0xff]  ;;  %v12544_v1 = vld [vmem:[%s23961_s1 + $0x18] sm:$0xff]  ;;  %v13317_v2 = vld [vmem:[%s23961_s1 + $0x40] sm:$0xff] }
   0x2   :  { %v17414_v3 = vpack.c.bf16 %v12544_v1, %v12543_v0  ;;  %v13318_v4 = vld [vmem:[%s23961_s1 + $0x48] sm:$0xff]  ;;  %v13189_v6 = vld [vmem:[%s23962_s0 + $0x19] sm:$0xff]  ;;  %v13575_v11 = vld [vmem:[%s23961_s1 + $0x50] sm:$0xff] }
   0x3   :  { %v144_v5 = vld [vmem:[%s23962_s0 + $0x1] sm:$0xff]  ;;  %v18516_v7 = vpack.c.bf16 %v13318_v4, %v13317_v2  ;;  %16438 = vmatprep.mubr.msk.f32.mxu0 %vm275_vm0, %v13189_v6  ;;  %v13576_v12 = vld [vmem:[%s23961_s1 + $0x58] sm:$0xff]  ;;  %v145_v13 = vld [vmem:[%s23962_s0 + $0x9] sm:$0xff] }
   0x4   :  { %15654 = vmatprep.mubr.msk.f32.mxu1 %vm275_vm0, %v144_v5  ;;  %v142_v8 = vld [vmem:[%s23961_s1] sm:$0xff]  ;;  %v143_v9 = vld [vmem:[%s23961_s1 + $0x8] sm:$0xff]  ;;  %17415 = vmatprep.subr.bf16.mxu1 %v17414_v3  ;;  %v17434_v14 = vpack.c.bf16 %v13576_v12, %v13575_v11  ;;  %v13191_v16 = vld [vmem:[%s23962_s0 + $0x31] sm:$0xff] }
   0x5   :  { %v17418_v10 = vpack.c.bf16 %v143_v9, %v142_v8  ;;  %17431 = vmatprep.subr.bf16.mxu0 %v18516_v7  ;;  %17417 = vmatpush3.bf16.msra.mxu1 %v17414_v3  ;;  %v13190_v15 = vld [vmem:[%s23962_s0 + $0x21] sm:$0xff]  ;;  %v13192_v17 = vld [vmem:[%s23962_s0 + $0x39] sm:$0xff]  ;;  %v13193_v18 = vld [vmem:[%s23962_s0 + $0x49] sm:$0xff] }
   0x6   :  { %17433 = vmatpush3.bf16.msra.mxu0 %v18516_v7  ;;  %v13194_v19 = vld [vmem:[%s23962_s0 + $0x51] sm:$0xff]  ;;  %v13195_v20 = vld [vmem:[%s23962_s0 + $0x61] sm:$0xff]  ;;  %v13196_v21 = vld [vmem:[%s23962_s0 + $0x69] sm:$0xff] }
   0x7   :  { %17419 = vmatprep.subr.bf16.mxu1 %v17418_v10  ;;  %17435 = vmatprep.subr.bf16.mxu0 %v17434_v14  ;;  %v13197_v22 = vld [vmem:[%s23962_s0 + $0x79] sm:$0xff]  ;;  %v13198_v23 = vld [vmem:[%s23962_s0 + $0x81] sm:$0xff]  ;;  %v13199_v24 = vld [vmem:[%s23962_s0 + $0x91] sm:$0xff] }
   0x8   :  { %15655 = vmatmul.mubr.msk.f32.vlgmr.msra.gmra.mrb[0].mxu1 %vm275_vm0, %v145_v13  ;;  %v13200_v25 = vld [vmem:[%s23962_s0 + $0x99] sm:$0xff]  ;;  %v13201_v26 = vld [vmem:[%s23962_s0 + $0xa9] sm:$0xff]  ;;  %v13202_v30 = vld [vmem:[%s23962_s0 + $0xb1] sm:$0xff] }
   0x9   :  { %16439 = vmatmul.mubr.msk.f32.vlgmr.msra.gmra.mrb[0].mxu0 %vm275_vm0, %v13190_v15  ;;  %17421 = vmatpush3.bf16.msra.mxu1 %v17418_v10  ;;  %v13833_v27 = vld [vmem:[%s23961_s1 + $0x60] sm:$0xff]  ;;  %v13834_v28 = vld [vmem:[%s23961_s1 + $0x68] sm:$0xff]  ;;  %v13207_v35 = vld [vmem:[%s23962_s0 + $0xf1] sm:$0xff] }
   0xa   :  { %17437 = vmatpush3.bf16.msra.mxu0 %v17434_v14  ;;  %15657 = vmatprep.mubr.msk.f32.mxu1 %vm275_vm0, %v13189_v6  ;;  %v18602_v29 = vpack.c.bf16 %v13834_v28, %v13833_v27  ;;  %v13203_v31 = vld [vmem:[%s23962_s0 + $0xc1] sm:$0xff]  ;;  %v13204_v32 = vld [vmem:[%s23962_s0 + $0xc9] sm:$0xff]  ;;  %v13205_v33 = vld [vmem:[%s23962_s0 + $0xd9] sm:$0xff] }
   0xb   :  { %16441 = vmatprep.mubr.msk.f32.mxu0 %vm275_vm0, %v13191_v16  ;;  %v13206_v34 = vld [vmem:[%s23962_s0 + $0xe1] sm:$0xff]  ;;  %v13208_v36 = vld [vmem:[%s23962_s0 + $0xf9] sm:$0xff]  ;;  %v13209_v37 = vld [vmem:[%s23962_s0 + $0x109] sm:$0xff] }
   0xc   :  { %15658 = vmatmul.mubr.msk.f32.gmra.mrb[2].mxu1 %vm275_vm0, %v13190_v15  ;;  %17439 = vmatprep.subr.bf16.mxu0 %v18602_v29  ;;  %v13210_v38 = vld [vmem:[%s23962_s0 + $0x111] sm:$0xff]  ;;  %v13211_v39 = vld [vmem:[%s23962_s0 + $0x121] sm:$0xff]  ;;  %v13212_v40 = vld [vmem:[%s23962_s0 + $0x129] sm:$0xff] }
   0xd   :  { %16442 = vmatmul.mubr.msk.f32.gmra.mrb[2].mxu0 %vm275_vm0, %v13192_v17  ;;  %15660 = vmatprep.mubr.msk.f32.mxu1 %vm275_vm0, %v13191_v16  ;;  %v13213_v41 = vld [vmem:[%s23962_s0 + $0x139] sm:$0xff]  ;;  %v13214_v42 = vld [vmem:[%s23962_s0 + $0x141] sm:$0xff]  ;;  %v13215_v43 = vld [vmem:[%s23962_s0 + $0x151] sm:$0xff] }
   0xe   :  { %16444 = vmatprep.mubr.msk.f32.mxu0 %vm275_vm0, %v13193_v18  ;;  %v13216_v44 = vld [vmem:[%s23962_s0 + $0x159] sm:$0xff]  ;;  %v13217_v45 = vld [vmem:[%s23962_s0 + $0x169] sm:$0xff]  ;;  %v13218_v46 = vld [vmem:[%s23962_s0 + $0x171] sm:$0xff] }
   0xf   :  { %v13219_v47 = vld [vmem:[%s23962_s0 + $0x181] sm:$0xff]  ;;  %v13220_v48 = vld [vmem:[%s23962_s0 + $0x189] sm:$0xff]  ;;  %v176_v49 = vld [vmem:[%s23962_s0 + $0x1b1] sm:$0xff] }
  0x10   :  { %15661 = vmatmul.mubr.msk.f32.gmra.mrb[4].mxu1 %vm275_vm0, %v13192_v17  ;;  %v13221_v50 = vld [vmem:[%s23962_s0 + $0x1c9] sm:$0xff]  ;;  %v177_v51 = vld [vmem:[%s23962_s0 + $0x1b9] sm:$0xff]  ;;  %v13222_v52 = vld [vmem:[%s23962_s0 + $0x1d1] sm:$0xff] }
  0x11   :  { %16445 = vmatmul.mubr.msk.f32.gmra.mrb[4].mxu0 %vm275_vm0, %v13194_v19  ;;  %15663 = vmatprep.mubr.msk.f32.mxu1 %vm275_vm0, %v13193_v18  ;;  %v13223_v53 = vld [vmem:[%s23962_s0 + $0x1e1] sm:$0xff]  ;;  %v13224_v54 = vld [vmem:[%s23962_s0 + $0x1e9] sm:$0xff]  ;;  %v13225_v55 = vld [vmem:[%s23962_s0 + $0x1f9] sm:$0xff] }
  0x12   :  { %16447 = vmatprep.mubr.msk.f32.mxu0 %vm275_vm0, %v13195_v20  ;;  %v13226_v56 = vld [vmem:[%s23962_s0 + $0x201] sm:$0xff]  ;;  %v13227_v57 = vld [vmem:[%s23962_s0 + $0x211] sm:$0xff]  ;;  %v13228_v58 = vld [vmem:[%s23962_s0 + $0x219] sm:$0xff] }
  0x13   :  { %v13229_v59 = vld [vmem:[%s23962_s0 + $0x229] sm:$0xff]  ;;  %v13230_v60 = vld [vmem:[%s23962_s0 + $0x231] sm:$0xff]  ;;  %v13231_v61 = vld [vmem:[%s23962_s0 + $0x241] sm:$0xff] }
  0x14   :  { %15664 = vmatmul.mubr.msk.f32.gmra.mrb[6].mxu1 %vm275_vm0, %v13194_v19  ;;  %v13232_v62 = vld [vmem:[%s23962_s0 + $0x249] sm:$0xff]  ;;  %v13233_v63 = vld [vmem:[%s23962_s0 + $0x259] sm:$0xff]  ;;  %v13234_v0 = vld [vmem:[%s23962_s0 + $0x261] sm:$0xff] }
  0x15   :  { %16448 = vmatmul.mubr.msk.f32.gmra.mrb[6].mxu0 %vm275_vm0, %v13196_v21  ;;  %15666 = vmatprep.mubr.msk.f32.mxu1 %vm275_vm0, %v13195_v20  ;;  %v13235_v1 = vld [vmem:[%s23962_s0 + $0x271] sm:$0xff]  ;;  %v13236_v2 = vld [vmem:[%s23962_s0 + $0x279] sm:$0xff]  ;;  %v13237_v3 = vld [vmem:[%s23962_s0 + $0x289] sm:$0xff] }
  0x16   :  { %16450 = vmatprep.mubr.msk.f32.mxu0 %vm275_vm0, %v13197_v22  ;;  %v13238_v4 = vld [vmem:[%s23962_s0 + $0x291] sm:$0xff]  ;;  %v13239_v5 = vld [vmem:[%s23962_s0 + $0x2a1] sm:$0xff]  ;;  %v13240_v6 = vld [vmem:[%s23962_s0 + $0x2a9] sm:$0xff] }
  0x17   :  { %v13241_v8 = vld [vmem:[%s23962_s0 + $0x2b9] sm:$0xff]  ;;  %v13242_v9 = vld [vmem:[%s23962_s0 + $0x2c1] sm:$0xff]  ;;  %v13243_v10 = vld [vmem:[%s23962_s0 + $0x2d1] sm:$0xff] }
  0x18   :  { %15667 = vmatmul.mubr.msk.f32.gmra.mrb[8].mxu1 %vm275_vm0, %v13196_v21  ;;  %v13244_v11 = vld [vmem:[%s23962_s0 + $0x2d9] sm:$0xff]  ;;  %v13245_v12 = vld [vmem:[%s23962_s0 + $0x2e9] sm:$0xff]  ;;  %v13246_v13 = vld [vmem:[%s23962_s0 + $0x2f1] sm:$0xff] }
  0x19   :  { %16451 = vmatmul.mubr.msk.f32.gmra.mrb[8].mxu0 %vm275_vm0, %v13198_v23  ;;  %15669 = vmatprep.mubr.msk.f32.mxu1 %vm275_vm0, %v13197_v22  ;;  %v13247_v14 = vld [vmem:[%s23962_s0 + $0x301] sm:$0xff]  ;;  %v13248_v15 = vld [vmem:[%s23962_s0 + $0x309] sm:$0xff]  ;;  %v13249_v16 = vld [vmem:[%s23962_s0 + $0x319] sm:$0xff] }
  0x1a   :  { %16453 = vmatprep.mubr.msk.f32.mxu0 %vm275_vm0, %v13199_v24  ;;  %v13250_v17 = vld [vmem:[%s23962_s0 + $0x321] sm:$0xff]  ;;  %v13251_v18 = vld [vmem:[%s23962_s0 + $0x331] sm:$0xff]  ;;  %v13252_v19 = vld [vmem:[%s23962_s0 + $0x339] sm:$0xff] }
  0x1b   :  { %v208_v20 = vld [vmem:[%s23962_s0 + $0x361] sm:$0xff]  ;;  %v209_v22 = vld [vmem:[%s23962_s0 + $0x369] sm:$0xff] }
  0x1c   :  { %15670 = vmatmul.mubr.msk.f32.gmra.mrb[10].mxu1 %vm275_vm0, %v13198_v23  ;;  %v13447_v21 = vld [vmem:[%s23962_s0 + $0x1a] sm:$0xff]  ;;  %v13448_v23 = vld [vmem:[%s23962_s0 + $0x22] sm:$0xff] }
  0x1d   :  { %16454 = vmatmul.mubr.msk.f32.gmra.mrb[10].mxu0 %vm275_vm0, %v13200_v25  ;;  %15672 = vmatprep.mubr.msk.f32.mxu1 %vm275_vm0, %v13199_v24  ;;  %v210_v24 = vld [vmem:[%s23962_s0 + $0x379] sm:$0xff]  ;;  %v12802_v27 = vld [vmem:[%s23961_s1 + $0x28] sm:$0xff] }
  0x1e   :  { %16456 = vmatprep.mubr.msk.f32.mxu0 %vm275_vm0, %v13201_v26  ;;  %v211_v28 = vld [vmem:[%s23962_s0 + $0x381] sm:$0xff] }
  0x20   :  { %15673 = vmatmul.mubr.msk.f32.gmra.mrb[12].mxu1 %vm275_vm0, %v13200_v25  ;;  %v13449_v25 = vld [vmem:[%s23962_s0 + $0x32] sm:$0xff] }
  0x21   :  { %16457 = vmatmul.mubr.msk.f32.gmra.mrb[12].mxu0 %vm275_vm0, %v13202_v30  ;;  %15675 = vmatprep.mubr.msk.f32.mxu1 %vm275_vm0, %v13201_v26  ;;  %v12801_v26 = vld [vmem:[%s23961_s1 + $0x20] sm:$0xff] }
  0x22   :  { %16459 = vmatprep.mubr.msk.f32.mxu0 %vm275_vm0, %v13203_v31 }
  0x24   :  { %15676 = vmatmul.mubr.msk.f32.gmra.mrb[14].mxu1 %vm275_vm0, %v13202_v30  ;;  %v18899_v30 = vpack.c.bf16 %v12802_v27, %v12801_v26  ;;  %v241_v26 = vld [vmem:[%s23962_s0 + $0x519] sm:$0xff] }
  0x25   :  { %16460 = vmatmul.mubr.msk.f32.gmra.mrb[14].mxu0 %vm275_vm0, %v13204_v32  ;;  %15678 = vmatprep.mubr.msk.f32.mxu1 %vm275_vm0, %v13203_v31  ;;  %v13450_v31 = vld [vmem:[%s23962_s0 + $0x3a] sm:$0xff]  ;;  %v13480_v27 = vld [vmem:[%s23962_s0 + $0x1d2] sm:$0xff] }
  0x26   :  { %16462 = vmatprep.mubr.msk.f32.mxu0 %vm275_vm0, %v13205_v33  ;;  %17423 = vmatprep.subr.bf16.mxu1 %v18899_v30 }
  0x28   :  { %15679 = vmatmul.mubr.msk.f32.gmra.mrb[16].mxu1 %vm275_vm0, %v13204_v32  ;;  %v212_v32 = vld [vmem:[%s23962_s0 + $0x391] sm:$0xff] }
  0x29   :  { %16463 = vmatmul.mubr.msk.f32.gmra.mrb[16].mxu0 %vm275_vm0, %v13206_v34  ;;  %15681 = vmatprep.mubr.msk.f32.mxu1 %vm275_vm0, %v13205_v33  ;;  %v13451_v33 = vld [vmem:[%s23962_s0 + $0x4a] sm:$0xff] }
  0x2a   :  { %16465 = vmatprep.mubr.msk.f32.mxu0 %vm275_vm0, %v13207_v35 }
  0x2c   :  { %15682 = vmatmul.mubr.msk.f32.gmra.mrb[18].mxu1 %vm275_vm0, %v13206_v34  ;;  %v13452_v34 = vld [vmem:[%s23962_s0 + $0x52] sm:$0xff] }
  0x2d   :  { %16466 = vmatmul.mubr.msk.f32.gmra.mrb[18].mxu0 %vm275_vm0, %v13208_v36  ;;  %15684 = vmatprep.mubr.msk.f32.mxu1 %vm275_vm0, %v13207_v35  ;;  %v214_v35 = vld [vmem:[%s23962_s0 + $0x3a9] sm:$0xff] }
  0x2e   :  { %16468 = vmatprep.mubr.msk.f32.mxu0 %vm275_vm0, %v13209_v37 }
  0x30   :  { %15685 = vmatmul.mubr.msk.f32.gmra.mrb[20].mxu1 %vm275_vm0, %v13208_v36  ;;  %v13453_v36 = vld [vmem:[%s23962_s0 + $0x62] sm:$0xff] }
  0x31   :  { %16469 = vmatmul.mubr.msk.f32.gmra.mrb[20].mxu0 %vm275_vm0, %v13210_v38  ;;  %15687 = vmatprep.mubr.msk.f32.mxu1 %vm275_vm0, %v13209_v37  ;;  %v215_v37 = vld [vmem:[%s23962_s0 + $0x3b1] sm:$0xff] }
  0x32   :  { %16471 = vmatprep.mubr.msk.f32.mxu0 %vm275_vm0, %v13211_v39 }
  0x34   :  { %15688 = vmatmul.mubr.msk.f32.gmra.mrb[22].mxu1 %vm275_vm0, %v13210_v38  ;;  %v13454_v38 = vld [vmem:[%s23962_s0 + $0x6a] sm:$0xff] }
  0x35   :  { %16472 = vmatmul.mubr.msk.f32.gmra.mrb[22].mxu0 %vm275_vm0, %v13212_v40  ;;  %15690 = vmatprep.mubr.msk.f32.mxu1 %vm275_vm0, %v13211_v39  ;;  %v216_v39 = vld [vmem:[%s23962_s0 + $0x3c1] sm:$0xff] }
  0x36   :  { %16474 = vmatprep.mubr.msk.f32.mxu0 %vm275_vm0, %v13213_v41 }
  0x38   :  { %15691 = vmatmul.mubr.msk.f32.gmra.mrb[24].mxu1 %vm275_vm0, %v13212_v40  ;;  %v13455_v40 = vld [vmem:[%s23962_s0 + $0x7a] sm:$0xff] }
  0x39   :  { %16475 = vmatmul.mubr.msk.f32.gmra.mrb[24].mxu0 %vm275_vm0, %v13214_v42  ;;  %15693 = vmatprep.mubr.msk.f32.mxu1 %vm275_vm0, %v13213_v41  ;;  %v217_v41 = vld [vmem:[%s23962_s0 + $0x3c9] sm:$0xff] }
  0x3a   :  { %16477 = vmatprep.mubr.msk.f32.mxu0 %vm275_vm0, %v13215_v43 }
  0x3c   :  { %15694 = vmatmul.mubr.msk.f32.gmra.mrb[26].mxu1 %vm275_vm0, %v13214_v42  ;;  %v13456_v42 = vld [vmem:[%s23962_s0 + $0x82] sm:$0xff] }
  0x3d   :  { %16478 = vmatmul.mubr.msk.f32.gmra.mrb[26].mxu0 %vm275_vm0, %v13216_v44  ;;  %15696 = vmatprep.mubr.msk.f32.mxu1 %vm275_vm0, %v13215_v43  ;;  %v218_v43 = vld [vmem:[%s23962_s0 + $0x3d9] sm:$0xff] }
  0x3e   :  { %16480 = vmatprep.mubr.msk.f32.mxu0 %vm275_vm0, %v13217_v45 }
  0x40   :  { %15697 = vmatmul.mubr.msk.f32.gmra.mrb[28].mxu1 %vm275_vm0, %v13216_v44  ;;  %v13457_v44 = vld [vmem:[%s23962_s0 + $0x92] sm:$0xff] }
  0x41   :  { %16481 = vmatmul.mubr.msk.f32.gmra.mrb[28].mxu0 %vm275_vm0, %v13218_v46  ;;  %15699 = vmatprep.mubr.msk.f32.mxu1 %vm275_vm0, %v13217_v45  ;;  %v219_v45 = vld [vmem:[%s23962_s0 + $0x3e1] sm:$0xff] }
  0x42   :  { %16483 = vmatprep.mubr.msk.f32.mxu0 %vm275_vm0, %v13219_v47  ;;  %v220_v47 = vld [vmem:[%s23962_s0 + $0x3f1] sm:$0xff] }
  0x44   :  { %15700 = vmatmul.mubr.msk.f32.gmra.mrb[30].mxu1 %vm275_vm0, %v13218_v46  ;;  %v13458_v46 = vld [vmem:[%s23962_s0 + $0x9a] sm:$0xff] }
  0x45   :  { %16484 = vmatmul.mubr.msk.f32.gmra.mrb[30].mxu0 %vm275_vm0, %v13220_v48  ;;  %15702 = vmatprep.mubr.msk.f32.mxu1 %vm275_vm0, %v176_v49  ;;  %v13459_v48 = vld [vmem:[%s23962_s0 + $0xaa] sm:$0xff]  ;;  %v221_v49 = vld [vmem:[%s23962_s0 + $0x3f9] sm:$0xff] }
  0x46   :  { %16486 = vmatprep.mubr.msk.f32.mxu0 %vm275_vm0, %v13221_v50 }
  0x48   :  { %15703 = vmatmul.mubr.msk.f32.gmra.mrb[32].mxu1 %vm275_vm0, %v177_v51  ;;  %v222_v51 = vld [vmem:[%s23962_s0 + $0x409] sm:$0xff] }
  0x49   :  { %16487 = vmatmul.mubr.msk.f32.gmra.mrb[32].mxu0 %vm275_vm0, %v13222_v52  ;;  %15705 = vmatprep.mubr.msk.f32.mxu1 %vm275_vm0, %v13221_v50  ;;  %v13460_v50 = vld [vmem:[%s23962_s0 + $0xb2] sm:$0xff] }
  0x4a   :  { %16489 = vmatprep.mubr.msk.f32.mxu0 %vm275_vm0, %v13223_v53 }
  0x4c   :  { %15706 = vmatmul.mubr.msk.f32.gmra.mrb[34].mxu1 %vm275_vm0, %v13222_v52  ;;  %v13461_v52 = vld [vmem:[%s23962_s0 + $0xc2] sm:$0xff] }
  0x4d   :  { %16490 = vmatmul.mubr.msk.f32.gmra.mrb[34].mxu0 %vm275_vm0, %v13224_v54  ;;  %15708 = vmatprep.mubr.msk.f32.mxu1 %vm275_vm0, %v13223_v53  ;;  %v223_v53 = vld [vmem:[%s23962_s0 + $0x411] sm:$0xff] }
  0x4e   :  { %16492 = vmatprep.mubr.msk.f32.mxu0 %vm275_vm0, %v13225_v55 }
  0x50   :  { %15709 = vmatmul.mubr.msk.f32.gmra.mrb[36].mxu1 %vm275_vm0, %v13224_v54  ;;  %v13462_v54 = vld [vmem:[%s23962_s0 + $0xca] sm:$0xff] }
  0x51   :  { %16493 = vmatmul.mubr.msk.f32.gmra.mrb[36].mxu0 %vm275_vm0, %v13226_v56  ;;  %15711 = vmatprep.mubr.msk.f32.mxu1 %vm275_vm0, %v13225_v55  ;;  %v224_v55 = vld [vmem:[%s23962_s0 + $0x421] sm:$0xff] }
  0x52   :  { %16495 = vmatprep.mubr.msk.f32.mxu0 %vm275_vm0, %v13227_v57 }
  0x54   :  { %15712 = vmatmul.mubr.msk.f32.gmra.mrb[38].mxu1 %vm275_vm0, %v13226_v56  ;;  %v13463_v56 = vld [vmem:[%s23962_s0 + $0xda] sm:$0xff] }
  0x55   :  { %16496 = vmatmul.mubr.msk.f32.gmra.mrb[38].mxu0 %vm275_vm0, %v13228_v58  ;;  %15714 = vmatprep.mubr.msk.f32.mxu1 %vm275_vm0, %v13227_v57  ;;  %v225_v57 = vld [vmem:[%s23962_s0 + $0x429] sm:$0xff] }
  0x56   :  { %16498 = vmatprep.mubr.msk.f32.mxu0 %vm275_vm0, %v13229_v59 }
  0x58   :  { %15715 = vmatmul.mubr.msk.f32.gmra.mrb[40].mxu1 %vm275_vm0, %v13228_v58  ;;  %v13464_v58 = vld [vmem:[%s23962_s0 + $0xe2] sm:$0xff] }
  0x59   :  { %16499 = vmatmul.mubr.msk.f32.gmra.mrb[40].mxu0 %vm275_vm0, %v13230_v60  ;;  %15717 = vmatprep.mubr.msk.f32.mxu1 %vm275_vm0, %v13229_v59  ;;  %v226_v59 = vld [vmem:[%s23962_s0 + $0x439] sm:$0xff] }
  0x5a   :  { %16501 = vmatprep.mubr.msk.f32.mxu0 %vm275_vm0, %v13231_v61 }
  0x5c   :  { %15718 = vmatmul.mubr.msk.f32.gmra.mrb[42].mxu1 %vm275_vm0, %v13230_v60  ;;  %v13465_v60 = vld [vmem:[%s23962_s0 + $0xf2] sm:$0xff] }
  0x5d   :  { %16502 = vmatmul.mubr.msk.f32.gmra.mrb[42].mxu0 %vm275_vm0, %v13232_v62  ;;  %15720 = vmatprep.mubr.msk.f32.mxu1 %vm275_vm0, %v13231_v61  ;;  %v227_v61 = vld [vmem:[%s23962_s0 + $0x441] sm:$0xff] }
  0x5e   :  { %16504 = vmatprep.mubr.msk.f32.mxu0 %vm275_vm0, %v13233_v63 }
  0x60   :  { %15721 = vmatmul.mubr.msk.f32.gmra.mrb[44].mxu1 %vm275_vm0, %v13232_v62  ;;  %v13466_v62 = vld [vmem:[%s23962_s0 + $0xfa] sm:$0xff] }
  0x61   :  { %16505 = vmatmul.mubr.msk.f32.gmra.mrb[44].mxu0 %vm275_vm0, %v13234_v0  ;;  %15723 = vmatprep.mubr.msk.f32.mxu1 %vm275_vm0, %v13233_v63  ;;  %v228_v63 = vld [vmem:[%s23962_s0 + $0x451] sm:$0xff] }
  0x62   :  { %16507 = vmatprep.mubr.msk.f32.mxu0 %vm275_vm0, %v13235_v1 }
  0x64   :  { %15724 = vmatmul.mubr.msk.f32.gmra.mrb[46].mxu1 %vm275_vm0, %v13234_v0  ;;  %v13467_v0 = vld [vmem:[%s23962_s0 + $0x10a] sm:$0xff] }
  0x65   :  { %16508 = vmatmul.mubr.msk.f32.gmra.mrb[46].mxu0 %vm275_vm0, %v13236_v2  ;;  %15726 = vmatprep.mubr.msk.f32.mxu1 %vm275_vm0, %v13235_v1  ;;  %v229_v1 = vld [vmem:[%s23962_s0 + $0x459] sm:$0xff] }
  0x66   :  { %16510 = vmatprep.mubr.msk.f32.mxu0 %vm275_vm0, %v13237_v3 }
  0x68   :  { %15727 = vmatmul.mubr.msk.f32.gmra.mrb[48].mxu1 %vm275_vm0, %v13236_v2  ;;  %v13468_v2 = vld [vmem:[%s23962_s0 + $0x112] sm:$0xff] }
  0x69   :  { %16511 = vmatmul.mubr.msk.f32.gmra.mrb[48].mxu0 %vm275_vm0, %v13238_v4  ;;  %15729 = vmatprep.mubr.msk.f32.mxu1 %vm275_vm0, %v13237_v3  ;;  %v230_v3 = vld [vmem:[%s23962_s0 + $0x469] sm:$0xff] }
  0x6a   :  { %16513 = vmatprep.mubr.msk.f32.mxu0 %vm275_vm0, %v13239_v5 }
  0x6c   :  { %15730 = vmatmul.mubr.msk.f32.gmra.mrb[50].mxu1 %vm275_vm0, %v13238_v4  ;;  %v13469_v4 = vld [vmem:[%s23962_s0 + $0x122] sm:$0xff] }
  0x6d   :  { %16514 = vmatmul.mubr.msk.f32.gmra.mrb[50].mxu0 %vm275_vm0, %v13240_v6  ;;  %15732 = vmatprep.mubr.msk.f32.mxu1 %vm275_vm0, %v13239_v5  ;;  %v231_v5 = vld [vmem:[%s23962_s0 + $0x471] sm:$0xff] }
  0x6e   :  { %16516 = vmatprep.mubr.msk.f32.mxu0 %vm275_vm0, %v13241_v8 }
  0x70   :  { %15733 = vmatmul.mubr.msk.f32.gmra.mrb[52].mxu1 %vm275_vm0, %v13240_v6  ;;  %v13470_v6 = vld [vmem:[%s23962_s0 + $0x12a] sm:$0xff] }
  0x71   :  { %16517 = vmatmul.mubr.msk.f32.gmra.mrb[52].mxu0 %vm275_vm0, %v13242_v9  ;;  %15735 = vmatprep.mubr.msk.f32.mxu1 %vm275_vm0, %v13241_v8  ;;  %v232_v8 = vld [vmem:[%s23962_s0 + $0x481] sm:$0xff] }
  0x72   :  { %16519 = vmatprep.mubr.msk.f32.mxu0 %vm275_vm0, %v13243_v10 }
  0x74   :  { %15736 = vmatmul.mubr.msk.f32.gmra.mrb[54].mxu1 %vm275_vm0, %v13242_v9  ;;  %v13471_v9 = vld [vmem:[%s23962_s0 + $0x13a] sm:$0xff] }
  0x75   :  { %16520 = vmatmul.mubr.msk.f32.gmra.mrb[54].mxu0 %vm275_vm0, %v13244_v11  ;;  %15738 = vmatprep.mubr.msk.f32.mxu1 %vm275_vm0, %v13243_v10  ;;  %v233_v10 = vld [vmem:[%s23962_s0 + $0x489] sm:$0xff] }
  0x76   :  { %16522 = vmatprep.mubr.msk.f32.mxu0 %vm275_vm0, %v13245_v12 }
  0x78   :  { %15739 = vmatmul.mubr.msk.f32.gmra.mrb[56].mxu1 %vm275_vm0, %v13244_v11  ;;  %v13472_v11 = vld [vmem:[%s23962_s0 + $0x142] sm:$0xff] }
  0x79   :  { %16523 = vmatmul.mubr.msk.f32.gmra.mrb[56].mxu0 %vm275_vm0, %v13246_v13  ;;  %15741 = vmatprep.mubr.msk.f32.mxu1 %vm275_vm0, %v13245_v12  ;;  %v234_v12 = vld [vmem:[%s23962_s0 + $0x499] sm:$0xff] }
  0x7a   :  { %16525 = vmatprep.mubr.msk.f32.mxu0 %vm275_vm0, %v13247_v14 }
  0x7c   :  { %15742 = vmatmul.mubr.msk.f32.gmra.mrb[58].mxu1 %vm275_vm0, %v13246_v13  ;;  %v13473_v13 = vld [vmem:[%s23962_s0 + $0x152] sm:$0xff] }
  0x7d   :  { %16526 = vmatmul.mubr.msk.f32.gmra.mrb[58].mxu0 %vm275_vm0, %v13248_v15  ;;  %15744 = vmatprep.mubr.msk.f32.mxu1 %vm275_vm0, %v13247_v14  ;;  %v235_v14 = vld [vmem:[%s23962_s0 + $0x4a1] sm:$0xff] }
  0x7e   :  { %16528 = vmatprep.mubr.msk.f32.mxu0 %vm275_vm0, %v13249_v16 }
  0x80   :  { %15745 = vmatmul.mubr.msk.f32.gmra.mrb[60].mxu1 %vm275_vm0, %v13248_v15  ;;  %v13474_v15 = vld [vmem:[%s23962_s0 + $0x15a] sm:$0xff] }
  0x81   :  { %16529 = vmatmul.mubr.msk.f32.gmra.mrb[60].mxu0 %vm275_vm0, %v13250_v17  ;;  %15747 = vmatprep.mubr.msk.f32.mxu1 %vm275_vm0, %v13249_v16  ;;  %v236_v16 = vld [vmem:[%s23962_s0 + $0x4b1] sm:$0xff] }
  0x82   :  { %16531 = vmatprep.mubr.msk.f32.mxu0 %vm275_vm0, %v13251_v18  ;;  %v237_v18 = vld [vmem:[%s23962_s0 + $0x4b9] sm:$0xff] }
  0x84   :  { %15748 = vmatmul.mubr.msk.f32.gmra.mrb[62].mxu1 %vm275_vm0, %v13250_v17  ;;  %v13475_v17 = vld [vmem:[%s23962_s0 + $0x16a] sm:$0xff] }
  0x85   :  { %16532 = vmatmul.mubr.msk.f32.gmra.mrb[62].mxu0 %vm275_vm0, %v13252_v19  ;;  %15750 = vmatprep.mubr.msk.f32.mxu1 %vm275_vm0, %v208_v20  ;;  %v13476_v19 = vld [vmem:[%s23962_s0 + $0x172] sm:$0xff]  ;;  %v238_v20 = vld [vmem:[%s23962_s0 + $0x4c9] sm:$0xff] }
  0x86   :  { %16634 = vmatprep.mubr.msk.f32.mxu0 %vm275_vm0, %v13447_v21  ;;  %v13477_v21 = vld [vmem:[%s23962_s0 + $0x182] sm:$0xff] }
  0x88   :  { %15751 = vmatmul.mubr.msk.f32.gmra.mrb[64].mxu1 %vm275_vm0, %v209_v22  ;;  %v239_v22 = vld [vmem:[%s23962_s0 + $0x4d1] sm:$0xff] }
  0x89   :  { %16635 = vmatmul.mubr.msk.f32.vlgmr.msra.gmra.mrb[0].mxu0 %vm275_vm0, %v13448_v23  ;;  %15753 = vmatprep.mubr.msk.f32.mxu1 %vm275_vm0, %v210_v24  ;;  %v13478_v23 = vld [vmem:[%s23962_s0 + $0x18a] sm:$0xff] }
  0x8a   :  { %17441 = vmatpush3.bf16.msra.mxu0 %v18602_v29  ;;  %16637 = vmatprep.mubr.msk.f32.mxu0 %vm275_vm0, %v13449_v25  ;;  %v213_v29 = vld [vmem:[%s23962_s0 + $0x399] sm:$0xff]  ;;  %v240_v24 = vld [vmem:[%s23962_s0 + $0x511] sm:$0xff] }
  0x8b   :  { %v13479_v25 = vld [vmem:[%s23962_s0 + $0x1ca] sm:$0xff] }
  0x8c   :  { %15754 = vmatmul.mubr.msk.f32.gmra.mrb[66].mxu1 %vm275_vm0, %v211_v28  ;;  %v242_v28 = vld [vmem:[%s23962_s0 + $0x529] sm:$0xff] }
  0x8d   :  { %16638 = vmatmul.mubr.msk.f32.gmra.mrb[2].mxu0 %vm275_vm0, %v13450_v31  ;;  %15756 = vmatprep.mubr.msk.f32.mxu1 %vm275_vm0, %v212_v32  ;;  %v13481_v31 = vld [vmem:[%s23962_s0 + $0x1e2] sm:$0xff]  ;;  %v243_v32 = vld [vmem:[%s23962_s0 + $0x531] sm:$0xff] }
  0x8e   :  { %16640 = vmatprep.mubr.msk.f32.mxu0 %vm275_vm0, %v13451_v33  ;;  %v13482_v33 = vld [vmem:[%s23962_s0 + $0x1ea] sm:$0xff] }
  0x90   :  { %15757 = vmatmul.mubr.msk.f32.gmra.mrb[68].mxu1 %vm275_vm0, %v213_v29  ;;  %v244_v29 = vld [vmem:[%s23962_s0 + $0x541] sm:$0xff] }
  0x91   :  { %16641 = vmatmul.mubr.msk.f32.gmra.mrb[4].mxu0 %vm275_vm0, %v13452_v34  ;;  %15759 = vmatprep.mubr.msk.f32.mxu1 %vm275_vm0, %v214_v35  ;;  %v13483_v34 = vld [vmem:[%s23962_s0 + $0x1fa] sm:$0xff]  ;;  %v245_v35 = vld [vmem:[%s23962_s0 + $0x549] sm:$0xff] }
  0x92   :  { %16643 = vmatprep.mubr.msk.f32.mxu0 %vm275_vm0, %v13453_v36  ;;  %v13484_v36 = vld [vmem:[%s23962_s0 + $0x202] sm:$0xff] }
  0x94   :  { %15760 = vmatmul.mubr.msk.f32.gmra.mrb[70].mxu1 %vm275_vm0, %v215_v37  ;;  %v246_v37 = vld [vmem:[%s23962_s0 + $0x559] sm:$0xff] }
  0x95   :  { %16644 = vmatmul.mubr.msk.f32.gmra.mrb[6].mxu0 %vm275_vm0, %v13454_v38  ;;  %15762 = vmatprep.mubr.msk.f32.mxu1 %vm275_vm0, %v216_v39  ;;  %v13485_v38 = vld [vmem:[%s23962_s0 + $0x212] sm:$0xff]  ;;  %v247_v39 = vld [vmem:[%s23962_s0 + $0x561] sm:$0xff] }
  0x96   :  { %16646 = vmatprep.mubr.msk.f32.mxu0 %vm275_vm0, %v13455_v40  ;;  %v13486_v40 = vld [vmem:[%s23962_s0 + $0x21a] sm:$0xff] }
  0x98   :  { %15763 = vmatmul.mubr.msk.f32.gmra.mrb[72].mxu1 %vm275_vm0, %v217_v41  ;;  %v248_v41 = vld [vmem:[%s23962_s0 + $0x571] sm:$0xff] }
  0x99   :  { %16647 = vmatmul.mubr.msk.f32.gmra.mrb[8].mxu0 %vm275_vm0, %v13456_v42  ;;  %15765 = vmatprep.mubr.msk.f32.mxu1 %vm275_vm0, %v218_v43  ;;  %v13487_v42 = vld [vmem:[%s23962_s0 + $0x22a] sm:$0xff]  ;;  %v249_v43 = vld [vmem:[%s23962_s0 + $0x579] sm:$0xff] }
  0x9a   :  { %16649 = vmatprep.mubr.msk.f32.mxu0 %vm275_vm0, %v13457_v44  ;;  %v13488_v44 = vld [vmem:[%s23962_s0 + $0x232] sm:$0xff] }
  0x9c   :  { %15766 = vmatmul.mubr.msk.f32.gmra.mrb[74].mxu1 %vm275_vm0, %v219_v45  ;;  %v250_v45 = vld [vmem:[%s23962_s0 + $0x589] sm:$0xff] }
  0x9d   :  { %16650 = vmatmul.mubr.msk.f32.gmra.mrb[10].mxu0 %vm275_vm0, %v13458_v46  ;;  %15768 = vmatprep.mubr.msk.f32.mxu1 %vm275_vm0, %v220_v47  ;;  %v13489_v46 = vld [vmem:[%s23962_s0 + $0x242] sm:$0xff]  ;;  %v251_v47 = vld [vmem:[%s23962_s0 + $0x591] sm:$0xff] }
  0x9e   :  { %16652 = vmatprep.mubr.msk.f32.mxu0 %vm275_vm0, %v13459_v48  ;;  %v13490_v48 = vld [vmem:[%s23962_s0 + $0x24a] sm:$0xff] }
  0xa0   :  { %15769 = vmatmul.mubr.msk.f32.gmra.mrb[76].mxu1 %vm275_vm0, %v221_v49  ;;  %v252_v49 = vld [vmem:[%s23962_s0 + $0x5a1] sm:$0xff] }
  0xa1   :  { %16653 = vmatmul.mubr.msk.f32.gmra.mrb[12].mxu0 %vm275_vm0, %v13460_v50  ;;  %15771 = vmatprep.mubr.msk.f32.mxu1 %vm275_vm0, %v222_v51  ;;  %v13491_v50 = vld [vmem:[%s23962_s0 + $0x25a] sm:$0xff]  ;;  %v253_v51 = vld [vmem:[%s23962_s0 + $0x5a9] sm:$0xff] }
  0xa2   :  { %16655 = vmatprep.mubr.msk.f32.mxu0 %vm275_vm0, %v13461_v52  ;;  %v13492_v52 = vld [vmem:[%s23962_s0 + $0x262] sm:$0xff] }
  0xa4   :  { %15772 = vmatmul.mubr.msk.f32.gmra.mrb[78].mxu1 %vm275_vm0, %v223_v53  ;;  %v254_v53 = vld [vmem:[%s23962_s0 + $0x5b9] sm:$0xff] }
  0xa5   :  { %16656 = vmatmul.mubr.msk.f32.gmra.mrb[14].mxu0 %vm275_vm0, %v13462_v54  ;;  %15774 = vmatprep.mubr.msk.f32.mxu1 %vm275_vm0, %v224_v55  ;;  %v13493_v54 = vld [vmem:[%s23962_s0 + $0x272] sm:$0xff]  ;;  %v255_v55 = vld [vmem:[%s23962_s0 + $0x5c1] sm:$0xff] }
  0xa6   :  { %16658 = vmatprep.mubr.msk.f32.mxu0 %vm275_vm0, %v13463_v56  ;;  %v13494_v56 = vld [vmem:[%s23962_s0 + $0x27a] sm:$0xff] }
  0xa8   :  { %15775 = vmatmul.mubr.msk.f32.gmra.mrb[80].mxu1 %vm275_vm0, %v225_v57  ;;  %v256_v57 = vld [vmem:[%s23962_s0 + $0x5d1] sm:$0xff] }
  0xa9   :  { %16659 = vmatmul.mubr.msk.f32.gmra.mrb[16].mxu0 %vm275_vm0, %v13464_v58  ;;  %15777 = vmatprep.mubr.msk.f32.mxu1 %vm275_vm0, %v226_v59  ;;  %v13495_v58 = vld [vmem:[%s23962_s0 + $0x28a] sm:$0xff]  ;;  %v257_v59 = vld [vmem:[%s23962_s0 + $0x5d9] sm:$0xff] }
  0xaa   :  { %16661 = vmatprep.mubr.msk.f32.mxu0 %vm275_vm0, %v13465_v60  ;;  %v13496_v60 = vld [vmem:[%s23962_s0 + $0x292] sm:$0xff] }
  0xac   :  { %15778 = vmatmul.mubr.msk.f32.gmra.mrb[82].mxu1 %vm275_vm0, %v227_v61  ;;  %v258_v61 = vld [vmem:[%s23962_s0 + $0x5e9] sm:$0xff] }
  0xad   :  { %16662 = vmatmul.mubr.msk.f32.gmra.mrb[18].mxu0 %vm275_vm0, %v13466_v62  ;;  %15780 = vmatprep.mubr.msk.f32.mxu1 %vm275_vm0, %v228_v63  ;;  %v13497_v62 = vld [vmem:[%s23962_s0 + $0x2a2] sm:$0xff]  ;;  %v259_v63 = vld [vmem:[%s23962_s0 + $0x5f1] sm:$0xff] }
  0xae   :  { %16664 = vmatprep.mubr.msk.f32.mxu0 %vm275_vm0, %v13467_v0  ;;  %v13498_v0 = vld [vmem:[%s23962_s0 + $0x2aa] sm:$0xff] }
  0xb0   :  { %15781 = vmatmul.mubr.msk.f32.gmra.mrb[84].mxu1 %vm275_vm0, %v229_v1  ;;  %v260_v1 = vld [vmem:[%s23962_s0 + $0x601] sm:$0xff] }
  0xb1   :  { %16665 = vmatmul.mubr.msk.f32.gmra.mrb[20].mxu0 %vm275_vm0, %v13468_v2  ;;  %15783 = vmatprep.mubr.msk.f32.mxu1 %vm275_vm0, %v230_v3  ;;  %v13499_v2 = vld [vmem:[%s23962_s0 + $0x2ba] sm:$0xff]  ;;  %v261_v3 = vld [vmem:[%s23962_s0 + $0x609] sm:$0xff] }
  0xb2   :  { %16667 = vmatprep.mubr.msk.f32.mxu0 %vm275_vm0, %v13469_v4  ;;  %v13500_v4 = vld [vmem:[%s23962_s0 + $0x2c2] sm:$0xff] }
  0xb4   :  { %15784 = vmatmul.mubr.msk.f32.gmra.mrb[86].mxu1 %vm275_vm0, %v231_v5  ;;  %v262_v5 = vld [vmem:[%s23962_s0 + $0x619] sm:$0xff] }
  0xb5   :  { %16668 = vmatmul.mubr.msk.f32.gmra.mrb[22].mxu0 %vm275_vm0, %v13470_v6  ;;  %15786 = vmatprep.mubr.msk.f32.mxu1 %vm275_vm0, %v232_v8  ;;  %v13501_v6 = vld [vmem:[%s23962_s0 + $0x2d2] sm:$0xff]  ;;  %v263_v8 = vld [vmem:[%s23962_s0 + $0x621] sm:$0xff] }
  0xb6   :  { %16670 = vmatprep.mubr.msk.f32.mxu0 %vm275_vm0, %v13471_v9  ;;  %v13502_v9 = vld [vmem:[%s23962_s0 + $0x2da] sm:$0xff] }
  0xb8   :  { %15787 = vmatmul.mubr.msk.f32.gmra.mrb[88].mxu1 %vm275_vm0, %v233_v10  ;;  %v264_v10 = vld [vmem:[%s23962_s0 + $0x631] sm:$0xff] }
  0xb9   :  { %16671 = vmatmul.mubr.msk.f32.gmra.mrb[24].mxu0 %vm275_vm0, %v13472_v11  ;;  %15789 = vmatprep.mubr.msk.f32.mxu1 %vm275_vm0, %v234_v12  ;;  %v13503_v11 = vld [vmem:[%s23962_s0 + $0x2ea] sm:$0xff]  ;;  %v265_v12 = vld [vmem:[%s23962_s0 + $0x639] sm:$0xff] }
  0xba   :  { %16673 = vmatprep.mubr.msk.f32.mxu0 %vm275_vm0, %v13473_v13  ;;  %v13504_v13 = vld [vmem:[%s23962_s0 + $0x2f2] sm:$0xff] }
  0xbc   :  { %15790 = vmatmul.mubr.msk.f32.gmra.mrb[90].mxu1 %vm275_vm0, %v235_v14  ;;  %v266_v14 = vld [vmem:[%s23962_s0 + $0x649] sm:$0xff] }
  0xbd   :  { %16674 = vmatmul.mubr.msk.f32.gmra.mrb[26].mxu0 %vm275_vm0, %v13474_v15  ;;  %15792 = vmatprep.mubr.msk.f32.mxu1 %vm275_vm0, %v236_v16  ;;  %v13505_v15 = vld [vmem:[%s23962_s0 + $0x302] sm:$0xff]  ;;  %v267_v16 = vld [vmem:[%s23962_s0 + $0x651] sm:$0xff] }
  0xbe   :  { %16676 = vmatprep.mubr.msk.f32.mxu0 %vm275_vm0, %v13475_v17  ;;  %v13506_v17 = vld [vmem:[%s23962_s0 + $0x30a] sm:$0xff] }
  0xc0   :  { %15793 = vmatmul.mubr.msk.f32.gmra.mrb[92].mxu1 %vm275_vm0, %v237_v18  ;;  %v268_v18 = vld [vmem:[%s23962_s0 + $0x661] sm:$0xff] }
  0xc1   :  { %16677 = vmatmul.mubr.msk.f32.gmra.mrb[28].mxu0 %vm275_vm0, %v13476_v19  ;;  %15795 = vmatprep.mubr.msk.f32.mxu1 %vm275_vm0, %v238_v20  ;;  %v13507_v19 = vld [vmem:[%s23962_s0 + $0x31a] sm:$0xff]  ;;  %v269_v20 = vld [vmem:[%s23962_s0 + $0x669] sm:$0xff] }
  0xc2   :  { %16679 = vmatprep.mubr.msk.f32.mxu0 %vm275_vm0, %v13477_v21  ;;  %v13508_v21 = vld [vmem:[%s23962_s0 + $0x322] sm:$0xff] }
  0xc4   :  { %15796 = vmatmul.mubr.msk.f32.gmra.mrb[94].mxu1 %vm275_vm0, %v239_v22  ;;  %v270_v22 = vld [vmem:[%s23962_s0 + $0x679] sm:$0xff] }
  0xc5   :  { %16680 = vmatmul.mubr.msk.f32.gmra.mrb[30].mxu0 %vm275_vm0, %v13478_v23  ;;  %15798 = vmatprep.mubr.msk.f32.mxu1 %vm275_vm0, %v240_v24  ;;  %v13509_v23 = vld [vmem:[%s23962_s0 + $0x332] sm:$0xff]  ;;  %v271_v24 = vld [vmem:[%s23962_s0 + $0x681] sm:$0xff] }
  0xc6   :  { %16682 = vmatprep.mubr.msk.f32.mxu0 %vm275_vm0, %v13479_v25  ;;  %v13510_v25 = vld [vmem:[%s23962_s0 + $0x33a] sm:$0xff] }
  0xc8   :  { %15799 = vmatmul.mubr.msk.f32.gmra.mrb[96].mxu1 %vm275_vm0, %v241_v26  ;;  %v14_v26 = vld [vmem:[%s23962_s0] sm:$0xff] }
  0xc9   :  { %16683 = vmatmul.mubr.msk.f32.gmra.mrb[32].mxu0 %vm275_vm0, %v13480_v27  ;;  %15801 = vmatprep.mubr.msk.f32.mxu1 %vm275_vm0, %v242_v28  ;;  %v13511_v27 = vld [vmem:[%s23962_s0 + $0x37a] sm:$0xff]  ;;  %v15_v28 = vld [vmem:[%s23962_s0 + $0x8] sm:$0xff] }
  0xca   :  { %16685 = vmatprep.mubr.msk.f32.mxu0 %vm275_vm0, %v13481_v31  ;;  %v13512_v31 = vld [vmem:[%s23962_s0 + $0x382] sm:$0xff] }
  0xcc   :  { %15802 = vmatmul.mubr.msk.f32.gmra.mrb[98].mxu1 %vm275_vm0, %v243_v32  ;;  %v16_v32 = vld [vmem:[%s23962_s0 + $0x18] sm:$0xff] }
  0xcd   :  { %16686 = vmatmul.mubr.msk.f32.gmra.mrb[34].mxu0 %vm275_vm0, %v13482_v33  ;;  %15804 = vmatprep.mubr.msk.f32.mxu1 %vm275_vm0, %v244_v29  ;;  %v13513_v33 = vld [vmem:[%s23962_s0 + $0x392] sm:$0xff]  ;;  %v17_v29 = vld [vmem:[%s23962_s0 + $0x20] sm:$0xff] }
  0xce   :  { %16688 = vmatprep.mubr.msk.f32.mxu0 %vm275_vm0, %v13483_v34  ;;  %v14091_v34 = vld [vmem:[%s23961_s1 + $0x70] sm:$0xff] }
  0xd0   :  { %15805 = vmatmul.mubr.msk.f32.gmra.mrb[100].mxu1 %vm275_vm0, %v245_v35  ;;  %v14092_v35 = vld [vmem:[%s23961_s1 + $0x78] sm:$0xff] }
  0xd1   :  { %16689 = vmatmul.mubr.msk.f32.gmra.mrb[36].mxu0 %vm275_vm0, %v13484_v36  ;;  %15807 = vmatprep.mubr.msk.f32.mxu1 %vm275_vm0, %v246_v37  ;;  %v19429_v36 = vld [vmem:[%s23962_s0 + $0x30] sm:$0xff]  ;;  %v19431_v37 = vpack.c.bf16 %v14092_v35, %v14091_v34  ;;  %v48_v35 = vld [vmem:[%s23962_s0 + $0x1c8] sm:$0xff] }
  0xd2   :  { %16691 = vmatprep.mubr.msk.f32.mxu0 %vm275_vm0, %v13485_v38  ;;  %v13515_v38 = vld [vmem:[%s23962_s0 + $0x3aa] sm:$0xff]  ;;  %v13544_v34 = vld [vmem:[%s23962_s0 + $0x532] sm:$0xff] }
  0xd3   :  { %17443 = vmatprep.subr.bf16.mxu0 %v19431_v37 }
  0xd4   :  { %15808 = vmatmul.mubr.msk.f32.gmra.mrb[102].mxu1 %vm275_vm0, %v247_v39  ;;  %v19444_v39 = vld [vmem:[%s23962_s0 + $0x38] sm:$0xff] }
  0xd5   :  { %16692 = vmatmul.mubr.msk.f32.gmra.mrb[38].mxu0 %vm275_vm0, %v13486_v40  ;;  %15810 = vmatprep.mubr.msk.f32.mxu1 %vm275_vm0, %v248_v41  ;;  %v13516_v40 = vld [vmem:[%s23962_s0 + $0x3b2] sm:$0xff]  ;;  %v19453_v41 = vld [vmem:[%s23962_s0 + $0x48] sm:$0xff] }
  0xd6   :  { %16694 = vmatprep.mubr.msk.f32.mxu0 %vm275_vm0, %v13487_v42  ;;  %v13517_v42 = vld [vmem:[%s23962_s0 + $0x3c2] sm:$0xff] }
  0xd8   :  { %15811 = vmatmul.mubr.msk.f32.gmra.mrb[104].mxu1 %vm275_vm0, %v249_v43  ;;  %v19466_v43 = vld [vmem:[%s23962_s0 + $0x50] sm:$0xff] }
  0xd9   :  { %16695 = vmatmul.mubr.msk.f32.gmra.mrb[40].mxu0 %vm275_vm0, %v13488_v44  ;;  %15813 = vmatprep.mubr.msk.f32.mxu1 %vm275_vm0, %v250_v45  ;;  %v13518_v44 = vld [vmem:[%s23962_s0 + $0x3ca] sm:$0xff]  ;;  %v19475_v45 = vld [vmem:[%s23962_s0 + $0x60] sm:$0xff] }
  0xda   :  { %16697 = vmatprep.mubr.msk.f32.mxu0 %vm275_vm0, %v13489_v46  ;;  %v13519_v46 = vld [vmem:[%s23962_s0 + $0x3da] sm:$0xff] }
  0xdc   :  { %15814 = vmatmul.mubr.msk.f32.gmra.mrb[106].mxu1 %vm275_vm0, %v251_v47  ;;  %v19488_v47 = vld [vmem:[%s23962_s0 + $0x68] sm:$0xff] }
  0xdd   :  { %16698 = vmatmul.mubr.msk.f32.gmra.mrb[42].mxu0 %vm275_vm0, %v13490_v48  ;;  %15816 = vmatprep.mubr.msk.f32.mxu1 %vm275_vm0, %v252_v49  ;;  %v13520_v48 = vld [vmem:[%s23962_s0 + $0x3e2] sm:$0xff]  ;;  %v19497_v49 = vld [vmem:[%s23962_s0 + $0x78] sm:$0xff] }
  0xde   :  { %16700 = vmatprep.mubr.msk.f32.mxu0 %vm275_vm0, %v13491_v50  ;;  %v13521_v50 = vld [vmem:[%s23962_s0 + $0x3f2] sm:$0xff] }
  0xe0   :  { %15817 = vmatmul.mubr.msk.f32.gmra.mrb[108].mxu1 %vm275_vm0, %v253_v51  ;;  %v19510_v51 = vld [vmem:[%s23962_s0 + $0x80] sm:$0xff] }
  0xe1   :  { %16701 = vmatmul.mubr.msk.f32.gmra.mrb[44].mxu0 %vm275_vm0, %v13492_v52  ;;  %15819 = vmatprep.mubr.msk.f32.mxu1 %vm275_vm0, %v254_v53  ;;  %v13522_v52 = vld [vmem:[%s23962_s0 + $0x3fa] sm:$0xff]  ;;  %v19519_v53 = vld [vmem:[%s23962_s0 + $0x90] sm:$0xff] }
  0xe2   :  { %16703 = vmatprep.mubr.msk.f32.mxu0 %vm275_vm0, %v13493_v54  ;;  %v13523_v54 = vld [vmem:[%s23962_s0 + $0x40a] sm:$0xff] }
  0xe4   :  { %15820 = vmatmul.mubr.msk.f32.gmra.mrb[110].mxu1 %vm275_vm0, %v255_v55  ;;  %v19532_v55 = vld [vmem:[%s23962_s0 + $0x98] sm:$0xff] }
  0xe5   :  { %16704 = vmatmul.mubr.msk.f32.gmra.mrb[46].mxu0 %vm275_vm0, %v13494_v56  ;;  %15822 = vmatprep.mubr.msk.f32.mxu1 %vm275_vm0, %v256_v57  ;;  %v13524_v56 = vld [vmem:[%s23962_s0 + $0x412] sm:$0xff]  ;;  %v19541_v57 = vld [vmem:[%s23962_s0 + $0xa8] sm:$0xff] }
  0xe6   :  { %16706 = vmatprep.mubr.msk.f32.mxu0 %vm275_vm0, %v13495_v58  ;;  %v13525_v58 = vld [vmem:[%s23962_s0 + $0x422] sm:$0xff] }
  0xe8   :  { %15823 = vmatmul.mubr.msk.f32.gmra.mrb[112].mxu1 %vm275_vm0, %v257_v59  ;;  %v19554_v59 = vld [vmem:[%s23962_s0 + $0xb0] sm:$0xff] }
  0xe9   :  { %16707 = vmatmul.mubr.msk.f32.gmra.mrb[48].mxu0 %vm275_vm0, %v13496_v60  ;;  %15825 = vmatprep.mubr.msk.f32.mxu1 %vm275_vm0, %v258_v61  ;;  %v13526_v60 = vld [vmem:[%s23962_s0 + $0x42a] sm:$0xff]  ;;  %v19563_v61 = vld [vmem:[%s23962_s0 + $0xc0] sm:$0xff] }
  0xea   :  { %16709 = vmatprep.mubr.msk.f32.mxu0 %vm275_vm0, %v13497_v62  ;;  %v13527_v62 = vld [vmem:[%s23962_s0 + $0x43a] sm:$0xff] }
  0xec   :  { %15826 = vmatmul.mubr.msk.f32.gmra.mrb[114].mxu1 %vm275_vm0, %v259_v63  ;;  %v19576_v63 = vld [vmem:[%s23962_s0 + $0xc8] sm:$0xff] }
  0xed   :  { %16710 = vmatmul.mubr.msk.f32.gmra.mrb[50].mxu0 %vm275_vm0, %v13498_v0  ;;  %15828 = vmatprep.mubr.msk.f32.mxu1 %vm275_vm0, %v260_v1  ;;  %v13528_v0 = vld [vmem:[%s23962_s0 + $0x442] sm:$0xff]  ;;  %v19585_v1 = vld [vmem:[%s23962_s0 + $0xd8] sm:$0xff] }
  0xee   :  { %16712 = vmatprep.mubr.msk.f32.mxu0 %vm275_vm0, %v13499_v2  ;;  %v13529_v2 = vld [vmem:[%s23962_s0 + $0x452] sm:$0xff] }
  0xf0   :  { %15829 = vmatmul.mubr.msk.f32.gmra.mrb[116].mxu1 %vm275_vm0, %v261_v3  ;;  %v19598_v3 = vld [vmem:[%s23962_s0 + $0xe0] sm:$0xff] }
  0xf1   :  { %16713 = vmatmul.mubr.msk.f32.gmra.mrb[52].mxu0 %vm275_vm0, %v13500_v4  ;;  %15831 = vmatprep.mubr.msk.f32.mxu1 %vm275_vm0, %v262_v5  ;;  %v13530_v4 = vld [vmem:[%s23962_s0 + $0x45a] sm:$0xff]  ;;  %v19607_v5 = vld [vmem:[%s23962_s0 + $0xf0] sm:$0xff] }
  0xf2   :  { %16715 = vmatprep.mubr.msk.f32.mxu0 %vm275_vm0, %v13501_v6  ;;  %v13531_v6 = vld [vmem:[%s23962_s0 + $0x46a] sm:$0xff] }
  0xf4   :  { %15832 = vmatmul.mubr.msk.f32.gmra.mrb[118].mxu1 %vm275_vm0, %v263_v8  ;;  %v19620_v8 = vld [vmem:[%s23962_s0 + $0xf8] sm:$0xff] }
  0xf5   :  { %16716 = vmatmul.mubr.msk.f32.gmra.mrb[54].mxu0 %vm275_vm0, %v13502_v9  ;;  %15834 = vmatprep.mubr.msk.f32.mxu1 %vm275_vm0, %v264_v10  ;;  %v13532_v9 = vld [vmem:[%s23962_s0 + $0x472] sm:$0xff]  ;;  %v19629_v10 = vld [vmem:[%s23962_s0 + $0x108] sm:$0xff] }
  0xf6   :  { %16718 = vmatprep.mubr.msk.f32.mxu0 %vm275_vm0, %v13503_v11  ;;  %v13533_v11 = vld [vmem:[%s23962_s0 + $0x482] sm:$0xff] }
  0xf8   :  { %15835 = vmatmul.mubr.msk.f32.gmra.mrb[120].mxu1 %vm275_vm0, %v265_v12  ;;  %v19642_v12 = vld [vmem:[%s23962_s0 + $0x110] sm:$0xff] }
  0xf9   :  { %16719 = vmatmul.mubr.msk.f32.gmra.mrb[56].mxu0 %vm275_vm0, %v13504_v13  ;;  %15837 = vmatprep.mubr.msk.f32.mxu1 %vm275_vm0, %v266_v14  ;;  %v13534_v13 = vld [vmem:[%s23962_s0 + $0x48a] sm:$0xff]  ;;  %v19651_v14 = vld [vmem:[%s23962_s0 + $0x120] sm:$0xff] }
  0xfa   :  { %16721 = vmatprep.mubr.msk.f32.mxu0 %vm275_vm0, %v13505_v15  ;;  %v13535_v15 = vld [vmem:[%s23962_s0 + $0x49a] sm:$0xff] }
  0xfc   :  { %15838 = vmatmul.mubr.msk.f32.gmra.mrb[122].mxu1 %vm275_vm0, %v267_v16  ;;  %v19664_v16 = vld [vmem:[%s23962_s0 + $0x128] sm:$0xff] }
  0xfd   :  { %16722 = vmatmul.mubr.msk.f32.gmra.mrb[58].mxu0 %vm275_vm0, %v13506_v17  ;;  %15840 = vmatprep.mubr.msk.f32.mxu1 %vm275_vm0, %v268_v18  ;;  %v13536_v17 = vld [vmem:[%s23962_s0 + $0x4a2] sm:$0xff]  ;;  %v19673_v18 = vld [vmem:[%s23962_s0 + $0x138] sm:$0xff] }
  0xfe   :  { %16724 = vmatprep.mubr.msk.f32.mxu0 %vm275_vm0, %v13507_v19  ;;  %v13537_v19 = vld [vmem:[%s23962_s0 + $0x4b2] sm:$0xff] }
 0x100   :  { %15841 = vmatmul.mubr.msk.f32.gmra.mrb[124].mxu1 %vm275_vm0, %v269_v20  ;;  %v19686_v20 = vld [vmem:[%s23962_s0 + $0x140] sm:$0xff] }
 0x101   :  { %16725 = vmatmul.mubr.msk.f32.gmra.mrb[60].mxu0 %vm275_vm0, %v13508_v21  ;;  %15843 = vmatprep.mubr.msk.f32.mxu1 %vm275_vm0, %v270_v22  ;;  %v13538_v21 = vld [vmem:[%s23962_s0 + $0x4ba] sm:$0xff]  ;;  %v19695_v22 = vld [vmem:[%s23962_s0 + $0x150] sm:$0xff] }
 0x102   :  { %16727 = vmatprep.mubr.msk.f32.mxu0 %vm275_vm0, %v13509_v23  ;;  %v13539_v23 = vld [vmem:[%s23962_s0 + $0x4ca] sm:$0xff] }
 0x104   :  { %15844 = vmatmul.mubr.msk.f32.gmra.mrb[126].mxu1 %vm275_vm0, %v271_v24  ;;  %v19708_v24 = vld [vmem:[%s23962_s0 + $0x158] sm:$0xff] }
 0x105   :  { %16728 = vmatmul.mubr.msk.f32.gmra.mrb[62].mxu0 %vm275_vm0, %v13510_v25  ;;  %15850 = vmatprep.mubr.msk.f32.mxu1 %vm275_vm0, %v14_v26  ;;  %v13540_v25 = vld [vmem:[%s23962_s0 + $0x4d2] sm:$0xff]  ;;  %v19717_v26 = vld [vmem:[%s23962_s0 + $0x168] sm:$0xff] }
 0x106   :  { %16730 = vmatprep.mubr.msk.f32.mxu0 %vm275_vm0, %v13511_v27  ;;  %v13541_v27 = vld [vmem:[%s23962_s0 + $0x4e2] sm:$0xff] }
 0x108   :  { %15851 = vmatmul.mubr.msk.f32.vlgmr.msra.gmra.mrb[0].mxu1 %vm275_vm0, %v15_v28  ;;  %v19730_v28 = vld [vmem:[%s23962_s0 + $0x170] sm:$0xff] }
 0x109   :  { %16731 = vmatmul.mubr.msk.f32.gmra.mrb[64].mxu0 %vm275_vm0, %v13512_v31  ;;  %17425 = vmatpush3.bf16.msra.mxu1 %v18899_v30  ;;  %v13514_v30 = vld [vmem:[%s23962_s0 + $0x39a] sm:$0xff]  ;;  %v13542_v31 = vld [vmem:[%s23962_s0 + $0x4ea] sm:$0xff] }
 0x10a   :  { %15853 = vmatprep.mubr.msk.f32.mxu1 %vm275_vm0, %v16_v32  ;;  %16733 = vmatprep.mubr.msk.f32.mxu0 %vm275_vm0, %v13513_v33  ;;  %v46_v32 = vld [vmem:[%s23962_s0 + $0x1b0] sm:$0xff] }
 0x10b   :  { %v13543_v33 = vld [vmem:[%s23962_s0 + $0x52a] sm:$0xff] }
 0x10c   :  { %15854 = vmatmul.mubr.msk.f32.gmra.mrb[2].mxu1 %vm275_vm0, %v17_v29  ;;  %v47_v29 = vld [vmem:[%s23962_s0 + $0x1b8] sm:$0xff] }
 0x10d   :  { %16734 = vmatmul.mubr.msk.f32.gmra.mrb[66].mxu0 %vm275_vm0, %v13514_v30  ;;  %15856 = vmatprep.mubr.msk.f32.mxu1 %vm275_vm0, %v19429_v36  ;;  %v13545_v30 = vld [vmem:[%s23962_s0 + $0x542] sm:$0xff] }
 0x10e   :  { %16736 = vmatprep.mubr.msk.f32.mxu0 %vm275_vm0, %v13515_v38  ;;  %v49_v38 = vld [vmem:[%s23962_s0 + $0x1d0] sm:$0xff] }
 0x110   :  { %15857 = vmatmul.mubr.msk.f32.gmra.mrb[4].mxu1 %vm275_vm0, %v19444_v39 }
 0x111   :  { %16737 = vmatmul.mubr.msk.f32.gmra.mrb[68].mxu0 %vm275_vm0, %v13516_v40  ;;  %15859 = vmatprep.mubr.msk.f32.mxu1 %vm275_vm0, %v19453_v41  ;;  %v13546_v40 = vld [vmem:[%s23962_s0 + $0x54a] sm:$0xff] }
 0x112   :  { %16739 = vmatprep.mubr.msk.f32.mxu0 %vm275_vm0, %v13517_v42  ;;  %v19772_v42 = vld [vmem:[%s23962_s0 + $0x1e0] sm:$0xff] }
 0x114   :  { %15860 = vmatmul.mubr.msk.f32.gmra.mrb[6].mxu1 %vm275_vm0, %v19466_v43 }
 0x115   :  { %16740 = vmatmul.mubr.msk.f32.gmra.mrb[70].mxu0 %vm275_vm0, %v13518_v44  ;;  %15862 = vmatprep.mubr.msk.f32.mxu1 %vm275_vm0, %v19475_v45  ;;  %v13547_v44 = vld [vmem:[%s23962_s0 + $0x55a] sm:$0xff] }
 0x116   :  { %16742 = vmatprep.mubr.msk.f32.mxu0 %vm275_vm0, %v13519_v46  ;;  %v19784_v46 = vld [vmem:[%s23962_s0 + $0x1e8] sm:$0xff] }
 0x118   :  { %15863 = vmatmul.mubr.msk.f32.gmra.mrb[8].mxu1 %vm275_vm0, %v19488_v47 }
 0x119   :  { %16743 = vmatmul.mubr.msk.f32.gmra.mrb[72].mxu0 %vm275_vm0, %v13520_v48  ;;  %15865 = vmatprep.mubr.msk.f32.mxu1 %vm275_vm0, %v19497_v49  ;;  %v13548_v48 = vld [vmem:[%s23962_s0 + $0x562] sm:$0xff] }
 0x11a   :  { %16745 = vmatprep.mubr.msk.f32.mxu0 %vm275_vm0, %v13521_v50  ;;  %v19793_v50 = vld [vmem:[%s23962_s0 + $0x1f8] sm:$0xff] }
 0x11c   :  { %15866 = vmatmul.mubr.msk.f32.gmra.mrb[10].mxu1 %vm275_vm0, %v19510_v51 }
 0x11d   :  { %16746 = vmatmul.mubr.msk.f32.gmra.mrb[74].mxu0 %vm275_vm0, %v13522_v52  ;;  %15868 = vmatprep.mubr.msk.f32.mxu1 %vm275_vm0, %v19519_v53  ;;  %v13549_v52 = vld [vmem:[%s23962_s0 + $0x572] sm:$0xff] }
 0x11e   :  { %16748 = vmatprep.mubr.msk.f32.mxu0 %vm275_vm0, %v13523_v54  ;;  %v19806_v54 = vld [vmem:[%s23962_s0 + $0x200] sm:$0xff] }
 0x120   :  { %15869 = vmatmul.mubr.msk.f32.gmra.mrb[12].mxu1 %vm275_vm0, %v19532_v55 }
 0x121   :  { %16749 = vmatmul.mubr.msk.f32.gmra.mrb[76].mxu0 %vm275_vm0, %v13524_v56  ;;  %15871 = vmatprep.mubr.msk.f32.mxu1 %vm275_vm0, %v19541_v57  ;;  %v13550_v56 = vld [vmem:[%s23962_s0 + $0x57a] sm:$0xff] }
 0x122   :  { %16751 = vmatprep.mubr.msk.f32.mxu0 %vm275_vm0, %v13525_v58  ;;  %v19815_v58 = vld [vmem:[%s23962_s0 + $0x210] sm:$0xff] }
 0x124   :  { %15872 = vmatmul.mubr.msk.f32.gmra.mrb[14].mxu1 %vm275_vm0, %v19554_v59 }
 0x125   :  { %16752 = vmatmul.mubr.msk.f32.gmra.mrb[78].mxu0 %vm275_vm0, %v13526_v60  ;;  %15874 = vmatprep.mubr.msk.f32.mxu1 %vm275_vm0, %v19563_v61  ;;  %v13551_v60 = vld [vmem:[%s23962_s0 + $0x58a] sm:$0xff] }
 0x126   :  { %16754 = vmatprep.mubr.msk.f32.mxu0 %vm275_vm0, %v13527_v62  ;;  %v19828_v62 = vld [vmem:[%s23962_s0 + $0x218] sm:$0xff] }
 0x128   :  { %15875 = vmatmul.mubr.msk.f32.gmra.mrb[16].mxu1 %vm275_vm0, %v19576_v63 }
 0x129   :  { %16755 = vmatmul.mubr.msk.f32.gmra.mrb[80].mxu0 %vm275_vm0, %v13528_v0  ;;  %15877 = vmatprep.mubr.msk.f32.mxu1 %vm275_vm0, %v19585_v1  ;;  %v13552_v0 = vld [vmem:[%s23962_s0 + $0x592] sm:$0xff] }
 0x12a   :  { %16757 = vmatprep.mubr.msk.f32.mxu0 %vm275_vm0, %v13529_v2  ;;  %v19837_v2 = vld [vmem:[%s23962_s0 + $0x228] sm:$0xff] }
 0x12c   :  { %15878 = vmatmul.mubr.msk.f32.gmra.mrb[18].mxu1 %vm275_vm0, %v19598_v3 }
 0x12d   :  { %16758 = vmatmul.mubr.msk.f32.gmra.mrb[82].mxu0 %vm275_vm0, %v13530_v4  ;;  %15880 = vmatprep.mubr.msk.f32.mxu1 %vm275_vm0, %v19607_v5  ;;  %v13553_v4 = vld [vmem:[%s23962_s0 + $0x5a2] sm:$0xff] }
 0x12e   :  { %16760 = vmatprep.mubr.msk.f32.mxu0 %vm275_vm0, %v13531_v6  ;;  %v19850_v6 = vld [vmem:[%s23962_s0 + $0x230] sm:$0xff] }
 0x130   :  { %15881 = vmatmul.mubr.msk.f32.gmra.mrb[20].mxu1 %vm275_vm0, %v19620_v8 }
 0x131   :  { %16761 = vmatmul.mubr.msk.f32.gmra.mrb[84].mxu0 %vm275_vm0, %v13532_v9  ;;  %15883 = vmatprep.mubr.msk.f32.mxu1 %vm275_vm0, %v19629_v10  ;;  %v13554_v9 = vld [vmem:[%s23962_s0 + $0x5aa] sm:$0xff] }
 0x132   :  { %16763 = vmatprep.mubr.msk.f32.mxu0 %vm275_vm0, %v13533_v11  ;;  %v19859_v11 = vld [vmem:[%s23962_s0 + $0x240] sm:$0xff] }
 0x134   :  { %15884 = vmatmul.mubr.msk.f32.gmra.mrb[22].mxu1 %vm275_vm0, %v19642_v12 }
 0x135   :  { %16764 = vmatmul.mubr.msk.f32.gmra.mrb[86].mxu0 %vm275_vm0, %v13534_v13  ;;  %15886 = vmatprep.mubr.msk.f32.mxu1 %vm275_vm0, %v19651_v14  ;;  %v13555_v13 = vld [vmem:[%s23962_s0 + $0x5ba] sm:$0xff] }
 0x136   :  { %16766 = vmatprep.mubr.msk.f32.mxu0 %vm275_vm0, %v13535_v15  ;;  %v19872_v15 = vld [vmem:[%s23962_s0 + $0x248] sm:$0xff] }
 0x138   :  { %15887 = vmatmul.mubr.msk.f32.gmra.mrb[24].mxu1 %vm275_vm0, %v19664_v16 }
 0x139   :  { %16767 = vmatmul.mubr.msk.f32.gmra.mrb[88].mxu0 %vm275_vm0, %v13536_v17  ;;  %15889 = vmatprep.mubr.msk.f32.mxu1 %vm275_vm0, %v19673_v18  ;;  %v13556_v17 = vld [vmem:[%s23962_s0 + $0x5c2] sm:$0xff] }
 0x13a   :  { %16769 = vmatprep.mubr.msk.f32.mxu0 %vm275_vm0, %v13537_v19  ;;  %v19881_v19 = vld [vmem:[%s23962_s0 + $0x258] sm:$0xff] }
 0x13c   :  { %15890 = vmatmul.mubr.msk.f32.gmra.mrb[26].mxu1 %vm275_vm0, %v19686_v20 }
 0x13d   :  { %16770 = vmatmul.mubr.msk.f32.gmra.mrb[90].mxu0 %vm275_vm0, %v13538_v21  ;;  %15892 = vmatprep.mubr.msk.f32.mxu1 %vm275_vm0, %v19695_v22  ;;  %v13557_v21 = vld [vmem:[%s23962_s0 + $0x5d2] sm:$0xff] }
 0x13e   :  { %16772 = vmatprep.mubr.msk.f32.mxu0 %vm275_vm0, %v13539_v23  ;;  %v19894_v23 = vld [vmem:[%s23962_s0 + $0x260] sm:$0xff] }
 0x140   :  { %15893 = vmatmul.mubr.msk.f32.gmra.mrb[28].mxu1 %vm275_vm0, %v19708_v24 }
 0x141   :  { %16773 = vmatmul.mubr.msk.f32.gmra.mrb[92].mxu0 %vm275_vm0, %v13540_v25  ;;  %15895 = vmatprep.mubr.msk.f32.mxu1 %vm275_vm0, %v19717_v26  ;;  %v13558_v25 = vld [vmem:[%s23962_s0 + $0x5da] sm:$0xff] }
 0x142   :  { %16775 = vmatprep.mubr.msk.f32.mxu0 %vm275_vm0, %v13541_v27  ;;  %v19903_v27 = vld [vmem:[%s23962_s0 + $0x270] sm:$0xff] }
 0x144   :  { %15896 = vmatmul.mubr.msk.f32.gmra.mrb[30].mxu1 %vm275_vm0, %v19730_v28 }
 0x145   :  { %16776 = vmatmul.mubr.msk.f32.gmra.mrb[94].mxu0 %vm275_vm0, %v13542_v31  ;;  %15898 = vmatprep.mubr.msk.f32.mxu1 %vm275_vm0, %v46_v32  ;;  %v13559_v31 = vld [vmem:[%s23962_s0 + $0x5ea] sm:$0xff]  ;;  %v19916_v32 = vld [vmem:[%s23962_s0 + $0x278] sm:$0xff] }
 0x146   :  { %16778 = vmatprep.mubr.msk.f32.mxu0 %vm275_vm0, %v13543_v33  ;;  %v13560_v33 = vld [vmem:[%s23962_s0 + $0x5f2] sm:$0xff] }
 0x148   :  { %15899 = vmatmul.mubr.msk.f32.gmra.mrb[32].mxu1 %vm275_vm0, %v47_v29  ;;  %v19925_v29 = vld [vmem:[%s23962_s0 + $0x288] sm:$0xff] }
 0x149   :  { %16779 = vmatmul.mubr.msk.f32.gmra.mrb[96].mxu0 %vm275_vm0, %v13544_v34  ;;  %15901 = vmatprep.mubr.msk.f32.mxu1 %vm275_vm0, %v48_v35  ;;  %v13561_v34 = vld [vmem:[%s23962_s0 + $0x602] sm:$0xff]  ;;  %v19938_v35 = vld [vmem:[%s23962_s0 + $0x290] sm:$0xff] }
 0x14a   :  { %16781 = vmatprep.mubr.msk.f32.mxu0 %vm275_vm0, %v13545_v30  ;;  %v13562_v30 = vld [vmem:[%s23962_s0 + $0x60a] sm:$0xff] }
 0x14c   :  { %15902 = vmatmul.mubr.msk.f32.gmra.mrb[34].mxu1 %vm275_vm0, %v49_v38  ;;  %v19947_v38 = vld [vmem:[%s23962_s0 + $0x2a0] sm:$0xff] }
 0x14d   :  { %16782 = vmatmul.mubr.msk.f32.gmra.mrb[98].mxu0 %vm275_vm0, %v13546_v40  ;;  %15904 = vmatprep.mubr.msk.f32.mxu1 %vm275_vm0, %v19772_v42  ;;  %v13563_v40 = vld [vmem:[%s23962_s0 + $0x61a] sm:$0xff] }
 0x14e   :  { %16784 = vmatprep.mubr.msk.f32.mxu0 %vm275_vm0, %v13547_v44  ;;  %v19960_v44 = vld [vmem:[%s23962_s0 + $0x2a8] sm:$0xff] }
 0x150   :  { %15905 = vmatmul.mubr.msk.f32.gmra.mrb[36].mxu1 %vm275_vm0, %v19784_v46 }
 0x151   :  { %16785 = vmatmul.mubr.msk.f32.gmra.mrb[100].mxu0 %vm275_vm0, %v13548_v48  ;;  %15907 = vmatprep.mubr.msk.f32.mxu1 %vm275_vm0, %v19793_v50  ;;  %v13564_v48 = vld [vmem:[%s23962_s0 + $0x622] sm:$0xff] }
 0x152   :  { %16787 = vmatprep.mubr.msk.f32.mxu0 %vm275_vm0, %v13549_v52  ;;  %v19969_v52 = vld [vmem:[%s23962_s0 + $0x2b8] sm:$0xff] }
 0x154   :  { %15908 = vmatmul.mubr.msk.f32.gmra.mrb[38].mxu1 %vm275_vm0, %v19806_v54 }
 0x155   :  { %16788 = vmatmul.mubr.msk.f32.gmra.mrb[102].mxu0 %vm275_vm0, %v13550_v56  ;;  %15910 = vmatprep.mubr.msk.f32.mxu1 %vm275_vm0, %v19815_v58  ;;  %v13565_v56 = vld [vmem:[%s23962_s0 + $0x632] sm:$0xff] }
 0x156   :  { %16790 = vmatprep.mubr.msk.f32.mxu0 %vm275_vm0, %v13551_v60  ;;  %v19982_v60 = vld [vmem:[%s23962_s0 + $0x2c0] sm:$0xff] }
 0x158   :  { %15911 = vmatmul.mubr.msk.f32.gmra.mrb[40].mxu1 %vm275_vm0, %v19828_v62 }
 0x159   :  { %16791 = vmatmul.mubr.msk.f32.gmra.mrb[104].mxu0 %vm275_vm0, %v13552_v0  ;;  %15913 = vmatprep.mubr.msk.f32.mxu1 %vm275_vm0, %v19837_v2  ;;  %v13566_v0 = vld [vmem:[%s23962_s0 + $0x63a] sm:$0xff] }
 0x15a   :  { %16793 = vmatprep.mubr.msk.f32.mxu0 %vm275_vm0, %v13553_v4  ;;  %v19991_v4 = vld [vmem:[%s23962_s0 + $0x2d0] sm:$0xff] }
 0x15c   :  { %15914 = vmatmul.mubr.msk.f32.gmra.mrb[42].mxu1 %vm275_vm0, %v19850_v6 }
 0x15d   :  { %16794 = vmatmul.mubr.msk.f32.gmra.mrb[106].mxu0 %vm275_vm0, %v13554_v9  ;;  %15916 = vmatprep.mubr.msk.f32.mxu1 %vm275_vm0, %v19859_v11  ;;  %v13567_v9 = vld [vmem:[%s23962_s0 + $0x64a] sm:$0xff] }
 0x15e   :  { %16796 = vmatprep.mubr.msk.f32.mxu0 %vm275_vm0, %v13555_v13  ;;  %v20004_v13 = vld [vmem:[%s23962_s0 + $0x2d8] sm:$0xff] }
 0x160   :  { %15917 = vmatmul.mubr.msk.f32.gmra.mrb[44].mxu1 %vm275_vm0, %v19872_v15 }
 0x161   :  { %16797 = vmatmul.mubr.msk.f32.gmra.mrb[108].mxu0 %vm275_vm0, %v13556_v17  ;;  %15919 = vmatprep.mubr.msk.f32.mxu1 %vm275_vm0, %v19881_v19  ;;  %v13568_v17 = vld [vmem:[%s23962_s0 + $0x652] sm:$0xff] }
 0x162   :  { %16799 = vmatprep.mubr.msk.f32.mxu0 %vm275_vm0, %v13557_v21  ;;  %v20013_v21 = vld [vmem:[%s23962_s0 + $0x2e8] sm:$0xff] }
 0x164   :  { %15920 = vmatmul.mubr.msk.f32.gmra.mrb[46].mxu1 %vm275_vm0, %v19894_v23 }
 0x165   :  { %16800 = vmatmul.mubr.msk.f32.gmra.mrb[110].mxu0 %vm275_vm0, %v13558_v25  ;;  %15922 = vmatprep.mubr.msk.f32.mxu1 %vm275_vm0, %v19903_v27  ;;  %v13569_v25 = vld [vmem:[%s23962_s0 + $0x662] sm:$0xff] }
 0x166   :  { %16802 = vmatprep.mubr.msk.f32.mxu0 %vm275_vm0, %v13559_v31  ;;  %v20026_v31 = vld [vmem:[%s23962_s0 + $0x2f0] sm:$0xff] }
 0x168   :  { %15923 = vmatmul.mubr.msk.f32.gmra.mrb[48].mxu1 %vm275_vm0, %v19916_v32 }
 0x169   :  { %16803 = vmatmul.mubr.msk.f32.gmra.mrb[112].mxu0 %vm275_vm0, %v13560_v33  ;;  %15925 = vmatprep.mubr.msk.f32.mxu1 %vm275_vm0, %v19925_v29  ;;  %v13570_v33 = vld [vmem:[%s23962_s0 + $0x66a] sm:$0xff] }
 0x16a   :  { %16805 = vmatprep.mubr.msk.f32.mxu0 %vm275_vm0, %v13561_v34  ;;  %v20035_v34 = vld [vmem:[%s23962_s0 + $0x300] sm:$0xff] }
 0x16c   :  { %15926 = vmatmul.mubr.msk.f32.gmra.mrb[50].mxu1 %vm275_vm0, %v19938_v35 }
 0x16d   :  { %16806 = vmatmul.mubr.msk.f32.gmra.mrb[114].mxu0 %vm275_vm0, %v13562_v30  ;;  %15928 = vmatprep.mubr.msk.f32.mxu1 %vm275_vm0, %v19947_v38  ;;  %v13571_v30 = vld [vmem:[%s23962_s0 + $0x67a] sm:$0xff] }
 0x16e   :  { %16808 = vmatprep.mubr.msk.f32.mxu0 %vm275_vm0, %v13563_v40  ;;  %v20048_v40 = vld [vmem:[%s23962_s0 + $0x308] sm:$0xff] }
 0x170   :  { %15929 = vmatmul.mubr.msk.f32.gmra.mrb[52].mxu1 %vm275_vm0, %v19960_v44 }
 0x171   :  { %16809 = vmatmul.mubr.msk.f32.gmra.mrb[116].mxu0 %vm275_vm0, %v13564_v48  ;;  %15931 = vmatprep.mubr.msk.f32.mxu1 %vm275_vm0, %v19969_v52  ;;  %v13572_v48 = vld [vmem:[%s23962_s0 + $0x682] sm:$0xff] }
 0x172   :  { %16811 = vmatprep.mubr.msk.f32.mxu0 %vm275_vm0, %v13565_v56  ;;  %v20057_v56 = vld [vmem:[%s23962_s0 + $0x318] sm:$0xff] }
 0x174   :  { %15932 = vmatmul.mubr.msk.f32.gmra.mrb[54].mxu1 %vm275_vm0, %v19982_v60 }
 0x175   :  { %16812 = vmatmul.mubr.msk.f32.gmra.mrb[118].mxu0 %vm275_vm0, %v13566_v0  ;;  %15934 = vmatprep.mubr.msk.f32.mxu1 %vm275_vm0, %v19991_v4  ;;  %v13573_v0 = vld [vmem:[%s23962_s0 + $0x692] sm:$0xff] }
 0x176   :  { %16814 = vmatprep.mubr.msk.f32.mxu0 %vm275_vm0, %v13567_v9  ;;  %v20070_v9 = vld [vmem:[%s23962_s0 + $0x320] sm:$0xff] }
 0x178   :  { %15935 = vmatmul.mubr.msk.f32.gmra.mrb[56].mxu1 %vm275_vm0, %v20004_v13 }
 0x179   :  { %16815 = vmatmul.mubr.msk.f32.gmra.mrb[120].mxu0 %vm275_vm0, %v13568_v17  ;;  %15937 = vmatprep.mubr.msk.f32.mxu1 %vm275_vm0, %v20013_v21  ;;  %v13574_v17 = vld [vmem:[%s23962_s0 + $0x69a] sm:$0xff] }
 0x17a   :  { %16817 = vmatprep.mubr.msk.f32.mxu0 %vm275_vm0, %v13569_v25  ;;  %v78_v25 = vld [vmem:[%s23962_s0 + $0x360] sm:$0xff] }
 0x17c   :  { %15938 = vmatmul.mubr.msk.f32.gmra.mrb[58].mxu1 %vm275_vm0, %v20026_v31 }
 0x17d   :  { %16818 = vmatmul.mubr.msk.f32.gmra.mrb[122].mxu0 %vm275_vm0, %v13570_v33  ;;  %15940 = vmatprep.mubr.msk.f32.mxu1 %vm275_vm0, %v20035_v34  ;;  %v79_v33 = vld [vmem:[%s23962_s0 + $0x368] sm:$0xff] }
 0x17e   :  { %16820 = vmatprep.mubr.msk.f32.mxu0 %vm275_vm0, %v13571_v30  ;;  %v80_v30 = vld [vmem:[%s23962_s0 + $0x378] sm:$0xff] }
 0x180   :  { %15941 = vmatmul.mubr.msk.f32.gmra.mrb[60].mxu1 %vm275_vm0, %v20048_v40 }
 0x181   :  { %16821 = vmatmul.mubr.msk.f32.gmra.mrb[124].mxu0 %vm275_vm0, %v13572_v48  ;;  %15943 = vmatprep.mubr.msk.f32.mxu1 %vm275_vm0, %v20057_v56  ;;  %v13059_v48 = vld [vmem:[%s23961_s1 + $0x30] sm:$0xff] }
 0x182   :  { %16823 = vmatprep.mubr.msk.f32.mxu0 %vm275_vm0, %v13573_v0  ;;  %v13060_v0 = vld [vmem:[%s23961_s1 + $0x38] sm:$0xff] }
 0x184   :  { %15944 = vmatmul.mubr.msk.f32.gmra.mrb[62].mxu1 %vm275_vm0, %v20070_v9 }
 0x185   :  { %16824 = vmatmul.mubr.msk.f32.gmra.mrb[126].mxu0 %vm275_vm0, %v13574_v17  ;;  %15946 = vmatprep.mubr.msk.f32.mxu1 %vm275_vm0, %v78_v25  ;;  %v20104_v17 = vpack.c.bf16 %v13060_v0, %v13059_v48  ;;  %v20112_v25 = vld [vmem:[%s23962_s0 + $0x390] sm:$0xff]  ;;  %v13736_v48 = vld [vmem:[%s23962_s0 + $0x1a0] sm:$0xff] }
 0x186   :  { %16830 = vmatprep.mubr.msk.f32.mxu0 %vm275_vm0, %v19429_v36  ;;  %v81_v36 = vld [vmem:[%s23962_s0 + $0x380] sm:$0xff]  ;;  %v110_v0 = vld [vmem:[%s23962_s0 + $0x510] sm:$0xff] }
 0x187   :  { %17427 = vmatprep.subr.bf16.mxu1 %v20104_v17 }
 0x188   :  { %15947 = vmatmul.mubr.msk.f32.gmra.mrb[64].mxu1 %vm275_vm0, %v79_v33  ;;  %v20351_v33 = vld [vmem:[%s23962_s0 + $0x4c8] sm:$0xff] }
 0x189   :  { %16831 = vmatmul.mubr.msk.f32.vlgmr.msra.gmra.mrb[0].mxu0 %vm275_vm0, %v19444_v39  ;;  %15949 = vmatprep.mubr.msk.f32.mxu1 %vm275_vm0, %v80_v30  ;;  %v20130_v39 = vld [vmem:[%s23962_s0 + $0x3a8] sm:$0xff]  ;;  %v20364_v30 = vld [vmem:[%s23962_s0 + $0x4d0] sm:$0xff] }
 0x18a   :  { %17445 = vmatpush3.bf16.msra.mxu0 %v19431_v37  ;;  %16833 = vmatprep.mubr.msk.f32.mxu0 %vm275_vm0, %v19453_v41  ;;  %v20123_v37 = vld [vmem:[%s23962_s0 + $0x398] sm:$0xff]  ;;  %v20141_v41 = vld [vmem:[%s23962_s0 + $0x3b0] sm:$0xff] }
 0x18c   :  { %15950 = vmatmul.mubr.msk.f32.gmra.mrb[66].mxu1 %vm275_vm0, %v81_v36  ;;  %v111_v36 = vld [vmem:[%s23962_s0 + $0x518] sm:$0xff] }
 0x18d   :  { %16834 = vmatmul.mubr.msk.f32.gmra.mrb[2].mxu0 %vm275_vm0, %v19466_v43  ;;  %15952 = vmatprep.mubr.msk.f32.mxu1 %vm275_vm0, %v20112_v25  ;;  %v20148_v43 = vld [vmem:[%s23962_s0 + $0x3c0] sm:$0xff] }
 0x18e   :  { %16836 = vmatprep.mubr.msk.f32.mxu0 %vm275_vm0, %v19475_v45  ;;  %v20159_v45 = vld [vmem:[%s23962_s0 + $0x3c8] sm:$0xff] }
 0x190   :  { %15953 = vmatmul.mubr.msk.f32.gmra.mrb[68].mxu1 %vm275_vm0, %v20123_v37 }
 0x191   :  { %16837 = vmatmul.mubr.msk.f32.gmra.mrb[4].mxu0 %vm275_vm0, %v19488_v47  ;;  %15955 = vmatprep.mubr.msk.f32.mxu1 %vm275_vm0, %v20130_v39  ;;  %v20166_v47 = vld [vmem:[%s23962_s0 + $0x3d8] sm:$0xff] }
 0x192   :  { %16839 = vmatprep.mubr.msk.f32.mxu0 %vm275_vm0, %v19497_v49  ;;  %v20177_v49 = vld [vmem:[%s23962_s0 + $0x3e0] sm:$0xff] }
 0x194   :  { %15956 = vmatmul.mubr.msk.f32.gmra.mrb[70].mxu1 %vm275_vm0, %v20141_v41 }
 0x195   :  { %16840 = vmatmul.mubr.msk.f32.gmra.mrb[6].mxu0 %vm275_vm0, %v19510_v51  ;;  %15958 = vmatprep.mubr.msk.f32.mxu1 %vm275_vm0, %v20148_v43  ;;  %v20184_v51 = vld [vmem:[%s23962_s0 + $0x3f0] sm:$0xff] }
 0x196   :  { %16842 = vmatprep.mubr.msk.f32.mxu0 %vm275_vm0, %v19519_v53  ;;  %v20195_v53 = vld [vmem:[%s23962_s0 + $0x3f8] sm:$0xff] }
 0x198   :  { %15959 = vmatmul.mubr.msk.f32.gmra.mrb[72].mxu1 %vm275_vm0, %v20159_v45 }
 0x199   :  { %16843 = vmatmul.mubr.msk.f32.gmra.mrb[8].mxu0 %vm275_vm0, %v19532_v55  ;;  %15961 = vmatprep.mubr.msk.f32.mxu1 %vm275_vm0, %v20166_v47  ;;  %v20202_v55 = vld [vmem:[%s23962_s0 + $0x408] sm:$0xff] }
 0x19a   :  { %16845 = vmatprep.mubr.msk.f32.mxu0 %vm275_vm0, %v19541_v57  ;;  %v20213_v57 = vld [vmem:[%s23962_s0 + $0x410] sm:$0xff] }
 0x19c   :  { %15962 = vmatmul.mubr.msk.f32.gmra.mrb[74].mxu1 %vm275_vm0, %v20177_v49 }
 0x19d   :  { %16846 = vmatmul.mubr.msk.f32.gmra.mrb[10].mxu0 %vm275_vm0, %v19554_v59  ;;  %15964 = vmatprep.mubr.msk.f32.mxu1 %vm275_vm0, %v20184_v51  ;;  %v20220_v59 = vld [vmem:[%s23962_s0 + $0x420] sm:$0xff] }
 0x19e   :  { %16848 = vmatprep.mubr.msk.f32.mxu0 %vm275_vm0, %v19563_v61  ;;  %v20231_v61 = vld [vmem:[%s23962_s0 + $0x428] sm:$0xff] }
 0x1a0   :  { %15965 = vmatmul.mubr.msk.f32.gmra.mrb[76].mxu1 %vm275_vm0, %v20195_v53 }
 0x1a1   :  { %16849 = vmatmul.mubr.msk.f32.gmra.mrb[12].mxu0 %vm275_vm0, %v19576_v63  ;;  %15967 = vmatprep.mubr.msk.f32.mxu1 %vm275_vm0, %v20202_v55  ;;  %v20238_v63 = vld [vmem:[%s23962_s0 + $0x438] sm:$0xff] }
 0x1a2   :  { %16851 = vmatprep.mubr.msk.f32.mxu0 %vm275_vm0, %v19585_v1  ;;  %v20249_v1 = vld [vmem:[%s23962_s0 + $0x440] sm:$0xff] }
 0x1a4   :  { %15968 = vmatmul.mubr.msk.f32.gmra.mrb[78].mxu1 %vm275_vm0, %v20213_v57 }
 0x1a5   :  { %16852 = vmatmul.mubr.msk.f32.gmra.mrb[14].mxu0 %vm275_vm0, %v19598_v3  ;;  %15970 = vmatprep.mubr.msk.f32.mxu1 %vm275_vm0, %v20220_v59  ;;  %v20256_v3 = vld [vmem:[%s23962_s0 + $0x450] sm:$0xff] }
 0x1a6   :  { %16854 = vmatprep.mubr.msk.f32.mxu0 %vm275_vm0, %v19607_v5  ;;  %v20267_v5 = vld [vmem:[%s23962_s0 + $0x458] sm:$0xff] }
 0x1a8   :  { %15971 = vmatmul.mubr.msk.f32.gmra.mrb[80].mxu1 %vm275_vm0, %v20231_v61 }
 0x1a9   :  { %16855 = vmatmul.mubr.msk.f32.gmra.mrb[16].mxu0 %vm275_vm0, %v19620_v8  ;;  %15973 = vmatprep.mubr.msk.f32.mxu1 %vm275_vm0, %v20238_v63  ;;  %v20274_v8 = vld [vmem:[%s23962_s0 + $0x468] sm:$0xff] }
 0x1aa   :  { %16857 = vmatprep.mubr.msk.f32.mxu0 %vm275_vm0, %v19629_v10  ;;  %v20285_v10 = vld [vmem:[%s23962_s0 + $0x470] sm:$0xff] }
 0x1ac   :  { %15974 = vmatmul.mubr.msk.f32.gmra.mrb[82].mxu1 %vm275_vm0, %v20249_v1 }
 0x1ad   :  { %16858 = vmatmul.mubr.msk.f32.gmra.mrb[18].mxu0 %vm275_vm0, %v19642_v12  ;;  %15976 = vmatprep.mubr.msk.f32.mxu1 %vm275_vm0, %v20256_v3  ;;  %v20292_v12 = vld [vmem:[%s23962_s0 + $0x480] sm:$0xff] }
 0x1ae   :  { %16860 = vmatprep.mubr.msk.f32.mxu0 %vm275_vm0, %v19651_v14  ;;  %v20303_v14 = vld [vmem:[%s23962_s0 + $0x488] sm:$0xff] }
 0x1b0   :  { %15977 = vmatmul.mubr.msk.f32.gmra.mrb[84].mxu1 %vm275_vm0, %v20267_v5 }
 0x1b1   :  { %16861 = vmatmul.mubr.msk.f32.gmra.mrb[20].mxu0 %vm275_vm0, %v19664_v16  ;;  %15979 = vmatprep.mubr.msk.f32.mxu1 %vm275_vm0, %v20274_v8  ;;  %v20310_v16 = vld [vmem:[%s23962_s0 + $0x498] sm:$0xff] }
 0x1b2   :  { %16863 = vmatprep.mubr.msk.f32.mxu0 %vm275_vm0, %v19673_v18  ;;  %v20321_v18 = vld [vmem:[%s23962_s0 + $0x4a0] sm:$0xff] }
 0x1b4   :  { %15980 = vmatmul.mubr.msk.f32.gmra.mrb[86].mxu1 %vm275_vm0, %v20285_v10 }
 0x1b5   :  { %16864 = vmatmul.mubr.msk.f32.gmra.mrb[22].mxu0 %vm275_vm0, %v19686_v20  ;;  %15982 = vmatprep.mubr.msk.f32.mxu1 %vm275_vm0, %v20292_v12  ;;  %v20328_v20 = vld [vmem:[%s23962_s0 + $0x4b0] sm:$0xff] }
 0x1b6   :  { %16866 = vmatprep.mubr.msk.f32.mxu0 %vm275_vm0, %v19695_v22  ;;  %v13733_v22 = vld [vmem:[%s23962_s0 + $0x180] sm:$0xff] }
 0x1b8   :  { %15983 = vmatmul.mubr.msk.f32.gmra.mrb[88].mxu1 %vm275_vm0, %v20303_v14 }
 0x1b9   :  { %16867 = vmatmul.mubr.msk.f32.gmra.mrb[24].mxu0 %vm275_vm0, %v19708_v24  ;;  %15985 = vmatprep.mubr.msk.f32.mxu1 %vm275_vm0, %v20310_v16  ;;  %v20342_v24 = vld [vmem:[%s23962_s0 + $0x4b8] sm:$0xff] }
 0x1ba   :  { %16869 = vmatprep.mubr.msk.f32.mxu0 %vm275_vm0, %v19717_v26  ;;  %v13734_v26 = vld [vmem:[%s23962_s0 + $0x188] sm:$0xff] }
 0x1bc   :  { %15986 = vmatmul.mubr.msk.f32.gmra.mrb[90].mxu1 %vm275_vm0, %v20321_v18 }
 0x1bd   :  { %16870 = vmatmul.mubr.msk.f32.gmra.mrb[26].mxu0 %vm275_vm0, %v19730_v28  ;;  %15988 = vmatprep.mubr.msk.f32.mxu1 %vm275_vm0, %v20328_v20  ;;  %v13735_v28 = vld [vmem:[%s23962_s0 + $0x198] sm:$0xff] }
 0x1be   :  { %16872 = vmatprep.mubr.msk.f32.mxu0 %vm275_vm0, %v13733_v22  ;;  %v112_v22 = vld [vmem:[%s23962_s0 + $0x528] sm:$0xff] }
 0x1c0   :  { %15989 = vmatmul.mubr.msk.f32.gmra.mrb[92].mxu1 %vm275_vm0, %v20342_v24 }
 0x1c1   :  { %16873 = vmatmul.mubr.msk.f32.gmra.mrb[28].mxu0 %vm275_vm0, %v13734_v26  ;;  %15991 = vmatprep.mubr.msk.f32.mxu1 %vm275_vm0, %v20351_v33  ;;  %v113_v26 = vld [vmem:[%s23962_s0 + $0x530] sm:$0xff] }
 0x1c2   :  { %16875 = vmatprep.mubr.msk.f32.mxu0 %vm275_vm0, %v13735_v28  ;;  %v13766_v28 = vld [vmem:[%s23962_s0 + $0x338] sm:$0xff] }
 0x1c4   :  { %15992 = vmatmul.mubr.msk.f32.gmra.mrb[94].mxu1 %vm275_vm0, %v20364_v30 }
 0x1c5   :  { %16876 = vmatmul.mubr.msk.f32.gmra.mrb[30].mxu0 %vm275_vm0, %v13736_v48  ;;  %15994 = vmatprep.mubr.msk.f32.mxu1 %vm275_vm0, %v110_v0  ;;  %v20635_v48 = vld [vmem:[%s23962_s0 + $0x678] sm:$0xff]  ;;  %v20648_v0 = vld [vmem:[%s23962_s0 + $0x680] sm:$0xff] }
 0x1c6   :  { %16878 = vmatprep.mubr.msk.f32.mxu0 %vm275_vm0, %v19772_v42  ;;  %v20397_v42 = vld [vmem:[%s23962_s0 + $0x540] sm:$0xff] }
 0x1c8   :  { %15995 = vmatmul.mubr.msk.f32.gmra.mrb[96].mxu1 %vm275_vm0, %v111_v36  ;;  %v13768_v36 = vld [vmem:[%s23962_s0 + $0x350] sm:$0xff] }
 0x1c9   :  { %16879 = vmatmul.mubr.msk.f32.gmra.mrb[32].mxu0 %vm275_vm0, %v19784_v46  ;;  %15997 = vmatprep.mubr.msk.f32.mxu1 %vm275_vm0, %v112_v22  ;;  %v20407_v46 = vld [vmem:[%s23962_s0 + $0x548] sm:$0xff] }
 0x1ca   :  { %16881 = vmatprep.mubr.msk.f32.mxu0 %vm275_vm0, %v19793_v50  ;;  %v20414_v50 = vld [vmem:[%s23962_s0 + $0x558] sm:$0xff]  ;;  %v2454_v22 = vld [vmem:[%s23962_s0 + $0x2] sm:$0xff] }
 0x1cc   :  { %15998 = vmatmul.mubr.msk.f32.gmra.mrb[98].mxu1 %vm275_vm0, %v113_v26  ;;  %v2455_v26 = vld [vmem:[%s23962_s0 + $0xa] sm:$0xff] }
 0x1cd   :  { %16882 = vmatmul.mubr.msk.f32.gmra.mrb[34].mxu0 %vm275_vm0, %v19806_v54  ;;  %16000 = vmatprep.mubr.msk.f32.mxu1 %vm275_vm0, %v20397_v42  ;;  %v20425_v54 = vld [vmem:[%s23962_s0 + $0x560] sm:$0xff] }
 0x1ce   :  { %16884 = vmatprep.mubr.msk.f32.mxu0 %vm275_vm0, %v19815_v58  ;;  %v20432_v58 = vld [vmem:[%s23962_s0 + $0x570] sm:$0xff] }
 0x1d0   :  { %16001 = vmatmul.mubr.msk.f32.gmra.mrb[100].mxu1 %vm275_vm0, %v20407_v46 }
 0x1d1   :  { %16885 = vmatmul.mubr.msk.f32.gmra.mrb[36].mxu0 %vm275_vm0, %v19828_v62  ;;  %16003 = vmatprep.mubr.msk.f32.mxu1 %vm275_vm0, %v20414_v50  ;;  %v20443_v62 = vld [vmem:[%s23962_s0 + $0x578] sm:$0xff] }
 0x1d2   :  { %16887 = vmatprep.mubr.msk.f32.mxu0 %vm275_vm0, %v19837_v2  ;;  %v20450_v2 = vld [vmem:[%s23962_s0 + $0x588] sm:$0xff] }
 0x1d4   :  { %16004 = vmatmul.mubr.msk.f32.gmra.mrb[102].mxu1 %vm275_vm0, %v20425_v54 }
 0x1d5   :  { %16888 = vmatmul.mubr.msk.f32.gmra.mrb[38].mxu0 %vm275_vm0, %v19850_v6  ;;  %16006 = vmatprep.mubr.msk.f32.mxu1 %vm275_vm0, %v20432_v58  ;;  %v20461_v6 = vld [vmem:[%s23962_s0 + $0x590] sm:$0xff] }
 0x1d6   :  { %16890 = vmatprep.mubr.msk.f32.mxu0 %vm275_vm0, %v19859_v11  ;;  %v20468_v11 = vld [vmem:[%s23962_s0 + $0x5a0] sm:$0xff] }
 0x1d8   :  { %16007 = vmatmul.mubr.msk.f32.gmra.mrb[104].mxu1 %vm275_vm0, %v20443_v62 }
 0x1d9   :  { %16891 = vmatmul.mubr.msk.f32.gmra.mrb[40].mxu0 %vm275_vm0, %v19872_v15  ;;  %16009 = vmatprep.mubr.msk.f32.mxu1 %vm275_vm0, %v20450_v2  ;;  %v20479_v15 = vld [vmem:[%s23962_s0 + $0x5a8] sm:$0xff] }
 0x1da   :  { %16893 = vmatprep.mubr.msk.f32.mxu0 %vm275_vm0, %v19881_v19  ;;  %v20486_v19 = vld [vmem:[%s23962_s0 + $0x5b8] sm:$0xff] }
 0x1dc   :  { %16010 = vmatmul.mubr.msk.f32.gmra.mrb[106].mxu1 %vm275_vm0, %v20461_v6 }
 0x1dd   :  { %16894 = vmatmul.mubr.msk.f32.gmra.mrb[42].mxu0 %vm275_vm0, %v19894_v23  ;;  %16012 = vmatprep.mubr.msk.f32.mxu1 %vm275_vm0, %v20468_v11  ;;  %v20497_v23 = vld [vmem:[%s23962_s0 + $0x5c0] sm:$0xff] }
 0x1de   :  { %16896 = vmatprep.mubr.msk.f32.mxu0 %vm275_vm0, %v19903_v27  ;;  %v20504_v27 = vld [vmem:[%s23962_s0 + $0x5d0] sm:$0xff] }
 0x1e0   :  { %16013 = vmatmul.mubr.msk.f32.gmra.mrb[108].mxu1 %vm275_vm0, %v20479_v15 }
 0x1e1   :  { %16897 = vmatmul.mubr.msk.f32.gmra.mrb[44].mxu0 %vm275_vm0, %v19916_v32  ;;  %16015 = vmatprep.mubr.msk.f32.mxu1 %vm275_vm0, %v20486_v19  ;;  %v20515_v32 = vld [vmem:[%s23962_s0 + $0x5d8] sm:$0xff] }
 0x1e2   :  { %16899 = vmatprep.mubr.msk.f32.mxu0 %vm275_vm0, %v19925_v29  ;;  %v20522_v29 = vld [vmem:[%s23962_s0 + $0x5e8] sm:$0xff] }
 0x1e4   :  { %16016 = vmatmul.mubr.msk.f32.gmra.mrb[110].mxu1 %vm275_vm0, %v20497_v23 }
 0x1e5   :  { %16900 = vmatmul.mubr.msk.f32.gmra.mrb[46].mxu0 %vm275_vm0, %v19938_v35  ;;  %16018 = vmatprep.mubr.msk.f32.mxu1 %vm275_vm0, %v20504_v27  ;;  %v20533_v35 = vld [vmem:[%s23962_s0 + $0x5f0] sm:$0xff] }
 0x1e6   :  { %16902 = vmatprep.mubr.msk.f32.mxu0 %vm275_vm0, %v19947_v38  ;;  %v20540_v38 = vld [vmem:[%s23962_s0 + $0x600] sm:$0xff] }
 0x1e8   :  { %16019 = vmatmul.mubr.msk.f32.gmra.mrb[112].mxu1 %vm275_vm0, %v20515_v32 }
 0x1e9   :  { %16903 = vmatmul.mubr.msk.f32.gmra.mrb[48].mxu0 %vm275_vm0, %v19960_v44  ;;  %16021 = vmatprep.mubr.msk.f32.mxu1 %vm275_vm0, %v20522_v29  ;;  %v20551_v44 = vld [vmem:[%s23962_s0 + $0x608] sm:$0xff] }
 0x1ea   :  { %16905 = vmatprep.mubr.msk.f32.mxu0 %vm275_vm0, %v19969_v52  ;;  %v20558_v52 = vld [vmem:[%s23962_s0 + $0x618] sm:$0xff] }
 0x1ec   :  { %16022 = vmatmul.mubr.msk.f32.gmra.mrb[114].mxu1 %vm275_vm0, %v20533_v35 }
 0x1ed   :  { %16906 = vmatmul.mubr.msk.f32.gmra.mrb[50].mxu0 %vm275_vm0, %v19982_v60  ;;  %16024 = vmatprep.mubr.msk.f32.mxu1 %vm275_vm0, %v20540_v38  ;;  %v20569_v60 = vld [vmem:[%s23962_s0 + $0x620] sm:$0xff] }
 0x1ee   :  { %16908 = vmatprep.mubr.msk.f32.mxu0 %vm275_vm0, %v19991_v4  ;;  %v20576_v4 = vld [vmem:[%s23962_s0 + $0x630] sm:$0xff] }
 0x1f0   :  { %16025 = vmatmul.mubr.msk.f32.gmra.mrb[116].mxu1 %vm275_vm0, %v20551_v44 }
 0x1f1   :  { %16909 = vmatmul.mubr.msk.f32.gmra.mrb[52].mxu0 %vm275_vm0, %v20004_v13  ;;  %16027 = vmatprep.mubr.msk.f32.mxu1 %vm275_vm0, %v20558_v52  ;;  %v20587_v13 = vld [vmem:[%s23962_s0 + $0x638] sm:$0xff] }
 0x1f2   :  { %16911 = vmatprep.mubr.msk.f32.mxu0 %vm275_vm0, %v20013_v21  ;;  %v20594_v21 = vld [vmem:[%s23962_s0 + $0x648] sm:$0xff] }
 0x1f4   :  { %16028 = vmatmul.mubr.msk.f32.gmra.mrb[118].mxu1 %vm275_vm0, %v20569_v60 }
 0x1f5   :  { %16912 = vmatmul.mubr.msk.f32.gmra.mrb[54].mxu0 %vm275_vm0, %v20026_v31  ;;  %16030 = vmatprep.mubr.msk.f32.mxu1 %vm275_vm0, %v20576_v4  ;;  %v20605_v31 = vld [vmem:[%s23962_s0 + $0x650] sm:$0xff] }
 0x1f6   :  { %16914 = vmatprep.mubr.msk.f32.mxu0 %vm275_vm0, %v20035_v34  ;;  %v20612_v34 = vld [vmem:[%s23962_s0 + $0x660] sm:$0xff] }
 0x1f8   :  { %16031 = vmatmul.mubr.msk.f32.gmra.mrb[120].mxu1 %vm275_vm0, %v20587_v13 }
 0x1f9   :  { %16915 = vmatmul.mubr.msk.f32.gmra.mrb[56].mxu0 %vm275_vm0, %v20048_v40  ;;  %16033 = vmatprep.mubr.msk.f32.mxu1 %vm275_vm0, %v20594_v21  ;;  %v13765_v40 = vld [vmem:[%s23962_s0 + $0x330] sm:$0xff] }
 0x1fa   :  { %16917 = vmatprep.mubr.msk.f32.mxu0 %vm275_vm0, %v20057_v56  ;;  %v20626_v56 = vld [vmem:[%s23962_s0 + $0x668] sm:$0xff] }
 0x1fc   :  { %16034 = vmatmul.mubr.msk.f32.gmra.mrb[122].mxu1 %vm275_vm0, %v20605_v31 }
 0x1fd   :  { %16918 = vmatmul.mubr.msk.f32.gmra.mrb[58].mxu0 %vm275_vm0, %v20070_v9  ;;  %16036 = vmatprep.mubr.msk.f32.mxu1 %vm275_vm0, %v20612_v34  ;;  %v13767_v9 = vld [vmem:[%s23962_s0 + $0x348] sm:$0xff] }
 0x1fe   :  { %16920 = vmatprep.mubr.msk.f32.mxu0 %vm275_vm0, %v13765_v40  ;;  %v2456_v40 = vld [vmem:[%s23962_s0 + $0x1a] sm:$0xff] }
 0x200   :  { %16037 = vmatmul.mubr.msk.f32.gmra.mrb[124].mxu1 %vm275_vm0, %v20626_v56 }
 0x201   :  { %16921 = vmatmul.mubr.msk.f32.gmra.mrb[60].mxu0 %vm275_vm0, %v13766_v28  ;;  %16039 = vmatprep.mubr.msk.f32.mxu1 %vm275_vm0, %v20635_v48  ;;  %v2457_v28 = vld [vmem:[%s23962_s0 + $0x22] sm:$0xff] }
 0x202   :  { %16923 = vmatprep.mubr.msk.f32.mxu0 %vm275_vm0, %v13767_v9  ;;  %v14349_v9 = vld [vmem:[%s23961_s1 + $0x80] sm:$0xff] }
 0x204   :  { %16040 = vmatmul.mubr.msk.f32.gmra.mrb[126].mxu1 %vm275_vm0, %v20648_v0 }
 0x205   :  { %16924 = vmatmul.mubr.msk.f32.gmra.mrb[62].mxu0 %vm275_vm0, %v13768_v36  ;;  %16046 = vmatprep.mubr.msk.f32.mxu1 %vm275_vm0, %v2454_v22  ;;  %v2460_v36 = vld [vmem:[%s23962_s0 + $0x4a] sm:$0xff]  ;;  %v13797_v22 = vld [vmem:[%s23962_s0 + $0x4e0] sm:$0xff] }
 0x206   :  { %16926 = vmatprep.mubr.msk.f32.mxu0 %vm275_vm0, %v20112_v25  ;;  %v14350_v25 = vld [vmem:[%s23961_s1 + $0x88] sm:$0xff] }
 0x208   :  { %16047 = vmatmul.mubr.msk.f32.vlgmr.msra.gmra.mrb[0].mxu1 %vm275_vm0, %v2455_v26  ;;  %v2484_v26 = vld [vmem:[%s23962_s0 + $0x16a] sm:$0xff] }
 0x209   :  { %16927 = vmatmul.mubr.msk.f32.gmra.mrb[64].mxu0 %vm275_vm0, %v20123_v37  ;;  %17429 = vmatpush3.bf16.msra.mxu1 %v20104_v17  ;;  %v2458_v17 = vld [vmem:[%s23962_s0 + $0x32] sm:$0xff]  ;;  %v20688_v37 = vpack.c.bf16 %v14350_v25, %v14349_v9  ;;  %v2487_v25 = vld [vmem:[%s23962_s0 + $0x1ba] sm:$0xff] }
 0x20a   :  { %16049 = vmatprep.mubr.msk.f32.mxu1 %vm275_vm0, %v2456_v40  ;;  %16929 = vmatprep.mubr.msk.f32.mxu0 %vm275_vm0, %v20130_v39  ;;  %v2459_v39 = vld [vmem:[%s23962_s0 + $0x3a] sm:$0xff]  ;;  %v2485_v40 = vld [vmem:[%s23962_s0 + $0x172] sm:$0xff] }
 0x20b   :  { %17450 = vmatprep.subr.bf16.mxu1 %v18516_v7  ;;  %17447 = vmatprep.subr.bf16.mxu0 %v20688_v37  ;;  %v2486_v9 = vld [vmem:[%s23962_s0 + $0x1b2] sm:$0xff] }
 0x20c   :  { %16050 = vmatmul.mubr.msk.f32.gmra.mrb[2].mxu1 %vm275_vm0, %v2457_v28  ;;  %v13800_v28 = vld [vmem:[%s23962_s0 + $0x500] sm:$0xff] }
 0x20d   :  { %16930 = vmatmul.mubr.msk.f32.gmra.mrb[66].mxu0 %vm275_vm0, %v20141_v41  ;;  %16052 = vmatprep.mubr.msk.f32.mxu1 %vm275_vm0, %v2458_v17  ;;  %v2461_v41 = vld [vmem:[%s23962_s0 + $0x52] sm:$0xff]  ;;  %v2488_v17 = vld [vmem:[%s23962_s0 + $0x1ca] sm:$0xff] }
 0x20e   :  { %16932 = vmatprep.mubr.msk.f32.mxu0 %vm275_vm0, %v20148_v43  ;;  %v2462_v43 = vld [vmem:[%s23962_s0 + $0x62] sm:$0xff] }
 0x210   :  { %16053 = vmatmul.mubr.msk.f32.gmra.mrb[4].mxu1 %vm275_vm0, %v2459_v39  ;;  %v2489_v39 = vld [vmem:[%s23962_s0 + $0x1d2] sm:$0xff] }
 0x211   :  { %16933 = vmatmul.mubr.msk.f32.gmra.mrb[68].mxu0 %vm275_vm0, %v20159_v45  ;;  %16055 = vmatprep.mubr.msk.f32.mxu1 %vm275_vm0, %v2460_v36  ;;  %v2463_v45 = vld [vmem:[%s23962_s0 + $0x6a] sm:$0xff] }
 0x212   :  { %16935 = vmatprep.mubr.msk.f32.mxu0 %vm275_vm0, %v20166_v47  ;;  %v2464_v47 = vld [vmem:[%s23962_s0 + $0x7a] sm:$0xff]  ;;  %v13829_v36 = vld [vmem:[%s23962_s0 + $0x690] sm:$0xff] }
 0x214   :  { %16056 = vmatmul.mubr.msk.f32.gmra.mrb[6].mxu1 %vm275_vm0, %v2461_v41  ;;  %v2516_v41 = vld [vmem:[%s23962_s0 + $0x31a] sm:$0xff] }
 0x215   :  { %16936 = vmatmul.mubr.msk.f32.gmra.mrb[70].mxu0 %vm275_vm0, %v20177_v49  ;;  %16058 = vmatprep.mubr.msk.f32.mxu1 %vm275_vm0, %v2462_v43  ;;  %v2465_v49 = vld [vmem:[%s23962_s0 + $0x82] sm:$0xff] }
 0x216   :  { %16938 = vmatprep.mubr.msk.f32.mxu0 %vm275_vm0, %v20184_v51  ;;  %v2466_v51 = vld [vmem:[%s23962_s0 + $0x92] sm:$0xff]  ;;  %v2517_v43 = vld [vmem:[%s23962_s0 + $0x322] sm:$0xff] }
 0x218   :  { %16059 = vmatmul.mubr.msk.f32.gmra.mrb[8].mxu1 %vm275_vm0, %v2463_v45  ;;  %v13832_v45 = vld [vmem:[%s23962_s0 + $0x6b0] sm:$0xff] }
 0x219   :  { %16939 = vmatmul.mubr.msk.f32.gmra.mrb[72].mxu0 %vm275_vm0, %v20195_v53  ;;  %16061 = vmatprep.mubr.msk.f32.mxu1 %vm275_vm0, %v2464_v47  ;;  %v2467_v53 = vld [vmem:[%s23962_s0 + $0x9a] sm:$0xff]  ;;  %v2518_v47 = vld [vmem:[%s23962_s0 + $0x362] sm:$0xff] }
 0x21a   :  { %16941 = vmatprep.mubr.msk.f32.mxu0 %vm275_vm0, %v20202_v55  ;;  %v2468_v55 = vld [vmem:[%s23962_s0 + $0xaa] sm:$0xff] }
 0x21c   :  { %16062 = vmatmul.mubr.msk.f32.gmra.mrb[10].mxu1 %vm275_vm0, %v2465_v49  ;;  %v13963_v49 = vld [vmem:[%s23962_s0 + $0x31] sm:$0xff] }
 0x21d   :  { %16942 = vmatmul.mubr.msk.f32.gmra.mrb[74].mxu0 %vm275_vm0, %v20213_v57  ;;  %16064 = vmatprep.mubr.msk.f32.mxu1 %vm275_vm0, %v2466_v51  ;;  %v2469_v57 = vld [vmem:[%s23962_s0 + $0xb2] sm:$0xff]  ;;  %v2519_v51 = vld [vmem:[%s23962_s0 + $0x36a] sm:$0xff] }
 0x21e   :  { %16944 = vmatprep.mubr.msk.f32.mxu0 %vm275_vm0, %v20220_v59  ;;  %v2470_v59 = vld [vmem:[%s23962_s0 + $0xc2] sm:$0xff] }
 0x220   :  { %16065 = vmatmul.mubr.msk.f32.gmra.mrb[12].mxu1 %vm275_vm0, %v2467_v53  ;;  %v13964_v53 = vld [vmem:[%s23962_s0 + $0x39] sm:$0xff] }
 0x221   :  { %16945 = vmatmul.mubr.msk.f32.gmra.mrb[76].mxu0 %vm275_vm0, %v20231_v61  ;;  %16067 = vmatprep.mubr.msk.f32.mxu1 %vm275_vm0, %v2468_v55  ;;  %v2471_v61 = vld [vmem:[%s23962_s0 + $0xca] sm:$0xff]  ;;  %v2520_v55 = vld [vmem:[%s23962_s0 + $0x37a] sm:$0xff] }
 0x222   :  { %16947 = vmatprep.mubr.msk.f32.mxu0 %vm275_vm0, %v20238_v63  ;;  %v2472_v63 = vld [vmem:[%s23962_s0 + $0xda] sm:$0xff] }
 0x224   :  { %16068 = vmatmul.mubr.msk.f32.gmra.mrb[14].mxu1 %vm275_vm0, %v2469_v57  ;;  %v13965_v57 = vld [vmem:[%s23962_s0 + $0x49] sm:$0xff] }
 0x225   :  { %16948 = vmatmul.mubr.msk.f32.gmra.mrb[78].mxu0 %vm275_vm0, %v20249_v1  ;;  %16070 = vmatprep.mubr.msk.f32.mxu1 %vm275_vm0, %v2470_v59  ;;  %v2473_v1 = vld [vmem:[%s23962_s0 + $0xe2] sm:$0xff] }
 0x226   :  { %16950 = vmatprep.mubr.msk.f32.mxu0 %vm275_vm0, %v20256_v3  ;;  %v2474_v3 = vld [vmem:[%s23962_s0 + $0xf2] sm:$0xff]  ;;  %v2521_v59 = vld [vmem:[%s23962_s0 + $0x382] sm:$0xff] }
 0x228   :  { %16071 = vmatmul.mubr.msk.f32.gmra.mrb[16].mxu1 %vm275_vm0, %v2471_v61  ;;  %v13966_v61 = vld [vmem:[%s23962_s0 + $0x51] sm:$0xff] }
 0x229   :  { %16951 = vmatmul.mubr.msk.f32.gmra.mrb[80].mxu0 %vm275_vm0, %v20267_v5  ;;  %16073 = vmatprep.mubr.msk.f32.mxu1 %vm275_vm0, %v2472_v63  ;;  %v2475_v5 = vld [vmem:[%s23962_s0 + $0xfa] sm:$0xff]  ;;  %v2522_v63 = vld [vmem:[%s23962_s0 + $0x392] sm:$0xff] }
 0x22a   :  { %16953 = vmatprep.mubr.msk.f32.mxu0 %vm275_vm0, %v20274_v8  ;;  %v2476_v8 = vld [vmem:[%s23962_s0 + $0x10a] sm:$0xff] }
 0x22c   :  { %16074 = vmatmul.mubr.msk.f32.gmra.mrb[18].mxu1 %vm275_vm0, %v2473_v1  ;;  %v13967_v1 = vld [vmem:[%s23962_s0 + $0x61] sm:$0xff] }
 0x22d   :  { %16954 = vmatmul.mubr.msk.f32.gmra.mrb[82].mxu0 %vm275_vm0, %v20285_v10  ;;  %16076 = vmatprep.mubr.msk.f32.mxu1 %vm275_vm0, %v2474_v3  ;;  %v2477_v10 = vld [vmem:[%s23962_s0 + $0x112] sm:$0xff]  ;;  %v13968_v3 = vld [vmem:[%s23962_s0 + $0x69] sm:$0xff] }
 0x22e   :  { %16956 = vmatprep.mubr.msk.f32.mxu0 %vm275_vm0, %v20292_v12  ;;  %v2478_v12 = vld [vmem:[%s23962_s0 + $0x122] sm:$0xff] }
 0x230   :  { %16077 = vmatmul.mubr.msk.f32.gmra.mrb[20].mxu1 %vm275_vm0, %v2475_v5  ;;  %v2524_v5 = vld [vmem:[%s23962_s0 + $0x3aa] sm:$0xff] }
 0x231   :  { %16957 = vmatmul.mubr.msk.f32.gmra.mrb[84].mxu0 %vm275_vm0, %v20303_v14  ;;  %16079 = vmatprep.mubr.msk.f32.mxu1 %vm275_vm0, %v2476_v8  ;;  %v2479_v14 = vld [vmem:[%s23962_s0 + $0x12a] sm:$0xff]  ;;  %v13969_v8 = vld [vmem:[%s23962_s0 + $0x79] sm:$0xff] }
 0x232   :  { %16959 = vmatprep.mubr.msk.f32.mxu0 %vm275_vm0, %v20310_v16  ;;  %v2480_v16 = vld [vmem:[%s23962_s0 + $0x13a] sm:$0xff] }
 0x234   :  { %16080 = vmatmul.mubr.msk.f32.gmra.mrb[22].mxu1 %vm275_vm0, %v2477_v10  ;;  %v2525_v10 = vld [vmem:[%s23962_s0 + $0x3b2] sm:$0xff] }
 0x235   :  { %16960 = vmatmul.mubr.msk.f32.gmra.mrb[86].mxu0 %vm275_vm0, %v20321_v18  ;;  %16082 = vmatprep.mubr.msk.f32.mxu1 %vm275_vm0, %v2478_v12  ;;  %v2481_v18 = vld [vmem:[%s23962_s0 + $0x142] sm:$0xff] }
 0x236   :  { %16962 = vmatprep.mubr.msk.f32.mxu0 %vm275_vm0, %v20328_v20  ;;  %v2482_v20 = vld [vmem:[%s23962_s0 + $0x152] sm:$0xff]  ;;  %v13970_v12 = vld [vmem:[%s23962_s0 + $0x81] sm:$0xff] }
 0x238   :  { %16083 = vmatmul.mubr.msk.f32.gmra.mrb[24].mxu1 %vm275_vm0, %v2479_v14  ;;  %v2526_v14 = vld [vmem:[%s23962_s0 + $0x3c2] sm:$0xff] }
 0x239   :  { %16963 = vmatmul.mubr.msk.f32.gmra.mrb[88].mxu0 %vm275_vm0, %v20342_v24  ;;  %16085 = vmatprep.mubr.msk.f32.mxu1 %vm275_vm0, %v2480_v16  ;;  %v2483_v24 = vld [vmem:[%s23962_s0 + $0x15a] sm:$0xff]  ;;  %v13971_v16 = vld [vmem:[%s23962_s0 + $0x91] sm:$0xff] }
 0x23a   :  { %16965 = vmatprep.mubr.msk.f32.mxu0 %vm275_vm0, %v20351_v33  ;;  %v13798_v33 = vld [vmem:[%s23962_s0 + $0x4e8] sm:$0xff] }
 0x23c   :  { %16086 = vmatmul.mubr.msk.f32.gmra.mrb[26].mxu1 %vm275_vm0, %v2481_v18  ;;  %v2527_v18 = vld [vmem:[%s23962_s0 + $0x3ca] sm:$0xff] }
 0x23d   :  { %16966 = vmatmul.mubr.msk.f32.gmra.mrb[90].mxu0 %vm275_vm0, %v20364_v30  ;;  %16088 = vmatprep.mubr.msk.f32.mxu1 %vm275_vm0, %v2482_v20  ;;  %v13799_v30 = vld [vmem:[%s23962_s0 + $0x4f8] sm:$0xff] }
 0x23e   :  { %16968 = vmatprep.mubr.msk.f32.mxu0 %vm275_vm0, %v13797_v22  ;;  %v13972_v20 = vld [vmem:[%s23962_s0 + $0x99] sm:$0xff] }
 0x23f   :  { %v2528_v22 = vld [vmem:[%s23962_s0 + $0x3da] sm:$0xff] }
 0x240   :  { %16089 = vmatmul.mubr.msk.f32.gmra.mrb[28].mxu1 %vm275_vm0, %v2483_v24  ;;  %v13973_v24 = vld [vmem:[%s23962_s0 + $0xa9] sm:$0xff] }
 0x241   :  { %16969 = vmatmul.mubr.msk.f32.gmra.mrb[92].mxu0 %vm275_vm0, %v13798_v33  ;;  %16091 = vmatprep.mubr.msk.f32.mxu1 %vm275_vm0, %v2484_v26  ;;  %v2529_v33 = vld [vmem:[%s23962_s0 + $0x3e2] sm:$0xff]  ;;  %v13974_v26 = vld [vmem:[%s23962_s0 + $0xb1] sm:$0xff] }
 0x242   :  { %16971 = vmatprep.mubr.msk.f32.mxu0 %vm275_vm0, %v13799_v30  ;;  %v2530_v30 = vld [vmem:[%s23962_s0 + $0x3f2] sm:$0xff] }
 0x244   :  { %16092 = vmatmul.mubr.msk.f32.gmra.mrb[30].mxu1 %vm275_vm0, %v2485_v40  ;;  %v13975_v40 = vld [vmem:[%s23962_s0 + $0xc1] sm:$0xff] }
 0x245   :  { %16972 = vmatmul.mubr.msk.f32.gmra.mrb[94].mxu0 %vm275_vm0, %v13800_v28  ;;  %16094 = vmatprep.mubr.msk.f32.mxu1 %vm275_vm0, %v2486_v9  ;;  %v2531_v28 = vld [vmem:[%s23962_s0 + $0x3fa] sm:$0xff]  ;;  %v13976_v9 = vld [vmem:[%s23962_s0 + $0xc9] sm:$0xff] }
 0x246   :  { %16974 = vmatprep.mubr.msk.f32.mxu0 %vm275_vm0, %v20397_v42  ;;  %v2490_v42 = vld [vmem:[%s23962_s0 + $0x1e2] sm:$0xff] }
 0x248   :  { %16095 = vmatmul.mubr.msk.f32.gmra.mrb[32].mxu1 %vm275_vm0, %v2487_v25  ;;  %v2532_v25 = vld [vmem:[%s23962_s0 + $0x40a] sm:$0xff] }
 0x249   :  { %16975 = vmatmul.mubr.msk.f32.gmra.mrb[96].mxu0 %vm275_vm0, %v20407_v46  ;;  %16097 = vmatprep.mubr.msk.f32.mxu1 %vm275_vm0, %v2488_v17  ;;  %v2491_v46 = vld [vmem:[%s23962_s0 + $0x1ea] sm:$0xff]  ;;  %v13977_v17 = vld [vmem:[%s23962_s0 + $0xd9] sm:$0xff] }
 0x24a   :  { %16977 = vmatprep.mubr.msk.f32.mxu0 %vm275_vm0, %v20414_v50  ;;  %v2492_v50 = vld [vmem:[%s23962_s0 + $0x1fa] sm:$0xff] }
 0x24c   :  { %16098 = vmatmul.mubr.msk.f32.gmra.mrb[34].mxu1 %vm275_vm0, %v2489_v39  ;;  %v2533_v39 = vld [vmem:[%s23962_s0 + $0x412] sm:$0xff] }
 0x24d   :  { %16978 = vmatmul.mubr.msk.f32.gmra.mrb[98].mxu0 %vm275_vm0, %v20425_v54  ;;  %16100 = vmatprep.mubr.msk.f32.mxu1 %vm275_vm0, %v2490_v42  ;;  %v2493_v54 = vld [vmem:[%s23962_s0 + $0x202] sm:$0xff] }
 0x24e   :  { %16980 = vmatprep.mubr.msk.f32.mxu0 %vm275_vm0, %v20432_v58  ;;  %v2494_v58 = vld [vmem:[%s23962_s0 + $0x212] sm:$0xff]  ;;  %v13978_v42 = vld [vmem:[%s23962_s0 + $0xe1] sm:$0xff] }
 0x250   :  { %16101 = vmatmul.mubr.msk.f32.gmra.mrb[36].mxu1 %vm275_vm0, %v2491_v46  ;;  %v2534_v46 = vld [vmem:[%s23962_s0 + $0x422] sm:$0xff] }
 0x251   :  { %16981 = vmatmul.mubr.msk.f32.gmra.mrb[100].mxu0 %vm275_vm0, %v20443_v62  ;;  %16103 = vmatprep.mubr.msk.f32.mxu1 %vm275_vm0, %v2492_v50  ;;  %v2495_v62 = vld [vmem:[%s23962_s0 + $0x21a] sm:$0xff]  ;;  %v13979_v50 = vld [vmem:[%s23962_s0 + $0xf1] sm:$0xff] }
 0x252   :  { %16983 = vmatprep.mubr.msk.f32.mxu0 %vm275_vm0, %v20450_v2  ;;  %v2496_v2 = vld [vmem:[%s23962_s0 + $0x22a] sm:$0xff] }
 0x254   :  { %16104 = vmatmul.mubr.msk.f32.gmra.mrb[38].mxu1 %vm275_vm0, %v2493_v54  ;;  %v2535_v54 = vld [vmem:[%s23962_s0 + $0x42a] sm:$0xff] }
 0x255   :  { %16984 = vmatmul.mubr.msk.f32.gmra.mrb[102].mxu0 %vm275_vm0, %v20461_v6  ;;  %16106 = vmatprep.mubr.msk.f32.mxu1 %vm275_vm0, %v2494_v58  ;;  %v2497_v6 = vld [vmem:[%s23962_s0 + $0x232] sm:$0xff] }
 0x256   :  { %16986 = vmatprep.mubr.msk.f32.mxu0 %vm275_vm0, %v20468_v11  ;;  %v2498_v11 = vld [vmem:[%s23962_s0 + $0x242] sm:$0xff]  ;;  %v13980_v58 = vld [vmem:[%s23962_s0 + $0xf9] sm:$0xff] }
 0x258   :  { %16107 = vmatmul.mubr.msk.f32.gmra.mrb[40].mxu1 %vm275_vm0, %v2495_v62  ;;  %v2536_v62 = vld [vmem:[%s23962_s0 + $0x43a] sm:$0xff] }
 0x259   :  { %16987 = vmatmul.mubr.msk.f32.gmra.mrb[104].mxu0 %vm275_vm0, %v20479_v15  ;;  %16109 = vmatprep.mubr.msk.f32.mxu1 %vm275_vm0, %v2496_v2  ;;  %v2499_v15 = vld [vmem:[%s23962_s0 + $0x24a] sm:$0xff] }
 0x25a   :  { %16989 = vmatprep.mubr.msk.f32.mxu0 %vm275_vm0, %v20486_v19  ;;  %v2500_v19 = vld [vmem:[%s23962_s0 + $0x25a] sm:$0xff]  ;;  %v13981_v2 = vld [vmem:[%s23962_s0 + $0x109] sm:$0xff] }
 0x25c   :  { %16110 = vmatmul.mubr.msk.f32.gmra.mrb[42].mxu1 %vm275_vm0, %v2497_v6  ;;  %v2537_v6 = vld [vmem:[%s23962_s0 + $0x442] sm:$0xff] }
 0x25d   :  { %16990 = vmatmul.mubr.msk.f32.gmra.mrb[106].mxu0 %vm275_vm0, %v20497_v23  ;;  %16112 = vmatprep.mubr.msk.f32.mxu1 %vm275_vm0, %v2498_v11  ;;  %v2501_v23 = vld [vmem:[%s23962_s0 + $0x262] sm:$0xff]  ;;  %v13982_v11 = vld [vmem:[%s23962_s0 + $0x111] sm:$0xff] }
 0x25e   :  { %16992 = vmatprep.mubr.msk.f32.mxu0 %vm275_vm0, %v20504_v27  ;;  %v2502_v27 = vld [vmem:[%s23962_s0 + $0x272] sm:$0xff] }
 0x260   :  { %16113 = vmatmul.mubr.msk.f32.gmra.mrb[44].mxu1 %vm275_vm0, %v2499_v15  ;;  %v2538_v15 = vld [vmem:[%s23962_s0 + $0x452] sm:$0xff] }
 0x261   :  { %16993 = vmatmul.mubr.msk.f32.gmra.mrb[108].mxu0 %vm275_vm0, %v20515_v32  ;;  %16115 = vmatprep.mubr.msk.f32.mxu1 %vm275_vm0, %v2500_v19  ;;  %v2503_v32 = vld [vmem:[%s23962_s0 + $0x27a] sm:$0xff] }
 0x262   :  { %16995 = vmatprep.mubr.msk.f32.mxu0 %vm275_vm0, %v20522_v29  ;;  %v2504_v29 = vld [vmem:[%s23962_s0 + $0x28a] sm:$0xff]  ;;  %v13983_v19 = vld [vmem:[%s23962_s0 + $0x121] sm:$0xff] }
 0x264   :  { %16116 = vmatmul.mubr.msk.f32.gmra.mrb[46].mxu1 %vm275_vm0, %v2501_v23  ;;  %v2539_v23 = vld [vmem:[%s23962_s0 + $0x45a] sm:$0xff] }
 0x265   :  { %16996 = vmatmul.mubr.msk.f32.gmra.mrb[110].mxu0 %vm275_vm0, %v20533_v35  ;;  %16118 = vmatprep.mubr.msk.f32.mxu1 %vm275_vm0, %v2502_v27  ;;  %v2505_v35 = vld [vmem:[%s23962_s0 + $0x292] sm:$0xff]  ;;  %v13984_v27 = vld [vmem:[%s23962_s0 + $0x129] sm:$0xff] }
 0x266   :  { %16998 = vmatprep.mubr.msk.f32.mxu0 %vm275_vm0, %v20540_v38  ;;  %v2506_v38 = vld [vmem:[%s23962_s0 + $0x2a2] sm:$0xff] }
 0x268   :  { %16119 = vmatmul.mubr.msk.f32.gmra.mrb[48].mxu1 %vm275_vm0, %v2503_v32  ;;  %v2540_v32 = vld [vmem:[%s23962_s0 + $0x46a] sm:$0xff] }
 0x269   :  { %16999 = vmatmul.mubr.msk.f32.gmra.mrb[112].mxu0 %vm275_vm0, %v20551_v44  ;;  %16121 = vmatprep.mubr.msk.f32.mxu1 %vm275_vm0, %v2504_v29  ;;  %v2507_v44 = vld [vmem:[%s23962_s0 + $0x2aa] sm:$0xff]  ;;  %v13985_v29 = vld [vmem:[%s23962_s0 + $0x139] sm:$0xff] }
 0x26a   :  { %17001 = vmatprep.mubr.msk.f32.mxu0 %vm275_vm0, %v20558_v52  ;;  %v2508_v52 = vld [vmem:[%s23962_s0 + $0x2ba] sm:$0xff] }
 0x26c   :  { %16122 = vmatmul.mubr.msk.f32.gmra.mrb[50].mxu1 %vm275_vm0, %v2505_v35  ;;  %v2541_v35 = vld [vmem:[%s23962_s0 + $0x472] sm:$0xff] }
 0x26d   :  { %17002 = vmatmul.mubr.msk.f32.gmra.mrb[114].mxu0 %vm275_vm0, %v20569_v60  ;;  %16124 = vmatprep.mubr.msk.f32.mxu1 %vm275_vm0, %v2506_v38  ;;  %v2509_v60 = vld [vmem:[%s23962_s0 + $0x2c2] sm:$0xff] }
 0x26e   :  { %17004 = vmatprep.mubr.msk.f32.mxu0 %vm275_vm0, %v20576_v4  ;;  %v2510_v4 = vld [vmem:[%s23962_s0 + $0x2d2] sm:$0xff]  ;;  %v13986_v38 = vld [vmem:[%s23962_s0 + $0x141] sm:$0xff] }
 0x270   :  { %16125 = vmatmul.mubr.msk.f32.gmra.mrb[52].mxu1 %vm275_vm0, %v2507_v44  ;;  %v2542_v44 = vld [vmem:[%s23962_s0 + $0x482] sm:$0xff] }
 0x271   :  { %17005 = vmatmul.mubr.msk.f32.gmra.mrb[116].mxu0 %vm275_vm0, %v20587_v13  ;;  %16127 = vmatprep.mubr.msk.f32.mxu1 %vm275_vm0, %v2508_v52  ;;  %v2511_v13 = vld [vmem:[%s23962_s0 + $0x2da] sm:$0xff]  ;;  %v13987_v52 = vld [vmem:[%s23962_s0 + $0x151] sm:$0xff] }
 0x272   :  { %17007 = vmatprep.mubr.msk.f32.mxu0 %vm275_vm0, %v20594_v21  ;;  %v2512_v21 = vld [vmem:[%s23962_s0 + $0x2ea] sm:$0xff] }
 0x274   :  { %16128 = vmatmul.mubr.msk.f32.gmra.mrb[54].mxu1 %vm275_vm0, %v2509_v60  ;;  %v2543_v60 = vld [vmem:[%s23962_s0 + $0x48a] sm:$0xff] }
 0x275   :  { %17008 = vmatmul.mubr.msk.f32.gmra.mrb[118].mxu0 %vm275_vm0, %v20605_v31  ;;  %16130 = vmatprep.mubr.msk.f32.mxu1 %vm275_vm0, %v2510_v4  ;;  %v2513_v31 = vld [vmem:[%s23962_s0 + $0x2f2] sm:$0xff] }
 0x276   :  { %17010 = vmatprep.mubr.msk.f32.mxu0 %vm275_vm0, %v20612_v34  ;;  %v2514_v34 = vld [vmem:[%s23962_s0 + $0x302] sm:$0xff]  ;;  %v13988_v4 = vld [vmem:[%s23962_s0 + $0x159] sm:$0xff] }
 0x278   :  { %16131 = vmatmul.mubr.msk.f32.gmra.mrb[56].mxu1 %vm275_vm0, %v2511_v13  ;;  %v2544_v13 = vld [vmem:[%s23962_s0 + $0x49a] sm:$0xff] }
 0x279   :  { %17011 = vmatmul.mubr.msk.f32.gmra.mrb[120].mxu0 %vm275_vm0, %v20626_v56  ;;  %16133 = vmatprep.mubr.msk.f32.mxu1 %vm275_vm0, %v2512_v21  ;;  %v2515_v56 = vld [vmem:[%s23962_s0 + $0x30a] sm:$0xff] }
 0x27a   :  { %17013 = vmatprep.mubr.msk.f32.mxu0 %vm275_vm0, %v20635_v48  ;;  %v13830_v48 = vld [vmem:[%s23962_s0 + $0x698] sm:$0xff]  ;;  %v13989_v21 = vld [vmem:[%s23962_s0 + $0x169] sm:$0xff] }
 0x27c   :  { %16134 = vmatmul.mubr.msk.f32.gmra.mrb[58].mxu1 %vm275_vm0, %v2513_v31  ;;  %v2545_v31 = vld [vmem:[%s23962_s0 + $0x4a2] sm:$0xff] }
 0x27d   :  { %17014 = vmatmul.mubr.msk.f32.gmra.mrb[122].mxu0 %vm275_vm0, %v20648_v0  ;;  %16136 = vmatprep.mubr.msk.f32.mxu1 %vm275_vm0, %v2514_v34  ;;  %v13831_v0 = vld [vmem:[%s23962_s0 + $0x6a8] sm:$0xff]  ;;  %v13990_v34 = vld [vmem:[%s23962_s0 + $0x171] sm:$0xff] }
 0x27e   :  { %17016 = vmatprep.mubr.msk.f32.mxu0 %vm275_vm0, %v13829_v36  ;;  %v2546_v36 = vld [vmem:[%s23962_s0 + $0x4b2] sm:$0xff] }
 0x280   :  { %16137 = vmatmul.mubr.msk.f32.gmra.mrb[60].mxu1 %vm275_vm0, %v2515_v56  ;;  %v13991_v56 = vld [vmem:[%s23962_s0 + $0x181] sm:$0xff] }
 0x281   :  { %17017 = vmatmul.mubr.msk.f32.gmra.mrb[124].mxu0 %vm275_vm0, %v13830_v48  ;;  %16139 = vmatprep.mubr.msk.f32.mxu1 %vm275_vm0, %v2516_v41  ;;  %v2547_v48 = vld [vmem:[%s23962_s0 + $0x4ba] sm:$0xff]  ;;  %v13992_v41 = vld [vmem:[%s23962_s0 + $0x189] sm:$0xff] }
 0x282   :  { %17019 = vmatprep.mubr.msk.f32.mxu0 %vm275_vm0, %v13831_v0  ;;  %v2548_v0 = vld [vmem:[%s23962_s0 + $0x4ca] sm:$0xff] }
 0x284   :  { %16140 = vmatmul.mubr.msk.f32.gmra.mrb[62].mxu1 %vm275_vm0, %v2517_v43  ;;  %v13993_v43 = vld [vmem:[%s23962_s0 + $0x199] sm:$0xff] }
 0x285   :  { %17020 = vmatmul.mubr.msk.f32.gmra.mrb[126].mxu0 %vm275_vm0, %v13832_v45  ;;  %16142 = vmatprep.mubr.msk.f32.mxu1 %vm275_vm0, %v2518_v47  ;;  %v2549_v45 = vld [vmem:[%s23962_s0 + $0x4d2] sm:$0xff]  ;;  %v13994_v47 = vld [vmem:[%s23962_s0 + $0x1a1] sm:$0xff] }
 0x286   :  { %17026 = vmatprep.mubr.msk.f32.mxu0 %vm275_vm0, %v13963_v49  ;;  %v2550_v49 = vld [vmem:[%s23962_s0 + $0x512] sm:$0xff] }
 0x288   :  { %16143 = vmatmul.mubr.msk.f32.gmra.mrb[64].mxu1 %vm275_vm0, %v2519_v51  ;;  %v13995_v51 = vld [vmem:[%s23962_s0 + $0x1e1] sm:$0xff] }
 0x289   :  { %17027 = vmatmul.mubr.msk.f32.vlgmr.msra.gmra.mrb[0].mxu0 %vm275_vm0, %v13964_v53  ;;  %16145 = vmatprep.mubr.msk.f32.mxu1 %vm275_vm0, %v2520_v55  ;;  %v2551_v53 = vld [vmem:[%s23962_s0 + $0x51a] sm:$0xff]  ;;  %v13996_v55 = vld [vmem:[%s23962_s0 + $0x1e9] sm:$0xff] }
 0x28a   :  { %17449 = vmatpush3.bf16.msra.mxu0 %v20688_v37  ;;  %17029 = vmatprep.mubr.msk.f32.mxu0 %vm275_vm0, %v13965_v57  ;;  %v2523_v37 = vld [vmem:[%s23962_s0 + $0x39a] sm:$0xff]  ;;  %v2552_v57 = vld [vmem:[%s23962_s0 + $0x52a] sm:$0xff] }
 0x28c   :  { %16146 = vmatmul.mubr.msk.f32.gmra.mrb[66].mxu1 %vm275_vm0, %v2521_v59  ;;  %v13997_v59 = vld [vmem:[%s23962_s0 + $0x1f9] sm:$0xff] }
 0x28d   :  { %17030 = vmatmul.mubr.msk.f32.gmra.mrb[2].mxu0 %vm275_vm0, %v13966_v61  ;;  %16148 = vmatprep.mubr.msk.f32.mxu1 %vm275_vm0, %v2522_v63  ;;  %v2553_v61 = vld [vmem:[%s23962_s0 + $0x532] sm:$0xff]  ;;  %v13998_v63 = vld [vmem:[%s23962_s0 + $0x201] sm:$0xff] }
 0x28e   :  { %17032 = vmatprep.mubr.msk.f32.mxu0 %vm275_vm0, %v13967_v1  ;;  %v2554_v1 = vld [vmem:[%s23962_s0 + $0x542] sm:$0xff] }
 0x290   :  { %16149 = vmatmul.mubr.msk.f32.gmra.mrb[68].mxu1 %vm275_vm0, %v2523_v37  ;;  %v13999_v37 = vld [vmem:[%s23962_s0 + $0x211] sm:$0xff] }
 0x291   :  { %17033 = vmatmul.mubr.msk.f32.gmra.mrb[4].mxu0 %vm275_vm0, %v13968_v3  ;;  %16151 = vmatprep.mubr.msk.f32.mxu1 %vm275_vm0, %v2524_v5  ;;  %v2555_v3 = vld [vmem:[%s23962_s0 + $0x54a] sm:$0xff]  ;;  %v14000_v5 = vld [vmem:[%s23962_s0 + $0x219] sm:$0xff] }
 0x292   :  { %17035 = vmatprep.mubr.msk.f32.mxu0 %vm275_vm0, %v13969_v8  ;;  %v2556_v8 = vld [vmem:[%s23962_s0 + $0x55a] sm:$0xff] }
 0x294   :  { %16152 = vmatmul.mubr.msk.f32.gmra.mrb[70].mxu1 %vm275_vm0, %v2525_v10  ;;  %v14001_v10 = vld [vmem:[%s23962_s0 + $0x229] sm:$0xff] }
 0x295   :  { %17036 = vmatmul.mubr.msk.f32.gmra.mrb[6].mxu0 %vm275_vm0, %v13970_v12  ;;  %16154 = vmatprep.mubr.msk.f32.mxu1 %vm275_vm0, %v2526_v14  ;;  %v2557_v12 = vld [vmem:[%s23962_s0 + $0x562] sm:$0xff]  ;;  %v14002_v14 = vld [vmem:[%s23962_s0 + $0x231] sm:$0xff] }
 0x296   :  { %17038 = vmatprep.mubr.msk.f32.mxu0 %vm275_vm0, %v13971_v16  ;;  %v2558_v16 = vld [vmem:[%s23962_s0 + $0x572] sm:$0xff] }
 0x298   :  { %16155 = vmatmul.mubr.msk.f32.gmra.mrb[72].mxu1 %vm275_vm0, %v2527_v18  ;;  %v14003_v18 = vld [vmem:[%s23962_s0 + $0x241] sm:$0xff] }
 0x299   :  { %17039 = vmatmul.mubr.msk.f32.gmra.mrb[8].mxu0 %vm275_vm0, %v13972_v20  ;;  %16157 = vmatprep.mubr.msk.f32.mxu1 %vm275_vm0, %v2528_v22  ;;  %v2559_v20 = vld [vmem:[%s23962_s0 + $0x57a] sm:$0xff]  ;;  %v14004_v22 = vld [vmem:[%s23962_s0 + $0x249] sm:$0xff] }
 0x29a   :  { %17041 = vmatprep.mubr.msk.f32.mxu0 %vm275_vm0, %v13973_v24  ;;  %v2560_v24 = vld [vmem:[%s23962_s0 + $0x58a] sm:$0xff] }
 0x29c   :  { %16158 = vmatmul.mubr.msk.f32.gmra.mrb[74].mxu1 %vm275_vm0, %v2529_v33  ;;  %v14005_v33 = vld [vmem:[%s23962_s0 + $0x259] sm:$0xff] }
 0x29d   :  { %17042 = vmatmul.mubr.msk.f32.gmra.mrb[10].mxu0 %vm275_vm0, %v13974_v26  ;;  %16160 = vmatprep.mubr.msk.f32.mxu1 %vm275_vm0, %v2530_v30  ;;  %v2561_v26 = vld [vmem:[%s23962_s0 + $0x592] sm:$0xff]  ;;  %v14006_v30 = vld [vmem:[%s23962_s0 + $0x261] sm:$0xff] }
 0x29e   :  { %17044 = vmatprep.mubr.msk.f32.mxu0 %vm275_vm0, %v13975_v40  ;;  %v2562_v40 = vld [vmem:[%s23962_s0 + $0x5a2] sm:$0xff] }
 0x2a0   :  { %16161 = vmatmul.mubr.msk.f32.gmra.mrb[76].mxu1 %vm275_vm0, %v2531_v28  ;;  %v14007_v28 = vld [vmem:[%s23962_s0 + $0x271] sm:$0xff] }
 0x2a1   :  { %17045 = vmatmul.mubr.msk.f32.gmra.mrb[12].mxu0 %vm275_vm0, %v13976_v9  ;;  %16163 = vmatprep.mubr.msk.f32.mxu1 %vm275_vm0, %v2532_v25  ;;  %v2563_v9 = vld [vmem:[%s23962_s0 + $0x5aa] sm:$0xff]  ;;  %v14008_v25 = vld [vmem:[%s23962_s0 + $0x279] sm:$0xff] }
 0x2a2   :  { %17047 = vmatprep.mubr.msk.f32.mxu0 %vm275_vm0, %v13977_v17  ;;  %v2564_v17 = vld [vmem:[%s23962_s0 + $0x5ba] sm:$0xff] }
 0x2a4   :  { %16164 = vmatmul.mubr.msk.f32.gmra.mrb[78].mxu1 %vm275_vm0, %v2533_v39  ;;  %v14009_v39 = vld [vmem:[%s23962_s0 + $0x289] sm:$0xff] }
 0x2a5   :  { %17048 = vmatmul.mubr.msk.f32.gmra.mrb[14].mxu0 %vm275_vm0, %v13978_v42  ;;  %16166 = vmatprep.mubr.msk.f32.mxu1 %vm275_vm0, %v2534_v46  ;;  %v2565_v42 = vld [vmem:[%s23962_s0 + $0x5c2] sm:$0xff]  ;;  %v14010_v46 = vld [vmem:[%s23962_s0 + $0x291] sm:$0xff] }
 0x2a6   :  { %17050 = vmatprep.mubr.msk.f32.mxu0 %vm275_vm0, %v13979_v50  ;;  %v2566_v50 = vld [vmem:[%s23962_s0 + $0x5d2] sm:$0xff] }
 0x2a8   :  { %16167 = vmatmul.mubr.msk.f32.gmra.mrb[80].mxu1 %vm275_vm0, %v2535_v54  ;;  %v14011_v54 = vld [vmem:[%s23962_s0 + $0x2a1] sm:$0xff] }
 0x2a9   :  { %17051 = vmatmul.mubr.msk.f32.gmra.mrb[16].mxu0 %vm275_vm0, %v13980_v58  ;;  %16169 = vmatprep.mubr.msk.f32.mxu1 %vm275_vm0, %v2536_v62  ;;  %v2567_v58 = vld [vmem:[%s23962_s0 + $0x5da] sm:$0xff]  ;;  %v14012_v62 = vld [vmem:[%s23962_s0 + $0x2a9] sm:$0xff] }
 0x2aa   :  { %17053 = vmatprep.mubr.msk.f32.mxu0 %vm275_vm0, %v13981_v2  ;;  %v2568_v2 = vld [vmem:[%s23962_s0 + $0x5ea] sm:$0xff] }
 0x2ac   :  { %16170 = vmatmul.mubr.msk.f32.gmra.mrb[82].mxu1 %vm275_vm0, %v2537_v6  ;;  %v14013_v6 = vld [vmem:[%s23962_s0 + $0x2b9] sm:$0xff] }
 0x2ad   :  { %17054 = vmatmul.mubr.msk.f32.gmra.mrb[18].mxu0 %vm275_vm0, %v13982_v11  ;;  %16172 = vmatprep.mubr.msk.f32.mxu1 %vm275_vm0, %v2538_v15  ;;  %v2569_v11 = vld [vmem:[%s23962_s0 + $0x5f2] sm:$0xff]  ;;  %v14014_v15 = vld [vmem:[%s23962_s0 + $0x2c1] sm:$0xff] }
 0x2ae   :  { %17056 = vmatprep.mubr.msk.f32.mxu0 %vm275_vm0, %v13983_v19  ;;  %v2570_v19 = vld [vmem:[%s23962_s0 + $0x602] sm:$0xff] }
 0x2b0   :  { %16173 = vmatmul.mubr.msk.f32.gmra.mrb[84].mxu1 %vm275_vm0, %v2539_v23  ;;  %v14015_v23 = vld [vmem:[%s23962_s0 + $0x2d1] sm:$0xff] }
 0x2b1   :  { %17057 = vmatmul.mubr.msk.f32.gmra.mrb[20].mxu0 %vm275_vm0, %v13984_v27  ;;  %16175 = vmatprep.mubr.msk.f32.mxu1 %vm275_vm0, %v2540_v32  ;;  %v2571_v27 = vld [vmem:[%s23962_s0 + $0x60a] sm:$0xff]  ;;  %v14016_v32 = vld [vmem:[%s23962_s0 + $0x2d9] sm:$0xff] }
 0x2b2   :  { %17059 = vmatprep.mubr.msk.f32.mxu0 %vm275_vm0, %v13985_v29  ;;  %v2572_v29 = vld [vmem:[%s23962_s0 + $0x61a] sm:$0xff] }
 0x2b4   :  { %16176 = vmatmul.mubr.msk.f32.gmra.mrb[86].mxu1 %vm275_vm0, %v2541_v35  ;;  %v14017_v35 = vld [vmem:[%s23962_s0 + $0x2e9] sm:$0xff] }
 0x2b5   :  { %17060 = vmatmul.mubr.msk.f32.gmra.mrb[22].mxu0 %vm275_vm0, %v13986_v38  ;;  %16178 = vmatprep.mubr.msk.f32.mxu1 %vm275_vm0, %v2542_v44  ;;  %v2573_v38 = vld [vmem:[%s23962_s0 + $0x622] sm:$0xff]  ;;  %v14018_v44 = vld [vmem:[%s23962_s0 + $0x2f1] sm:$0xff] }
 0x2b6   :  { %17062 = vmatprep.mubr.msk.f32.mxu0 %vm275_vm0, %v13987_v52  ;;  %v2574_v52 = vld [vmem:[%s23962_s0 + $0x632] sm:$0xff] }
 0x2b8   :  { %16179 = vmatmul.mubr.msk.f32.gmra.mrb[88].mxu1 %vm275_vm0, %v2543_v60  ;;  %v14019_v60 = vld [vmem:[%s23962_s0 + $0x301] sm:$0xff] }
 0x2b9   :  { %17063 = vmatmul.mubr.msk.f32.gmra.mrb[24].mxu0 %vm275_vm0, %v13988_v4  ;;  %16181 = vmatprep.mubr.msk.f32.mxu1 %vm275_vm0, %v2544_v13  ;;  %v2575_v4 = vld [vmem:[%s23962_s0 + $0x63a] sm:$0xff]  ;;  %v14020_v13 = vld [vmem:[%s23962_s0 + $0x309] sm:$0xff] }
 0x2ba   :  { %17065 = vmatprep.mubr.msk.f32.mxu0 %vm275_vm0, %v13989_v21  ;;  %v2576_v21 = vld [vmem:[%s23962_s0 + $0x64a] sm:$0xff] }
 0x2bc   :  { %16182 = vmatmul.mubr.msk.f32.gmra.mrb[90].mxu1 %vm275_vm0, %v2545_v31  ;;  %v14021_v31 = vld [vmem:[%s23962_s0 + $0x319] sm:$0xff] }
 0x2bd   :  { %17066 = vmatmul.mubr.msk.f32.gmra.mrb[26].mxu0 %vm275_vm0, %v13990_v34  ;;  %16184 = vmatprep.mubr.msk.f32.mxu1 %vm275_vm0, %v2546_v36  ;;  %v2577_v34 = vld [vmem:[%s23962_s0 + $0x652] sm:$0xff]  ;;  %v14022_v36 = vld [vmem:[%s23962_s0 + $0x321] sm:$0xff] }
 0x2be   :  { %17068 = vmatprep.mubr.msk.f32.mxu0 %vm275_vm0, %v13991_v56  ;;  %v2578_v56 = vld [vmem:[%s23962_s0 + $0x662] sm:$0xff] }
 0x2c0   :  { %16185 = vmatmul.mubr.msk.f32.gmra.mrb[92].mxu1 %vm275_vm0, %v2547_v48  ;;  %v14023_v48 = vld [vmem:[%s23962_s0 + $0x331] sm:$0xff] }
 0x2c1   :  { %17069 = vmatmul.mubr.msk.f32.gmra.mrb[28].mxu0 %vm275_vm0, %v13992_v41  ;;  %16187 = vmatprep.mubr.msk.f32.mxu1 %vm275_vm0, %v2548_v0  ;;  %v2579_v41 = vld [vmem:[%s23962_s0 + $0x66a] sm:$0xff]  ;;  %v14024_v0 = vld [vmem:[%s23962_s0 + $0x339] sm:$0xff] }
 0x2c2   :  { %17071 = vmatprep.mubr.msk.f32.mxu0 %vm275_vm0, %v13993_v43  ;;  %v2580_v43 = vld [vmem:[%s23962_s0 + $0x67a] sm:$0xff] }
 0x2c4   :  { %16188 = vmatmul.mubr.msk.f32.gmra.mrb[94].mxu1 %vm275_vm0, %v2549_v45  ;;  %v14025_v45 = vld [vmem:[%s23962_s0 + $0x349] sm:$0xff] }
 0x2c5   :  { %17072 = vmatmul.mubr.msk.f32.gmra.mrb[30].mxu0 %vm275_vm0, %v13994_v47  ;;  %16190 = vmatprep.mubr.msk.f32.mxu1 %vm275_vm0, %v2550_v49  ;;  %v2581_v47 = vld [vmem:[%s23962_s0 + $0x682] sm:$0xff]  ;;  %v14026_v49 = vld [vmem:[%s23962_s0 + $0x351] sm:$0xff] }
 0x2c6   :  { %17074 = vmatprep.mubr.msk.f32.mxu0 %vm275_vm0, %v13995_v51  ;;  %v12931_v51 = vld [vmem:[%s23962_s0 + $0x18] sm:$0xff] }
 0x2c8   :  { %16191 = vmatmul.mubr.msk.f32.gmra.mrb[96].mxu1 %vm275_vm0, %v2551_v53  ;;  %v14027_v53 = vld [vmem:[%s23962_s0 + $0x391] sm:$0xff] }
 0x2c9   :  { %17075 = vmatmul.mubr.msk.f32.gmra.mrb[32].mxu0 %vm275_vm0, %v13996_v55  ;;  %16193 = vmatprep.mubr.msk.f32.mxu1 %vm275_vm0, %v2552_v57  ;;  %v12932_v55 = vld [vmem:[%s23962_s0 + $0x20] sm:$0xff] }
 0x2ca   :  { %17077 = vmatprep.mubr.msk.f32.mxu0 %vm275_vm0, %v13997_v59  ;;  %v14028_v57 = vld [vmem:[%s23962_s0 + $0x399] sm:$0xff]  ;;  %v12933_v59 = vld [vmem:[%s23962_s0 + $0x30] sm:$0xff] }
 0x2cc   :  { %16194 = vmatmul.mubr.msk.f32.gmra.mrb[98].mxu1 %vm275_vm0, %v2553_v61  ;;  %v14029_v61 = vld [vmem:[%s23962_s0 + $0x3a9] sm:$0xff] }
 0x2cd   :  { %17078 = vmatmul.mubr.msk.f32.gmra.mrb[34].mxu0 %vm275_vm0, %v13998_v63  ;;  %16196 = vmatprep.mubr.msk.f32.mxu1 %vm275_vm0, %v2554_v1  ;;  %v12934_v63 = vld [vmem:[%s23962_s0 + $0x38] sm:$0xff] }
 0x2ce   :  { %17080 = vmatprep.mubr.msk.f32.mxu0 %vm275_vm0, %v13999_v37  ;;  %v14030_v1 = vld [vmem:[%s23962_s0 + $0x3b1] sm:$0xff]  ;;  %v12935_v37 = vld [vmem:[%s23962_s0 + $0x48] sm:$0xff] }
 0x2d0   :  { %16197 = vmatmul.mubr.msk.f32.gmra.mrb[100].mxu1 %vm275_vm0, %v2555_v3  ;;  %v12936_v3 = vld [vmem:[%s23962_s0 + $0x50] sm:$0xff] }
 0x2d1   :  { %17081 = vmatmul.mubr.msk.f32.gmra.mrb[36].mxu0 %vm275_vm0, %v14000_v5  ;;  %16199 = vmatprep.mubr.msk.f32.mxu1 %vm275_vm0, %v2556_v8  ;;  %v14032_v5 = vld [vmem:[%s23962_s0 + $0x3c9] sm:$0xff]  ;;  %v12937_v8 = vld [vmem:[%s23962_s0 + $0x60] sm:$0xff] }
 0x2d2   :  { %17083 = vmatprep.mubr.msk.f32.mxu0 %vm275_vm0, %v14001_v10  ;;  %v14033_v10 = vld [vmem:[%s23962_s0 + $0x3d9] sm:$0xff] }
 0x2d4   :  { %16200 = vmatmul.mubr.msk.f32.gmra.mrb[102].mxu1 %vm275_vm0, %v2557_v12  ;;  %v12938_v12 = vld [vmem:[%s23962_s0 + $0x68] sm:$0xff] }
 0x2d5   :  { %17084 = vmatmul.mubr.msk.f32.gmra.mrb[38].mxu0 %vm275_vm0, %v14002_v14  ;;  %16202 = vmatprep.mubr.msk.f32.mxu1 %vm275_vm0, %v2558_v16  ;;  %v14034_v14 = vld [vmem:[%s23962_s0 + $0x3e1] sm:$0xff]  ;;  %v12939_v16 = vld [vmem:[%s23962_s0 + $0x78] sm:$0xff] }
 0x2d6   :  { %17086 = vmatprep.mubr.msk.f32.mxu0 %vm275_vm0, %v14003_v18  ;;  %v14035_v18 = vld [vmem:[%s23962_s0 + $0x3f1] sm:$0xff] }
 0x2d8   :  { %16203 = vmatmul.mubr.msk.f32.gmra.mrb[104].mxu1 %vm275_vm0, %v2559_v20  ;;  %v12940_v20 = vld [vmem:[%s23962_s0 + $0x80] sm:$0xff] }
 0x2d9   :  { %17087 = vmatmul.mubr.msk.f32.gmra.mrb[40].mxu0 %vm275_vm0, %v14004_v22  ;;  %16205 = vmatprep.mubr.msk.f32.mxu1 %vm275_vm0, %v2560_v24  ;;  %v14036_v22 = vld [vmem:[%s23962_s0 + $0x3f9] sm:$0xff]  ;;  %v12941_v24 = vld [vmem:[%s23962_s0 + $0x90] sm:$0xff] }
 0x2da   :  { %17089 = vmatprep.mubr.msk.f32.mxu0 %vm275_vm0, %v14005_v33  ;;  %v14037_v33 = vld [vmem:[%s23962_s0 + $0x409] sm:$0xff] }
 0x2dc   :  { %16206 = vmatmul.mubr.msk.f32.gmra.mrb[106].mxu1 %vm275_vm0, %v2561_v26  ;;  %v12942_v26 = vld [vmem:[%s23962_s0 + $0x98] sm:$0xff] }
 0x2dd   :  { %17090 = vmatmul.mubr.msk.f32.gmra.mrb[42].mxu0 %vm275_vm0, %v14006_v30  ;;  %16208 = vmatprep.mubr.msk.f32.mxu1 %vm275_vm0, %v2562_v40  ;;  %v14038_v30 = vld [vmem:[%s23962_s0 + $0x411] sm:$0xff]  ;;  %v12943_v40 = vld [vmem:[%s23962_s0 + $0xa8] sm:$0xff] }
 0x2de   :  { %17092 = vmatprep.mubr.msk.f32.mxu0 %vm275_vm0, %v14007_v28  ;;  %v14039_v28 = vld [vmem:[%s23962_s0 + $0x421] sm:$0xff] }
 0x2e0   :  { %16209 = vmatmul.mubr.msk.f32.gmra.mrb[108].mxu1 %vm275_vm0, %v2563_v9  ;;  %v12944_v9 = vld [vmem:[%s23962_s0 + $0xb0] sm:$0xff] }
 0x2e1   :  { %17093 = vmatmul.mubr.msk.f32.gmra.mrb[44].mxu0 %vm275_vm0, %v14008_v25  ;;  %16211 = vmatprep.mubr.msk.f32.mxu1 %vm275_vm0, %v2564_v17  ;;  %v14040_v25 = vld [vmem:[%s23962_s0 + $0x429] sm:$0xff]  ;;  %v12945_v17 = vld [vmem:[%s23962_s0 + $0xc0] sm:$0xff] }
 0x2e2   :  { %17095 = vmatprep.mubr.msk.f32.mxu0 %vm275_vm0, %v14009_v39  ;;  %v14041_v39 = vld [vmem:[%s23962_s0 + $0x439] sm:$0xff] }
 0x2e4   :  { %16212 = vmatmul.mubr.msk.f32.gmra.mrb[110].mxu1 %vm275_vm0, %v2565_v42  ;;  %v12946_v42 = vld [vmem:[%s23962_s0 + $0xc8] sm:$0xff] }
 0x2e5   :  { %17096 = vmatmul.mubr.msk.f32.gmra.mrb[46].mxu0 %vm275_vm0, %v14010_v46  ;;  %16214 = vmatprep.mubr.msk.f32.mxu1 %vm275_vm0, %v2566_v50  ;;  %v14042_v46 = vld [vmem:[%s23962_s0 + $0x441] sm:$0xff]  ;;  %v12947_v50 = vld [vmem:[%s23962_s0 + $0xd8] sm:$0xff] }
 0x2e6   :  { %17098 = vmatprep.mubr.msk.f32.mxu0 %vm275_vm0, %v14011_v54  ;;  %v14043_v54 = vld [vmem:[%s23962_s0 + $0x451] sm:$0xff] }
 0x2e8   :  { %16215 = vmatmul.mubr.msk.f32.gmra.mrb[112].mxu1 %vm275_vm0, %v2567_v58  ;;  %v12948_v58 = vld [vmem:[%s23962_s0 + $0xe0] sm:$0xff] }
 0x2e9   :  { %17099 = vmatmul.mubr.msk.f32.gmra.mrb[48].mxu0 %vm275_vm0, %v14012_v62  ;;  %16217 = vmatprep.mubr.msk.f32.mxu1 %vm275_vm0, %v2568_v2  ;;  %v14044_v62 = vld [vmem:[%s23962_s0 + $0x459] sm:$0xff]  ;;  %v12949_v2 = vld [vmem:[%s23962_s0 + $0xf0] sm:$0xff] }
 0x2ea   :  { %17101 = vmatprep.mubr.msk.f32.mxu0 %vm275_vm0, %v14013_v6  ;;  %v14045_v6 = vld [vmem:[%s23962_s0 + $0x469] sm:$0xff] }
 0x2ec   :  { %16218 = vmatmul.mubr.msk.f32.gmra.mrb[114].mxu1 %vm275_vm0, %v2569_v11  ;;  %v12950_v11 = vld [vmem:[%s23962_s0 + $0xf8] sm:$0xff] }
 0x2ed   :  { %17102 = vmatmul.mubr.msk.f32.gmra.mrb[50].mxu0 %vm275_vm0, %v14014_v15  ;;  %16220 = vmatprep.mubr.msk.f32.mxu1 %vm275_vm0, %v2570_v19  ;;  %v14046_v15 = vld [vmem:[%s23962_s0 + $0x471] sm:$0xff]  ;;  %v12951_v19 = vld [vmem:[%s23962_s0 + $0x108] sm:$0xff] }
 0x2ee   :  { %17104 = vmatprep.mubr.msk.f32.mxu0 %vm275_vm0, %v14015_v23  ;;  %v14047_v23 = vld [vmem:[%s23962_s0 + $0x481] sm:$0xff] }
 0x2f0   :  { %16221 = vmatmul.mubr.msk.f32.gmra.mrb[116].mxu1 %vm275_vm0, %v2571_v27  ;;  %v12952_v27 = vld [vmem:[%s23962_s0 + $0x110] sm:$0xff] }
 0x2f1   :  { %17105 = vmatmul.mubr.msk.f32.gmra.mrb[52].mxu0 %vm275_vm0, %v14016_v32  ;;  %16223 = vmatprep.mubr.msk.f32.mxu1 %vm275_vm0, %v2572_v29  ;;  %v14048_v32 = vld [vmem:[%s23962_s0 + $0x489] sm:$0xff]  ;;  %v12953_v29 = vld [vmem:[%s23962_s0 + $0x120] sm:$0xff] }
 0x2f2   :  { %17107 = vmatprep.mubr.msk.f32.mxu0 %vm275_vm0, %v14017_v35  ;;  %v14049_v35 = vld [vmem:[%s23962_s0 + $0x499] sm:$0xff] }
 0x2f4   :  { %16224 = vmatmul.mubr.msk.f32.gmra.mrb[118].mxu1 %vm275_vm0, %v2573_v38  ;;  %v12954_v38 = vld [vmem:[%s23962_s0 + $0x128] sm:$0xff] }
 0x2f5   :  { %17108 = vmatmul.mubr.msk.f32.gmra.mrb[54].mxu0 %vm275_vm0, %v14018_v44  ;;  %16226 = vmatprep.mubr.msk.f32.mxu1 %vm275_vm0, %v2574_v52  ;;  %v14050_v44 = vld [vmem:[%s23962_s0 + $0x4a1] sm:$0xff]  ;;  %v12955_v52 = vld [vmem:[%s23962_s0 + $0x138] sm:$0xff] }
 0x2f6   :  { %17110 = vmatprep.mubr.msk.f32.mxu0 %vm275_vm0, %v14019_v60  ;;  %v14051_v60 = vld [vmem:[%s23962_s0 + $0x4b1] sm:$0xff] }
 0x2f8   :  { %16227 = vmatmul.mubr.msk.f32.gmra.mrb[120].mxu1 %vm275_vm0, %v2575_v4  ;;  %v12956_v4 = vld [vmem:[%s23962_s0 + $0x140] sm:$0xff] }
 0x2f9   :  { %17111 = vmatmul.mubr.msk.f32.gmra.mrb[56].mxu0 %vm275_vm0, %v14020_v13  ;;  %16229 = vmatprep.mubr.msk.f32.mxu1 %vm275_vm0, %v2576_v21  ;;  %v14052_v13 = vld [vmem:[%s23962_s0 + $0x4b9] sm:$0xff]  ;;  %v12957_v21 = vld [vmem:[%s23962_s0 + $0x150] sm:$0xff] }
 0x2fa   :  { %17113 = vmatprep.mubr.msk.f32.mxu0 %vm275_vm0, %v14021_v31  ;;  %v14053_v31 = vld [vmem:[%s23962_s0 + $0x4c9] sm:$0xff] }
 0x2fc   :  { %16230 = vmatmul.mubr.msk.f32.gmra.mrb[122].mxu1 %vm275_vm0, %v2577_v34  ;;  %v12958_v34 = vld [vmem:[%s23962_s0 + $0x158] sm:$0xff] }
 0x2fd   :  { %17114 = vmatmul.mubr.msk.f32.gmra.mrb[58].mxu0 %vm275_vm0, %v14022_v36  ;;  %16232 = vmatprep.mubr.msk.f32.mxu1 %vm275_vm0, %v2578_v56  ;;  %v14054_v36 = vld [vmem:[%s23962_s0 + $0x4d1] sm:$0xff]  ;;  %v12959_v56 = vld [vmem:[%s23962_s0 + $0x168] sm:$0xff] }
 0x2fe   :  { %17116 = vmatprep.mubr.msk.f32.mxu0 %vm275_vm0, %v14023_v48  ;;  %v14055_v48 = vld [vmem:[%s23962_s0 + $0x4e1] sm:$0xff] }
 0x300   :  { %16233 = vmatmul.mubr.msk.f32.gmra.mrb[124].mxu1 %vm275_vm0, %v2579_v41  ;;  %v12960_v41 = vld [vmem:[%s23962_s0 + $0x170] sm:$0xff] }
 0x301   :  { %17117 = vmatmul.mubr.msk.f32.gmra.mrb[60].mxu0 %vm275_vm0, %v14024_v0  ;;  %16235 = vmatprep.mubr.msk.f32.mxu1 %vm275_vm0, %v2580_v43  ;;  %v14056_v0 = vld [vmem:[%s23962_s0 + $0x4e9] sm:$0xff]  ;;  %v12961_v43 = vld [vmem:[%s23962_s0 + $0x180] sm:$0xff] }
 0x302   :  { %17119 = vmatprep.mubr.msk.f32.mxu0 %vm275_vm0, %v14025_v45  ;;  %v14057_v45 = vld [vmem:[%s23962_s0 + $0x4f9] sm:$0xff] }
 0x304   :  { %16236 = vmatmul.mubr.msk.f32.gmra.mrb[126].mxu1 %vm275_vm0, %v2581_v47  ;;  %v12962_v47 = vld [vmem:[%s23962_s0 + $0x188] sm:$0xff] }
 0x305   :  { %17120 = vmatmul.mubr.msk.f32.gmra.mrb[62].mxu0 %vm275_vm0, %v14026_v49  ;;  %16242 = vmatprep.mubr.msk.f32.mxu1 %vm275_vm0, %v12931_v51  ;;  %v14058_v49 = vld [vmem:[%s23962_s0 + $0x501] sm:$0xff] }
 0x306   :  { %17122 = vmatprep.mubr.msk.f32.mxu0 %vm275_vm0, %v14027_v53  ;;  %v12963_v51 = vld [vmem:[%s23962_s0 + $0x1c8] sm:$0xff] }
 0x307   :  { %v14059_v53 = vld [vmem:[%s23962_s0 + $0x541] sm:$0xff] }
 0x308   :  { %16243 = vmatmul.mubr.msk.f32.vlgmr.msra.gmra.mrb[0].mxu1 %vm275_vm0, %v12932_v55  ;;  %v12964_v55 = vld [vmem:[%s23962_s0 + $0x1d0] sm:$0xff] }
 0x309   :  { %17123 = vmatmul.mubr.msk.f32.gmra.mrb[64].mxu0 %vm275_vm0, %v14028_v57  ;;  %17451 = vmatpush3.bf16.msra.mxu1 %v18516_v7  ;;  %v14031_v7 = vld [vmem:[%s23962_s0 + $0x3c1] sm:$0xff]  ;;  %v14060_v57 = vld [vmem:[%s23962_s0 + $0x549] sm:$0xff] }
 0x30a   :  { %16245 = vmatprep.mubr.msk.f32.mxu1 %vm275_vm0, %v12933_v59  ;;  %17125 = vmatprep.mubr.msk.f32.mxu0 %vm275_vm0, %v14029_v61  ;;  %v12965_v59 = vld [vmem:[%s23962_s0 + $0x1e0] sm:$0xff] }
 0x30b   :  { %v14061_v61 = vld [vmem:[%s23962_s0 + $0x559] sm:$0xff] }
 0x30c   :  { %16246 = vmatmul.mubr.msk.f32.gmra.mrb[2].mxu1 %vm275_vm0, %v12934_v63  ;;  %v12966_v63 = vld [vmem:[%s23962_s0 + $0x1e8] sm:$0xff] }
 0x30d   :  { %17126 = vmatmul.mubr.msk.f32.gmra.mrb[66].mxu0 %vm275_vm0, %v14030_v1  ;;  %16248 = vmatprep.mubr.msk.f32.mxu1 %vm275_vm0, %v12935_v37  ;;  %v14062_v1 = vld [vmem:[%s23962_s0 + $0x561] sm:$0xff]  ;;  %v12967_v37 = vld [vmem:[%s23962_s0 + $0x1f8] sm:$0xff] }
 0x30e   :  { %17128 = vmatprep.mubr.msk.f32.mxu0 %vm275_vm0, %v14031_v7  ;;  %v14063_v7 = vld [vmem:[%s23962_s0 + $0x571] sm:$0xff] }
 0x310   :  { %16249 = vmatmul.mubr.msk.f32.gmra.mrb[4].mxu1 %vm275_vm0, %v12936_v3  ;;  %v12968_v3 = vld [vmem:[%s23962_s0 + $0x200] sm:$0xff] }
 0x311   :  { %17129 = vmatmul.mubr.msk.f32.gmra.mrb[68].mxu0 %vm275_vm0, %v14032_v5  ;;  %16251 = vmatprep.mubr.msk.f32.mxu1 %vm275_vm0, %v12937_v8  ;;  %v14064_v5 = vld [vmem:[%s23962_s0 + $0x579] sm:$0xff]  ;;  %v12969_v8 = vld [vmem:[%s23962_s0 + $0x210] sm:$0xff] }
 0x312   :  { %17131 = vmatprep.mubr.msk.f32.mxu0 %vm275_vm0, %v14033_v10  ;;  %v14065_v10 = vld [vmem:[%s23962_s0 + $0x589] sm:$0xff] }
 0x314   :  { %16252 = vmatmul.mubr.msk.f32.gmra.mrb[6].mxu1 %vm275_vm0, %v12938_v12  ;;  %v12970_v12 = vld [vmem:[%s23962_s0 + $0x218] sm:$0xff] }
 0x315   :  { %17132 = vmatmul.mubr.msk.f32.gmra.mrb[70].mxu0 %vm275_vm0, %v14034_v14  ;;  %16254 = vmatprep.mubr.msk.f32.mxu1 %vm275_vm0, %v12939_v16  ;;  %v14066_v14 = vld [vmem:[%s23962_s0 + $0x591] sm:$0xff]  ;;  %v12971_v16 = vld [vmem:[%s23962_s0 + $0x228] sm:$0xff] }
 0x316   :  { %17134 = vmatprep.mubr.msk.f32.mxu0 %vm275_vm0, %v14035_v18  ;;  %v14067_v18 = vld [vmem:[%s23962_s0 + $0x5a1] sm:$0xff] }
 0x318   :  { %16255 = vmatmul.mubr.msk.f32.gmra.mrb[8].mxu1 %vm275_vm0, %v12940_v20  ;;  %v12972_v20 = vld [vmem:[%s23962_s0 + $0x230] sm:$0xff] }
 0x319   :  { %17135 = vmatmul.mubr.msk.f32.gmra.mrb[72].mxu0 %vm275_vm0, %v14036_v22  ;;  %16257 = vmatprep.mubr.msk.f32.mxu1 %vm275_vm0, %v12941_v24  ;;  %v14068_v22 = vld [vmem:[%s23962_s0 + $0x5a9] sm:$0xff]  ;;  %v12973_v24 = vld [vmem:[%s23962_s0 + $0x240] sm:$0xff] }
 0x31a   :  { %17137 = vmatprep.mubr.msk.f32.mxu0 %vm275_vm0, %v14037_v33  ;;  %v14069_v33 = vld [vmem:[%s23962_s0 + $0x5b9] sm:$0xff] }
 0x31c   :  { %16258 = vmatmul.mubr.msk.f32.gmra.mrb[10].mxu1 %vm275_vm0, %v12942_v26  ;;  %v12974_v26 = vld [vmem:[%s23962_s0 + $0x248] sm:$0xff] }
 0x31d   :  { %17138 = vmatmul.mubr.msk.f32.gmra.mrb[74].mxu0 %vm275_vm0, %v14038_v30  ;;  %16260 = vmatprep.mubr.msk.f32.mxu1 %vm275_vm0, %v12943_v40  ;;  %v14070_v30 = vld [vmem:[%s23962_s0 + $0x5c1] sm:$0xff]  ;;  %v12975_v40 = vld [vmem:[%s23962_s0 + $0x258] sm:$0xff] }
 0x31e   :  { %17140 = vmatprep.mubr.msk.f32.mxu0 %vm275_vm0, %v14039_v28  ;;  %v14071_v28 = vld [vmem:[%s23962_s0 + $0x5d1] sm:$0xff] }
 0x320   :  { %16261 = vmatmul.mubr.msk.f32.gmra.mrb[12].mxu1 %vm275_vm0, %v12944_v9  ;;  %v12976_v9 = vld [vmem:[%s23962_s0 + $0x260] sm:$0xff] }
 0x321   :  { %17141 = vmatmul.mubr.msk.f32.gmra.mrb[76].mxu0 %vm275_vm0, %v14040_v25  ;;  %16263 = vmatprep.mubr.msk.f32.mxu1 %vm275_vm0, %v12945_v17  ;;  %v14072_v25 = vld [vmem:[%s23962_s0 + $0x5d9] sm:$0xff]  ;;  %v12977_v17 = vld [vmem:[%s23962_s0 + $0x270] sm:$0xff] }
 0x322   :  { %17143 = vmatprep.mubr.msk.f32.mxu0 %vm275_vm0, %v14041_v39  ;;  %v14073_v39 = vld [vmem:[%s23962_s0 + $0x5e9] sm:$0xff] }
 0x324   :  { %16264 = vmatmul.mubr.msk.f32.gmra.mrb[14].mxu1 %vm275_vm0, %v12946_v42  ;;  %v12978_v42 = vld [vmem:[%s23962_s0 + $0x278] sm:$0xff] }
 0x325   :  { %17144 = vmatmul.mubr.msk.f32.gmra.mrb[78].mxu0 %vm275_vm0, %v14042_v46  ;;  %16266 = vmatprep.mubr.msk.f32.mxu1 %vm275_vm0, %v12947_v50  ;;  %v14074_v46 = vld [vmem:[%s23962_s0 + $0x5f1] sm:$0xff]  ;;  %v12979_v50 = vld [vmem:[%s23962_s0 + $0x288] sm:$0xff] }
 0x326   :  { %17146 = vmatprep.mubr.msk.f32.mxu0 %vm275_vm0, %v14043_v54  ;;  %v14075_v54 = vld [vmem:[%s23962_s0 + $0x601] sm:$0xff] }
 0x328   :  { %16267 = vmatmul.mubr.msk.f32.gmra.mrb[16].mxu1 %vm275_vm0, %v12948_v58  ;;  %v12980_v58 = vld [vmem:[%s23962_s0 + $0x290] sm:$0xff] }
 0x329   :  { %17147 = vmatmul.mubr.msk.f32.gmra.mrb[80].mxu0 %vm275_vm0, %v14044_v62  ;;  %16269 = vmatprep.mubr.msk.f32.mxu1 %vm275_vm0, %v12949_v2  ;;  %v14076_v62 = vld [vmem:[%s23962_s0 + $0x609] sm:$0xff]  ;;  %v12981_v2 = vld [vmem:[%s23962_s0 + $0x2a0] sm:$0xff] }
 0x32a   :  { %17149 = vmatprep.mubr.msk.f32.mxu0 %vm275_vm0, %v14045_v6  ;;  %v14077_v6 = vld [vmem:[%s23962_s0 + $0x619] sm:$0xff] }
 0x32c   :  { %16270 = vmatmul.mubr.msk.f32.gmra.mrb[18].mxu1 %vm275_vm0, %v12950_v11  ;;  %v12982_v11 = vld [vmem:[%s23962_s0 + $0x2a8] sm:$0xff] }
 0x32d   :  { %17150 = vmatmul.mubr.msk.f32.gmra.mrb[82].mxu0 %vm275_vm0, %v14046_v15  ;;  %16272 = vmatprep.mubr.msk.f32.mxu1 %vm275_vm0, %v12951_v19  ;;  %v14078_v15 = vld [vmem:[%s23962_s0 + $0x621] sm:$0xff]  ;;  %v12983_v19 = vld [vmem:[%s23962_s0 + $0x2b8] sm:$0xff] }
 0x32e   :  { %17152 = vmatprep.mubr.msk.f32.mxu0 %vm275_vm0, %v14047_v23  ;;  %v14079_v23 = vld [vmem:[%s23962_s0 + $0x631] sm:$0xff] }
 0x330   :  { %16273 = vmatmul.mubr.msk.f32.gmra.mrb[20].mxu1 %vm275_vm0, %v12952_v27  ;;  %v12984_v27 = vld [vmem:[%s23962_s0 + $0x2c0] sm:$0xff] }
 0x331   :  { %17153 = vmatmul.mubr.msk.f32.gmra.mrb[84].mxu0 %vm275_vm0, %v14048_v32  ;;  %16275 = vmatprep.mubr.msk.f32.mxu1 %vm275_vm0, %v12953_v29  ;;  %v14080_v32 = vld [vmem:[%s23962_s0 + $0x639] sm:$0xff]  ;;  %v12985_v29 = vld [vmem:[%s23962_s0 + $0x2d0] sm:$0xff] }
 0x332   :  { %17155 = vmatprep.mubr.msk.f32.mxu0 %vm275_vm0, %v14049_v35  ;;  %v14081_v35 = vld [vmem:[%s23962_s0 + $0x649] sm:$0xff] }
 0x334   :  { %16276 = vmatmul.mubr.msk.f32.gmra.mrb[22].mxu1 %vm275_vm0, %v12954_v38  ;;  %v12986_v38 = vld [vmem:[%s23962_s0 + $0x2d8] sm:$0xff] }
 0x335   :  { %17156 = vmatmul.mubr.msk.f32.gmra.mrb[86].mxu0 %vm275_vm0, %v14050_v44  ;;  %16278 = vmatprep.mubr.msk.f32.mxu1 %vm275_vm0, %v12955_v52  ;;  %v14082_v44 = vld [vmem:[%s23962_s0 + $0x651] sm:$0xff]  ;;  %v12987_v52 = vld [vmem:[%s23962_s0 + $0x2e8] sm:$0xff] }
 0x336   :  { %17158 = vmatprep.mubr.msk.f32.mxu0 %vm275_vm0, %v14051_v60  ;;  %v14083_v60 = vld [vmem:[%s23962_s0 + $0x661] sm:$0xff] }
 0x338   :  { %16279 = vmatmul.mubr.msk.f32.gmra.mrb[24].mxu1 %vm275_vm0, %v12956_v4  ;;  %v12988_v4 = vld [vmem:[%s23962_s0 + $0x2f0] sm:$0xff] }
 0x339   :  { %17159 = vmatmul.mubr.msk.f32.gmra.mrb[88].mxu0 %vm275_vm0, %v14052_v13  ;;  %16281 = vmatprep.mubr.msk.f32.mxu1 %vm275_vm0, %v12957_v21  ;;  %v14084_v13 = vld [vmem:[%s23962_s0 + $0x669] sm:$0xff]  ;;  %v12989_v21 = vld [vmem:[%s23962_s0 + $0x300] sm:$0xff] }
 0x33a   :  { %17161 = vmatprep.mubr.msk.f32.mxu0 %vm275_vm0, %v14053_v31  ;;  %v14085_v31 = vld [vmem:[%s23962_s0 + $0x679] sm:$0xff] }
 0x33c   :  { %16282 = vmatmul.mubr.msk.f32.gmra.mrb[26].mxu1 %vm275_vm0, %v12958_v34  ;;  %v12990_v34 = vld [vmem:[%s23962_s0 + $0x308] sm:$0xff] }
 0x33d   :  { %17162 = vmatmul.mubr.msk.f32.gmra.mrb[90].mxu0 %vm275_vm0, %v14054_v36  ;;  %16284 = vmatprep.mubr.msk.f32.mxu1 %vm275_vm0, %v12959_v56  ;;  %v14086_v36 = vld [vmem:[%s23962_s0 + $0x681] sm:$0xff]  ;;  %v12991_v56 = vld [vmem:[%s23962_s0 + $0x318] sm:$0xff] }
 0x33e   :  { %17164 = vmatprep.mubr.msk.f32.mxu0 %vm275_vm0, %v14055_v48  ;;  %v14087_v48 = vld [vmem:[%s23962_s0 + $0x691] sm:$0xff] }
 0x340   :  { %16285 = vmatmul.mubr.msk.f32.gmra.mrb[28].mxu1 %vm275_vm0, %v12960_v41  ;;  %v12992_v41 = vld [vmem:[%s23962_s0 + $0x320] sm:$0xff] }
 0x341   :  { %17165 = vmatmul.mubr.msk.f32.gmra.mrb[92].mxu0 %vm275_vm0, %v14056_v0  ;;  %16287 = vmatprep.mubr.msk.f32.mxu1 %vm275_vm0, %v12961_v43  ;;  %v14088_v0 = vld [vmem:[%s23962_s0 + $0x699] sm:$0xff]  ;;  %v12993_v43 = vld [vmem:[%s23962_s0 + $0x330] sm:$0xff] }
 0x342   :  { %17167 = vmatprep.mubr.msk.f32.mxu0 %vm275_vm0, %v14057_v45  ;;  %v14089_v45 = vld [vmem:[%s23962_s0 + $0x6a9] sm:$0xff] }
 0x344   :  { %16288 = vmatmul.mubr.msk.f32.gmra.mrb[30].mxu1 %vm275_vm0, %v12962_v47  ;;  %v12994_v47 = vld [vmem:[%s23962_s0 + $0x338] sm:$0xff] }
 0x345   :  { %17168 = vmatmul.mubr.msk.f32.gmra.mrb[94].mxu0 %vm275_vm0, %v14058_v49  ;;  %16290 = vmatprep.mubr.msk.f32.mxu1 %vm275_vm0, %v12963_v51  ;;  %v14090_v49 = vld [vmem:[%s23962_s0 + $0x6b1] sm:$0xff] }
 0x346   :  { %17170 = vmatprep.mubr.msk.f32.mxu0 %vm275_vm0, %v14059_v53  ;;  %v12995_v51 = vld [vmem:[%s23962_s0 + $0x378] sm:$0xff] }
 0x347   :  { %v14221_v53 = vld [vmem:[%s23962_s0 + $0x32] sm:$0xff] }
 0x348   :  { %16291 = vmatmul.mubr.msk.f32.gmra.mrb[32].mxu1 %vm275_vm0, %v12964_v55  ;;  %v12996_v55 = vld [vmem:[%s23962_s0 + $0x380] sm:$0xff] }
 0x349   :  { %17171 = vmatmul.mubr.msk.f32.gmra.mrb[96].mxu0 %vm275_vm0, %v14060_v57  ;;  %16293 = vmatprep.mubr.msk.f32.mxu1 %vm275_vm0, %v12965_v59  ;;  %v14222_v57 = vld [vmem:[%s23962_s0 + $0x3a] sm:$0xff]  ;;  %v12997_v59 = vld [vmem:[%s23962_s0 + $0x390] sm:$0xff] }
 0x34a   :  { %17173 = vmatprep.mubr.msk.f32.mxu0 %vm275_vm0, %v14061_v61  ;;  %v14223_v61 = vld [vmem:[%s23962_s0 + $0x4a] sm:$0xff] }
 0x34c   :  { %16294 = vmatmul.mubr.msk.f32.gmra.mrb[34].mxu1 %vm275_vm0, %v12966_v63  ;;  %v12998_v63 = vld [vmem:[%s23962_s0 + $0x398] sm:$0xff] }
 0x34d   :  { %17174 = vmatmul.mubr.msk.f32.gmra.mrb[98].mxu0 %vm275_vm0, %v14062_v1  ;;  %16296 = vmatprep.mubr.msk.f32.mxu1 %vm275_vm0, %v12967_v37  ;;  %v14224_v1 = vld [vmem:[%s23962_s0 + $0x52] sm:$0xff]  ;;  %v12999_v37 = vld [vmem:[%s23962_s0 + $0x3a8] sm:$0xff] }
 0x34e   :  { %17176 = vmatprep.mubr.msk.f32.mxu0 %vm275_vm0, %v14063_v7  ;;  %v14225_v7 = vld [vmem:[%s23962_s0 + $0x62] sm:$0xff] }
 0x350   :  { %16297 = vmatmul.mubr.msk.f32.gmra.mrb[36].mxu1 %vm275_vm0, %v12968_v3  ;;  %v13000_v3 = vld [vmem:[%s23962_s0 + $0x3b0] sm:$0xff] }
 0x351   :  { %17177 = vmatmul.mubr.msk.f32.gmra.mrb[100].mxu0 %vm275_vm0, %v14064_v5  ;;  %16299 = vmatprep.mubr.msk.f32.mxu1 %vm275_vm0, %v12969_v8  ;;  %v14226_v5 = vld [vmem:[%s23962_s0 + $0x6a] sm:$0xff]  ;;  %v13001_v8 = vld [vmem:[%s23962_s0 + $0x3c0] sm:$0xff] }
 0x352   :  { %17179 = vmatprep.mubr.msk.f32.mxu0 %vm275_vm0, %v14065_v10  ;;  %v14227_v10 = vld [vmem:[%s23962_s0 + $0x7a] sm:$0xff] }
 0x354   :  { %16300 = vmatmul.mubr.msk.f32.gmra.mrb[38].mxu1 %vm275_vm0, %v12970_v12  ;;  %v13002_v12 = vld [vmem:[%s23962_s0 + $0x3c8] sm:$0xff] }
 0x355   :  { %17180 = vmatmul.mubr.msk.f32.gmra.mrb[102].mxu0 %vm275_vm0, %v14066_v14  ;;  %16302 = vmatprep.mubr.msk.f32.mxu1 %vm275_vm0, %v12971_v16  ;;  %v14228_v14 = vld [vmem:[%s23962_s0 + $0x82] sm:$0xff]  ;;  %v13003_v16 = vld [vmem:[%s23962_s0 + $0x3d8] sm:$0xff] }
 0x356   :  { %17182 = vmatprep.mubr.msk.f32.mxu0 %vm275_vm0, %v14067_v18  ;;  %v14229_v18 = vld [vmem:[%s23962_s0 + $0x92] sm:$0xff] }
 0x358   :  { %16303 = vmatmul.mubr.msk.f32.gmra.mrb[40].mxu1 %vm275_vm0, %v12972_v20  ;;  %v13004_v20 = vld [vmem:[%s23962_s0 + $0x3e0] sm:$0xff] }
 0x359   :  { %17183 = vmatmul.mubr.msk.f32.gmra.mrb[104].mxu0 %vm275_vm0, %v14068_v22  ;;  %16305 = vmatprep.mubr.msk.f32.mxu1 %vm275_vm0, %v12973_v24  ;;  %v14230_v22 = vld [vmem:[%s23962_s0 + $0x9a] sm:$0xff]  ;;  %v13005_v24 = vld [vmem:[%s23962_s0 + $0x3f0] sm:$0xff] }
 0x35a   :  { %17185 = vmatprep.mubr.msk.f32.mxu0 %vm275_vm0, %v14069_v33  ;;  %v14231_v33 = vld [vmem:[%s23962_s0 + $0xaa] sm:$0xff] }
 0x35c   :  { %16306 = vmatmul.mubr.msk.f32.gmra.mrb[42].mxu1 %vm275_vm0, %v12974_v26  ;;  %v13006_v26 = vld [vmem:[%s23962_s0 + $0x3f8] sm:$0xff] }
 0x35d   :  { %17186 = vmatmul.mubr.msk.f32.gmra.mrb[106].mxu0 %vm275_vm0, %v14070_v30  ;;  %16308 = vmatprep.mubr.msk.f32.mxu1 %vm275_vm0, %v12975_v40  ;;  %v14232_v30 = vld [vmem:[%s23962_s0 + $0xb2] sm:$0xff]  ;;  %v13007_v40 = vld [vmem:[%s23962_s0 + $0x408] sm:$0xff] }
 0x35e   :  { %17188 = vmatprep.mubr.msk.f32.mxu0 %vm275_vm0, %v14071_v28  ;;  %v14233_v28 = vld [vmem:[%s23962_s0 + $0xc2] sm:$0xff] }
 0x360   :  { %16309 = vmatmul.mubr.msk.f32.gmra.mrb[44].mxu1 %vm275_vm0, %v12976_v9  ;;  %v13008_v9 = vld [vmem:[%s23962_s0 + $0x410] sm:$0xff] }
 0x361   :  { %17189 = vmatmul.mubr.msk.f32.gmra.mrb[108].mxu0 %vm275_vm0, %v14072_v25  ;;  %16311 = vmatprep.mubr.msk.f32.mxu1 %vm275_vm0, %v12977_v17  ;;  %v14234_v25 = vld [vmem:[%s23962_s0 + $0xca] sm:$0xff]  ;;  %v13009_v17 = vld [vmem:[%s23962_s0 + $0x420] sm:$0xff] }
 0x362   :  { %17191 = vmatprep.mubr.msk.f32.mxu0 %vm275_vm0, %v14073_v39  ;;  %v14235_v39 = vld [vmem:[%s23962_s0 + $0xda] sm:$0xff] }
 0x364   :  { %16312 = vmatmul.mubr.msk.f32.gmra.mrb[46].mxu1 %vm275_vm0, %v12978_v42  ;;  %v13010_v42 = vld [vmem:[%s23962_s0 + $0x428] sm:$0xff] }
 0x365   :  { %17192 = vmatmul.mubr.msk.f32.gmra.mrb[110].mxu0 %vm275_vm0, %v14074_v46  ;;  %16314 = vmatprep.mubr.msk.f32.mxu1 %vm275_vm0, %v12979_v50  ;;  %v14236_v46 = vld [vmem:[%s23962_s0 + $0xe2] sm:$0xff]  ;;  %v13011_v50 = vld [vmem:[%s23962_s0 + $0x438] sm:$0xff] }
 0x366   :  { %17194 = vmatprep.mubr.msk.f32.mxu0 %vm275_vm0, %v14075_v54  ;;  %v14237_v54 = vld [vmem:[%s23962_s0 + $0xf2] sm:$0xff] }
 0x368   :  { %16315 = vmatmul.mubr.msk.f32.gmra.mrb[48].mxu1 %vm275_vm0, %v12980_v58  ;;  %v13012_v58 = vld [vmem:[%s23962_s0 + $0x440] sm:$0xff] }
 0x369   :  { %17195 = vmatmul.mubr.msk.f32.gmra.mrb[112].mxu0 %vm275_vm0, %v14076_v62  ;;  %16317 = vmatprep.mubr.msk.f32.mxu1 %vm275_vm0, %v12981_v2  ;;  %v14238_v62 = vld [vmem:[%s23962_s0 + $0xfa] sm:$0xff]  ;;  %v13013_v2 = vld [vmem:[%s23962_s0 + $0x450] sm:$0xff] }
 0x36a   :  { %17197 = vmatprep.mubr.msk.f32.mxu0 %vm275_vm0, %v14077_v6  ;;  %v14239_v6 = vld [vmem:[%s23962_s0 + $0x10a] sm:$0xff] }
 0x36c   :  { %16318 = vmatmul.mubr.msk.f32.gmra.mrb[50].mxu1 %vm275_vm0, %v12982_v11  ;;  %v13014_v11 = vld [vmem:[%s23962_s0 + $0x458] sm:$0xff] }
 0x36d   :  { %17198 = vmatmul.mubr.msk.f32.gmra.mrb[114].mxu0 %vm275_vm0, %v14078_v15  ;;  %16320 = vmatprep.mubr.msk.f32.mxu1 %vm275_vm0, %v12983_v19  ;;  %v14240_v15 = vld [vmem:[%s23962_s0 + $0x112] sm:$0xff]  ;;  %v13015_v19 = vld [vmem:[%s23962_s0 + $0x468] sm:$0xff] }
 0x36e   :  { %17200 = vmatprep.mubr.msk.f32.mxu0 %vm275_vm0, %v14079_v23  ;;  %v14241_v23 = vld [vmem:[%s23962_s0 + $0x122] sm:$0xff] }
 0x370   :  { %16321 = vmatmul.mubr.msk.f32.gmra.mrb[52].mxu1 %vm275_vm0, %v12984_v27  ;;  %v13016_v27 = vld [vmem:[%s23962_s0 + $0x470] sm:$0xff] }
 0x371   :  { %17201 = vmatmul.mubr.msk.f32.gmra.mrb[116].mxu0 %vm275_vm0, %v14080_v32  ;;  %16323 = vmatprep.mubr.msk.f32.mxu1 %vm275_vm0, %v12985_v29  ;;  %v14242_v32 = vld [vmem:[%s23962_s0 + $0x12a] sm:$0xff]  ;;  %v13017_v29 = vld [vmem:[%s23962_s0 + $0x480] sm:$0xff] }
 0x372   :  { %17203 = vmatprep.mubr.msk.f32.mxu0 %vm275_vm0, %v14081_v35  ;;  %v14243_v35 = vld [vmem:[%s23962_s0 + $0x13a] sm:$0xff] }
 0x374   :  { %16324 = vmatmul.mubr.msk.f32.gmra.mrb[54].mxu1 %vm275_vm0, %v12986_v38  ;;  %v13018_v38 = vld [vmem:[%s23962_s0 + $0x488] sm:$0xff] }
 0x375   :  { %17204 = vmatmul.mubr.msk.f32.gmra.mrb[118].mxu0 %vm275_vm0, %v14082_v44  ;;  %16326 = vmatprep.mubr.msk.f32.mxu1 %vm275_vm0, %v12987_v52  ;;  %v14244_v44 = vld [vmem:[%s23962_s0 + $0x142] sm:$0xff]  ;;  %v13019_v52 = vld [vmem:[%s23962_s0 + $0x498] sm:$0xff] }
 0x376   :  { %17206 = vmatprep.mubr.msk.f32.mxu0 %vm275_vm0, %v14083_v60  ;;  %v14245_v60 = vld [vmem:[%s23962_s0 + $0x152] sm:$0xff] }
 0x378   :  { %16327 = vmatmul.mubr.msk.f32.gmra.mrb[56].mxu1 %vm275_vm0, %v12988_v4  ;;  %v13020_v4 = vld [vmem:[%s23962_s0 + $0x4a0] sm:$0xff] }
 0x379   :  { %17207 = vmatmul.mubr.msk.f32.gmra.mrb[120].mxu0 %vm275_vm0, %v14084_v13  ;;  %16329 = vmatprep.mubr.msk.f32.mxu1 %vm275_vm0, %v12989_v21  ;;  %v14246_v13 = vld [vmem:[%s23962_s0 + $0x15a] sm:$0xff]  ;;  %v13021_v21 = vld [vmem:[%s23962_s0 + $0x4b0] sm:$0xff] }
 0x37a   :  { %17209 = vmatprep.mubr.msk.f32.mxu0 %vm275_vm0, %v14085_v31  ;;  %v14247_v31 = vld [vmem:[%s23962_s0 + $0x16a] sm:$0xff] }
 0x37c   :  { %16330 = vmatmul.mubr.msk.f32.gmra.mrb[58].mxu1 %vm275_vm0, %v12990_v34  ;;  %v13022_v34 = vld [vmem:[%s23962_s0 + $0x4b8] sm:$0xff] }
 0x37d   :  { %17210 = vmatmul.mubr.msk.f32.gmra.mrb[122].mxu0 %vm275_vm0, %v14086_v36  ;;  %16332 = vmatprep.mubr.msk.f32.mxu1 %vm275_vm0, %v12991_v56  ;;  %v14248_v36 = vld [vmem:[%s23962_s0 + $0x172] sm:$0xff]  ;;  %v13023_v56 = vld [vmem:[%s23962_s0 + $0x4c8] sm:$0xff] }
 0x37e   :  { %17212 = vmatprep.mubr.msk.f32.mxu0 %vm275_vm0, %v14087_v48  ;;  %v14249_v48 = vld [vmem:[%s23962_s0 + $0x182] sm:$0xff] }
 0x380   :  { %16333 = vmatmul.mubr.msk.f32.gmra.mrb[60].mxu1 %vm275_vm0, %v12992_v41  ;;  %v13024_v41 = vld [vmem:[%s23962_s0 + $0x4d0] sm:$0xff] }
 0x381   :  { %17213 = vmatmul.mubr.msk.f32.gmra.mrb[124].mxu0 %vm275_vm0, %v14088_v0  ;;  %16335 = vmatprep.mubr.msk.f32.mxu1 %vm275_vm0, %v12993_v43  ;;  %v14250_v0 = vld [vmem:[%s23962_s0 + $0x18a] sm:$0xff]  ;;  %v13025_v43 = vld [vmem:[%s23962_s0 + $0x4e0] sm:$0xff] }
 0x382   :  { %17215 = vmatprep.mubr.msk.f32.mxu0 %vm275_vm0, %v14089_v45  ;;  %v14251_v45 = vld [vmem:[%s23962_s0 + $0x19a] sm:$0xff] }
 0x384   :  { %16336 = vmatmul.mubr.msk.f32.gmra.mrb[62].mxu1 %vm275_vm0, %v12994_v47  ;;  %v13026_v47 = vld [vmem:[%s23962_s0 + $0x4e8] sm:$0xff] }
 0x385   :  { %17216 = vmatmul.mubr.msk.f32.gmra.mrb[126].mxu0 %vm275_vm0, %v14090_v49  ;;  %16338 = vmatprep.mubr.msk.f32.mxu1 %vm275_vm0, %v12995_v51  ;;  %v14252_v49 = vld [vmem:[%s23962_s0 + $0x1a2] sm:$0xff] }
 0x386   :  { %17222 = vmatprep.mubr.msk.f32.mxu0 %vm275_vm0, %v14221_v53  ;;  %v13027_v51 = vld [vmem:[%s23962_s0 + $0x528] sm:$0xff] }
 0x387   :  { %v14253_v53 = vld [vmem:[%s23962_s0 + $0x1e2] sm:$0xff] }
 0x388   :  { %16339 = vmatmul.mubr.msk.f32.gmra.mrb[64].mxu1 %vm275_vm0, %v12996_v55  ;;  %v13028_v55 = vld [vmem:[%s23962_s0 + $0x530] sm:$0xff] }
 0x389   :  { %17223 = vmatmul.mubr.msk.f32.vlgmr.msra.gmra.mrb[0].mxu0 %vm275_vm0, %v14222_v57  ;;  %16341 = vmatprep.mubr.msk.f32.mxu1 %vm275_vm0, %v12997_v59  ;;  %v14254_v57 = vld [vmem:[%s23962_s0 + $0x1ea] sm:$0xff]  ;;  %v13029_v59 = vld [vmem:[%s23962_s0 + $0x540] sm:$0xff] }
 0x38a   :  { %17225 = vmatprep.mubr.msk.f32.mxu0 %vm275_vm0, %v14223_v61  ;;  %v14255_v61 = vld [vmem:[%s23962_s0 + $0x1fa] sm:$0xff] }
 0x38c   :  { %16342 = vmatmul.mubr.msk.f32.gmra.mrb[66].mxu1 %vm275_vm0, %v12998_v63  ;;  %v13030_v63 = vld [vmem:[%s23962_s0 + $0x548] sm:$0xff] }
 0x38d   :  { %17226 = vmatmul.mubr.msk.f32.gmra.mrb[2].mxu0 %vm275_vm0, %v14224_v1  ;;  %16344 = vmatprep.mubr.msk.f32.mxu1 %vm275_vm0, %v12999_v37  ;;  %v14256_v1 = vld [vmem:[%s23962_s0 + $0x202] sm:$0xff]  ;;  %v13031_v37 = vld [vmem:[%s23962_s0 + $0x558] sm:$0xff] }
 0x38e   :  { %17228 = vmatprep.mubr.msk.f32.mxu0 %vm275_vm0, %v14225_v7  ;;  %v14257_v7 = vld [vmem:[%s23962_s0 + $0x212] sm:$0xff] }
 0x390   :  { %16345 = vmatmul.mubr.msk.f32.gmra.mrb[68].mxu1 %vm275_vm0, %v13000_v3  ;;  %v13032_v3 = vld [vmem:[%s23962_s0 + $0x560] sm:$0xff] }
 0x391   :  { %17229 = vmatmul.mubr.msk.f32.gmra.mrb[4].mxu0 %vm275_vm0, %v14226_v5  ;;  %16347 = vmatprep.mubr.msk.f32.mxu1 %vm275_vm0, %v13001_v8  ;;  %v14258_v5 = vld [vmem:[%s23962_s0 + $0x21a] sm:$0xff]  ;;  %v13033_v8 = vld [vmem:[%s23962_s0 + $0x570] sm:$0xff] }
 0x392   :  { %17231 = vmatprep.mubr.msk.f32.mxu0 %vm275_vm0, %v14227_v10  ;;  %v14259_v10 = vld [vmem:[%s23962_s0 + $0x22a] sm:$0xff] }
 0x394   :  { %16348 = vmatmul.mubr.msk.f32.gmra.mrb[70].mxu1 %vm275_vm0, %v13002_v12  ;;  %v13034_v12 = vld [vmem:[%s23962_s0 + $0x578] sm:$0xff] }
 0x395   :  { %17232 = vmatmul.mubr.msk.f32.gmra.mrb[6].mxu0 %vm275_vm0, %v14228_v14  ;;  %16350 = vmatprep.mubr.msk.f32.mxu1 %vm275_vm0, %v13003_v16  ;;  %v14260_v14 = vld [vmem:[%s23962_s0 + $0x232] sm:$0xff]  ;;  %v13035_v16 = vld [vmem:[%s23962_s0 + $0x588] sm:$0xff] }
 0x396   :  { %17234 = vmatprep.mubr.msk.f32.mxu0 %vm275_vm0, %v14229_v18  ;;  %v14261_v18 = vld [vmem:[%s23962_s0 + $0x242] sm:$0xff] }
 0x398   :  { %16351 = vmatmul.mubr.msk.f32.gmra.mrb[72].mxu1 %vm275_vm0, %v13004_v20  ;;  %v13036_v20 = vld [vmem:[%s23962_s0 + $0x590] sm:$0xff] }
 0x399   :  { %17235 = vmatmul.mubr.msk.f32.gmra.mrb[8].mxu0 %vm275_vm0, %v14230_v22  ;;  %16353 = vmatprep.mubr.msk.f32.mxu1 %vm275_vm0, %v13005_v24  ;;  %v14262_v22 = vld [vmem:[%s23962_s0 + $0x24a] sm:$0xff]  ;;  %v13037_v24 = vld [vmem:[%s23962_s0 + $0x5a0] sm:$0xff] }
 0x39a   :  { %17237 = vmatprep.mubr.msk.f32.mxu0 %vm275_vm0, %v14231_v33  ;;  %v14263_v33 = vld [vmem:[%s23962_s0 + $0x25a] sm:$0xff] }
 0x39c   :  { %16354 = vmatmul.mubr.msk.f32.gmra.mrb[74].mxu1 %vm275_vm0, %v13006_v26  ;;  %v13038_v26 = vld [vmem:[%s23962_s0 + $0x5a8] sm:$0xff] }
 0x39d   :  { %17238 = vmatmul.mubr.msk.f32.gmra.mrb[10].mxu0 %vm275_vm0, %v14232_v30  ;;  %16356 = vmatprep.mubr.msk.f32.mxu1 %vm275_vm0, %v13007_v40  ;;  %v14264_v30 = vld [vmem:[%s23962_s0 + $0x262] sm:$0xff]  ;;  %v13039_v40 = vld [vmem:[%s23962_s0 + $0x5b8] sm:$0xff] }
 0x39e   :  { %17240 = vmatprep.mubr.msk.f32.mxu0 %vm275_vm0, %v14233_v28 }
 0x3a0   :  { %16357 = vmatmul.mubr.msk.f32.gmra.mrb[76].mxu1 %vm275_vm0, %v13008_v9  ;;  %v14265_v9 = vld [vmem:[%s23962_s0 + $0x272] sm:$0xff] }
 0x3a1   :  { %17241 = vmatmul.mubr.msk.f32.gmra.mrb[12].mxu0 %vm275_vm0, %v14234_v25  ;;  %16359 = vmatprep.mubr.msk.f32.mxu1 %vm275_vm0, %v13009_v17  ;;  %v13040_v17 = vld [vmem:[%s23962_s0 + $0x5c0] sm:$0xff] }
 0x3a2   :  { %17243 = vmatprep.mubr.msk.f32.mxu0 %vm275_vm0, %v14235_v39  ;;  %v14266_v39 = vld [vmem:[%s23962_s0 + $0x27a] sm:$0xff] }
 0x3a4   :  { %16360 = vmatmul.mubr.msk.f32.gmra.mrb[78].mxu1 %vm275_vm0, %v13010_v42  ;;  %v13041_v42 = vld [vmem:[%s23962_s0 + $0x5d0] sm:$0xff] }
 0x3a5   :  { %17244 = vmatmul.mubr.msk.f32.gmra.mrb[14].mxu0 %vm275_vm0, %v14236_v46  ;;  %16362 = vmatprep.mubr.msk.f32.mxu1 %vm275_vm0, %v13011_v50  ;;  %v14267_v50 = vld [vmem:[%s23962_s0 + $0x28a] sm:$0xff] }
 0x3a6   :  { %17246 = vmatprep.mubr.msk.f32.mxu0 %vm275_vm0, %v14237_v54 }
 0x3a8   :  { %16363 = vmatmul.mubr.msk.f32.gmra.mrb[80].mxu1 %vm275_vm0, %v13012_v58  ;;  %v13042_v58 = vld [vmem:[%s23962_s0 + $0x5d8] sm:$0xff] }
 0x3a9   :  { %17247 = vmatmul.mubr.msk.f32.gmra.mrb[16].mxu0 %vm275_vm0, %v14238_v62  ;;  %16365 = vmatprep.mubr.msk.f32.mxu1 %vm275_vm0, %v13013_v2  ;;  %v14268_v62 = vld [vmem:[%s23962_s0 + $0x292] sm:$0xff]  ;;  %v13043_v2 = vld [vmem:[%s23962_s0 + $0x5e8] sm:$0xff] }
 0x3aa   :  { %17249 = vmatprep.mubr.msk.f32.mxu0 %vm275_vm0, %v14239_v6 }
 0x3ac   :  { %16366 = vmatmul.mubr.msk.f32.gmra.mrb[82].mxu1 %vm275_vm0, %v13014_v11  ;;  %v14269_v11 = vld [vmem:[%s23962_s0 + $0x2a2] sm:$0xff] }
 0x3ad   :  { %17250 = vmatmul.mubr.msk.f32.gmra.mrb[18].mxu0 %vm275_vm0, %v14240_v15  ;;  %16368 = vmatprep.mubr.msk.f32.mxu1 %vm275_vm0, %v13015_v19  ;;  %v13044_v19 = vld [vmem:[%s23962_s0 + $0x5f0] sm:$0xff] }
 0x3ae   :  { %17252 = vmatprep.mubr.msk.f32.mxu0 %vm275_vm0, %v14241_v23  ;;  %v14270_v23 = vld [vmem:[%s23962_s0 + $0x2aa] sm:$0xff] }
 0x3b0   :  { %16369 = vmatmul.mubr.msk.f32.gmra.mrb[84].mxu1 %vm275_vm0, %v13016_v27  ;;  %v13045_v27 = vld [vmem:[%s23962_s0 + $0x600] sm:$0xff] }
 0x3b1   :  { %17253 = vmatmul.mubr.msk.f32.gmra.mrb[20].mxu0 %vm275_vm0, %v14242_v32  ;;  %16371 = vmatprep.mubr.msk.f32.mxu1 %vm275_vm0, %v13017_v29  ;;  %v14271_v29 = vld [vmem:[%s23962_s0 + $0x2ba] sm:$0xff] }
 0x3b2   :  { %17255 = vmatprep.mubr.msk.f32.mxu0 %vm275_vm0, %v14243_v35 }
 0x3b4   :  { %16372 = vmatmul.mubr.msk.f32.gmra.mrb[86].mxu1 %vm275_vm0, %v13018_v38  ;;  %v13046_v38 = vld [vmem:[%s23962_s0 + $0x608] sm:$0xff] }
 0x3b5   :  { %17256 = vmatmul.mubr.msk.f32.gmra.mrb[22].mxu0 %vm275_vm0, %v14244_v44  ;;  %16374 = vmatprep.mubr.msk.f32.mxu1 %vm275_vm0, %v13019_v52  ;;  %v14272_v44 = vld [vmem:[%s23962_s0 + $0x2c2] sm:$0xff]  ;;  %v13047_v52 = vld [vmem:[%s23962_s0 + $0x618] sm:$0xff] }
 0x3b6   :  { %17258 = vmatprep.mubr.msk.f32.mxu0 %vm275_vm0, %v14245_v60 }
 0x3b8   :  { %16375 = vmatmul.mubr.msk.f32.gmra.mrb[88].mxu1 %vm275_vm0, %v13020_v4  ;;  %v14273_v4 = vld [vmem:[%s23962_s0 + $0x2d2] sm:$0xff] }
 0x3b9   :  { %17259 = vmatmul.mubr.msk.f32.gmra.mrb[24].mxu0 %vm275_vm0, %v14246_v13  ;;  %16377 = vmatprep.mubr.msk.f32.mxu1 %vm275_vm0, %v13021_v21  ;;  %v13048_v21 = vld [vmem:[%s23962_s0 + $0x620] sm:$0xff] }
 0x3ba   :  { %17261 = vmatprep.mubr.msk.f32.mxu0 %vm275_vm0, %v14247_v31  ;;  %v14274_v31 = vld [vmem:[%s23962_s0 + $0x2da] sm:$0xff] }
 0x3bc   :  { %16378 = vmatmul.mubr.msk.f32.gmra.mrb[90].mxu1 %vm275_vm0, %v13022_v34  ;;  %v13049_v34 = vld [vmem:[%s23962_s0 + $0x630] sm:$0xff] }
 0x3bd   :  { %17262 = vmatmul.mubr.msk.f32.gmra.mrb[26].mxu0 %vm275_vm0, %v14248_v36  ;;  %16380 = vmatprep.mubr.msk.f32.mxu1 %vm275_vm0, %v13023_v56  ;;  %v14275_v56 = vld [vmem:[%s23962_s0 + $0x2ea] sm:$0xff] }
 0x3be   :  { %17264 = vmatprep.mubr.msk.f32.mxu0 %vm275_vm0, %v14249_v48 }
 0x3c0   :  { %16381 = vmatmul.mubr.msk.f32.gmra.mrb[92].mxu1 %vm275_vm0, %v13024_v41  ;;  %v13050_v41 = vld [vmem:[%s23962_s0 + $0x638] sm:$0xff] }
 0x3c1   :  { %17265 = vmatmul.mubr.msk.f32.gmra.mrb[28].mxu0 %vm275_vm0, %v14250_v0  ;;  %16383 = vmatprep.mubr.msk.f32.mxu1 %vm275_vm0, %v13025_v43  ;;  %v14276_v0 = vld [vmem:[%s23962_s0 + $0x2f2] sm:$0xff]  ;;  %v13051_v43 = vld [vmem:[%s23962_s0 + $0x648] sm:$0xff] }
 0x3c2   :  { %17267 = vmatprep.mubr.msk.f32.mxu0 %vm275_vm0, %v14251_v45 }
 0x3c4   :  { %16384 = vmatmul.mubr.msk.f32.gmra.mrb[94].mxu1 %vm275_vm0, %v13026_v47  ;;  %v14277_v47 = vld [vmem:[%s23962_s0 + $0x302] sm:$0xff] }
 0x3c5   :  { %17268 = vmatmul.mubr.msk.f32.gmra.mrb[30].mxu0 %vm275_vm0, %v14252_v49  ;;  %16386 = vmatprep.mubr.msk.f32.mxu1 %vm275_vm0, %v13027_v51  ;;  %v13052_v51 = vld [vmem:[%s23962_s0 + $0x650] sm:$0xff] }
 0x3c6   :  { %17270 = vmatprep.mubr.msk.f32.mxu0 %vm275_vm0, %v14253_v53  ;;  %v14278_v53 = vld [vmem:[%s23962_s0 + $0x30a] sm:$0xff] }
 0x3c8   :  { %16387 = vmatmul.mubr.msk.f32.gmra.mrb[96].mxu1 %vm275_vm0, %v13028_v55  ;;  %v13053_v55 = vld [vmem:[%s23962_s0 + $0x660] sm:$0xff] }
 0x3c9   :  { %17271 = vmatmul.mubr.msk.f32.gmra.mrb[32].mxu0 %vm275_vm0, %v14254_v57  ;;  %16389 = vmatprep.mubr.msk.f32.mxu1 %vm275_vm0, %v13029_v59  ;;  %v14279_v59 = vld [vmem:[%s23962_s0 + $0x31a] sm:$0xff] }
 0x3ca   :  { %17273 = vmatprep.mubr.msk.f32.mxu0 %vm275_vm0, %v14255_v61 }
 0x3cc   :  { %16390 = vmatmul.mubr.msk.f32.gmra.mrb[98].mxu1 %vm275_vm0, %v13030_v63  ;;  %v13054_v63 = vld [vmem:[%s23962_s0 + $0x668] sm:$0xff] }
 0x3cd   :  { %17274 = vmatmul.mubr.msk.f32.gmra.mrb[34].mxu0 %vm275_vm0, %v14256_v1  ;;  %16392 = vmatprep.mubr.msk.f32.mxu1 %vm275_vm0, %v13031_v37  ;;  %v14280_v1 = vld [vmem:[%s23962_s0 + $0x322] sm:$0xff]  ;;  %v13055_v37 = vld [vmem:[%s23962_s0 + $0x678] sm:$0xff] }
 0x3ce   :  { %17276 = vmatprep.mubr.msk.f32.mxu0 %vm275_vm0, %v14257_v7 }
 0x3d0   :  { %16393 = vmatmul.mubr.msk.f32.gmra.mrb[100].mxu1 %vm275_vm0, %v13032_v3  ;;  %v14281_v3 = vld [vmem:[%s23962_s0 + $0x332] sm:$0xff] }
 0x3d1   :  { %17277 = vmatmul.mubr.msk.f32.gmra.mrb[36].mxu0 %vm275_vm0, %v14258_v5  ;;  %16395 = vmatprep.mubr.msk.f32.mxu1 %vm275_vm0, %v13033_v8  ;;  %v13056_v8 = vld [vmem:[%s23962_s0 + $0x680] sm:$0xff] }
 0x3d2   :  { %17279 = vmatprep.mubr.msk.f32.mxu0 %vm275_vm0, %v14259_v10  ;;  %v14282_v10 = vld [vmem:[%s23962_s0 + $0x33a] sm:$0xff] }
 0x3d4   :  { %16396 = vmatmul.mubr.msk.f32.gmra.mrb[102].mxu1 %vm275_vm0, %v13034_v12  ;;  %v13057_v12 = vld [vmem:[%s23962_s0 + $0x690] sm:$0xff] }
 0x3d5   :  { %17280 = vmatmul.mubr.msk.f32.gmra.mrb[38].mxu0 %vm275_vm0, %v14260_v14  ;;  %16398 = vmatprep.mubr.msk.f32.mxu1 %vm275_vm0, %v13035_v16  ;;  %v14283_v16 = vld [vmem:[%s23962_s0 + $0x34a] sm:$0xff] }
 0x3d6   :  { %17282 = vmatprep.mubr.msk.f32.mxu0 %vm275_vm0, %v14261_v18 }
 0x3d8   :  { %16399 = vmatmul.mubr.msk.f32.gmra.mrb[104].mxu1 %vm275_vm0, %v13036_v20  ;;  %v13058_v20 = vld [vmem:[%s23962_s0 + $0x698] sm:$0xff] }
 0x3d9   :  { %17283 = vmatmul.mubr.msk.f32.gmra.mrb[40].mxu0 %vm275_vm0, %v14262_v22  ;;  %16401 = vmatprep.mubr.msk.f32.mxu1 %vm275_vm0, %v13037_v24  ;;  %v14284_v22 = vld [vmem:[%s23962_s0 + $0x352] sm:$0xff] }
 0x3da   :  { %17285 = vmatprep.mubr.msk.f32.mxu0 %vm275_vm0, %v14263_v33  ;;  %v13253_v24 = vld [vmem:[%s23962_s0 + $0x379] sm:$0xff] }
 0x3db   :  { %v22447_v28 = vpop.f32.mrb[0].mxu1 }
 0x3dc   :  { %v22452_v25 = vpop.f32.mrb[1].mxu1  ;;  %16402 = vmatmul.mubr.msk.f32.gmra.mrb[106].mxu1 %vm275_vm0, %v13038_v26  ;;  %v14285_v26 = vld [vmem:[%s23962_s0 + $0x392] sm:$0xff] }
 0x3dd   :  { %17286 = vmatmul.mubr.msk.f32.gmra.mrb[42].mxu0 %vm275_vm0, %v14264_v30  ;;  %16404 = vmatprep.mubr.msk.f32.mxu1 %vm275_vm0, %v13039_v40  ;;  %v13254_v40 = vld [vmem:[%s23962_s0 + $0x381] sm:$0xff] }
 0x3de   :  { %17288 = vmatprep.mubr.msk.f32.mxu0 %vm275_vm0, %v14265_v9  ;;  %v14286_v9 = vld [vmem:[%s23962_s0 + $0x39a] sm:$0xff] }
 0x3df   :  { %v22467_v46 = vpop.f32.mrb[2].mxu1 }
 0x3e0   :  { %v22472_v54 = vpop.f32.mrb[3].mxu1  ;;  %16405 = vmatmul.mubr.msk.f32.gmra.mrb[108].mxu1 %vm275_vm0, %v13040_v17  ;;  %v13255_v17 = vld [vmem:[%s23962_s0 + $0x391] sm:$0xff] }
 0x3e1   :  { %17289 = vmatmul.mubr.msk.f32.gmra.mrb[44].mxu0 %vm275_vm0, %v14266_v39  ;;  %16407 = vmatprep.mubr.msk.f32.mxu1 %vm275_vm0, %v13041_v42  ;;  %v14287_v42 = vld [vmem:[%s23962_s0 + $0x3aa] sm:$0xff] }
 0x3e2   :  { %17291 = vmatprep.mubr.msk.f32.mxu0 %vm275_vm0, %v14267_v50 }
 0x3e3   :  { %v22487_v6 = vpop.f32.mrb[4].mxu1 }
 0x3e4   :  { %v22492_v15 = vpop.f32.mrb[5].mxu1  ;;  %16408 = vmatmul.mubr.msk.f32.gmra.mrb[110].mxu1 %vm275_vm0, %v13042_v58  ;;  %v13256_v58 = vld [vmem:[%s23962_s0 + $0x399] sm:$0xff] }
 0x3e5   :  { %17292 = vmatmul.mubr.msk.f32.gmra.mrb[46].mxu0 %vm275_vm0, %v14268_v62  ;;  %16410 = vmatprep.mubr.msk.f32.mxu1 %vm275_vm0, %v13043_v2  ;;  %v14288_v62 = vld [vmem:[%s23962_s0 + $0x3b2] sm:$0xff]  ;;  %v13257_v2 = vld [vmem:[%s23962_s0 + $0x3a9] sm:$0xff] }
 0x3e6   :  { %17294 = vmatprep.mubr.msk.f32.mxu0 %vm275_vm0, %v14269_v11 }
 0x3e7   :  { %v22507_v32 = vpop.f32.mrb[6].mxu1 }
 0x3e8   :  { %v22512_v35 = vpop.f32.mrb[7].mxu1  ;;  %16411 = vmatmul.mubr.msk.f32.gmra.mrb[112].mxu1 %vm275_vm0, %v13044_v19  ;;  %v14289_v19 = vld [vmem:[%s23962_s0 + $0x3c2] sm:$0xff] }
 0x3e9   :  { %17295 = vmatmul.mubr.msk.f32.gmra.mrb[48].mxu0 %vm275_vm0, %v14270_v23  ;;  %16413 = vmatprep.mubr.msk.f32.mxu1 %vm275_vm0, %v13045_v27  ;;  %v13258_v27 = vld [vmem:[%s23962_s0 + $0x3b1] sm:$0xff] }
 0x3ea   :  { %17297 = vmatprep.mubr.msk.f32.mxu0 %vm275_vm0, %v14271_v29  ;;  %v14290_v29 = vld [vmem:[%s23962_s0 + $0x3ca] sm:$0xff] }
 0x3eb   :  { %v22527_v60 = vpop.f32.mrb[8].mxu1 }
 0x3ec   :  { %v22532_v13 = vpop.f32.mrb[9].mxu1  ;;  %16414 = vmatmul.mubr.msk.f32.gmra.mrb[114].mxu1 %vm275_vm0, %v13046_v38  ;;  %v13259_v38 = vld [vmem:[%s23962_s0 + $0x3c1] sm:$0xff] }
 0x3ed   :  { %17298 = vmatmul.mubr.msk.f32.gmra.mrb[50].mxu0 %vm275_vm0, %v14272_v44  ;;  %16416 = vmatprep.mubr.msk.f32.mxu1 %vm275_vm0, %v13047_v52  ;;  %v14291_v52 = vld [vmem:[%s23962_s0 + $0x3da] sm:$0xff] }
 0x3ee   :  { %17300 = vmatprep.mubr.msk.f32.mxu0 %vm275_vm0, %v14273_v4 }
 0x3ef   :  { %v22547_v36 = vpop.f32.mrb[10].mxu1 }
 0x3f0   :  { %v22552_v48 = vpop.f32.mrb[11].mxu1  ;;  %16417 = vmatmul.mubr.msk.f32.gmra.mrb[116].mxu1 %vm275_vm0, %v13048_v21  ;;  %v13260_v21 = vld [vmem:[%s23962_s0 + $0x3c9] sm:$0xff] }
 0x3f1   :  { %17301 = vmatmul.mubr.msk.f32.gmra.mrb[52].mxu0 %vm275_vm0, %v14274_v31  ;;  %16419 = vmatprep.mubr.msk.f32.mxu1 %vm275_vm0, %v13049_v34  ;;  %v14292_v31 = vld [vmem:[%s23962_s0 + $0x3e2] sm:$0xff]  ;;  %v13261_v34 = vld [vmem:[%s23962_s0 + $0x3d9] sm:$0xff] }
 0x3f2   :  { %17303 = vmatprep.mubr.msk.f32.mxu0 %vm275_vm0, %v14275_v56 }
 0x3f3   :  { %v22567_v45 = vpop.f32.mrb[12].mxu1 }
 0x3f4   :  { %v22572_v49 = vpop.f32.mrb[13].mxu1  ;;  %16420 = vmatmul.mubr.msk.f32.gmra.mrb[118].mxu1 %vm275_vm0, %v13050_v41  ;;  %v14293_v41 = vld [vmem:[%s23962_s0 + $0x3f2] sm:$0xff] }
 0x3f5   :  { %17304 = vmatmul.mubr.msk.f32.gmra.mrb[54].mxu0 %vm275_vm0, %v14276_v0  ;;  %16422 = vmatprep.mubr.msk.f32.mxu1 %vm275_vm0, %v13051_v43  ;;  %v13262_v43 = vld [vmem:[%s23962_s0 + $0x3e1] sm:$0xff] }
 0x3f6   :  { %17306 = vmatprep.mubr.msk.f32.mxu0 %vm275_vm0, %v14277_v47  ;;  %v14294_v47 = vld [vmem:[%s23962_s0 + $0x3fa] sm:$0xff] }
 0x3f7   :  { %v22587_v57 = vpop.f32.mrb[14].mxu1 }
 0x3f8   :  { %v22592_v61 = vpop.f32.mrb[15].mxu1  ;;  %16423 = vmatmul.mubr.msk.f32.gmra.mrb[120].mxu1 %vm275_vm0, %v13052_v51  ;;  %v13263_v51 = vld [vmem:[%s23962_s0 + $0x3f1] sm:$0xff] }
 0x3f9   :  { %17307 = vmatmul.mubr.msk.f32.gmra.mrb[56].mxu0 %vm275_vm0, %v14278_v53  ;;  %16425 = vmatprep.mubr.msk.f32.mxu1 %vm275_vm0, %v13053_v55  ;;  %v14295_v55 = vld [vmem:[%s23962_s0 + $0x40a] sm:$0xff] }
 0x3fa   :  { %17309 = vmatprep.mubr.msk.f32.mxu0 %vm275_vm0, %v14279_v59 }
 0x3fb   :  { %v22607_v7 = vpop.f32.mrb[16].mxu1 }
 0x3fc   :  { %v22612_v5 = vpop.f32.mrb[17].mxu1  ;;  %16426 = vmatmul.mubr.msk.f32.gmra.mrb[122].mxu1 %vm275_vm0, %v13054_v63  ;;  %v13264_v63 = vld [vmem:[%s23962_s0 + $0x3f9] sm:$0xff] }
 0x3fd   :  { %17310 = vmatmul.mubr.msk.f32.gmra.mrb[58].mxu0 %vm275_vm0, %v14280_v1  ;;  %16428 = vmatprep.mubr.msk.f32.mxu1 %vm275_vm0, %v13055_v37  ;;  %v14296_v1 = vld [vmem:[%s23962_s0 + $0x412] sm:$0xff]  ;;  %v13265_v37 = vld [vmem:[%s23962_s0 + $0x409] sm:$0xff] }
 0x3fe   :  { %17312 = vmatprep.mubr.msk.f32.mxu0 %vm275_vm0, %v14281_v3 }
 0x3ff   :  { %v22627_v14 = vpop.f32.mrb[18].mxu1 }
 0x400   :  { %v22632_v18 = vpop.f32.mrb[19].mxu1  ;;  %16429 = vmatmul.mubr.msk.f32.gmra.mrb[124].mxu1 %vm275_vm0, %v13056_v8  ;;  %v14297_v8 = vld [vmem:[%s23962_s0 + $0x422] sm:$0xff] }
 0x401   :  { %17313 = vmatmul.mubr.msk.f32.gmra.mrb[60].mxu0 %vm275_vm0, %v14282_v10  ;;  %16431 = vmatprep.mubr.msk.f32.mxu1 %vm275_vm0, %v13057_v12  ;;  %v13266_v12 = vld [vmem:[%s23962_s0 + $0x411] sm:$0xff] }
 0x402   :  { %17315 = vmatprep.mubr.msk.f32.mxu0 %vm275_vm0, %v14283_v16  ;;  %v14298_v16 = vld [vmem:[%s23962_s0 + $0x42a] sm:$0xff] }
 0x403   :  { %v22647_v33 = vpop.f32.mrb[20].mxu1 }
 0x404   :  { %v22652_v30 = vpop.f32.mrb[21].mxu1  ;;  %16432 = vmatmul.mubr.msk.f32.gmra.mrb[126].mxu1 %vm275_vm0, %v13058_v20  ;;  %v13267_v20 = vld [vmem:[%s23962_s0 + $0x421] sm:$0xff] }
 0x405   :  { %17316 = vmatmul.mubr.msk.f32.gmra.mrb[62].mxu0 %vm275_vm0, %v14284_v22  ;;  %16534 = vmatprep.mubr.msk.f32.mxu1 %vm275_vm0, %v13253_v24  ;;  %v14299_v24 = vld [vmem:[%s23962_s0 + $0x43a] sm:$0xff] }
 0x406   :  { %17318 = vmatprep.mubr.msk.f32.mxu0 %vm275_vm0, %v14285_v26 }
 0x407   :  { %v22667_v39 = vpop.f32.mrb[22].mxu1 }
 0x408   :  { %v22672_v50 = vpop.f32.mrb[23].mxu1  ;;  %16535 = vmatmul.mubr.msk.f32.vlgmr.msra.gmra.mrb[64].mxu1 %vm275_vm0, %v13254_v40  ;;  %v13268_v40 = vld [vmem:[%s23962_s0 + $0x429] sm:$0xff] }
 0x409   :  { %17319 = vmatmul.mubr.msk.f32.gmra.mrb[64].mxu0 %vm275_vm0, %v14286_v9  ;;  %16537 = vmatprep.mubr.msk.f32.mxu1 %vm275_vm0, %v13255_v17  ;;  %v14300_v9 = vld [vmem:[%s23962_s0 + $0x442] sm:$0xff]  ;;  %v13269_v17 = vld [vmem:[%s23962_s0 + $0x439] sm:$0xff] }
 0x40a   :  { %17321 = vmatprep.mubr.msk.f32.mxu0 %vm275_vm0, %v14287_v42 }
 0x40b   :  { %v22687_v11 = vpop.f32.mrb[24].mxu1 }
 0x40c   :  { %v22692_v23 = vpop.f32.mrb[25].mxu1  ;;  %16538 = vmatmul.mubr.msk.f32.gmra.mrb[66].mxu1 %vm275_vm0, %v13256_v58  ;;  %v14301_v58 = vld [vmem:[%s23962_s0 + $0x452] sm:$0xff] }
 0x40d   :  { %17322 = vmatmul.mubr.msk.f32.gmra.mrb[66].mxu0 %vm275_vm0, %v14288_v62  ;;  %16540 = vmatprep.mubr.msk.f32.mxu1 %vm275_vm0, %v13257_v2  ;;  %v13270_v2 = vld [vmem:[%s23962_s0 + $0x441] sm:$0xff] }
 0x40e   :  { %17324 = vmatprep.mubr.msk.f32.mxu0 %vm275_vm0, %v14289_v19  ;;  %v14302_v19 = vld [vmem:[%s23962_s0 + $0x45a] sm:$0xff] }
 0x40f   :  { %v22707_v44 = vpop.f32.mrb[26].mxu1 }
 0x410   :  { %v22712_v4 = vpop.f32.mrb[27].mxu1  ;;  %16541 = vmatmul.mubr.msk.f32.gmra.mrb[68].mxu1 %vm275_vm0, %v13258_v27  ;;  %v13271_v27 = vld [vmem:[%s23962_s0 + $0x451] sm:$0xff] }
 0x411   :  { %17325 = vmatmul.mubr.msk.f32.gmra.mrb[68].mxu0 %vm275_vm0, %v14290_v29  ;;  %16543 = vmatprep.mubr.msk.f32.mxu1 %vm275_vm0, %v13259_v38  ;;  %v14303_v38 = vld [vmem:[%s23962_s0 + $0x46a] sm:$0xff] }
 0x412   :  { %17327 = vmatprep.mubr.msk.f32.mxu0 %vm275_vm0, %v14291_v52 }
 0x413   :  { %v22727_v56 = vpop.f32.mrb[28].mxu1 }
 0x414   :  { %v22732_v0 = vpop.f32.mrb[29].mxu1  ;;  %16544 = vmatmul.mubr.msk.f32.gmra.mrb[70].mxu1 %vm275_vm0, %v13260_v21  ;;  %v13272_v21 = vld [vmem:[%s23962_s0 + $0x459] sm:$0xff] }
 0x415   :  { %17328 = vmatmul.mubr.msk.f32.gmra.mrb[70].mxu0 %vm275_vm0, %v14292_v31  ;;  %16546 = vmatprep.mubr.msk.f32.mxu1 %vm275_vm0, %v13261_v34  ;;  %v14304_v31 = vld [vmem:[%s23962_s0 + $0x472] sm:$0xff]  ;;  %v13273_v34 = vld [vmem:[%s23962_s0 + $0x469] sm:$0xff] }
 0x416   :  { %17330 = vmatprep.mubr.msk.f32.mxu0 %vm275_vm0, %v14293_v41 }
 0x417   :  { %v22747_v53 = vpop.f32.mrb[30].mxu1 }
 0x418   :  { %v22752_v59 = vpop.f32.mrb[31].mxu1  ;;  %16547 = vmatmul.mubr.msk.f32.gmra.mrb[72].mxu1 %vm275_vm0, %v13262_v43  ;;  %v14305_v43 = vld [vmem:[%s23962_s0 + $0x482] sm:$0xff] }
 0x419   :  { %17331 = vmatmul.mubr.msk.f32.gmra.mrb[72].mxu0 %vm275_vm0, %v14294_v47  ;;  %16549 = vmatprep.mubr.msk.f32.mxu1 %vm275_vm0, %v13263_v51  ;;  %v13274_v51 = vld [vmem:[%s23962_s0 + $0x471] sm:$0xff] }
 0x41a   :  { %17333 = vmatprep.mubr.msk.f32.mxu0 %vm275_vm0, %v14295_v55  ;;  %v14306_v55 = vld [vmem:[%s23962_s0 + $0x48a] sm:$0xff] }
 0x41b   :  { %v22767_v3 = vpop.f32.mrb[32].mxu1 }
 0x41c   :  { %v22772_v10 = vpop.f32.mrb[33].mxu1  ;;  %16550 = vmatmul.mubr.msk.f32.gmra.mrb[74].mxu1 %vm275_vm0, %v13264_v63  ;;  %v13275_v63 = vld [vmem:[%s23962_s0 + $0x481] sm:$0xff] }
 0x41d   :  { %17334 = vmatmul.mubr.msk.f32.gmra.mrb[74].mxu0 %vm275_vm0, %v14296_v1  ;;  %16552 = vmatprep.mubr.msk.f32.mxu1 %vm275_vm0, %v13265_v37  ;;  %v14307_v37 = vld [vmem:[%s23962_s0 + $0x49a] sm:$0xff] }
 0x41e   :  { %17336 = vmatprep.mubr.msk.f32.mxu0 %vm275_vm0, %v14297_v8 }
 0x41f   :  { %v22787_v22 = vpop.f32.mrb[34].mxu1 }
 0x420   :  { %v22792_v26 = vpop.f32.mrb[35].mxu1  ;;  %16553 = vmatmul.mubr.msk.f32.gmra.mrb[76].mxu1 %vm275_vm0, %v13266_v12  ;;  %v13276_v12 = vld [vmem:[%s23962_s0 + $0x489] sm:$0xff] }
 0x421   :  { %17337 = vmatmul.mubr.msk.f32.gmra.mrb[76].mxu0 %vm275_vm0, %v14298_v16  ;;  %16555 = vmatprep.mubr.msk.f32.mxu1 %vm275_vm0, %v13267_v20  ;;  %v14308_v16 = vld [vmem:[%s23962_s0 + $0x4a2] sm:$0xff]  ;;  %v13277_v20 = vld [vmem:[%s23962_s0 + $0x499] sm:$0xff] }
 0x422   :  { %17339 = vmatprep.mubr.msk.f32.mxu0 %vm275_vm0, %v14299_v24 }
 0x423   :  { %v22807_v42 = vpop.f32.mrb[36].mxu1 }
 0x424   :  { %v22812_v62 = vpop.f32.mrb[37].mxu1  ;;  %16556 = vmatmul.mubr.msk.f32.gmra.mrb[78].mxu1 %vm275_vm0, %v13268_v40  ;;  %v14309_v40 = vld [vmem:[%s23962_s0 + $0x4b2] sm:$0xff] }
 0x425   :  { %17340 = vmatmul.mubr.msk.f32.gmra.mrb[78].mxu0 %vm275_vm0, %v14300_v9  ;;  %16558 = vmatprep.mubr.msk.f32.mxu1 %vm275_vm0, %v13269_v17  ;;  %v13278_v17 = vld [vmem:[%s23962_s0 + $0x4a1] sm:$0xff] }
 0x426   :  { %17342 = vmatprep.mubr.msk.f32.mxu0 %vm275_vm0, %v14301_v58  ;;  %v14310_v58 = vld [vmem:[%s23962_s0 + $0x4ba] sm:$0xff] }
 0x427   :  { %v22827_v29 = vpop.f32.mrb[38].mxu1 }
 0x428   :  { %v22832_v52 = vpop.f32.mrb[39].mxu1  ;;  %16559 = vmatmul.mubr.msk.f32.gmra.mrb[80].mxu1 %vm275_vm0, %v13270_v2  ;;  %v13279_v2 = vld [vmem:[%s23962_s0 + $0x4b1] sm:$0xff] }
 0x429   :  { %17343 = vmatmul.mubr.msk.f32.gmra.mrb[80].mxu0 %vm275_vm0, %v14302_v19  ;;  %16561 = vmatprep.mubr.msk.f32.mxu1 %vm275_vm0, %v13271_v27  ;;  %v14311_v27 = vld [vmem:[%s23962_s0 + $0x4ca] sm:$0xff] }
 0x42a   :  { %17345 = vmatprep.mubr.msk.f32.mxu0 %vm275_vm0, %v14303_v38 }
 0x42b   :  { %v22847_v41 = vpop.f32.mrb[40].mxu1 }
 0x42c   :  { %v22852_v47 = vpop.f32.mrb[41].mxu1  ;;  %16562 = vmatmul.mubr.msk.f32.gmra.mrb[82].mxu1 %vm275_vm0, %v13272_v21  ;;  %v13280_v21 = vld [vmem:[%s23962_s0 + $0x4b9] sm:$0xff] }
 0x42d   :  { %17346 = vmatmul.mubr.msk.f32.gmra.mrb[82].mxu0 %vm275_vm0, %v14304_v31  ;;  %16564 = vmatprep.mubr.msk.f32.mxu1 %vm275_vm0, %v13273_v34  ;;  %v14312_v31 = vld [vmem:[%s23962_s0 + $0x4d2] sm:$0xff]  ;;  %v13281_v34 = vld [vmem:[%s23962_s0 + $0x4c9] sm:$0xff] }
 0x42e   :  { %17348 = vmatprep.mubr.msk.f32.mxu0 %vm275_vm0, %v14305_v43 }
 0x42f   :  { %v22867_v1 = vpop.f32.mrb[42].mxu1 }
 0x430   :  { %v22872_v8 = vpop.f32.mrb[43].mxu1  ;;  %16565 = vmatmul.mubr.msk.f32.gmra.mrb[84].mxu1 %vm275_vm0, %v13274_v51  ;;  %v14313_v51 = vld [vmem:[%s23962_s0 + $0x4e2] sm:$0xff] }
 0x431   :  { %17349 = vmatmul.mubr.msk.f32.gmra.mrb[84].mxu0 %vm275_vm0, %v14306_v55  ;;  %16567 = vmatprep.mubr.msk.f32.mxu1 %vm275_vm0, %v13275_v63  ;;  %v13282_v63 = vld [vmem:[%s23962_s0 + $0x4d1] sm:$0xff] }
 0x432   :  { %17351 = vmatprep.mubr.msk.f32.mxu0 %vm275_vm0, %v14307_v37  ;;  %v14314_v37 = vld [vmem:[%s23962_s0 + $0x4ea] sm:$0xff] }
 0x433   :  { %v22887_v24 = vpop.f32.mrb[44].mxu1 }
 0x434   :  { %v22892_v9 = vpop.f32.mrb[45].mxu1  ;;  %16568 = vmatmul.mubr.msk.f32.gmra.mrb[86].mxu1 %vm275_vm0, %v13276_v12  ;;  %v13283_v12 = vld [vmem:[%s23962_s0 + $0x4e1] sm:$0xff] }
 0x435   :  { %17352 = vmatmul.mubr.msk.f32.gmra.mrb[86].mxu0 %vm275_vm0, %v14308_v16  ;;  %16570 = vmatprep.mubr.msk.f32.mxu1 %vm275_vm0, %v13277_v20  ;;  %v14315_v20 = vld [vmem:[%s23962_s0 + $0x4fa] sm:$0xff] }
 0x436   :  { %17354 = vmatprep.mubr.msk.f32.mxu0 %vm275_vm0, %v14309_v40 }
 0x437   :  { %v22907_v19 = vpop.f32.mrb[46].mxu1 }
 0x438   :  { %v22912_v38 = vpop.f32.mrb[47].mxu1  ;;  %16571 = vmatmul.mubr.msk.f32.gmra.mrb[88].mxu1 %vm275_vm0, %v13278_v17  ;;  %v13284_v17 = vld [vmem:[%s23962_s0 + $0x4e9] sm:$0xff] }
 0x439   :  { %17355 = vmatmul.mubr.msk.f32.gmra.mrb[88].mxu0 %vm275_vm0, %v14310_v58  ;;  %16573 = vmatprep.mubr.msk.f32.mxu1 %vm275_vm0, %v13279_v2  ;;  %v14316_v58 = vld [vmem:[%s23962_s0 + $0x502] sm:$0xff] }
 0x43a   :  { %17357 = vmatprep.mubr.msk.f32.mxu0 %vm275_vm0, %v14311_v27  ;;  %v13285_v2 = vld [vmem:[%s23962_s0 + $0x529] sm:$0xff] }
 0x43b   :  { %v22927_v43 = vpop.f32.mrb[48].mxu1 }
 0x43c   :  { %v22932_v55 = vpop.f32.mrb[49].mxu1  ;;  %16574 = vmatmul.mubr.msk.f32.gmra.mrb[90].mxu1 %vm275_vm0, %v13280_v21  ;;  %v14317_v21 = vld [vmem:[%s23962_s0 + $0x542] sm:$0xff] }
 0x43d   :  { %17358 = vmatmul.mubr.msk.f32.gmra.mrb[90].mxu0 %vm275_vm0, %v14312_v31  ;;  %16576 = vmatprep.mubr.msk.f32.mxu1 %vm275_vm0, %v13281_v34  ;;  %v13286_v34 = vld [vmem:[%s23962_s0 + $0x531] sm:$0xff] }
 0x43e   :  { %17360 = vmatprep.mubr.msk.f32.mxu0 %vm275_vm0, %v14313_v51  ;;  %v14318_v51 = vld [vmem:[%s23962_s0 + $0x54a] sm:$0xff] }
 0x43f   :  { %v22947_v16 = vpop.f32.mrb[50].mxu1 }
 0x440   :  { %v22952_v40 = vpop.f32.mrb[51].mxu1  ;;  %16577 = vmatmul.mubr.msk.f32.gmra.mrb[92].mxu1 %vm275_vm0, %v13282_v63  ;;  %v13287_v63 = vld [vmem:[%s23962_s0 + $0x541] sm:$0xff] }
 0x441   :  { %17361 = vmatmul.mubr.msk.f32.gmra.mrb[92].mxu0 %vm275_vm0, %v14314_v37  ;;  %16579 = vmatprep.mubr.msk.f32.mxu1 %vm275_vm0, %v13283_v12  ;;  %v14319_v12 = vld [vmem:[%s23962_s0 + $0x55a] sm:$0xff] }
 0x442   :  { %17363 = vmatprep.mubr.msk.f32.mxu0 %vm275_vm0, %v14315_v20 }
 0x443   :  { %v22967_v27 = vpop.f32.mrb[52].mxu1 }
 0x444   :  { %23965 = vst [vmem:[#allocation2_spill] sm:$0xff] %v22967_v27  ;;  %v22972_v31 = vpop.f32.mrb[53].mxu1  ;;  %16580 = vmatmul.mubr.msk.f32.gmra.mrb[94].mxu1 %vm275_vm0, %v13284_v17  ;;  %v13288_v17 = vld [vmem:[%s23962_s0 + $0x549] sm:$0xff] }
 0x445   :  { %23966 = vst [vmem:[#allocation3_spill] sm:$0xff] %v22972_v31  ;;  %17364 = vmatmul.mubr.msk.f32.gmra.mrb[94].mxu0 %vm275_vm0, %v14316_v58  ;;  %16582 = vmatprep.mubr.msk.f32.mxu1 %vm275_vm0, %v13285_v2  ;;  %v14320_v58 = vld [vmem:[%s23962_s0 + $0x562] sm:$0xff]  ;;  %v13289_v2 = vld [vmem:[%s23962_s0 + $0x559] sm:$0xff] }
 0x446   :  { %17366 = vmatprep.mubr.msk.f32.mxu0 %vm275_vm0, %v14317_v21  ;;  %v14330_v31 = vld [vmem:[%s23962_s0 + $0x5da] sm:$0xff] }
 0x447   :  { %v22987_v37 = vpop.f32.mrb[54].mxu1 }
 0x448   :  { %23967 = vst [vmem:[#allocation4_spill] sm:$0xff] %v22987_v37  ;;  %v22992_v20 = vpop.f32.mrb[55].mxu1  ;;  %16583 = vmatmul.mubr.msk.f32.gmra.mrb[96].mxu1 %vm275_vm0, %v13286_v34  ;;  %v14321_v34 = vld [vmem:[%s23962_s0 + $0x572] sm:$0xff] }
 0x449   :  { %23968 = vst [vmem:[#allocation5_spill] sm:$0xff] %v22992_v20  ;;  %17367 = vmatmul.mubr.msk.f32.gmra.mrb[96].mxu0 %vm275_vm0, %v14318_v51  ;;  %16585 = vmatprep.mubr.msk.f32.mxu1 %vm275_vm0, %v13287_v63  ;;  %v13290_v63 = vld [vmem:[%s23962_s0 + $0x561] sm:$0xff] }
 0x44a   :  { %17369 = vmatprep.mubr.msk.f32.mxu0 %vm275_vm0, %v14319_v12  ;;  %v14322_v12 = vld [vmem:[%s23962_s0 + $0x57a] sm:$0xff] }
 0x44b   :  { %v23007_v21 = vpop.f32.mrb[56].mxu1  ;;  %v13298_v20 = vld [vmem:[%s23962_s0 + $0x5c1] sm:$0xff] }
 0x44c   :  { %23969 = vst [vmem:[#allocation6_spill] sm:$0xff] %v23007_v21  ;;  %v23012_v51 = vpop.f32.mrb[57].mxu1  ;;  %16586 = vmatmul.mubr.msk.f32.gmra.mrb[98].mxu1 %vm275_vm0, %v13288_v17  ;;  %v14323_v17 = vld [vmem:[%s23962_s0 + $0x58a] sm:$0xff] }
 0x44d   :  { %23970 = vst [vmem:[#allocation7_spill] sm:$0xff] %v23012_v51  ;;  %17370 = vmatmul.mubr.msk.f32.gmra.mrb[98].mxu0 %vm275_vm0, %v14320_v58  ;;  %16588 = vmatprep.mubr.msk.f32.mxu1 %vm275_vm0, %v13289_v2  ;;  %v13291_v51 = vld [vmem:[%s23962_s0 + $0x571] sm:$0xff]  ;;  %v13292_v2 = vld [vmem:[%s23962_s0 + $0x579] sm:$0xff] }
 0x44e   :  { %17372 = vmatprep.mubr.msk.f32.mxu0 %vm275_vm0, %v14321_v34  ;;  %v14324_v34 = vld [vmem:[%s23962_s0 + $0x592] sm:$0xff] }
 0x44f   :  { %v23027_v21 = vpop.f32.mrb[58].mxu1 }
 0x450   :  { %23971 = vst [vmem:[#allocation8_spill] sm:$0xff] %v23027_v21  ;;  %v23032_v58 = vpop.f32.mrb[59].mxu1  ;;  %16589 = vmatmul.mubr.msk.f32.gmra.mrb[100].mxu1 %vm275_vm0, %v13290_v63 }
 0x451   :  { %23972 = vst [vmem:[#allocation9_spill] sm:$0xff] %v23032_v58  ;;  %17373 = vmatmul.mubr.msk.f32.gmra.mrb[100].mxu0 %vm275_vm0, %v14322_v12  ;;  %16591 = vmatprep.mubr.msk.f32.mxu1 %vm275_vm0, %v13291_v51  ;;  %v13293_v58 = vld [vmem:[%s23962_s0 + $0x589] sm:$0xff]  ;;  %v13294_v12 = vld [vmem:[%s23962_s0 + $0x591] sm:$0xff] }
 0x452   :  { %17375 = vmatprep.mubr.msk.f32.mxu0 %vm275_vm0, %v14323_v17  ;;  %v14325_v51 = vld [vmem:[%s23962_s0 + $0x5a2] sm:$0xff]  ;;  %v14326_v17 = vld [vmem:[%s23962_s0 + $0x5aa] sm:$0xff] }
 0x453   :  { %v23047_v21 = vpop.f32.mrb[60].mxu1 }
 0x454   :  { %23973 = vst [vmem:[#allocation10_spill] sm:$0xff] %v23047_v21  ;;  %v23052_v63 = vpop.f32.mrb[61].mxu1  ;;  %16592 = vmatmul.mubr.msk.f32.gmra.mrb[102].mxu1 %vm275_vm0, %v13292_v2 }
 0x455   :  { %23974 = vst [vmem:[#allocation11_spill] sm:$0xff] %v23052_v63  ;;  %17376 = vmatmul.mubr.msk.f32.gmra.mrb[102].mxu0 %vm275_vm0, %v14324_v34  ;;  %16594 = vmatprep.mubr.msk.f32.mxu1 %vm275_vm0, %v13293_v58  ;;  %v13295_v63 = vld [vmem:[%s23962_s0 + $0x5a1] sm:$0xff]  ;;  %v13296_v34 = vld [vmem:[%s23962_s0 + $0x5a9] sm:$0xff] }
 0x456   :  { %17378 = vmatprep.mubr.msk.f32.mxu0 %vm275_vm0, %v14325_v51  ;;  %v14327_v58 = vld [vmem:[%s23962_s0 + $0x5ba] sm:$0xff]  ;;  %v14328_v51 = vld [vmem:[%s23962_s0 + $0x5c2] sm:$0xff] }
 0x457   :  { %v23067_v21 = vpop.f32.mrb[62].mxu1 }
 0x458   :  { %23975 = vst [vmem:[#allocation12_spill] sm:$0xff] %v23067_v21  ;;  %v23072_v2 = vpop.f32.mrb[63].mxu1  ;;  %16595 = vmatmul.mubr.msk.f32.gmra.mrb[104].mxu1 %vm275_vm0, %v13294_v12  ;;  %v14329_v12 = vld [vmem:[%s23962_s0 + $0x5d2] sm:$0xff] }
 0x459   :  { %23976 = vst [vmem:[#allocation13_spill] sm:$0xff] %v23072_v2  ;;  %17379 = vmatmul.mubr.msk.f32.gmra.mrb[104].mxu0 %vm275_vm0, %v14326_v17  ;;  %16597 = vmatprep.mubr.msk.f32.mxu1 %vm275_vm0, %v13295_v63  ;;  %v13297_v2 = vld [vmem:[%s23962_s0 + $0x5b9] sm:$0xff] }
 0x45a   :  { %17381 = vmatprep.mubr.msk.f32.mxu0 %vm275_vm0, %v14327_v58  ;;  %v23093_v63 = vld [vmem:[%s23963_s2] ss:$0 sm:$0xff] }
 0x45c   :  { %v17224_v17 = vpop.f32.mrb[0].mxu0  ;;  %16598 = vmatmul.mubr.msk.f32.gmra.mrb[106].mxu1 %vm275_vm0, %v13296_v34 }
 0x45d   :  { %v17452_v58 = vadd.f32 %v17224_v17, %v22447_v28  ;;  %v11125_v21 = vpop.f32.mrb[1].mxu0  ;;  %17382 = vmatmul.mubr.msk.f32.gmra.mrb[106].mxu0 %vm275_vm0, %v14328_v51  ;;  %16600 = vmatprep.mubr.msk.f32.mxu1 %vm275_vm0, %v13297_v2  ;;  %v13299_v28 = vld [vmem:[%s23962_s0 + $0x5d1] sm:$0xff] }
 0x45e   :  { %v17453_v37 = vadd.f32 %v11125_v21, %v22452_v25  ;;  %17384 = vmatprep.mubr.msk.f32.mxu0 %vm275_vm0, %v14329_v12  ;;  %v14331_v2 = vld [vmem:[%s23962_s0 + $0x5ea] sm:$0xff] }
 0x45f   :  { %v11900_v34 = vadd.f32 %v17452_v58, %v23093_v63  ;;  %v13300_v58 = vld [vmem:[%s23962_s0 + $0x5d9] sm:$0xff] }
 0x460   :  { %v11899_v51 = vadd.f32 %v17453_v37, %v23093_v63  ;;  %v17227_v17 = vpop.f32.mrb[2].mxu0  ;;  %16601 = vmatmul.mubr.msk.f32.gmra.mrb[108].mxu1 %vm275_vm0, %v13298_v20  ;;  %v14332_v20 = vld [vmem:[%s23962_s0 + $0x5f2] sm:$0xff] }
 0x461   :  { %vm12028_vm1 = vcmp.ge.f32.partialorder %v11900_v34, 0.0  ;;  %v12156_v25 = vmul.f32 0.2, %v11900_v34  ;;  %v17454_v21 = vadd.f32 %v17227_v17, %v22467_v46  ;;  %v11135_v12 = vpop.f32.mrb[3].mxu0  ;;  %17385 = vmatmul.mubr.msk.f32.gmra.mrb[108].mxu0 %vm275_vm0, %v14330_v31  ;;  %16603 = vmatprep.mubr.msk.f32.mxu1 %vm275_vm0, %v13299_v28  ;;  %v13301_v46 = vld [vmem:[%s23962_s0 + $0x5e9] sm:$0xff] }
 0x462   :  { %vm12027_vm2 = vcmp.ge.f32.partialorder %v11899_v51, 0.0  ;;  %v12155_v27 = vmul.f32 0.2, %v11899_v51  ;;  %v17455_v37 = vadd.f32 %v11135_v12, %v22472_v54  ;;  %17387 = vmatprep.mubr.msk.f32.mxu0 %vm275_vm0, %v14331_v2  ;;  %v14333_v17 = vld [vmem:[%s23962_s0 + $0x602] sm:$0xff] }
 0x463   :  { %v12284_v31 = vsel %vm12028_vm1, %v11900_v34, %v12156_v25  ;;  %v11902_v28 = vadd.f32 %v17454_v21, %v23093_v63 }
 0x464   :  { %12412 = vst.msk [vmem:[%s23964_s3 + $0x8] sm:$0xff] %vm275_vm0, %v12284_v31  ;;  %v12283_v54 = vsel %vm12027_vm2, %v11899_v51, %v12155_v27  ;;  %v11901_v2 = vadd.f32 %v17455_v37, %v23093_v63  ;;  %v17230_v12 = vpop.f32.mrb[4].mxu0  ;;  %16604 = vmatmul.mubr.msk.f32.gmra.mrb[110].mxu1 %vm275_vm0, %v13300_v58  ;;  %v13302_v27 = vld [vmem:[%s23962_s0 + $0x5f1] sm:$0xff]  ;;  %v14335_v31 = vld [vmem:[%s23962_s0 + $0x61a] sm:$0xff] }
 0x465   :  { %12411 = vst.msk [vmem:[%s23964_s3] sm:$0xff] %vm275_vm0, %v12283_v54  ;;  %vm12030_vm3 = vcmp.ge.f32.partialorder %v11902_v28, 0.0  ;;  %v12158_v34 = vmul.f32 0.2, %v11902_v28  ;;  %v17456_v25 = vadd.f32 %v17230_v12, %v22487_v6  ;;  %v11145_v21 = vpop.f32.mrb[5].mxu0  ;;  %17388 = vmatmul.mubr.msk.f32.gmra.mrb[110].mxu0 %vm275_vm0, %v14332_v20  ;;  %16606 = vmatprep.mubr.msk.f32.mxu1 %vm275_vm0, %v13301_v46  ;;  %v14334_v37 = vld [vmem:[%s23962_s0 + $0x60a] sm:$0xff] }
 0x466   :  { %vm12029_vm4 = vcmp.ge.f32.partialorder %v11901_v2, 0.0  ;;  %v12157_v51 = vmul.f32 0.2, %v11901_v2  ;;  %v17457_v58 = vadd.f32 %v11145_v21, %v22492_v15  ;;  %17390 = vmatprep.mubr.msk.f32.mxu0 %vm275_vm0, %v14333_v17  ;;  %v13303_v6 = vld [vmem:[%s23962_s0 + $0x601] sm:$0xff] }
 0x467   :  { %v12286_v20 = vsel %vm12030_vm3, %v11902_v28, %v12158_v34  ;;  %v11904_v46 = vadd.f32 %v17456_v25, %v23093_v63 }
 0x468   :  { %12414 = vst.msk [vmem:[%s23964_s3 + $0x18] sm:$0xff] %vm275_vm0, %v12286_v20  ;;  %v12285_v15 = vsel %vm12029_vm4, %v11901_v2, %v12157_v51  ;;  %v11903_v17 = vadd.f32 %v17457_v58, %v23093_v63  ;;  %v17233_v54 = vpop.f32.mrb[6].mxu0  ;;  %16607 = vmatmul.mubr.msk.f32.gmra.mrb[112].mxu1 %vm275_vm0, %v13302_v27  ;;  %v13304_v2 = vld [vmem:[%s23962_s0 + $0x609] sm:$0xff] }
 0x469   :  { %12413 = vst.msk [vmem:[%s23964_s3 + $0x10] sm:$0xff] %vm275_vm0, %v12285_v15  ;;  %vm12032_vm5 = vcmp.ge.f32.partialorder %v11904_v46, 0.0  ;;  %v12160_v28 = vmul.f32 0.2, %v11904_v46  ;;  %v17458_v12 = vadd.f32 %v17233_v54, %v22507_v32  ;;  %v11155_v34 = vpop.f32.mrb[7].mxu0  ;;  %17391 = vmatmul.mubr.msk.f32.gmra.mrb[112].mxu0 %vm275_vm0, %v14334_v37  ;;  %16609 = vmatprep.mubr.msk.f32.mxu1 %vm275_vm0, %v13303_v6  ;;  %v14336_v27 = vld [vmem:[%s23962_s0 + $0x622] sm:$0xff] }
 0x46a   :  { %vm12031_vm6 = vcmp.ge.f32.partialorder %v11903_v17, 0.0  ;;  %v12159_v25 = vmul.f32 0.2, %v11903_v17  ;;  %v17459_v21 = vadd.f32 %v11155_v34, %v22512_v35  ;;  %17393 = vmatprep.mubr.msk.f32.mxu0 %vm275_vm0, %v14335_v31  ;;  %v13305_v32 = vld [vmem:[%s23962_s0 + $0x619] sm:$0xff] }
 0x46b   :  { %v12288_v51 = vsel %vm12032_vm5, %v11904_v46, %v12160_v28  ;;  %v11906_v58 = vadd.f32 %v17458_v12, %v23093_v63  ;;  %v14337_v37 = vld [vmem:[%s23962_s0 + $0x632] sm:$0xff]  ;;  %v14338_v12 = vld [vmem:[%s23962_s0 + $0x63a] sm:$0xff] }
 0x46c   :  { %12416 = vst.msk [vmem:[%s23964_s3 + $0x28] sm:$0xff] %vm275_vm0, %v12288_v51  ;;  %v12287_v35 = vsel %vm12031_vm6, %v11903_v17, %v12159_v25  ;;  %v11905_v6 = vadd.f32 %v17459_v21, %v23093_v63  ;;  %v17236_v20 = vpop.f32.mrb[8].mxu0  ;;  %16610 = vmatmul.mubr.msk.f32.gmra.mrb[114].mxu1 %vm275_vm0, %v13304_v2  ;;  %v13306_v17 = vld [vmem:[%s23962_s0 + $0x621] sm:$0xff]  ;;  %v14339_v25 = vld [vmem:[%s23962_s0 + $0x64a] sm:$0xff] }
 0x46d   :  { %12415 = vst.msk [vmem:[%s23964_s3 + $0x20] sm:$0xff] %vm275_vm0, %v12287_v35  ;;  %vm12034_vm7 = vcmp.ge.f32.partialorder %v11906_v58, 0.0  ;;  %v12162_v46 = vmul.f32 0.2, %v11906_v58  ;;  %v17460_v31 = vadd.f32 %v17236_v20, %v22527_v60  ;;  %v11165_v15 = vpop.f32.mrb[9].mxu0  ;;  %17394 = vmatmul.mubr.msk.f32.gmra.mrb[114].mxu0 %vm275_vm0, %v14336_v27  ;;  %16612 = vmatprep.mubr.msk.f32.mxu1 %vm275_vm0, %v13305_v32  ;;  %v13307_v60 = vld [vmem:[%s23962_s0 + $0x631] sm:$0xff] }
 0x46e   :  { %vm12033_vm8 = vcmp.ge.f32.partialorder %v11905_v6, 0.0  ;;  %v12161_v54 = vmul.f32 0.2, %v11905_v6  ;;  %v17461_v28 = vadd.f32 %v11165_v15, %v22532_v13  ;;  %17396 = vmatprep.mubr.msk.f32.mxu0 %vm275_vm0, %v14337_v37  ;;  %v13308_v37 = vld [vmem:[%s23962_s0 + $0x639] sm:$0xff]  ;;  %v14341_v15 = vld [vmem:[%s23962_s0 + $0x662] sm:$0xff] }
 0x46f   :  { %v12290_v34 = vsel %vm12034_vm7, %v11906_v58, %v12162_v46  ;;  %v11908_v2 = vadd.f32 %v17460_v31, %v23093_v63  ;;  %v14340_v20 = vld [vmem:[%s23962_s0 + $0x652] sm:$0xff] }
 0x470   :  { %12418 = vst.msk [vmem:[%s23964_s3 + $0x38] sm:$0xff] %vm275_vm0, %v12290_v34  ;;  %v12289_v13 = vsel %vm12033_vm8, %v11905_v6, %v12161_v54  ;;  %v11907_v21 = vadd.f32 %v17461_v28, %v23093_v63  ;;  %v17239_v27 = vpop.f32.mrb[10].mxu0  ;;  %16613 = vmatmul.mubr.msk.f32.gmra.mrb[116].mxu1 %vm275_vm0, %v13306_v17  ;;  %v13310_v34 = vld [vmem:[%s23962_s0 + $0x651] sm:$0xff] }
 0x471   :  { %12417 = vst.msk [vmem:[%s23964_s3 + $0x30] sm:$0xff] %vm275_vm0, %v12289_v13  ;;  %vm12036_vm9 = vcmp.ge.f32.partialorder %v11908_v2, 0.0  ;;  %v12164_v32 = vmul.f32 0.2, %v11908_v2  ;;  %v17462_v51 = vadd.f32 %v17239_v27, %v22547_v36  ;;  %v11175_v58 = vpop.f32.mrb[11].mxu0  ;;  %17397 = vmatmul.mubr.msk.f32.gmra.mrb[116].mxu0 %vm275_vm0, %v14338_v12  ;;  %16615 = vmatprep.mubr.msk.f32.mxu1 %vm275_vm0, %v13307_v60  ;;  %v13309_v36 = vld [vmem:[%s23962_s0 + $0x649] sm:$0xff] }
 0x472   :  { %vm12035_vm10 = vcmp.ge.f32.partialorder %v11907_v21, 0.0  ;;  %v12163_v35 = vmul.f32 0.2, %v11907_v21  ;;  %v17463_v6 = vadd.f32 %v11175_v58, %v22552_v48  ;;  %17399 = vmatprep.mubr.msk.f32.mxu0 %vm275_vm0, %v14339_v25  ;;  %v14342_v13 = vld [vmem:[%s23962_s0 + $0x66a] sm:$0xff] }
 0x473   :  { %v12292_v46 = vsel %vm12036_vm9, %v11908_v2, %v12164_v32  ;;  %v11910_v31 = vadd.f32 %v17462_v51, %v23093_v63  ;;  %v14343_v32 = vld [vmem:[%s23962_s0 + $0x67a] sm:$0xff] }
 0x474   :  { %12420 = vst.msk [vmem:[%s23964_s3 + $0x48] sm:$0xff] %vm275_vm0, %v12292_v46  ;;  %v12291_v48 = vsel %vm12035_vm10, %v11907_v21, %v12163_v35  ;;  %v11909_v17 = vadd.f32 %v17463_v6, %v23093_v63  ;;  %v17242_v54 = vpop.f32.mrb[12].mxu0  ;;  %16616 = vmatmul.mubr.msk.f32.gmra.mrb[118].mxu1 %vm275_vm0, %v13308_v37 }
 0x475   :  { %12419 = vst.msk [vmem:[%s23964_s3 + $0x40] sm:$0xff] %vm275_vm0, %v12291_v48  ;;  %vm12038_vm11 = vcmp.ge.f32.partialorder %v11910_v31, 0.0  ;;  %v12166_v28 = vmul.f32 0.2, %v11910_v31  ;;  %v17464_v12 = vadd.f32 %v17242_v54, %v22567_v45  ;;  %v11185_v60 = vpop.f32.mrb[13].mxu0  ;;  %17400 = vmatmul.mubr.msk.f32.gmra.mrb[118].mxu0 %vm275_vm0, %v14340_v20  ;;  %16618 = vmatprep.mubr.msk.f32.mxu1 %vm275_vm0, %v13309_v36  ;;  %v13311_v45 = vld [vmem:[%s23962_s0 + $0x661] sm:$0xff] }
 0x476   :  { %vm12037_vm12 = vcmp.ge.f32.partialorder %v11909_v17, 0.0  ;;  %v12165_v2 = vmul.f32 0.2, %v11909_v17  ;;  %v17465_v25 = vadd.f32 %v11185_v60, %v22572_v49  ;;  %17402 = vmatprep.mubr.msk.f32.mxu0 %vm275_vm0, %v14341_v15  ;;  %v13312_v20 = vld [vmem:[%s23962_s0 + $0x669] sm:$0xff] }
 0x477   :  { %v12294_v21 = vsel %vm12038_vm11, %v11910_v31, %v12166_v28  ;;  %v11912_v27 = vadd.f32 %v17464_v12, %v23093_v63  ;;  %v14344_v31 = vld [vmem:[%s23962_s0 + $0x682] sm:$0xff] }
 0x478   :  { %12422 = vst.msk [vmem:[%s23964_s3 + $0x58] sm:$0xff] %vm275_vm0, %v12294_v21  ;;  %v12293_v49 = vsel %vm12037_vm12, %v11909_v17, %v12165_v2  ;;  %v11911_v51 = vadd.f32 %v17465_v25, %v23093_v63  ;;  %v17245_v58 = vpop.f32.mrb[14].mxu0  ;;  %16619 = vmatmul.mubr.msk.f32.gmra.mrb[120].mxu1 %vm275_vm0, %v13310_v34  ;;  %v14345_v17 = vld [vmem:[%s23962_s0 + $0x692] sm:$0xff]  ;;  %v13314_v2 = vld [vmem:[%s23962_s0 + $0x681] sm:$0xff] }
 0x479   :  { %12421 = vst.msk [vmem:[%s23964_s3 + $0x50] sm:$0xff] %vm275_vm0, %v12293_v49  ;;  %vm12040_vm13 = vcmp.ge.f32.partialorder %v11912_v27, 0.0  ;;  %v12168_v37 = vmul.f32 0.2, %v11912_v27  ;;  %v17466_v35 = vadd.f32 %v17245_v58, %v22587_v57  ;;  %v11195_v6 = vpop.f32.mrb[15].mxu0  ;;  %17403 = vmatmul.mubr.msk.f32.gmra.mrb[120].mxu0 %vm275_vm0, %v14342_v13  ;;  %16621 = vmatprep.mubr.msk.f32.mxu1 %vm275_vm0, %v13311_v45  ;;  %v13313_v57 = vld [vmem:[%s23962_s0 + $0x679] sm:$0xff] }
 0x47a   :  { %vm12039_vm14 = vcmp.ge.f32.partialorder %v11911_v51, 0.0  ;;  %v12167_v36 = vmul.f32 0.2, %v11911_v51  ;;  %v17467_v46 = vadd.f32 %v11195_v6, %v22592_v61  ;;  %17405 = vmatprep.mubr.msk.f32.mxu0 %vm275_vm0, %v14343_v32  ;;  %v14346_v45 = vld [vmem:[%s23962_s0 + $0x69a] sm:$0xff]  ;;  %v14347_v32 = vld [vmem:[%s23962_s0 + $0x6aa] sm:$0xff] }
 0x47b   :  { %v12296_v15 = vsel %vm12040_vm13, %v11912_v27, %v12168_v37  ;;  %v11914_v48 = vadd.f32 %v17466_v35, %v23093_v63  ;;  %v13316_v6 = vld [vmem:[%s23962_s0 + $0x699] sm:$0xff] }
 0x47c   :  { %12424 = vst.msk [vmem:[%s23964_s3 + $0x68] sm:$0xff] %vm275_vm0, %v12296_v15  ;;  %v12295_v61 = vsel %vm12039_vm14, %v11911_v51, %v12167_v36  ;;  %v11913_v54 = vadd.f32 %v17467_v46, %v23093_v63  ;;  %v17248_v28 = vpop.f32.mrb[16].mxu0  ;;  %16622 = vmatmul.mubr.msk.f32.gmra.mrb[122].mxu1 %vm275_vm0, %v13312_v20  ;;  %v14348_v46 = vld [vmem:[%s23962_s0 + $0x6b2] sm:$0xff] }
 0x47d   :  { %12423 = vst.msk [vmem:[%s23964_s3 + $0x60] sm:$0xff] %vm275_vm0, %v12295_v61  ;;  %vm12042_vm15 = vcmp.ge.f32.partialorder %v11914_v48, 0.0  ;;  %v12170_v12 = vmul.f32 0.2, %v11914_v48  ;;  %v17468_v60 = vadd.f32 %v17248_v28, %v22607_v7  ;;  %v11205_v34 = vpop.f32.mrb[17].mxu0  ;;  %17406 = vmatmul.mubr.msk.f32.gmra.mrb[122].mxu0 %vm275_vm0, %v14344_v31  ;;  %16624 = vmatprep.mubr.msk.f32.mxu1 %vm275_vm0, %v13313_v57  ;;  %v13315_v7 = vld [vmem:[%s23962_s0 + $0x691] sm:$0xff] }
 0x47e   :  { %vm12041_vm1 = vcmp.ge.f32.partialorder %v11913_v54, 0.0  ;;  %v12169_v25 = vmul.f32 0.2, %v11913_v54  ;;  %v17469_v13 = vadd.f32 %v11205_v34, %v22612_v5  ;;  %17408 = vmatprep.mubr.msk.f32.mxu0 %vm275_vm0, %v14345_v17 }
 0x47f   :  { %v12298_v21 = vsel %vm12042_vm15, %v11914_v48, %v12170_v12  ;;  %v11916_v27 = vadd.f32 %v17468_v60, %v23093_v63 }
 0x480   :  { %12426 = vst.msk [vmem:[%s23964_s3 + $0x78] sm:$0xff] %vm275_vm0, %v12298_v21  ;;  %v12297_v5 = vsel %vm12041_vm1, %v11913_v54, %v12169_v25  ;;  %v11915_v49 = vadd.f32 %v17469_v13, %v23093_v63  ;;  %v17251_v51 = vpop.f32.mrb[18].mxu0  ;;  %16625 = vmatmul.mubr.msk.f32.gmra.mrb[124].mxu1 %vm275_vm0, %v13314_v2 }
 0x481   :  { %12425 = vst.msk [vmem:[%s23964_s3 + $0x70] sm:$0xff] %vm275_vm0, %v12297_v5  ;;  %vm12044_vm2 = vcmp.ge.f32.partialorder %v11916_v27, 0.0  ;;  %v12172_v58 = vmul.f32 0.2, %v11916_v27  ;;  %v17470_v37 = vadd.f32 %v17251_v51, %v22627_v14  ;;  %v11215_v35 = vpop.f32.mrb[19].mxu0  ;;  %17409 = vmatmul.mubr.msk.f32.gmra.mrb[124].mxu0 %vm275_vm0, %v14346_v45  ;;  %16627 = vmatprep.mubr.msk.f32.mxu1 %vm275_vm0, %v13315_v7 }
 0x482   :  { %vm12043_vm3 = vcmp.ge.f32.partialorder %v11915_v49, 0.0  ;;  %v12171_v20 = vmul.f32 0.2, %v11915_v49  ;;  %v17471_v36 = vadd.f32 %v11215_v35, %v22632_v18  ;;  %17411 = vmatprep.mubr.msk.f32.mxu0 %vm275_vm0, %v14347_v32 }
 0x483   :  { %v12300_v14 = vsel %vm12044_vm2, %v11916_v27, %v12172_v58  ;;  %v11918_v31 = vadd.f32 %v17470_v37, %v23093_v63 }
 0x484   :  { %12428 = vst.msk [vmem:[%s23964_s3 + $0x88] sm:$0xff] %vm275_vm0, %v12300_v14  ;;  %v12299_v57 = vsel %vm12043_vm3, %v11915_v49, %v12171_v20  ;;  %v11917_v15 = vadd.f32 %v17471_v36, %v23093_v63  ;;  %v17254_v48 = vpop.f32.mrb[20].mxu0  ;;  %16628 = vmatmul.mubr.msk.f32.gmra.mrb[126].mxu1 %vm275_vm0, %v13316_v6 }
 0x485   :  { %12427 = vst.msk [vmem:[%s23964_s3 + $0x80] sm:$0xff] %vm275_vm0, %v12299_v57  ;;  %vm12046_vm4 = vcmp.ge.f32.partialorder %v11918_v31, 0.0  ;;  %v12174_v18 = vmul.f32 0.2, %v11918_v31  ;;  %v17472_v17 = vadd.f32 %v17254_v48, %v22647_v33  ;;  %v11225_v61 = vpop.f32.mrb[21].mxu0  ;;  %17412 = vmatmul.mubr.msk.f32.gmra.mrb[126].mxu0 %vm275_vm0, %v14348_v46 }
 0x486   :  { %vm12045_vm5 = vcmp.ge.f32.partialorder %v11917_v15, 0.0  ;;  %v12173_v54 = vmul.f32 0.2, %v11917_v15  ;;  %v17473_v28 = vadd.f32 %v11225_v61, %v22652_v30 }
 0x487   :  { %v12302_v12 = vsel %vm12046_vm4, %v11918_v31, %v12174_v18  ;;  %v11920_v60 = vadd.f32 %v17472_v17, %v23093_v63 }
 0x488   :  { %12430 = vst.msk [vmem:[%s23964_s3 + $0x98] sm:$0xff] %vm275_vm0, %v12302_v12  ;;  %v12301_v34 = vsel %vm12045_vm5, %v11917_v15, %v12173_v54  ;;  %v11919_v2 = vadd.f32 %v17473_v28, %v23093_v63  ;;  %v17257_v25 = vpop.f32.mrb[22].mxu0 }
 0x489   :  { %12429 = vst.msk [vmem:[%s23964_s3 + $0x90] sm:$0xff] %vm275_vm0, %v12301_v34  ;;  %vm12048_vm6 = vcmp.ge.f32.partialorder %v11920_v60, 0.0  ;;  %v12176_v33 = vmul.f32 0.2, %v11920_v60  ;;  %v17474_v30 = vadd.f32 %v17257_v25, %v22667_v39  ;;  %v11235_v13 = vpop.f32.mrb[23].mxu0 }
 0x48a   :  { %vm12047_vm7 = vcmp.ge.f32.partialorder %v11919_v2, 0.0  ;;  %v12175_v45 = vmul.f32 0.2, %v11919_v2  ;;  %v17475_v7 = vadd.f32 %v11235_v13, %v22672_v50 }
 0x48b   :  { %v12304_v21 = vsel %vm12048_vm6, %v11920_v60, %v12176_v33  ;;  %v11922_v27 = vadd.f32 %v17474_v30, %v23093_v63 }
 0x48c   :  { %12432 = vst.msk [vmem:[%s23964_s3 + $0xa8] sm:$0xff] %vm275_vm0, %v12304_v21  ;;  %v12303_v32 = vsel %vm12047_vm7, %v11919_v2, %v12175_v45  ;;  %v11921_v5 = vadd.f32 %v17475_v7, %v23093_v63  ;;  %v17260_v49 = vpop.f32.mrb[24].mxu0 }
 0x48d   :  { %12431 = vst.msk [vmem:[%s23964_s3 + $0xa0] sm:$0xff] %vm275_vm0, %v12303_v32  ;;  %vm12050_vm8 = vcmp.ge.f32.partialorder %v11922_v27, 0.0  ;;  %v12178_v39 = vmul.f32 0.2, %v11922_v27  ;;  %v17476_v50 = vadd.f32 %v17260_v49, %v22687_v11  ;;  %v11245_v51 = vpop.f32.mrb[25].mxu0 }
 0x48e   :  { %vm12049_vm9 = vcmp.ge.f32.partialorder %v11921_v5, 0.0  ;;  %v12177_v58 = vmul.f32 0.2, %v11921_v5  ;;  %v17477_v37 = vadd.f32 %v11245_v51, %v22692_v23 }
 0x48f   :  { %v12306_v35 = vsel %vm12050_vm8, %v11922_v27, %v12178_v39  ;;  %v11924_v6 = vadd.f32 %v17476_v50, %v23093_v63 }
 0x490   :  { %12434 = vst.msk [vmem:[%s23964_s3 + $0xb8] sm:$0xff] %vm275_vm0, %v12306_v35  ;;  %v12305_v20 = vsel %vm12049_vm9, %v11921_v5, %v12177_v58  ;;  %v11923_v36 = vadd.f32 %v17477_v37, %v23093_v63  ;;  %v17263_v46 = vpop.f32.mrb[26].mxu0 }
 0x491   :  { %12433 = vst.msk [vmem:[%s23964_s3 + $0xb0] sm:$0xff] %vm275_vm0, %v12305_v20  ;;  %vm12052_vm10 = vcmp.ge.f32.partialorder %v11924_v6, 0.0  ;;  %v12180_v11 = vmul.f32 0.2, %v11924_v6  ;;  %v17478_v23 = vadd.f32 %v17263_v46, %v22707_v44  ;;  %v11255_v14 = vpop.f32.mrb[27].mxu0 }
 0x492   :  { %vm12051_vm11 = vcmp.ge.f32.partialorder %v11923_v36, 0.0  ;;  %v12179_v31 = vmul.f32 0.2, %v11923_v36  ;;  %v17479_v57 = vadd.f32 %v11255_v14, %v22712_v4 }
 0x493   :  { %v12308_v15 = vsel %vm12052_vm10, %v11924_v6, %v12180_v11  ;;  %v11926_v48 = vadd.f32 %v17478_v23, %v23093_v63 }
 0x494   :  { %12436 = vst.msk [vmem:[%s23964_s3 + $0xc8] sm:$0xff] %vm275_vm0, %v12308_v15  ;;  %v12307_v18 = vsel %vm12051_vm11, %v11923_v36, %v12179_v31  ;;  %v11925_v17 = vadd.f32 %v17479_v57, %v23093_v63  ;;  %v17266_v61 = vpop.f32.mrb[28].mxu0 }
 0x495   :  { %12435 = vst.msk [vmem:[%s23964_s3 + $0xc0] sm:$0xff] %vm275_vm0, %v12307_v18  ;;  %vm12054_vm12 = vcmp.ge.f32.partialorder %v11926_v48, 0.0  ;;  %v12182_v44 = vmul.f32 0.2, %v11926_v48  ;;  %v17480_v4 = vadd.f32 %v17266_v61, %v22727_v56  ;;  %v11265_v54 = vpop.f32.mrb[29].mxu0 }
 0x496   :  { %vm12053_vm13 = vcmp.ge.f32.partialorder %v11925_v17, 0.0  ;;  %v12181_v28 = vmul.f32 0.2, %v11925_v17  ;;  %v17481_v12 = vadd.f32 %v11265_v54, %v22732_v0 }
 0x497   :  { %v12310_v60 = vsel %vm12054_vm12, %v11926_v48, %v12182_v44  ;;  %v11928_v34 = vadd.f32 %v17480_v4, %v23093_v63 }
 0x498   :  { %12438 = vst.msk [vmem:[%s23964_s3 + $0xd8] sm:$0xff] %vm275_vm0, %v12310_v60  ;;  %v12309_v2 = vsel %vm12053_vm13, %v11925_v17, %v12181_v28  ;;  %v11927_v25 = vadd.f32 %v17481_v12, %v23093_v63  ;;  %v17269_v33 = vpop.f32.mrb[30].mxu0 }
 0x499   :  { %12437 = vst.msk [vmem:[%s23964_s3 + $0xd0] sm:$0xff] %vm275_vm0, %v12309_v2  ;;  %vm12056_vm14 = vcmp.ge.f32.partialorder %v11928_v34, 0.0  ;;  %v12184_v56 = vmul.f32 0.2, %v11928_v34  ;;  %v17482_v0 = vadd.f32 %v17269_v33, %v22747_v53  ;;  %v11275_v30 = vpop.f32.mrb[31].mxu0 }
 0x49a   :  { %vm12055_vm15 = vcmp.ge.f32.partialorder %v11927_v25, 0.0  ;;  %v12183_v13 = vmul.f32 0.2, %v11927_v25  ;;  %v17483_v45 = vadd.f32 %v11275_v30, %v22752_v59 }
 0x49b   :  { %v12312_v7 = vsel %vm12056_vm14, %v11928_v34, %v12184_v56  ;;  %v11930_v21 = vadd.f32 %v17482_v0, %v23093_v63 }
 0x49c   :  { %12440 = vst.msk [vmem:[%s23964_s3 + $0xe8] sm:$0xff] %vm275_vm0, %v12312_v7  ;;  %v12311_v27 = vsel %vm12055_vm15, %v11927_v25, %v12183_v13  ;;  %v11929_v32 = vadd.f32 %v17483_v45, %v23093_v63  ;;  %v17272_v5 = vpop.f32.mrb[32].mxu0 }
 0x49d   :  { %12439 = vst.msk [vmem:[%s23964_s3 + $0xe0] sm:$0xff] %vm275_vm0, %v12311_v27  ;;  %vm12058_vm1 = vcmp.ge.f32.partialorder %v11930_v21, 0.0  ;;  %v12186_v53 = vmul.f32 0.2, %v11930_v21  ;;  %v17484_v59 = vadd.f32 %v17272_v5, %v22767_v3  ;;  %v11285_v49 = vpop.f32.mrb[33].mxu0 }
 0x49e   :  { %vm12057_vm2 = vcmp.ge.f32.partialorder %v11929_v32, 0.0  ;;  %v12185_v39 = vmul.f32 0.2, %v11929_v32  ;;  %v17485_v50 = vadd.f32 %v11285_v49, %v22772_v10 }
 0x49f   :  { %v12314_v51 = vsel %vm12058_vm1, %v11930_v21, %v12186_v53  ;;  %v11932_v58 = vadd.f32 %v17484_v59, %v23093_v63 }
 0x4a0   :  { %12442 = vst.msk [vmem:[%s23964_s3 + $0xf8] sm:$0xff] %vm275_vm0, %v12314_v51  ;;  %v12313_v37 = vsel %vm12057_vm2, %v11929_v32, %v12185_v39  ;;  %v11931_v35 = vadd.f32 %v17485_v50, %v23093_v63  ;;  %v17275_v6 = vpop.f32.mrb[34].mxu0 }
 0x4a1   :  { %12441 = vst.msk [vmem:[%s23964_s3 + $0xf0] sm:$0xff] %vm275_vm0, %v12313_v37  ;;  %vm12060_vm3 = vcmp.ge.f32.partialorder %v11932_v58, 0.0  ;;  %v12188_v3 = vmul.f32 0.2, %v11932_v58  ;;  %v17486_v10 = vadd.f32 %v17275_v6, %v22787_v22  ;;  %v11295_v20 = vpop.f32.mrb[35].mxu0 }
 0x4a2   :  { %vm12059_vm4 = vcmp.ge.f32.partialorder %v11931_v35, 0.0  ;;  %v12187_v36 = vmul.f32 0.2, %v11931_v35  ;;  %v17487_v46 = vadd.f32 %v11295_v20, %v22792_v26 }
 0x4a3   :  { %v12316_v11 = vsel %vm12060_vm3, %v11932_v58, %v12188_v3  ;;  %v11934_v23 = vadd.f32 %v17486_v10, %v23093_v63 }
 0x4a4   :  { %12444 = vst.msk [vmem:[%s23964_s3 + $0x108] sm:$0xff] %vm275_vm0, %v12316_v11  ;;  %v12315_v14 = vsel %vm12059_vm4, %v11931_v35, %v12187_v36  ;;  %v11933_v31 = vadd.f32 %v17487_v46, %v23093_v63  ;;  %v17278_v57 = vpop.f32.mrb[36].mxu0 }
 0x4a5   :  { %12443 = vst.msk [vmem:[%s23964_s3 + $0x100] sm:$0xff] %vm275_vm0, %v12315_v14  ;;  %vm12062_vm5 = vcmp.ge.f32.partialorder %v11934_v23, 0.0  ;;  %v12190_v22 = vmul.f32 0.2, %v11934_v23  ;;  %v17488_v26 = vadd.f32 %v17278_v57, %v22807_v42  ;;  %v11305_v15 = vpop.f32.mrb[37].mxu0 }
 0x4a6   :  { %vm12061_vm6 = vcmp.ge.f32.partialorder %v11933_v31, 0.0  ;;  %v12189_v48 = vmul.f32 0.2, %v11933_v31  ;;  %v17489_v18 = vadd.f32 %v11305_v15, %v22812_v62 }
 0x4a7   :  { %v12318_v17 = vsel %vm12062_vm5, %v11934_v23, %v12190_v22  ;;  %v11936_v61 = vadd.f32 %v17488_v26, %v23093_v63 }
 0x4a8   :  { %12446 = vst.msk [vmem:[%s23964_s3 + $0x118] sm:$0xff] %vm275_vm0, %v12318_v17  ;;  %v12317_v44 = vsel %vm12061_vm6, %v11933_v31, %v12189_v48  ;;  %v11935_v4 = vadd.f32 %v17489_v18, %v23093_v63  ;;  %v17281_v54 = vpop.f32.mrb[38].mxu0 }
 0x4a9   :  { %12445 = vst.msk [vmem:[%s23964_s3 + $0x110] sm:$0xff] %vm275_vm0, %v12317_v44  ;;  %vm12064_vm7 = vcmp.ge.f32.partialorder %v11936_v61, 0.0  ;;  %v12192_v42 = vmul.f32 0.2, %v11936_v61  ;;  %v17490_v62 = vadd.f32 %v17281_v54, %v22827_v29  ;;  %v11315_v28 = vpop.f32.mrb[39].mxu0 }
 0x4aa   :  { %vm12063_vm8 = vcmp.ge.f32.partialorder %v11935_v4, 0.0  ;;  %v12191_v12 = vmul.f32 0.2, %v11935_v4  ;;  %v17491_v60 = vadd.f32 %v11315_v28, %v22832_v52 }
 0x4ab   :  { %v12320_v34 = vsel %vm12064_vm7, %v11936_v61, %v12192_v42  ;;  %v11938_v2 = vadd.f32 %v17490_v62, %v23093_v63 }
 0x4ac   :  { %12448 = vst.msk [vmem:[%s23964_s3 + $0x128] sm:$0xff] %vm275_vm0, %v12320_v34  ;;  %v12319_v25 = vsel %vm12063_vm8, %v11935_v4, %v12191_v12  ;;  %v11937_v33 = vadd.f32 %v17491_v60, %v23093_v63  ;;  %v17284_v56 = vpop.f32.mrb[40].mxu0 }
 0x4ad   :  { %12447 = vst.msk [vmem:[%s23964_s3 + $0x120] sm:$0xff] %vm275_vm0, %v12319_v25  ;;  %vm12066_vm9 = vcmp.ge.f32.partialorder %v11938_v2, 0.0  ;;  %v12194_v29 = vmul.f32 0.2, %v11938_v2  ;;  %v17492_v52 = vadd.f32 %v17284_v56, %v22847_v41  ;;  %v11325_v0 = vpop.f32.mrb[41].mxu0 }
 0x4ae   :  { %vm12065_vm10 = vcmp.ge.f32.partialorder %v11937_v33, 0.0  ;;  %v12193_v30 = vmul.f32 0.2, %v11937_v33  ;;  %v17493_v13 = vadd.f32 %v11325_v0, %v22852_v47  ;;  %v23978_v0 = vld [vmem:[#allocation3_spill] sm:$0xff] }
 0x4af   :  { %v12322_v45 = vsel %vm12066_vm9, %v11938_v2, %v12194_v29  ;;  %v11940_v7 = vadd.f32 %v17492_v52, %v23093_v63 }
 0x4b0   :  { %12450 = vst.msk [vmem:[%s23964_s3 + $0x138] sm:$0xff] %vm275_vm0, %v12322_v45  ;;  %v12321_v21 = vsel %vm12065_vm10, %v11937_v33, %v12193_v30  ;;  %v11939_v27 = vadd.f32 %v17493_v13, %v23093_v63  ;;  %v17287_v32 = vpop.f32.mrb[42].mxu0 }
 0x4b1   :  { %12449 = vst.msk [vmem:[%s23964_s3 + $0x130] sm:$0xff] %vm275_vm0, %v12321_v21  ;;  %vm12068_vm11 = vcmp.ge.f32.partialorder %v11940_v7, 0.0  ;;  %v12196_v41 = vmul.f32 0.2, %v11940_v7  ;;  %v17494_v47 = vadd.f32 %v17287_v32, %v22867_v1  ;;  %v11335_v5 = vpop.f32.mrb[43].mxu0 }
 0x4b2   :  { %vm12067_vm12 = vcmp.ge.f32.partialorder %v11939_v27, 0.0  ;;  %v12195_v53 = vmul.f32 0.2, %v11939_v27  ;;  %v17495_v59 = vadd.f32 %v11335_v5, %v22872_v8 }
 0x4b3   :  { %v12324_v49 = vsel %vm12068_vm11, %v11940_v7, %v12196_v41  ;;  %v11942_v39 = vadd.f32 %v17494_v47, %v23093_v63  ;;  %v23979_v41 = vld [vmem:[#allocation4_spill] sm:$0xff] }
 0x4b4   :  { %12452 = vst.msk [vmem:[%s23964_s3 + $0x148] sm:$0xff] %vm275_vm0, %v12324_v49  ;;  %v12323_v50 = vsel %vm12067_vm12, %v11939_v27, %v12195_v53  ;;  %v11941_v51 = vadd.f32 %v17495_v59, %v23093_v63  ;;  %v17290_v58 = vpop.f32.mrb[44].mxu0  ;;  %v23980_v59 = vld [vmem:[#allocation5_spill] sm:$0xff] }
 0x4b5   :  { %12451 = vst.msk [vmem:[%s23964_s3 + $0x140] sm:$0xff] %vm275_vm0, %v12323_v50  ;;  %vm12070_vm13 = vcmp.ge.f32.partialorder %v11942_v39, 0.0  ;;  %v12198_v1 = vmul.f32 0.2, %v11942_v39  ;;  %v17496_v8 = vadd.f32 %v17290_v58, %v22887_v24  ;;  %v11345_v37 = vpop.f32.mrb[45].mxu0 }
 0x4b6   :  { %vm12069_vm14 = vcmp.ge.f32.partialorder %v11941_v51, 0.0  ;;  %v12197_v35 = vmul.f32 0.2, %v11941_v51  ;;  %v17497_v6 = vadd.f32 %v11345_v37, %v22892_v9  ;;  %v23981_v37 = vld [vmem:[#allocation6_spill] sm:$0xff] }
 0x4b7   :  { %v12326_v3 = vsel %vm12070_vm13, %v11942_v39, %v12198_v1  ;;  %v11944_v10 = vadd.f32 %v17496_v8, %v23093_v63 }
 0x4b8   :  { %12454 = vst.msk [vmem:[%s23964_s3 + $0x158] sm:$0xff] %vm275_vm0, %v12326_v3  ;;  %v12325_v20 = vsel %vm12069_vm14, %v11941_v51, %v12197_v35  ;;  %v11943_v36 = vadd.f32 %v17497_v6, %v23093_v63  ;;  %v17293_v46 = vpop.f32.mrb[46].mxu0 }
 0x4b9   :  { %12453 = vst.msk [vmem:[%s23964_s3 + $0x150] sm:$0xff] %vm275_vm0, %v12325_v20  ;;  %vm12072_vm15 = vcmp.ge.f32.partialorder %v11944_v10, 0.0  ;;  %v12200_v24 = vmul.f32 0.2, %v11944_v10  ;;  %v17498_v9 = vadd.f32 %v17293_v46, %v22907_v19  ;;  %v11355_v11 = vpop.f32.mrb[47].mxu0 }
 0x4ba   :  { %vm12071_vm1 = vcmp.ge.f32.partialorder %v11943_v36, 0.0  ;;  %v12199_v23 = vmul.f32 0.2, %v11943_v36  ;;  %v17499_v14 = vadd.f32 %v11355_v11, %v22912_v38 }
 0x4bb   :  { %v12328_v31 = vsel %vm12072_vm15, %v11944_v10, %v12200_v24  ;;  %v11946_v57 = vadd.f32 %v17498_v9, %v23093_v63  ;;  %v23982_v10 = vld [vmem:[#allocation7_spill] sm:$0xff] }
 0x4bc   :  { %12456 = vst.msk [vmem:[%s23964_s3 + $0x168] sm:$0xff] %vm275_vm0, %v12328_v31  ;;  %v12327_v22 = vsel %vm12071_vm1, %v11943_v36, %v12199_v23  ;;  %v11945_v26 = vadd.f32 %v17499_v14, %v23093_v63  ;;  %v17296_v15 = vpop.f32.mrb[48].mxu0  ;;  %v23983_v14 = vld [vmem:[#allocation8_spill] sm:$0xff] }
 0x4bd   :  { %12455 = vst.msk [vmem:[%s23964_s3 + $0x160] sm:$0xff] %vm275_vm0, %v12327_v22  ;;  %vm12074_vm2 = vcmp.ge.f32.partialorder %v11946_v57, 0.0  ;;  %v12202_v19 = vmul.f32 0.2, %v11946_v57  ;;  %v17500_v38 = vadd.f32 %v17296_v15, %v22927_v43  ;;  %v11365_v48 = vpop.f32.mrb[49].mxu0 }
 0x4be   :  { %vm12073_vm3 = vcmp.ge.f32.partialorder %v11945_v26, 0.0  ;;  %v12201_v18 = vmul.f32 0.2, %v11945_v26  ;;  %v17501_v17 = vadd.f32 %v11365_v48, %v22932_v55 }
 0x4bf   :  { %v12330_v61 = vsel %vm12074_vm2, %v11946_v57, %v12202_v19  ;;  %v11948_v44 = vadd.f32 %v17500_v38, %v23093_v63 }
 0x4c0   :  { %12458 = vst.msk [vmem:[%s23964_s3 + $0x178] sm:$0xff] %vm275_vm0, %v12330_v61  ;;  %v12329_v4 = vsel %vm12073_vm3, %v11945_v26, %v12201_v18  ;;  %v11947_v54 = vadd.f32 %v17501_v17, %v23093_v63  ;;  %v17299_v42 = vpop.f32.mrb[50].mxu0  ;;  %v23984_v26 = vld [vmem:[#allocation9_spill] sm:$0xff] }
 0x4c1   :  { %12457 = vst.msk [vmem:[%s23964_s3 + $0x170] sm:$0xff] %vm275_vm0, %v12329_v4  ;;  %vm12076_vm4 = vcmp.ge.f32.partialorder %v11948_v44, 0.0  ;;  %v12204_v43 = vmul.f32 0.2, %v11948_v44  ;;  %v17502_v55 = vadd.f32 %v17299_v42, %v22947_v16  ;;  %v11375_v62 = vpop.f32.mrb[51].mxu0 }
 0x4c2   :  { %vm12075_vm5 = vcmp.ge.f32.partialorder %v11947_v54, 0.0  ;;  %v12203_v28 = vmul.f32 0.2, %v11947_v54  ;;  %v17503_v12 = vadd.f32 %v11375_v62, %v22952_v40  ;;  %v23977_v40 = vld [vmem:[#allocation2_spill] sm:$0xff] }
 0x4c3   :  { %v12332_v60 = vsel %vm12076_vm4, %v11948_v44, %v12204_v43  ;;  %v11950_v34 = vadd.f32 %v17502_v55, %v23093_v63  ;;  %v23985_v44 = vld [vmem:[#allocation10_spill] sm:$0xff]  ;;  %v23986_v43 = vld [vmem:[#allocation11_spill] sm:$0xff] }
 0x4c4   :  { %12460 = vst.msk [vmem:[%s23964_s3 + $0x188] sm:$0xff] %vm275_vm0, %v12332_v60  ;;  %v12331_v2 = vsel %vm12075_vm5, %v11947_v54, %v12203_v28  ;;  %v11949_v25 = vadd.f32 %v17503_v12, %v23093_v63  ;;  %v17302_v33 = vpop.f32.mrb[52].mxu0 }
 0x4c5   :  { %12459 = vst.msk [vmem:[%s23964_s3 + $0x180] sm:$0xff] %vm275_vm0, %v12331_v2  ;;  %vm12078_vm6 = vcmp.ge.f32.partialorder %v11950_v34, 0.0  ;;  %v12206_v16 = vmul.f32 0.2, %v11950_v34  ;;  %v17504_v56 = vadd.f32 %v17302_v33, %v23977_v40  ;;  %v11385_v29 = vpop.f32.mrb[53].mxu0 }
 0x4c6   :  { %vm12077_vm7 = vcmp.ge.f32.partialorder %v11949_v25, 0.0  ;;  %v12205_v52 = vmul.f32 0.2, %v11949_v25  ;;  %v17505_v30 = vadd.f32 %v11385_v29, %v23978_v0 }
 0x4c7   :  { %v12334_v13 = vsel %vm12078_vm6, %v11950_v34, %v12206_v16  ;;  %v11952_v45 = vadd.f32 %v17504_v56, %v23093_v63  ;;  %v23988_v56 = vld [vmem:[#allocation13_spill] sm:$0xff] }
 0x4c8   :  { %12462 = vst.msk [vmem:[%s23964_s3 + $0x198] sm:$0xff] %vm275_vm0, %v12334_v13  ;;  %v12333_v7 = vsel %vm12077_vm7, %v11949_v25, %v12205_v52  ;;  %v11951_v21 = vadd.f32 %v17505_v30, %v23093_v63  ;;  %v17305_v27 = vpop.f32.mrb[54].mxu0  ;;  %v23987_v25 = vld [vmem:[#allocation12_spill] sm:$0xff] }
 0x4c9   :  { %12461 = vst.msk [vmem:[%s23964_s3 + $0x190] sm:$0xff] %vm275_vm0, %v12333_v7  ;;  %vm12080_vm8 = vcmp.ge.f32.partialorder %v11952_v45, 0.0  ;;  %v12208_v32 = vmul.f32 0.2, %v11952_v45  ;;  %v17506_v47 = vadd.f32 %v17305_v27, %v23979_v41  ;;  %v11395_v5 = vpop.f32.mrb[55].mxu0 }
 0x4ca   :  { %vm12079_vm9 = vcmp.ge.f32.partialorder %v11951_v21, 0.0  ;;  %v12207_v53 = vmul.f32 0.2, %v11951_v21  ;;  %v17507_v49 = vadd.f32 %v11395_v5, %v23980_v59 }
 0x4cb   :  { %v12336_v39 = vsel %vm12080_vm8, %v11952_v45, %v12208_v32  ;;  %v11954_v50 = vadd.f32 %v17506_v47, %v23093_v63 }
 0x4cc   :  { %12464 = vst.msk [vmem:[%s23964_s3 + $0x1a8] sm:$0xff] %vm275_vm0, %v12336_v39  ;;  %v12335_v51 = vsel %vm12079_vm9, %v11951_v21, %v12207_v53  ;;  %v11953_v58 = vadd.f32 %v17507_v49, %v23093_v63  ;;  %v17308_v1 = vpop.f32.mrb[56].mxu0 }
 0x4cd   :  { %12463 = vst.msk [vmem:[%s23964_s3 + $0x1a0] sm:$0xff] %vm275_vm0, %v12335_v51  ;;  %vm12082_vm10 = vcmp.ge.f32.partialorder %v11954_v50, 0.0  ;;  %v12210_v8 = vmul.f32 0.2, %v11954_v50  ;;  %v17508_v35 = vadd.f32 %v17308_v1, %v23981_v37  ;;  %v11405_v6 = vpop.f32.mrb[57].mxu0 }
 0x4ce   :  { %vm12081_vm11 = vcmp.ge.f32.partialorder %v11953_v58, 0.0  ;;  %v12209_v3 = vmul.f32 0.2, %v11953_v58  ;;  %v17509_v20 = vadd.f32 %v11405_v6, %v23982_v10 }
 0x4cf   :  { %v12338_v36 = vsel %vm12082_vm10, %v11954_v50, %v12210_v8  ;;  %v11956_v46 = vadd.f32 %v17508_v35, %v23093_v63 }
 0x4d0   :  { %12466 = vst.msk [vmem:[%s23964_s3 + $0x1b8] sm:$0xff] %vm275_vm0, %v12338_v36  ;;  %v12337_v24 = vsel %vm12081_vm11, %v11953_v58, %v12209_v3  ;;  %v11955_v9 = vadd.f32 %v17509_v20, %v23093_v63  ;;  %v17311_v11 = vpop.f32.mrb[58].mxu0 }
 0x4d1   :  { %12465 = vst.msk [vmem:[%s23964_s3 + $0x1b0] sm:$0xff] %vm275_vm0, %v12337_v24  ;;  %vm12084_vm12 = vcmp.ge.f32.partialorder %v11956_v46, 0.0  ;;  %v12212_v23 = vmul.f32 0.2, %v11956_v46  ;;  %v17510_v31 = vadd.f32 %v17311_v11, %v23983_v14  ;;  %v11415_v57 = vpop.f32.mrb[59].mxu0 }
 0x4d2   :  { %vm12083_vm13 = vcmp.ge.f32.partialorder %v11955_v9, 0.0  ;;  %v12211_v22 = vmul.f32 0.2, %v11955_v9  ;;  %v17511_v15 = vadd.f32 %v11415_v57, %v23984_v26 }
 0x4d3   :  { %v12340_v19 = vsel %vm12084_vm12, %v11956_v46, %v12212_v23  ;;  %v11958_v38 = vadd.f32 %v17510_v31, %v23093_v63 }
 0x4d4   :  { %12468 = vst.msk [vmem:[%s23964_s3 + $0x1c8] sm:$0xff] %vm275_vm0, %v12340_v19  ;;  %v12339_v48 = vsel %vm12083_vm13, %v11955_v9, %v12211_v22  ;;  %v11957_v18 = vadd.f32 %v17511_v15, %v23093_v63  ;;  %v17314_v17 = vpop.f32.mrb[60].mxu0 }
 0x4d5   :  { %12467 = vst.msk [vmem:[%s23964_s3 + $0x1c0] sm:$0xff] %vm275_vm0, %v12339_v48  ;;  %vm12086_vm14 = vcmp.ge.f32.partialorder %v11958_v38, 0.0  ;;  %v12214_v61 = vmul.f32 0.2, %v11958_v38  ;;  %v17512_v4 = vadd.f32 %v17314_v17, %v23985_v44  ;;  %v11425_v54 = vpop.f32.mrb[61].mxu0 }
 0x4d6   :  { %vm12085_vm15 = vcmp.ge.f32.partialorder %v11957_v18, 0.0  ;;  %v12213_v42 = vmul.f32 0.2, %v11957_v18  ;;  %v17513_v55 = vadd.f32 %v11425_v54, %v23986_v43 }
 0x4d7   :  { %v12342_v62 = vsel %vm12086_vm14, %v11958_v38, %v12214_v61  ;;  %v11960_v28 = vadd.f32 %v17512_v4, %v23093_v63 }
 0x4d8   :  { %12470 = vst.msk [vmem:[%s23964_s3 + $0x1d8] sm:$0xff] %vm275_vm0, %v12342_v62  ;;  %v12341_v12 = vsel %vm12085_vm15, %v11957_v18, %v12213_v42  ;;  %v11959_v60 = vadd.f32 %v17513_v55, %v23093_v63  ;;  %v17317_v34 = vpop.f32.mrb[62].mxu0  ;;  %v23620_v63 = vld [vmem:[%s23963_s2] ss:$0 sm:$0xff] }
 0x4d9   :  { %12469 = vst.msk [vmem:[%s23964_s3 + $0x1d0] sm:$0xff] %vm275_vm0, %v12341_v12  ;;  %vm12088_vm1 = vcmp.ge.f32.partialorder %v11960_v28, 0.0  ;;  %v12216_v2 = vmul.f32 0.2, %v11960_v28  ;;  %v17514_v33 = vadd.f32 %v17317_v34, %v23987_v25  ;;  %v11435_v16 = vpop.f32.mrb[63].mxu0 }
 0x4da   :  { %vm12087_vm2 = vcmp.ge.f32.partialorder %v11959_v60, 0.0  ;;  %v12215_v40 = vmul.f32 0.2, %v11959_v60  ;;  %v17515_v29 = vadd.f32 %v11435_v16, %v23988_v56 }
 0x4db   :  { %v12344_v52 = vsel %vm12088_vm1, %v11960_v28, %v12216_v2  ;;  %v11962_v0 = vadd.f32 %v23620_v63, %v17514_v33  ;;  %v16536_v30 = vpop.f32.mrb[64].mxu1 }
 0x4dc   :  { %12472 = vst.msk [vmem:[%s23964_s3 + $0x1e8] sm:$0xff] %vm275_vm0, %v12344_v52  ;;  %v12343_v13 = vsel %vm12087_vm2, %v11959_v60, %v12215_v40  ;;  %v11961_v45 = vadd.f32 %v23620_v63, %v17515_v29  ;;  %v17320_v7 = vpop.f32.mrb[64].mxu0  ;;  %v6052_v21 = vpop.f32.mrb[65].mxu1 }
 0x4dd   :  { %12471 = vst.msk [vmem:[%s23964_s3 + $0x1e0] sm:$0xff] %vm275_vm0, %v12343_v13  ;;  %vm12090_vm3 = vcmp.ge.f32.partialorder %v11962_v0, 0.0  ;;  %v12218_v27 = vmul.f32 0.2, %v11962_v0  ;;  %v17516_v32 = vadd.f32 %v17320_v7, %v16536_v30  ;;  %v11445_v41 = vpop.f32.mrb[65].mxu0 }
 0x4de   :  { %vm12089_vm4 = vcmp.ge.f32.partialorder %v11961_v45, 0.0  ;;  %v12217_v47 = vmul.f32 0.2, %v11961_v45  ;;  %v17517_v5 = vadd.f32 %v11445_v41, %v6052_v21 }
 0x4df   :  { %v12346_v53 = vsel %vm12090_vm3, %v11962_v0, %v12218_v27  ;;  %v11964_v59 = vadd.f32 %v23620_v63, %v17516_v32  ;;  %v16539_v49 = vpop.f32.mrb[66].mxu1 }
 0x4e0   :  { %12474 = vst.msk [vmem:[%s23964_s3 + $0x1f8] sm:$0xff] %vm275_vm0, %v12346_v53  ;;  %v12345_v39 = vsel %vm12089_vm4, %v11961_v45, %v12217_v47  ;;  %v11963_v50 = vadd.f32 %v23620_v63, %v17517_v5  ;;  %v17323_v51 = vpop.f32.mrb[66].mxu0  ;;  %v6062_v58 = vpop.f32.mrb[67].mxu1 }
 0x4e1   :  { %12473 = vst.msk [vmem:[%s23964_s3 + $0x1f0] sm:$0xff] %vm275_vm0, %v12345_v39  ;;  %vm12092_vm5 = vcmp.ge.f32.partialorder %v11964_v59, 0.0  ;;  %v12220_v1 = vmul.f32 0.2, %v11964_v59  ;;  %v17518_v8 = vadd.f32 %v17323_v51, %v16539_v49  ;;  %v11455_v37 = vpop.f32.mrb[67].mxu0 }
 0x4e2   :  { %vm12091_vm6 = vcmp.ge.f32.partialorder %v11963_v50, 0.0  ;;  %v12219_v35 = vmul.f32 0.2, %v11963_v50  ;;  %v17519_v6 = vadd.f32 %v11455_v37, %v6062_v58 }
 0x4e3   :  { %v12348_v3 = vsel %vm12092_vm5, %v11964_v59, %v12220_v1  ;;  %v11966_v10 = vadd.f32 %v23620_v63, %v17518_v8  ;;  %v16542_v20 = vpop.f32.mrb[68].mxu1 }
 0x4e4   :  { %12476 = vst.msk [vmem:[%s23964_s3 + $0x208] sm:$0xff] %vm275_vm0, %v12348_v3  ;;  %v12347_v36 = vsel %vm12091_vm6, %v11963_v50, %v12219_v35  ;;  %v11965_v46 = vadd.f32 %v23620_v63, %v17519_v6  ;;  %v17326_v24 = vpop.f32.mrb[68].mxu0  ;;  %v6072_v9 = vpop.f32.mrb[69].mxu1 }
 0x4e5   :  { %12475 = vst.msk [vmem:[%s23964_s3 + $0x200] sm:$0xff] %vm275_vm0, %v12347_v36  ;;  %vm12094_vm7 = vcmp.ge.f32.partialorder %v11966_v10, 0.0  ;;  %v12222_v11 = vmul.f32 0.2, %v11966_v10  ;;  %v17520_v23 = vadd.f32 %v17326_v24, %v16542_v20  ;;  %v11465_v14 = vpop.f32.mrb[69].mxu0 }
 0x4e6   :  { %vm12093_vm8 = vcmp.ge.f32.partialorder %v11965_v46, 0.0  ;;  %v12221_v31 = vmul.f32 0.2, %v11965_v46  ;;  %v17521_v57 = vadd.f32 %v11465_v14, %v6072_v9 }
 0x4e7   :  { %v12350_v22 = vsel %vm12094_vm7, %v11966_v10, %v12222_v11  ;;  %v11968_v26 = vadd.f32 %v23620_v63, %v17520_v23  ;;  %v16545_v15 = vpop.f32.mrb[70].mxu1 }
 0x4e8   :  { %12478 = vst.msk [vmem:[%s23964_s3 + $0x218] sm:$0xff] %vm275_vm0, %v12350_v22  ;;  %v12349_v19 = vsel %vm12093_vm8, %v11965_v46, %v12221_v31  ;;  %v11967_v38 = vadd.f32 %v23620_v63, %v17521_v57  ;;  %v17329_v48 = vpop.f32.mrb[70].mxu0  ;;  %v6082_v18 = vpop.f32.mrb[71].mxu1 }
 0x4e9   :  { %12477 = vst.msk [vmem:[%s23964_s3 + $0x210] sm:$0xff] %vm275_vm0, %v12349_v19  ;;  %vm12096_vm9 = vcmp.ge.f32.partialorder %v11968_v26, 0.0  ;;  %v12224_v17 = vmul.f32 0.2, %v11968_v26  ;;  %v17522_v61 = vadd.f32 %v17329_v48, %v16545_v15  ;;  %v11475_v44 = vpop.f32.mrb[71].mxu0 }
 0x4ea   :  { %vm12095_vm10 = vcmp.ge.f32.partialorder %v11967_v38, 0.0  ;;  %v12223_v4 = vmul.f32 0.2, %v11967_v38  ;;  %v17523_v54 = vadd.f32 %v11475_v44, %v6082_v18 }
 0x4eb   :  { %v12352_v42 = vsel %vm12096_vm9, %v11968_v26, %v12224_v17  ;;  %v11970_v43 = vadd.f32 %v23620_v63, %v17522_v61  ;;  %v16548_v55 = vpop.f32.mrb[72].mxu1 }
 0x4ec   :  { %12480 = vst.msk [vmem:[%s23964_s3 + $0x228] sm:$0xff] %vm275_vm0, %v12352_v42  ;;  %v12351_v62 = vsel %vm12095_vm10, %v11967_v38, %v12223_v4  ;;  %v11969_v28 = vadd.f32 %v23620_v63, %v17523_v54  ;;  %v17332_v12 = vpop.f32.mrb[72].mxu0  ;;  %v6092_v60 = vpop.f32.mrb[73].mxu1 }
 0x4ed   :  { %12479 = vst.msk [vmem:[%s23964_s3 + $0x220] sm:$0xff] %vm275_vm0, %v12351_v62  ;;  %vm12098_vm11 = vcmp.ge.f32.partialorder %v11970_v43, 0.0  ;;  %v12226_v34 = vmul.f32 0.2, %v11970_v43  ;;  %v17524_v2 = vadd.f32 %v17332_v12, %v16548_v55  ;;  %v11485_v25 = vpop.f32.mrb[73].mxu0 }
 0x4ee   :  { %vm12097_vm12 = vcmp.ge.f32.partialorder %v11969_v28, 0.0  ;;  %v12225_v33 = vmul.f32 0.2, %v11969_v28  ;;  %v17525_v16 = vadd.f32 %v11485_v25, %v6092_v60 }
 0x4ef   :  { %v12354_v40 = vsel %vm12098_vm11, %v11970_v43, %v12226_v34  ;;  %v11972_v56 = vadd.f32 %v23620_v63, %v17524_v2  ;;  %v16551_v29 = vpop.f32.mrb[74].mxu1 }
 0x4f0   :  { %12482 = vst.msk [vmem:[%s23964_s3 + $0x238] sm:$0xff] %vm275_vm0, %v12354_v40  ;;  %v12353_v52 = vsel %vm12097_vm12, %v11969_v28, %v12225_v33  ;;  %v11971_v0 = vadd.f32 %v23620_v63, %v17525_v16  ;;  %v17335_v30 = vpop.f32.mrb[74].mxu0  ;;  %v6102_v13 = vpop.f32.mrb[75].mxu1 }
 0x4f1   :  { %12481 = vst.msk [vmem:[%s23964_s3 + $0x230] sm:$0xff] %vm275_vm0, %v12353_v52  ;;  %vm12100_vm13 = vcmp.ge.f32.partialorder %v11972_v56, 0.0  ;;  %v12228_v45 = vmul.f32 0.2, %v11972_v56  ;;  %v17526_v7 = vadd.f32 %v17335_v30, %v16551_v29  ;;  %v11495_v21 = vpop.f32.mrb[75].mxu0 }
 0x4f2   :  { %vm12099_vm14 = vcmp.ge.f32.partialorder %v11971_v0, 0.0  ;;  %v12227_v27 = vmul.f32 0.2, %v11971_v0  ;;  %v17527_v32 = vadd.f32 %v11495_v21, %v6102_v13 }
 0x4f3   :  { %v12356_v41 = vsel %vm12100_vm13, %v11972_v56, %v12228_v45  ;;  %v11974_v47 = vadd.f32 %v23620_v63, %v17526_v7  ;;  %v16554_v5 = vpop.f32.mrb[76].mxu1 }
 0x4f4   :  { %12484 = vst.msk [vmem:[%s23964_s3 + $0x248] sm:$0xff] %vm275_vm0, %v12356_v41  ;;  %v12355_v53 = vsel %vm12099_vm14, %v11971_v0, %v12227_v27  ;;  %v11973_v59 = vadd.f32 %v23620_v63, %v17527_v32  ;;  %v17338_v49 = vpop.f32.mrb[76].mxu0  ;;  %v6112_v39 = vpop.f32.mrb[77].mxu1 }
 0x4f5   :  { %12483 = vst.msk [vmem:[%s23964_s3 + $0x240] sm:$0xff] %vm275_vm0, %v12355_v53  ;;  %vm12102_vm15 = vcmp.ge.f32.partialorder %v11974_v47, 0.0  ;;  %v12230_v50 = vmul.f32 0.2, %v11974_v47  ;;  %v17528_v51 = vadd.f32 %v17338_v49, %v16554_v5  ;;  %v11505_v58 = vpop.f32.mrb[77].mxu0 }
 0x4f6   :  { %vm12101_vm1 = vcmp.ge.f32.partialorder %v11973_v59, 0.0  ;;  %v12229_v1 = vmul.f32 0.2, %v11973_v59  ;;  %v17529_v8 = vadd.f32 %v11505_v58, %v6112_v39 }
 0x4f7   :  { %v12358_v37 = vsel %vm12102_vm15, %v11974_v47, %v12230_v50  ;;  %v11976_v35 = vadd.f32 %v23620_v63, %v17528_v51  ;;  %v16557_v6 = vpop.f32.mrb[78].mxu1 }
 0x4f8   :  { %12486 = vst.msk [vmem:[%s23964_s3 + $0x258] sm:$0xff] %vm275_vm0, %v12358_v37  ;;  %v12357_v3 = vsel %vm12101_vm1, %v11973_v59, %v12229_v1  ;;  %v11975_v10 = vadd.f32 %v23620_v63, %v17529_v8  ;;  %v17341_v20 = vpop.f32.mrb[78].mxu0  ;;  %v6122_v36 = vpop.f32.mrb[79].mxu1 }
 0x4f9   :  { %12485 = vst.msk [vmem:[%s23964_s3 + $0x250] sm:$0xff] %vm275_vm0, %v12357_v3  ;;  %vm12104_vm2 = vcmp.ge.f32.partialorder %v11976_v35, 0.0  ;;  %v12232_v46 = vmul.f32 0.2, %v11976_v35  ;;  %v17530_v24 = vadd.f32 %v17341_v20, %v16557_v6  ;;  %v11515_v9 = vpop.f32.mrb[79].mxu0 }
 0x4fa   :  { %vm12103_vm3 = vcmp.ge.f32.partialorder %v11975_v10, 0.0  ;;  %v12231_v11 = vmul.f32 0.2, %v11975_v10  ;;  %v17531_v23 = vadd.f32 %v11515_v9, %v6122_v36 }
 0x4fb   :  { %v12360_v14 = vsel %vm12104_vm2, %v11976_v35, %v12232_v46  ;;  %v11978_v31 = vadd.f32 %v23620_v63, %v17530_v24  ;;  %v16560_v57 = vpop.f32.mrb[80].mxu1 }
 0x4fc   :  { %12488 = vst.msk [vmem:[%s23964_s3 + $0x268] sm:$0xff] %vm275_vm0, %v12360_v14  ;;  %v12359_v22 = vsel %vm12103_vm3, %v11975_v10, %v12231_v11  ;;  %v11977_v26 = vadd.f32 %v23620_v63, %v17531_v23  ;;  %v17344_v15 = vpop.f32.mrb[80].mxu0  ;;  %v6132_v19 = vpop.f32.mrb[81].mxu1 }
 0x4fd   :  { %12487 = vst.msk [vmem:[%s23964_s3 + $0x260] sm:$0xff] %vm275_vm0, %v12359_v22  ;;  %vm12106_vm4 = vcmp.ge.f32.partialorder %v11978_v31, 0.0  ;;  %v12234_v38 = vmul.f32 0.2, %v11978_v31  ;;  %v17532_v48 = vadd.f32 %v17344_v15, %v16560_v57  ;;  %v11525_v18 = vpop.f32.mrb[81].mxu0 }
 0x4fe   :  { %vm12105_vm5 = vcmp.ge.f32.partialorder %v11977_v26, 0.0  ;;  %v12233_v17 = vmul.f32 0.2, %v11977_v26  ;;  %v17533_v61 = vadd.f32 %v11525_v18, %v6132_v19 }
 0x4ff   :  { %v12362_v44 = vsel %vm12106_vm4, %v11978_v31, %v12234_v38  ;;  %v11980_v4 = vadd.f32 %v23620_v63, %v17532_v48  ;;  %v16563_v54 = vpop.f32.mrb[82].mxu1 }
 0x500   :  { %12490 = vst.msk [vmem:[%s23964_s3 + $0x278] sm:$0xff] %vm275_vm0, %v12362_v44  ;;  %v12361_v42 = vsel %vm12105_vm5, %v11977_v26, %v12233_v17  ;;  %v11979_v43 = vadd.f32 %v23620_v63, %v17533_v61  ;;  %v17347_v55 = vpop.f32.mrb[82].mxu0  ;;  %v6142_v62 = vpop.f32.mrb[83].mxu1 }
 0x501   :  { %12489 = vst.msk [vmem:[%s23964_s3 + $0x270] sm:$0xff] %vm275_vm0, %v12361_v42  ;;  %vm12108_vm6 = vcmp.ge.f32.partialorder %v11980_v4, 0.0  ;;  %v12236_v28 = vmul.f32 0.2, %v11980_v4  ;;  %v17534_v12 = vadd.f32 %v17347_v55, %v16563_v54  ;;  %v11535_v60 = vpop.f32.mrb[83].mxu0 }
 0x502   :  { %vm12107_vm7 = vcmp.ge.f32.partialorder %v11979_v43, 0.0  ;;  %v12235_v34 = vmul.f32 0.2, %v11979_v43  ;;  %v17535_v2 = vadd.f32 %v11535_v60, %v6142_v62 }
 0x503   :  { %v12364_v25 = vsel %vm12108_vm6, %v11980_v4, %v12236_v28  ;;  %v11982_v33 = vadd.f32 %v23620_v63, %v17534_v12  ;;  %v16566_v16 = vpop.f32.mrb[84].mxu1 }
 0x504   :  { %12492 = vst.msk [vmem:[%s23964_s3 + $0x288] sm:$0xff] %vm275_vm0, %v12364_v25  ;;  %v12363_v40 = vsel %vm12107_vm7, %v11979_v43, %v12235_v34  ;;  %v11981_v56 = vadd.f32 %v23620_v63, %v17535_v2  ;;  %v17350_v29 = vpop.f32.mrb[84].mxu0  ;;  %v6152_v52 = vpop.f32.mrb[85].mxu1 }
 0x505   :  { %12491 = vst.msk [vmem:[%s23964_s3 + $0x280] sm:$0xff] %vm275_vm0, %v12363_v40  ;;  %vm12110_vm8 = vcmp.ge.f32.partialorder %v11982_v33, 0.0  ;;  %v12238_v0 = vmul.f32 0.2, %v11982_v33  ;;  %v17536_v30 = vadd.f32 %v17350_v29, %v16566_v16  ;;  %v11545_v13 = vpop.f32.mrb[85].mxu0 }
 0x506   :  { %vm12109_vm9 = vcmp.ge.f32.partialorder %v11981_v56, 0.0  ;;  %v12237_v45 = vmul.f32 0.2, %v11981_v56  ;;  %v17537_v7 = vadd.f32 %v11545_v13, %v6152_v52 }
 0x507   :  { %v12366_v21 = vsel %vm12110_vm8, %v11982_v33, %v12238_v0  ;;  %v11984_v27 = vadd.f32 %v23620_v63, %v17536_v30  ;;  %v16569_v32 = vpop.f32.mrb[86].mxu1 }
 0x508   :  { %12494 = vst.msk [vmem:[%s23964_s3 + $0x298] sm:$0xff] %vm275_vm0, %v12366_v21  ;;  %v12365_v41 = vsel %vm12109_vm9, %v11981_v56, %v12237_v45  ;;  %v11983_v47 = vadd.f32 %v23620_v63, %v17537_v7  ;;  %v17353_v5 = vpop.f32.mrb[86].mxu0  ;;  %v6162_v53 = vpop.f32.mrb[87].mxu1 }
 0x509   :  { %12493 = vst.msk [vmem:[%s23964_s3 + $0x290] sm:$0xff] %vm275_vm0, %v12365_v41  ;;  %vm12112_vm10 = vcmp.ge.f32.partialorder %v11984_v27, 0.0  ;;  %v12240_v59 = vmul.f32 0.2, %v11984_v27  ;;  %v17538_v49 = vadd.f32 %v17353_v5, %v16569_v32  ;;  %v11555_v39 = vpop.f32.mrb[87].mxu0 }
 0x50a   :  { %vm12111_vm11 = vcmp.ge.f32.partialorder %v11983_v47, 0.0  ;;  %v12239_v50 = vmul.f32 0.2, %v11983_v47  ;;  %v17539_v51 = vadd.f32 %v11555_v39, %v6162_v53 }
 0x50b   :  { %v12368_v58 = vsel %vm12112_vm10, %v11984_v27, %v12240_v59  ;;  %v11986_v1 = vadd.f32 %v23620_v63, %v17538_v49  ;;  %v16572_v8 = vpop.f32.mrb[88].mxu1 }
 0x50c   :  { %12496 = vst.msk [vmem:[%s23964_s3 + $0x2a8] sm:$0xff] %vm275_vm0, %v12368_v58  ;;  %v12367_v37 = vsel %vm12111_vm11, %v11983_v47, %v12239_v50  ;;  %v11985_v35 = vadd.f32 %v23620_v63, %v17539_v51  ;;  %v17356_v6 = vpop.f32.mrb[88].mxu0  ;;  %v6172_v3 = vpop.f32.mrb[89].mxu1 }
 0x50d   :  { %12495 = vst.msk [vmem:[%s23964_s3 + $0x2a0] sm:$0xff] %vm275_vm0, %v12367_v37  ;;  %vm12114_vm12 = vcmp.ge.f32.partialorder %v11986_v1, 0.0  ;;  %v12242_v10 = vmul.f32 0.2, %v11986_v1  ;;  %v17540_v20 = vadd.f32 %v17356_v6, %v16572_v8  ;;  %v11565_v36 = vpop.f32.mrb[89].mxu0 }
 0x50e   :  { %vm12113_vm13 = vcmp.ge.f32.partialorder %v11985_v35, 0.0  ;;  %v12241_v46 = vmul.f32 0.2, %v11985_v35  ;;  %v17541_v24 = vadd.f32 %v11565_v36, %v6172_v3 }
 0x50f   :  { %v12370_v9 = vsel %vm12114_vm12, %v11986_v1, %v12242_v10  ;;  %v11988_v11 = vadd.f32 %v23620_v63, %v17540_v20  ;;  %v16575_v23 = vpop.f32.mrb[90].mxu1 }
 0x510   :  { %12498 = vst.msk [vmem:[%s23964_s3 + $0x2b8] sm:$0xff] %vm275_vm0, %v12370_v9  ;;  %v12369_v14 = vsel %vm12113_vm13, %v11985_v35, %v12241_v46  ;;  %v11987_v31 = vadd.f32 %v23620_v63, %v17541_v24  ;;  %v17359_v57 = vpop.f32.mrb[90].mxu0  ;;  %v6182_v22 = vpop.f32.mrb[91].mxu1 }
 0x511   :  { %12497 = vst.msk [vmem:[%s23964_s3 + $0x2b0] sm:$0xff] %vm275_vm0, %v12369_v14  ;;  %vm12116_vm14 = vcmp.ge.f32.partialorder %v11988_v11, 0.0  ;;  %v12244_v26 = vmul.f32 0.2, %v11988_v11  ;;  %v17542_v15 = vadd.f32 %v17359_v57, %v16575_v23  ;;  %v11575_v19 = vpop.f32.mrb[91].mxu0 }
 0x512   :  { %vm12115_vm15 = vcmp.ge.f32.partialorder %v11987_v31, 0.0  ;;  %v12243_v38 = vmul.f32 0.2, %v11987_v31  ;;  %v17543_v48 = vadd.f32 %v11575_v19, %v6182_v22 }
 0x513   :  { %v12372_v18 = vsel %vm12116_vm14, %v11988_v11, %v12244_v26  ;;  %v11990_v17 = vadd.f32 %v23620_v63, %v17542_v15  ;;  %v16578_v61 = vpop.f32.mrb[92].mxu1 }
 0x514   :  { %12500 = vst.msk [vmem:[%s23964_s3 + $0x2c8] sm:$0xff] %vm275_vm0, %v12372_v18  ;;  %v12371_v44 = vsel %vm12115_vm15, %v11987_v31, %v12243_v38  ;;  %v11989_v4 = vadd.f32 %v23620_v63, %v17543_v48  ;;  %v17362_v54 = vpop.f32.mrb[92].mxu0  ;;  %v6192_v42 = vpop.f32.mrb[93].mxu1 }
 0x515   :  { %12499 = vst.msk [vmem:[%s23964_s3 + $0x2c0] sm:$0xff] %vm275_vm0, %v12371_v44  ;;  %vm12118_vm1 = vcmp.ge.f32.partialorder %v11990_v17, 0.0  ;;  %v12246_v43 = vmul.f32 0.2, %v11990_v17  ;;  %v17544_v55 = vadd.f32 %v17362_v54, %v16578_v61  ;;  %v11585_v62 = vpop.f32.mrb[93].mxu0 }
 0x516   :  { %vm12117_vm2 = vcmp.ge.f32.partialorder %v11989_v4, 0.0  ;;  %v12245_v28 = vmul.f32 0.2, %v11989_v4  ;;  %v17545_v12 = vadd.f32 %v11585_v62, %v6192_v42 }
 0x517   :  { %v12374_v60 = vsel %vm12118_vm1, %v11990_v17, %v12246_v43  ;;  %v11992_v34 = vadd.f32 %v23620_v63, %v17544_v55  ;;  %v16581_v2 = vpop.f32.mrb[94].mxu1 }
 0x518   :  { %12502 = vst.msk [vmem:[%s23964_s3 + $0x2d8] sm:$0xff] %vm275_vm0, %v12374_v60  ;;  %v12373_v25 = vsel %vm12117_vm2, %v11989_v4, %v12245_v28  ;;  %v11991_v33 = vadd.f32 %v23620_v63, %v17545_v12  ;;  %v17365_v16 = vpop.f32.mrb[94].mxu0  ;;  %v6202_v40 = vpop.f32.mrb[95].mxu1 }
 0x519   :  { %12501 = vst.msk [vmem:[%s23964_s3 + $0x2d0] sm:$0xff] %vm275_vm0, %v12373_v25  ;;  %vm12120_vm3 = vcmp.ge.f32.partialorder %v11992_v34, 0.0  ;;  %v12248_v56 = vmul.f32 0.2, %v11992_v34  ;;  %v17546_v29 = vadd.f32 %v17365_v16, %v16581_v2  ;;  %v11595_v52 = vpop.f32.mrb[95].mxu0 }
 0x51a   :  { %vm12119_vm4 = vcmp.ge.f32.partialorder %v11991_v33, 0.0  ;;  %v12247_v0 = vmul.f32 0.2, %v11991_v33  ;;  %v17547_v30 = vadd.f32 %v11595_v52, %v6202_v40 }
 0x51b   :  { %v12376_v13 = vsel %vm12120_vm3, %v11992_v34, %v12248_v56  ;;  %v11994_v45 = vadd.f32 %v23620_v63, %v17546_v29  ;;  %v16584_v7 = vpop.f32.mrb[96].mxu1 }
 0x51c   :  { %12504 = vst.msk [vmem:[%s23964_s3 + $0x2e8] sm:$0xff] %vm275_vm0, %v12376_v13  ;;  %v12375_v21 = vsel %vm12119_vm4, %v11991_v33, %v12247_v0  ;;  %v11993_v27 = vadd.f32 %v23620_v63, %v17547_v30  ;;  %v17368_v32 = vpop.f32.mrb[96].mxu0  ;;  %v6212_v41 = vpop.f32.mrb[97].mxu1 }
 0x51d   :  { %12503 = vst.msk [vmem:[%s23964_s3 + $0x2e0] sm:$0xff] %vm275_vm0, %v12375_v21  ;;  %vm12122_vm5 = vcmp.ge.f32.partialorder %v11994_v45, 0.0  ;;  %v12250_v47 = vmul.f32 0.2, %v11994_v45  ;;  %v17548_v5 = vadd.f32 %v17368_v32, %v16584_v7  ;;  %v11605_v53 = vpop.f32.mrb[97].mxu0 }
 0x51e   :  { %vm12121_vm6 = vcmp.ge.f32.partialorder %v11993_v27, 0.0  ;;  %v12249_v59 = vmul.f32 0.2, %v11993_v27  ;;  %v17549_v49 = vadd.f32 %v11605_v53, %v6212_v41 }
 0x51f   :  { %v12378_v39 = vsel %vm12122_vm5, %v11994_v45, %v12250_v47  ;;  %v11996_v50 = vadd.f32 %v23620_v63, %v17548_v5  ;;  %v16587_v51 = vpop.f32.mrb[98].mxu1 }
 0x520   :  { %12506 = vst.msk [vmem:[%s23964_s3 + $0x2f8] sm:$0xff] %vm275_vm0, %v12378_v39  ;;  %v12377_v58 = vsel %vm12121_vm6, %v11993_v27, %v12249_v59  ;;  %v11995_v1 = vadd.f32 %v23620_v63, %v17549_v49  ;;  %v17371_v8 = vpop.f32.mrb[98].mxu0  ;;  %v6222_v37 = vpop.f32.mrb[99].mxu1 }
 0x521   :  { %12505 = vst.msk [vmem:[%s23964_s3 + $0x2f0] sm:$0xff] %vm275_vm0, %v12377_v58  ;;  %vm12124_vm7 = vcmp.ge.f32.partialorder %v11996_v50, 0.0  ;;  %v12252_v35 = vmul.f32 0.2, %v11996_v50  ;;  %v17550_v6 = vadd.f32 %v17371_v8, %v16587_v51  ;;  %v11615_v3 = vpop.f32.mrb[99].mxu0 }
 0x522   :  { %vm12123_vm8 = vcmp.ge.f32.partialorder %v11995_v1, 0.0  ;;  %v12251_v10 = vmul.f32 0.2, %v11995_v1  ;;  %v17551_v20 = vadd.f32 %v11615_v3, %v6222_v37 }
 0x523   :  { %v12380_v36 = vsel %vm12124_vm7, %v11996_v50, %v12252_v35  ;;  %v11998_v46 = vadd.f32 %v23620_v63, %v17550_v6  ;;  %v16590_v24 = vpop.f32.mrb[100].mxu1 }
 0x524   :  { %12508 = vst.msk [vmem:[%s23964_s3 + $0x308] sm:$0xff] %vm275_vm0, %v12380_v36  ;;  %v12379_v9 = vsel %vm12123_vm8, %v11995_v1, %v12251_v10  ;;  %v11997_v11 = vadd.f32 %v23620_v63, %v17551_v20  ;;  %v17374_v23 = vpop.f32.mrb[100].mxu0  ;;  %v6232_v14 = vpop.f32.mrb[101].mxu1 }
 0x525   :  { %12507 = vst.msk [vmem:[%s23964_s3 + $0x300] sm:$0xff] %vm275_vm0, %v12379_v9  ;;  %vm12126_vm9 = vcmp.ge.f32.partialorder %v11998_v46, 0.0  ;;  %v12254_v31 = vmul.f32 0.2, %v11998_v46  ;;  %v17552_v57 = vadd.f32 %v17374_v23, %v16590_v24  ;;  %v11625_v22 = vpop.f32.mrb[101].mxu0 }
 0x526   :  { %vm12125_vm10 = vcmp.ge.f32.partialorder %v11997_v11, 0.0  ;;  %v12253_v26 = vmul.f32 0.2, %v11997_v11  ;;  %v17553_v15 = vadd.f32 %v11625_v22, %v6232_v14 }
 0x527   :  { %v12382_v19 = vsel %vm12126_vm9, %v11998_v46, %v12254_v31  ;;  %v12000_v38 = vadd.f32 %v23620_v63, %v17552_v57  ;;  %v16593_v48 = vpop.f32.mrb[102].mxu1 }
 0x528   :  { %12510 = vst.msk [vmem:[%s23964_s3 + $0x318] sm:$0xff] %vm275_vm0, %v12382_v19  ;;  %v12381_v18 = vsel %vm12125_vm10, %v11997_v11, %v12253_v26  ;;  %v11999_v17 = vadd.f32 %v23620_v63, %v17553_v15  ;;  %v17377_v61 = vpop.f32.mrb[102].mxu0  ;;  %v6242_v44 = vpop.f32.mrb[103].mxu1 }
 0x529   :  { %12509 = vst.msk [vmem:[%s23964_s3 + $0x310] sm:$0xff] %vm275_vm0, %v12381_v18  ;;  %vm12128_vm11 = vcmp.ge.f32.partialorder %v12000_v38, 0.0  ;;  %v12256_v4 = vmul.f32 0.2, %v12000_v38  ;;  %v17554_v54 = vadd.f32 %v17377_v61, %v16593_v48  ;;  %v11635_v42 = vpop.f32.mrb[103].mxu0 }
 0x52a   :  { %vm12127_vm12 = vcmp.ge.f32.partialorder %v11999_v17, 0.0  ;;  %v12255_v43 = vmul.f32 0.2, %v11999_v17  ;;  %v17555_v55 = vadd.f32 %v11635_v42, %v6242_v44 }
 0x52b   :  { %v12384_v62 = vsel %vm12128_vm11, %v12000_v38, %v12256_v4  ;;  %v12002_v28 = vadd.f32 %v23620_v63, %v17554_v54  ;;  %v16596_v12 = vpop.f32.mrb[104].mxu1 }
 0x52c   :  { %12512 = vst.msk [vmem:[%s23964_s3 + $0x328] sm:$0xff] %vm275_vm0, %v12384_v62  ;;  %v12383_v60 = vsel %vm12127_vm12, %v11999_v17, %v12255_v43  ;;  %v12001_v34 = vadd.f32 %v23620_v63, %v17555_v55  ;;  %v17380_v2 = vpop.f32.mrb[104].mxu0  ;;  %v6252_v25 = vpop.f32.mrb[105].mxu1 }
 0x52d   :  { %12511 = vst.msk [vmem:[%s23964_s3 + $0x320] sm:$0xff] %vm275_vm0, %v12383_v60  ;;  %vm12130_vm13 = vcmp.ge.f32.partialorder %v12002_v28, 0.0  ;;  %v12258_v33 = vmul.f32 0.2, %v12002_v28  ;;  %v17556_v16 = vadd.f32 %v17380_v2, %v16596_v12  ;;  %v11645_v40 = vpop.f32.mrb[105].mxu0 }
 0x52e   :  { %vm12129_vm14 = vcmp.ge.f32.partialorder %v12001_v34, 0.0  ;;  %v12257_v56 = vmul.f32 0.2, %v12001_v34  ;;  %v17557_v29 = vadd.f32 %v11645_v40, %v6252_v25 }
 0x52f   :  { %v12386_v52 = vsel %vm12130_vm13, %v12002_v28, %v12258_v33  ;;  %v12004_v0 = vadd.f32 %v23620_v63, %v17556_v16  ;;  %v16599_v30 = vpop.f32.mrb[106].mxu1 }
 0x530   :  { %12514 = vst.msk [vmem:[%s23964_s3 + $0x338] sm:$0xff] %vm275_vm0, %v12386_v52  ;;  %v12385_v13 = vsel %vm12129_vm14, %v12001_v34, %v12257_v56  ;;  %v12003_v45 = vadd.f32 %v23620_v63, %v17557_v29  ;;  %v17383_v7 = vpop.f32.mrb[106].mxu0  ;;  %v6262_v21 = vpop.f32.mrb[107].mxu1 }
 0x531   :  { %12513 = vst.msk [vmem:[%s23964_s3 + $0x330] sm:$0xff] %vm275_vm0, %v12385_v13  ;;  %vm12132_vm15 = vcmp.ge.f32.partialorder %v12004_v0, 0.0  ;;  %v12260_v27 = vmul.f32 0.2, %v12004_v0  ;;  %v17558_v32 = vadd.f32 %v17383_v7, %v16599_v30  ;;  %v11655_v41 = vpop.f32.mrb[107].mxu0 }
 0x532   :  { %vm12131_vm1 = vcmp.ge.f32.partialorder %v12003_v45, 0.0  ;;  %v12259_v47 = vmul.f32 0.2, %v12003_v45  ;;  %v17559_v5 = vadd.f32 %v11655_v41, %v6262_v21 }
 0x533   :  { %v12388_v53 = vsel %vm12132_vm15, %v12004_v0, %v12260_v27  ;;  %v12006_v59 = vadd.f32 %v23620_v63, %v17558_v32  ;;  %v16602_v49 = vpop.f32.mrb[108].mxu1 }
 0x534   :  { %12516 = vst.msk [vmem:[%s23964_s3 + $0x348] sm:$0xff] %vm275_vm0, %v12388_v53  ;;  %v12387_v39 = vsel %vm12131_vm1, %v12003_v45, %v12259_v47  ;;  %v12005_v50 = vadd.f32 %v23620_v63, %v17559_v5  ;;  %v17386_v51 = vpop.f32.mrb[108].mxu0  ;;  %v6272_v58 = vpop.f32.mrb[109].mxu1 }
 0x535   :  { %12515 = vst.msk [vmem:[%s23964_s3 + $0x340] sm:$0xff] %vm275_vm0, %v12387_v39  ;;  %vm12134_vm2 = vcmp.ge.f32.partialorder %v12006_v59, 0.0  ;;  %v12262_v1 = vmul.f32 0.2, %v12006_v59  ;;  %v17560_v8 = vadd.f32 %v17386_v51, %v16602_v49  ;;  %v11665_v37 = vpop.f32.mrb[109].mxu0 }
 0x536   :  { %vm12133_vm3 = vcmp.ge.f32.partialorder %v12005_v50, 0.0  ;;  %v12261_v35 = vmul.f32 0.2, %v12005_v50  ;;  %v17561_v6 = vadd.f32 %v11665_v37, %v6272_v58 }
 0x537   :  { %v12390_v3 = vsel %vm12134_vm2, %v12006_v59, %v12262_v1  ;;  %v12008_v10 = vadd.f32 %v23620_v63, %v17560_v8  ;;  %v16605_v20 = vpop.f32.mrb[110].mxu1 }
 0x538   :  { %12518 = vst.msk [vmem:[%s23964_s3 + $0x358] sm:$0xff] %vm275_vm0, %v12390_v3  ;;  %v12389_v36 = vsel %vm12133_vm3, %v12005_v50, %v12261_v35  ;;  %v12007_v46 = vadd.f32 %v23620_v63, %v17561_v6  ;;  %v17389_v24 = vpop.f32.mrb[110].mxu0  ;;  %v6282_v9 = vpop.f32.mrb[111].mxu1 }
 0x539   :  { %12517 = vst.msk [vmem:[%s23964_s3 + $0x350] sm:$0xff] %vm275_vm0, %v12389_v36  ;;  %vm12136_vm4 = vcmp.ge.f32.partialorder %v12008_v10, 0.0  ;;  %v12264_v11 = vmul.f32 0.2, %v12008_v10  ;;  %v17562_v23 = vadd.f32 %v17389_v24, %v16605_v20  ;;  %v11675_v14 = vpop.f32.mrb[111].mxu0 }
 0x53a   :  { %vm12135_vm5 = vcmp.ge.f32.partialorder %v12007_v46, 0.0  ;;  %v12263_v31 = vmul.f32 0.2, %v12007_v46  ;;  %v17563_v57 = vadd.f32 %v11675_v14, %v6282_v9 }
 0x53b   :  { %v12392_v22 = vsel %vm12136_vm4, %v12008_v10, %v12264_v11  ;;  %v12010_v26 = vadd.f32 %v23620_v63, %v17562_v23  ;;  %v16608_v15 = vpop.f32.mrb[112].mxu1 }
 0x53c   :  { %12520 = vst.msk [vmem:[%s23964_s3 + $0x368] sm:$0xff] %vm275_vm0, %v12392_v22  ;;  %v12391_v19 = vsel %vm12135_vm5, %v12007_v46, %v12263_v31  ;;  %v12009_v38 = vadd.f32 %v23620_v63, %v17563_v57  ;;  %v17392_v48 = vpop.f32.mrb[112].mxu0  ;;  %v6292_v18 = vpop.f32.mrb[113].mxu1 }
 0x53d   :  { %12519 = vst.msk [vmem:[%s23964_s3 + $0x360] sm:$0xff] %vm275_vm0, %v12391_v19  ;;  %vm12138_vm6 = vcmp.ge.f32.partialorder %v12010_v26, 0.0  ;;  %v12266_v17 = vmul.f32 0.2, %v12010_v26  ;;  %v17564_v61 = vadd.f32 %v17392_v48, %v16608_v15  ;;  %v11685_v44 = vpop.f32.mrb[113].mxu0 }
 0x53e   :  { %vm12137_vm7 = vcmp.ge.f32.partialorder %v12009_v38, 0.0  ;;  %v12265_v4 = vmul.f32 0.2, %v12009_v38  ;;  %v17565_v54 = vadd.f32 %v11685_v44, %v6292_v18 }
 0x53f   :  { %v12394_v42 = vsel %vm12138_vm6, %v12010_v26, %v12266_v17  ;;  %v12012_v43 = vadd.f32 %v23620_v63, %v17564_v61  ;;  %v16611_v55 = vpop.f32.mrb[114].mxu1 }
 0x540   :  { %12522 = vst.msk [vmem:[%s23964_s3 + $0x378] sm:$0xff] %vm275_vm0, %v12394_v42  ;;  %v12393_v62 = vsel %vm12137_vm7, %v12009_v38, %v12265_v4  ;;  %v12011_v28 = vadd.f32 %v23620_v63, %v17565_v54  ;;  %v17395_v12 = vpop.f32.mrb[114].mxu0  ;;  %v6302_v60 = vpop.f32.mrb[115].mxu1 }
 0x541   :  { %12521 = vst.msk [vmem:[%s23964_s3 + $0x370] sm:$0xff] %vm275_vm0, %v12393_v62  ;;  %vm12140_vm8 = vcmp.ge.f32.partialorder %v12012_v43, 0.0  ;;  %v12268_v34 = vmul.f32 0.2, %v12012_v43  ;;  %v17566_v2 = vadd.f32 %v17395_v12, %v16611_v55  ;;  %v11695_v25 = vpop.f32.mrb[115].mxu0 }
 0x542   :  { %vm12139_vm9 = vcmp.ge.f32.partialorder %v12011_v28, 0.0  ;;  %v12267_v33 = vmul.f32 0.2, %v12011_v28  ;;  %v17567_v16 = vadd.f32 %v11695_v25, %v6302_v60 }
 0x543   :  { %v12396_v40 = vsel %vm12140_vm8, %v12012_v43, %v12268_v34  ;;  %v12014_v56 = vadd.f32 %v23620_v63, %v17566_v2  ;;  %v16614_v29 = vpop.f32.mrb[116].mxu1 }
 0x544   :  { %12524 = vst.msk [vmem:[%s23964_s3 + $0x388] sm:$0xff] %vm275_vm0, %v12396_v40  ;;  %v12395_v52 = vsel %vm12139_vm9, %v12011_v28, %v12267_v33  ;;  %v12013_v0 = vadd.f32 %v23620_v63, %v17567_v16  ;;  %v17398_v30 = vpop.f32.mrb[116].mxu0  ;;  %v6312_v13 = vpop.f32.mrb[117].mxu1 }
 0x545   :  { %12523 = vst.msk [vmem:[%s23964_s3 + $0x380] sm:$0xff] %vm275_vm0, %v12395_v52  ;;  %vm12142_vm10 = vcmp.ge.f32.partialorder %v12014_v56, 0.0  ;;  %v12270_v45 = vmul.f32 0.2, %v12014_v56  ;;  %v17568_v7 = vadd.f32 %v17398_v30, %v16614_v29  ;;  %v11705_v21 = vpop.f32.mrb[117].mxu0 }
 0x546   :  { %vm12141_vm11 = vcmp.ge.f32.partialorder %v12013_v0, 0.0  ;;  %v12269_v27 = vmul.f32 0.2, %v12013_v0  ;;  %v17569_v32 = vadd.f32 %v11705_v21, %v6312_v13 }
 0x547   :  { %v12398_v41 = vsel %vm12142_vm10, %v12014_v56, %v12270_v45  ;;  %v12016_v47 = vadd.f32 %v23620_v63, %v17568_v7  ;;  %v16617_v5 = vpop.f32.mrb[118].mxu1 }
 0x548   :  { %12526 = vst.msk [vmem:[%s23964_s3 + $0x398] sm:$0xff] %vm275_vm0, %v12398_v41  ;;  %v12397_v53 = vsel %vm12141_vm11, %v12013_v0, %v12269_v27  ;;  %v12015_v59 = vadd.f32 %v23620_v63, %v17569_v32  ;;  %v17401_v49 = vpop.f32.mrb[118].mxu0  ;;  %v6322_v39 = vpop.f32.mrb[119].mxu1  ;;  %v18477_v27 = vld [vmem:[%s23963_s2] ss:$0 sm:$0xff] }
 0x549   :  { %12525 = vst.msk [vmem:[%s23964_s3 + $0x390] sm:$0xff] %vm275_vm0, %v12397_v53  ;;  %vm12144_vm12 = vcmp.ge.f32.partialorder %v12016_v47, 0.0  ;;  %v12272_v50 = vmul.f32 0.2, %v12016_v47  ;;  %v17570_v51 = vadd.f32 %v17401_v49, %v16617_v5  ;;  %v11715_v58 = vpop.f32.mrb[119].mxu0 }
 0x54a   :  { %vm12143_vm13 = vcmp.ge.f32.partialorder %v12015_v59, 0.0  ;;  %v12271_v1 = vmul.f32 0.2, %v12015_v59  ;;  %v17571_v8 = vadd.f32 %v11715_v58, %v6322_v39 }
 0x54b   :  { %v12400_v37 = vsel %vm12144_vm12, %v12016_v47, %v12272_v50  ;;  %v12018_v35 = vadd.f32 %v23620_v63, %v17570_v51  ;;  %v16620_v6 = vpop.f32.mrb[120].mxu1 }
 0x54c   :  { %12528 = vst.msk [vmem:[%s23964_s3 + $0x3a8] sm:$0xff] %vm275_vm0, %v12400_v37  ;;  %v12399_v3 = vsel %vm12143_vm13, %v12015_v59, %v12271_v1  ;;  %v12017_v10 = vadd.f32 %v23620_v63, %v17571_v8  ;;  %v17404_v20 = vpop.f32.mrb[120].mxu0  ;;  %v6332_v36 = vpop.f32.mrb[121].mxu1 }
 0x54d   :  { %12527 = vst.msk [vmem:[%s23964_s3 + $0x3a0] sm:$0xff] %vm275_vm0, %v12399_v3  ;;  %vm12146_vm14 = vcmp.ge.f32.partialorder %v12018_v35, 0.0  ;;  %v12274_v46 = vmul.f32 0.2, %v12018_v35  ;;  %v17572_v24 = vadd.f32 %v17404_v20, %v16620_v6  ;;  %v11725_v9 = vpop.f32.mrb[121].mxu0 }
 0x54e   :  { %vm12145_vm15 = vcmp.ge.f32.partialorder %v12017_v10, 0.0  ;;  %v12273_v11 = vmul.f32 0.2, %v12017_v10  ;;  %v17573_v23 = vadd.f32 %v11725_v9, %v6332_v36 }
 0x54f   :  { %v12402_v14 = vsel %vm12146_vm14, %v12018_v35, %v12274_v46  ;;  %v12020_v31 = vadd.f32 %v23620_v63, %v17572_v24  ;;  %v16623_v57 = vpop.f32.mrb[122].mxu1 }
 0x550   :  { %12530 = vst.msk [vmem:[%s23964_s3 + $0x3b8] sm:$0xff] %vm275_vm0, %v12402_v14  ;;  %v12401_v22 = vsel %vm12145_vm15, %v12017_v10, %v12273_v11  ;;  %v12019_v26 = vadd.f32 %v23620_v63, %v17573_v23  ;;  %v17407_v15 = vpop.f32.mrb[122].mxu0  ;;  %v6342_v19 = vpop.f32.mrb[123].mxu1 }
 0x551   :  { %12529 = vst.msk [vmem:[%s23964_s3 + $0x3b0] sm:$0xff] %vm275_vm0, %v12401_v22  ;;  %vm12148_vm1 = vcmp.ge.f32.partialorder %v12020_v31, 0.0  ;;  %v12276_v38 = vmul.f32 0.2, %v12020_v31  ;;  %v17574_v48 = vadd.f32 %v17407_v15, %v16623_v57  ;;  %v11735_v18 = vpop.f32.mrb[123].mxu0 }
 0x552   :  { %vm12147_vm2 = vcmp.ge.f32.partialorder %v12019_v26, 0.0  ;;  %v12275_v17 = vmul.f32 0.2, %v12019_v26  ;;  %v17575_v61 = vadd.f32 %v11735_v18, %v6342_v19 }
 0x553   :  { %v12404_v44 = vsel %vm12148_vm1, %v12020_v31, %v12276_v38  ;;  %v12022_v4 = vadd.f32 %v23620_v63, %v17574_v48  ;;  %v16626_v54 = vpop.f32.mrb[124].mxu1 }
 0x554   :  { %12532 = vst.msk [vmem:[%s23964_s3 + $0x3c8] sm:$0xff] %vm275_vm0, %v12404_v44  ;;  %v12403_v42 = vsel %vm12147_vm2, %v12019_v26, %v12275_v17  ;;  %v12021_v43 = vadd.f32 %v23620_v63, %v17575_v61  ;;  %v17410_v55 = vpop.f32.mrb[124].mxu0  ;;  %v6352_v62 = vpop.f32.mrb[125].mxu1 }
 0x555   :  { %12531 = vst.msk [vmem:[%s23964_s3 + $0x3c0] sm:$0xff] %vm275_vm0, %v12403_v42  ;;  %vm12150_vm3 = vcmp.ge.f32.partialorder %v12022_v4, 0.0  ;;  %v12278_v28 = vmul.f32 0.2, %v12022_v4  ;;  %v17576_v12 = vadd.f32 %v17410_v55, %v16626_v54  ;;  %v11745_v60 = vpop.f32.mrb[125].mxu0 }
 0x556   :  { %vm12149_vm4 = vcmp.ge.f32.partialorder %v12021_v43, 0.0  ;;  %v12277_v34 = vmul.f32 0.2, %v12021_v43  ;;  %v17577_v2 = vadd.f32 %v11745_v60, %v6352_v62 }
 0x557   :  { %v12406_v25 = vsel %vm12150_vm3, %v12022_v4, %v12278_v28  ;;  %v12024_v33 = vadd.f32 %v23620_v63, %v17576_v12  ;;  %v16629_v16 = vpop.f32.mrb[126].mxu1 }
 0x558   :  { %12534 = vst.msk [vmem:[%s23964_s3 + $0x3d8] sm:$0xff] %vm275_vm0, %v12406_v25  ;;  %v12405_v40 = vsel %vm12149_vm4, %v12021_v43, %v12277_v34  ;;  %v12023_v56 = vadd.f32 %v23620_v63, %v17577_v2  ;;  %v17413_v29 = vpop.f32.mrb[126].mxu0  ;;  %v6362_v52 = vpop.f32.mrb[127].mxu1 }
 0x559   :  { %12533 = vst.msk [vmem:[%s23964_s3 + $0x3d0] sm:$0xff] %vm275_vm0, %v12405_v40  ;;  %vm12152_vm5 = vcmp.ge.f32.partialorder %v12024_v33, 0.0  ;;  %v12280_v0 = vmul.f32 0.2, %v12024_v33  ;;  %v17578_v30 = vadd.f32 %v17413_v29, %v16629_v16  ;;  %v11755_v13 = vpop.f32.mrb[127].mxu0 }
 0x55a   :  { %vm12151_vm6 = vcmp.ge.f32.partialorder %v12023_v56, 0.0  ;;  %v12279_v45 = vmul.f32 0.2, %v12023_v56  ;;  %v17579_v7 = vadd.f32 %v11755_v13, %v6362_v52 }
 0x55b   :  { %v12408_v21 = vsel %vm12152_vm5, %v12024_v33, %v12280_v0  ;;  %v12026_v63 = vadd.f32 %v18477_v27, %v17578_v30 }
 0x55c   :  { %12536 = vst.msk [vmem:[%s23964_s3 + $0x3e8] sm:$0xff] %vm275_vm0, %v12408_v21  ;;  %v12407_v32 = vsel %vm12151_vm6, %v12023_v56, %v12279_v45  ;;  %v12025_v41 = vadd.f32 %v18477_v27, %v17579_v7 }
 0x55d   :  { %12535 = vst.msk [vmem:[%s23964_s3 + $0x3e0] sm:$0xff] %vm275_vm0, %v12407_v32  ;;  %vm12154_vm7 = vcmp.ge.f32.partialorder %v12026_v63, 0.0  ;;  %v12282_v47 = vmul.f32 0.2, %v12026_v63 }
 0x55e   :  { %vm12153_vm8 = vcmp.ge.f32.partialorder %v12025_v41, 0.0  ;;  %v12281_v5 = vmul.f32 0.2, %v12025_v41 }
 0x55f   :  { %v12410_v53 = vsel %vm12154_vm7, %v12026_v63, %v12282_v47 }
 0x560   :  { %12538 = vst.msk [vmem:[%s23964_s3 + $0x3f8] sm:$0xff] %vm275_vm0, %v12410_v53  ;;  %v12409_v59 = vsel %vm12153_vm8, %v12025_v41, %v12281_v5 }
 0x561   :  { %12537 = vst.msk [vmem:[%s23964_s3 + $0x3f0] sm:$0xff] %vm275_vm0, %v12409_v59 }

</bundles_post_ra>
